<compile_context>
chip_gen: v7x
topology: tpu7x:2x2x1
jax: 0.10.0
libtpu: 0.0.40
codegen_flags: <defaults>
</compile_context>

<pallas_src>
import functools

import jax
import jax.numpy as jnp
import numpy as np
from jax.experimental import pallas as pl
from jax.experimental.pallas import tpu as pltpu

W0 = 30.0
HIDDEN = 128          # widest layer / padded feature width
LATENT_DIM = 2        # layer-4 output width

# (in_f, out_f) per layer; weights stored transposed vs PyTorch: y = x @ W + b
LAYER_DIMS = lambda in_ch: [(in_ch, 128), (128, 64), (64, 32), (32, LATENT_DIM),
                            (LATENT_DIM, 32), (32, 64), (64, 128), (128, in_ch)]

# Param indices (0-based layer numbers) of the two packed weight stacks.
#   wide   (MXU-heavy; bf16 in "mixed"/"bf16"): layers 2, 6, 7, 8
#   narrow (latent bottleneck; f32 in "mixed"): layers 3, 4, 5
_WIDE_LAYERS = (1, 5, 6, 7)
_NARROW_LAYERS = (2, 3, 4)
# Kernel loop plan for layers 2..8 (loop index 1..7): (stack, slot).
_PLAN = [("wide", 0), ("narrow", 0), ("narrow", 1), ("narrow", 2),
         ("wide", 1), ("wide", 2), ("wide", 3)]


# --------------------------------------------------------------------------
# Kernel
# --------------------------------------------------------------------------
def siren_kernel(x_ref, w1_ref, ww_ref, wn_ref, b_ref, out_ref, *, in_ch):
    """One batch tile of the full 8-layer SIREN forward.

    x_ref  : (tile, in_ch)             input
    w1_ref : (in_ch, 128)              layer-1 weight (W0 folded; bf16 or f32)
    ww_ref : (4, 128, 128)             layers 2,6,7,8 weights, zero padded
    wn_ref : (3, 128, 128)             layers 3,4,5  weights, zero padded
    b_ref  : (8, 1, 128)   f32         all biases, zero padded (W0 folded 1..7)
    out_ref: (tile, 128)               lanes [0:in_ch]          = reconstruction
                                       lanes [in_ch:in_ch+2]    = latent
                                       remaining lanes          = 0
    """

    def mm(a, w):
        # Weights are pre-cast on the host; only the activation operand is
        # cast (once, right before the dot) when the layer runs in bf16.
        if w.dtype == jnp.bfloat16:
            a = a.astype(jnp.bfloat16)
        return jnp.dot(a, w, preferred_element_type=jnp.float32)

    stacks = {"wide": ww_ref, "narrow": wn_ref}

    x = x_ref[...].astype(jnp.float32)

    # layer 1 (is_first): W0 already folded into w1/b1
    h = jnp.sin(mm(x, w1_ref[...]) + b_ref[0])          # (tile, 128)

    latent = None
    for li, (which, slot) in enumerate(_PLAN, start=1):  # layers 2..8
        pre = mm(h, stacks[which][slot]) + b_ref[li]     # (tile, 128) f32
        if li == 7:
            # layer 8 (is_last): linear, no activation, no W0 fold.
            # Padded lanes >= in_ch are exactly zero (zero weight cols / bias),
            # so write the full 128-lane block (unmasked, lane-dense writeback)
            # and overlay the two latent lanes on top.
            out_ref[...] = pre.astype(out_ref.dtype)
            out_ref[:, in_ch:in_ch + LATENT_DIM] = (
                latent[:, :LATENT_DIM].astype(out_ref.dtype))
        else:
            h = jnp.sin(pre)                             # W0 folded in weights
            if li == 3:
                latent = h                               # layer-4 activation


# --------------------------------------------------------------------------
# Host-side parameter packing (fold W0, pad, stack, cast)
# --------------------------------------------------------------------------
def pack_params(params, precision="mixed", w0=W0):
    """precision: "f32" | "mixed" (wide layers bf16) | "bf16" (all bf16)."""
    assert precision in ("f32", "mixed", "bf16")
    assert len(params) == 8
    in_ch, first_out = np.asarray(params[0][0]).shape
    assert first_out == HIDDEN and in_ch <= HIDDEN

    wide_dt = jnp.float32 if precision == "f32" else jnp.bfloat16
    narrow_dt = jnp.bfloat16 if precision == "bf16" else jnp.float32

    w1 = np.asarray(params[0][0], np.float32) * w0                   # (in_ch,128)
    ww = np.zeros((len(_WIDE_LAYERS), HIDDEN, HIDDEN), np.float32)   # layers 2,6,7,8
    wn = np.zeros((len(_NARROW_LAYERS), HIDDEN, HIDDEN), np.float32) # layers 3,4,5
    bp = np.zeros((8, 1, HIDDEN), np.float32)                        # all biases

    for li, (w, b) in enumerate(params):
        w = np.asarray(w, np.float32)
        b = np.asarray(b, np.float32).reshape(-1)
        scale = w0 if li < 7 else 1.0                                # no fold on last
        bp[li, 0, : b.shape[0]] = scale * b
        if li == 0:
            continue
        in_f, out_f = w.shape
        if li in _WIDE_LAYERS:
            ww[_WIDE_LAYERS.index(li), :in_f, :out_f] = scale * w
        else:
            wn[_NARROW_LAYERS.index(li), :in_f, :out_f] = scale * w

    return (jnp.asarray(w1, wide_dt), jnp.asarray(ww, wide_dt),
            jnp.asarray(wn, narrow_dt), jnp.asarray(bp, jnp.float32))


# --------------------------------------------------------------------------
# Wrapper
# --------------------------------------------------------------------------
def _auto_batch_tile(batch):
    # At least 2 grid steps when the batch allows (keeps both v7x TensorCores
    # busy under dimension_semantics=("parallel",)); up to 1024 rows per tile
    # to amortize the ~0.35 us per-grid-step pipeline overhead.
    half = -(-batch // 2)
    return min(1024, max(8, -(-half // 8) * 8))


def refine_circular_motion_forward(x, params, *, batch_tile=None,
                                   precision="mixed"):
    """x: (B, in_channels) f32.  Returns (reconstruction (B,in_ch), latent (B,2))."""
    B, in_ch = x.shape
    assert in_ch + LATENT_DIM <= HIDDEN
    if batch_tile is None:
        batch_tile = _auto_batch_tile(B)
    assert batch_tile % 8 == 0

    w1, ww, wn, bp = pack_params(params, precision=precision)

    n_tiles = -(-B // batch_tile)                 # ceil-div; ragged batch OK
    b_pad = n_tiles * batch_tile
    if b_pad != B:
        x = jnp.pad(x, ((0, b_pad - B), (0, 0)))

    kernel = functools.partial(siren_kernel, in_ch=in_ch)

    flops = 2 * b_pad * (in_ch * HIDDEN + 7 * HIDDEN * HIDDEN)
    transcendentals = 7 * b_pad * HIDDEN
    bytes_accessed = (x.size * x.dtype.itemsize
                      + w1.size * w1.dtype.itemsize
                      + ww.size * ww.dtype.itemsize
                      + wn.size * wn.dtype.itemsize
                      + bp.size * bp.dtype.itemsize
                      + b_pad * HIDDEN * x.dtype.itemsize)

    fused = pl.pallas_call(
        kernel,
        out_shape=jax.ShapeDtypeStruct((b_pad, HIDDEN), x.dtype),
        grid_spec=pltpu.PrefetchScalarGridSpec(
            num_scalar_prefetch=0,
            grid=(n_tiles,),
            in_specs=[
                pl.BlockSpec((batch_tile, in_ch), lambda i: (i, 0)),
                pl.BlockSpec((in_ch, HIDDEN), lambda i: (0, 0)),
                pl.BlockSpec((len(_WIDE_LAYERS), HIDDEN, HIDDEN),
                             lambda i: (0, 0, 0)),
                pl.BlockSpec((len(_NARROW_LAYERS), HIDDEN, HIDDEN),
                             lambda i: (0, 0, 0)),
                pl.BlockSpec((8, 1, HIDDEN), lambda i: (0, 0, 0)),
            ],
            out_specs=pl.BlockSpec((batch_tile, HIDDEN), lambda i: (i, 0)),
        ),
        compiler_params=pltpu.CompilerParams(
            dimension_semantics=("parallel",)),
        cost_estimate=pl.CostEstimate(flops=flops,
                                      transcendentals=transcendentals,
                                      bytes_accessed=bytes_accessed),
    )(x, w1, ww, wn, bp)

    return fused[:B, :in_ch], fused[:B, in_ch:in_ch + LATENT_DIM]


# --------------------------------------------------------------------------
# Synthetic params & pure-JAX reference (mirrors the PyTorch module exactly)
# --------------------------------------------------------------------------
def init_params(key, in_channels, dtype=jnp.float32):
    """Matches SirenLayer.init_weights + nn.Linear default bias init."""
    params = []
    for li, (in_f, out_f) in enumerate(LAYER_DIMS(in_channels)):
        key, kw, kb = jax.random.split(key, 3)
        is_first = (li == 0)
        bnd_w = (1.0 / in_f) if is_first else np.sqrt(6.0 / in_f) / W0
        bnd_b = 1.0 / np.sqrt(in_f)
        w = jax.random.uniform(kw, (in_f, out_f), dtype, -bnd_w, bnd_w)
        b = jax.random.uniform(kb, (1, out_f), dtype, -bnd_b, bnd_b)
        params.append((w, b))
    return params


def reference_forward(x, params):
    h = x
    latent = None
    for li, (w, b) in enumerate(params):
        h = jnp.dot(h, w, precision=jax.lax.Precision.HIGHEST) + b.reshape(1, -1)
        if li == 7:                       # layer 8: is_last, no activation
            break
        h = jnp.sin(W0 * h)
        if li == 3:                       # layer-4 activation is the latent
            latent = h
    return h, latent


# --------------------------------------------------------------------------
if __name__ == "__main__":
    key = jax.random.PRNGKey(0)
    in_channels = 4
    batch = 128

    kx, kp = jax.random.split(key)
    x = jax.random.uniform(kx, (batch, in_channels), jnp.float32, -1.0, 1.0)
    params = init_params(kp, in_channels)

    x_ref, lat_ref = reference_forward(x, params)

    # f32 path: mathematically identical to the reference (W0 fold only
    # reassociates the scale), tight tolerance.
    xo_f32, lat_f32 = refine_circular_motion_forward(x, params, precision="f32")
    jax.block_until_ready((xo_f32, lat_f32))
    np.testing.assert_allclose(np.asarray(xo_f32), np.asarray(x_ref),
                               rtol=1e-3, atol=1e-3)
    np.testing.assert_allclose(np.asarray(lat_f32), np.asarray(lat_ref),
                               rtol=1e-3, atol=1e-3)
    assert xo_f32.shape == (batch, in_channels)
    assert lat_f32.shape == (batch, LATENT_DIM)

    # Default mixed path: wide layers (1,2,6,7,8) on the bf16 MXU with f32
    # accumulation, latent bottleneck (3-5) in f32.  Looser tolerance by
    # design (documented accuracy contract of the fast path).
    xo_mx, lat_mx = refine_circular_motion_forward(x, params)  # precision="mixed"
    jax.block_until_ready((xo_mx, lat_mx))
    assert np.all(np.isfinite(np.asarray(xo_mx)))
    assert np.all(np.isfinite(np.asarray(lat_mx)))
    np.testing.assert_allclose(np.asarray(lat_mx), np.asarray(lat_ref),
                               rtol=0.1, atol=0.1)
    np.testing.assert_allclose(np.asarray(xo_mx), np.asarray(x_ref),
                               rtol=0.1, atol=0.1)

    # Ragged batch exercises the pad-to-tile path with the auto tile picker.
    xo_r, lat_r = refine_circular_motion_forward(x[:100], params,
                                                 precision="f32")
    jax.block_until_ready((xo_r, lat_r))
    np.testing.assert_allclose(np.asarray(xo_r), np.asarray(x_ref)[:100],
                               rtol=1e-3, atol=1e-3)
    np.testing.assert_allclose(np.asarray(lat_r), np.asarray(lat_ref)[:100],
                               rtol=1e-3, atol=1e-3)

    print("KERNEL_OK")
</pallas_src>

<mosaic_0001>
module attributes {stable_mosaic.version = 11 : i64} {
  func.func @siren_kernel(%arg0: i32, %arg1: memref<64x4xf32, #tpu.memory_space<vmem>>, %arg2: memref<4x128xf32, #tpu.memory_space<vmem>>, %arg3: memref<4x128x128xf32, #tpu.memory_space<vmem>>, %arg4: memref<3x128x128xf32, #tpu.memory_space<vmem>>, %arg5: memref<8x1x128xf32, #tpu.memory_space<vmem>>, %arg6: memref<64x128xf32, #tpu.memory_space<vmem>>) attributes {dimension_semantics = [#tpu.dimension_semantics<parallel>], iteration_bounds = array<i64: 2>, scalar_prefetch = 0 : i64, scratch_operands = 0 : i64, tpu.core_type = #tpu.core_type<tc>, window_params = [{transform_indices = @transform_0, window_bounds = array<i64: 64, 4>}, {pipeline_mode = #tpu.pipeline_mode<synchronous>, transform_indices = @transform_1, window_bounds = array<i64: 4, 128>}, {pipeline_mode = #tpu.pipeline_mode<synchronous>, transform_indices = @transform_2, window_bounds = array<i64: 4, 128, 128>}, {pipeline_mode = #tpu.pipeline_mode<synchronous>, transform_indices = @transform_3, window_bounds = array<i64: 3, 128, 128>}, {pipeline_mode = #tpu.pipeline_mode<synchronous>, transform_indices = @transform_4, window_bounds = array<i64: 8, 1, 128>}, {transform_indices = @transform_5, window_bounds = array<i64: 64, 128>}]} {
    %c0 = arith.constant 0 : index
    %c0_0 = arith.constant 0 : index
    %0 = vector.load %arg1[%c0, %c0_0] : memref<64x4xf32, #tpu.memory_space<vmem>>, vector<64x4xf32>
    %c0_1 = arith.constant 0 : index
    %c0_2 = arith.constant 0 : index
    %1 = vector.load %arg2[%c0_1, %c0_2] : memref<4x128xf32, #tpu.memory_space<vmem>>, vector<4x128xf32>
    %cst = arith.constant dense<0.000000e+00> : vector<64x128xf32>
    %2 = tpu.matmul %0, %1, %cst {dimension_numbers = #tpu.dot_dimension_numbers<[1], [0], [0], [1], [0, 0, 1, 1], [], []>} : vector<64x4xf32>, vector<4x128xf32>, vector<64x128xf32> -> vector<64x128xf32>
    %c0_3 = arith.constant 0 : index
    %c0_4 = arith.constant 0 : index
    %c0_5 = arith.constant 0 : index
    %3 = vector.load %arg5[%c0_3, %c0_4, %c0_5] : memref<8x1x128xf32, #tpu.memory_space<vmem>>, vector<1x1x128xf32>
    %4 = vector.shape_cast %3 : vector<1x1x128xf32> to vector<1x128xf32>
    %5 = vector.broadcast %4 : vector<1x128xf32> to vector<64x128xf32>
    %6 = arith.addf %2, %5 : vector<64x128xf32>
    %7 = math.sin %6 : vector<64x128xf32>
    %c0_6 = arith.constant 0 : index
    %c0_7 = arith.constant 0 : index
    %c0_8 = arith.constant 0 : index
    %8 = vector.load %arg3[%c0_6, %c0_7, %c0_8] : memref<4x128x128xf32, #tpu.memory_space<vmem>>, vector<1x128x128xf32>
    %9 = vector.shape_cast %8 : vector<1x128x128xf32> to vector<128x128xf32>
    %cst_9 = arith.constant dense<0.000000e+00> : vector<64x128xf32>
    %10 = tpu.matmul %7, %9, %cst_9 {dimension_numbers = #tpu.dot_dimension_numbers<[1], [0], [0], [1], [0, 0, 1, 1], [], []>} : vector<64x128xf32>, vector<128x128xf32>, vector<64x128xf32> -> vector<64x128xf32>
    %c1 = arith.constant 1 : index
    %c0_10 = arith.constant 0 : index
    %c0_11 = arith.constant 0 : index
    %11 = vector.load %arg5[%c1, %c0_10, %c0_11] : memref<8x1x128xf32, #tpu.memory_space<vmem>>, vector<1x1x128xf32>
    %12 = vector.shape_cast %11 : vector<1x1x128xf32> to vector<1x128xf32>
    %13 = vector.broadcast %12 : vector<1x128xf32> to vector<64x128xf32>
    %14 = arith.addf %10, %13 : vector<64x128xf32>
    %15 = math.sin %14 : vector<64x128xf32>
    %c0_12 = arith.constant 0 : index
    %c0_13 = arith.constant 0 : index
    %c0_14 = arith.constant 0 : index
    %16 = vector.load %arg4[%c0_12, %c0_13, %c0_14] : memref<3x128x128xf32, #tpu.memory_space<vmem>>, vector<1x128x128xf32>
    %17 = vector.shape_cast %16 : vector<1x128x128xf32> to vector<128x128xf32>
    %cst_15 = arith.constant dense<0.000000e+00> : vector<64x128xf32>
    %18 = tpu.matmul %15, %17, %cst_15 {dimension_numbers = #tpu.dot_dimension_numbers<[1], [0], [0], [1], [0, 0, 1, 1], [], []>} : vector<64x128xf32>, vector<128x128xf32>, vector<64x128xf32> -> vector<64x128xf32>
    %c2 = arith.constant 2 : index
    %c0_16 = arith.constant 0 : index
    %c0_17 = arith.constant 0 : index
    %19 = vector.load %arg5[%c2, %c0_16, %c0_17] : memref<8x1x128xf32, #tpu.memory_space<vmem>>, vector<1x1x128xf32>
    %20 = vector.shape_cast %19 : vector<1x1x128xf32> to vector<1x128xf32>
    %21 = vector.broadcast %20 : vector<1x128xf32> to vector<64x128xf32>
    %22 = arith.addf %18, %21 : vector<64x128xf32>
    %23 = math.sin %22 : vector<64x128xf32>
    %c1_18 = arith.constant 1 : index
    %c0_19 = arith.constant 0 : index
    %c0_20 = arith.constant 0 : index
    %24 = vector.load %arg4[%c1_18, %c0_19, %c0_20] : memref<3x128x128xf32, #tpu.memory_space<vmem>>, vector<1x128x128xf32>
    %25 = vector.shape_cast %24 : vector<1x128x128xf32> to vector<128x128xf32>
    %cst_21 = arith.constant dense<0.000000e+00> : vector<64x128xf32>
    %26 = tpu.matmul %23, %25, %cst_21 {dimension_numbers = #tpu.dot_dimension_numbers<[1], [0], [0], [1], [0, 0, 1, 1], [], []>} : vector<64x128xf32>, vector<128x128xf32>, vector<64x128xf32> -> vector<64x128xf32>
    %c3 = arith.constant 3 : index
    %c0_22 = arith.constant 0 : index
    %c0_23 = arith.constant 0 : index
    %27 = vector.load %arg5[%c3, %c0_22, %c0_23] : memref<8x1x128xf32, #tpu.memory_space<vmem>>, vector<1x1x128xf32>
    %28 = vector.shape_cast %27 : vector<1x1x128xf32> to vector<1x128xf32>
    %29 = vector.broadcast %28 : vector<1x128xf32> to vector<64x128xf32>
    %30 = arith.addf %26, %29 : vector<64x128xf32>
    %31 = math.sin %30 : vector<64x128xf32>
    %c2_24 = arith.constant 2 : index
    %c0_25 = arith.constant 0 : index
    %c0_26 = arith.constant 0 : index
    %32 = vector.load %arg4[%c2_24, %c0_25, %c0_26] : memref<3x128x128xf32, #tpu.memory_space<vmem>>, vector<1x128x128xf32>
    %33 = vector.shape_cast %32 : vector<1x128x128xf32> to vector<128x128xf32>
    %cst_27 = arith.constant dense<0.000000e+00> : vector<64x128xf32>
    %34 = tpu.matmul %31, %33, %cst_27 {dimension_numbers = #tpu.dot_dimension_numbers<[1], [0], [0], [1], [0, 0, 1, 1], [], []>} : vector<64x128xf32>, vector<128x128xf32>, vector<64x128xf32> -> vector<64x128xf32>
    %c4 = arith.constant 4 : index
    %c0_28 = arith.constant 0 : index
    %c0_29 = arith.constant 0 : index
    %35 = vector.load %arg5[%c4, %c0_28, %c0_29] : memref<8x1x128xf32, #tpu.memory_space<vmem>>, vector<1x1x128xf32>
    %36 = vector.shape_cast %35 : vector<1x1x128xf32> to vector<1x128xf32>
    %37 = vector.broadcast %36 : vector<1x128xf32> to vector<64x128xf32>
    %38 = arith.addf %34, %37 : vector<64x128xf32>
    %39 = math.sin %38 : vector<64x128xf32>
    %c1_30 = arith.constant 1 : index
    %c0_31 = arith.constant 0 : index
    %c0_32 = arith.constant 0 : index
    %40 = vector.load %arg3[%c1_30, %c0_31, %c0_32] : memref<4x128x128xf32, #tpu.memory_space<vmem>>, vector<1x128x128xf32>
    %41 = vector.shape_cast %40 : vector<1x128x128xf32> to vector<128x128xf32>
    %cst_33 = arith.constant dense<0.000000e+00> : vector<64x128xf32>
    %42 = tpu.matmul %39, %41, %cst_33 {dimension_numbers = #tpu.dot_dimension_numbers<[1], [0], [0], [1], [0, 0, 1, 1], [], []>} : vector<64x128xf32>, vector<128x128xf32>, vector<64x128xf32> -> vector<64x128xf32>
    %c5 = arith.constant 5 : index
    %c0_34 = arith.constant 0 : index
    %c0_35 = arith.constant 0 : index
    %43 = vector.load %arg5[%c5, %c0_34, %c0_35] : memref<8x1x128xf32, #tpu.memory_space<vmem>>, vector<1x1x128xf32>
    %44 = vector.shape_cast %43 : vector<1x1x128xf32> to vector<1x128xf32>
    %45 = vector.broadcast %44 : vector<1x128xf32> to vector<64x128xf32>
    %46 = arith.addf %42, %45 : vector<64x128xf32>
    %47 = math.sin %46 : vector<64x128xf32>
    %c2_36 = arith.constant 2 : index
    %c0_37 = arith.constant 0 : index
    %c0_38 = arith.constant 0 : index
    %48 = vector.load %arg3[%c2_36, %c0_37, %c0_38] : memref<4x128x128xf32, #tpu.memory_space<vmem>>, vector<1x128x128xf32>
    %49 = vector.shape_cast %48 : vector<1x128x128xf32> to vector<128x128xf32>
    %cst_39 = arith.constant dense<0.000000e+00> : vector<64x128xf32>
    %50 = tpu.matmul %47, %49, %cst_39 {dimension_numbers = #tpu.dot_dimension_numbers<[1], [0], [0], [1], [0, 0, 1, 1], [], []>} : vector<64x128xf32>, vector<128x128xf32>, vector<64x128xf32> -> vector<64x128xf32>
    %c6 = arith.constant 6 : index
    %c0_40 = arith.constant 0 : index
    %c0_41 = arith.constant 0 : index
    %51 = vector.load %arg5[%c6, %c0_40, %c0_41] : memref<8x1x128xf32, #tpu.memory_space<vmem>>, vector<1x1x128xf32>
    %52 = vector.shape_cast %51 : vector<1x1x128xf32> to vector<1x128xf32>
    %53 = vector.broadcast %52 : vector<1x128xf32> to vector<64x128xf32>
    %54 = arith.addf %50, %53 : vector<64x128xf32>
    %55 = math.sin %54 : vector<64x128xf32>
    %c3_42 = arith.constant 3 : index
    %c0_43 = arith.constant 0 : index
    %c0_44 = arith.constant 0 : index
    %56 = vector.load %arg3[%c3_42, %c0_43, %c0_44] : memref<4x128x128xf32, #tpu.memory_space<vmem>>, vector<1x128x128xf32>
    %57 = vector.shape_cast %56 : vector<1x128x128xf32> to vector<128x128xf32>
    %cst_45 = arith.constant dense<0.000000e+00> : vector<64x128xf32>
    %58 = tpu.matmul %55, %57, %cst_45 {dimension_numbers = #tpu.dot_dimension_numbers<[1], [0], [0], [1], [0, 0, 1, 1], [], []>} : vector<64x128xf32>, vector<128x128xf32>, vector<64x128xf32> -> vector<64x128xf32>
    %c7 = arith.constant 7 : index
    %c0_46 = arith.constant 0 : index
    %c0_47 = arith.constant 0 : index
    %59 = vector.load %arg5[%c7, %c0_46, %c0_47] : memref<8x1x128xf32, #tpu.memory_space<vmem>>, vector<1x1x128xf32>
    %60 = vector.shape_cast %59 : vector<1x1x128xf32> to vector<1x128xf32>
    %61 = vector.broadcast %60 : vector<1x128xf32> to vector<64x128xf32>
    %62 = arith.addf %58, %61 : vector<64x128xf32>
    %c0_48 = arith.constant 0 : index
    %c0_49 = arith.constant 0 : index
    %63 = vector.load %arg6[%c0_48, %c0_49] : memref<64x128xf32, #tpu.memory_space<vmem>>, vector<64x128xf32>
    tpu.vector_store %arg6[%c0_48, %c0_49], %62 {strides = array<i32>} : memref<64x128xf32, #tpu.memory_space<vmem>>, vector<64x128xf32>,
    %64 = vector.extract_strided_slice %31 {offsets = [0, 0], sizes = [64, 2], strides = [1, 1]} : vector<64x128xf32> to vector<64x2xf32>
    %c0_50 = arith.constant 0 : index
    %c4_51 = arith.constant 4 : index
    %65 = vector.load %arg6[%c0_50, %c4_51] : memref<64x128xf32, #tpu.memory_space<vmem>>, vector<64x2xf32>
    tpu.vector_store %arg6[%c0_50, %c4_51], %64 {strides = array<i32>} : memref<64x128xf32, #tpu.memory_space<vmem>>, vector<64x2xf32>,
    return
  }
  func.func @transform_0(%arg0: i32) -> (i32, i32) {
    %c0_i32 = arith.constant 0 : i32
    %c0_i32_0 = arith.constant 0 : i32
    return %arg0, %c0_i32 : i32, i32
  }
  func.func @transform_1(%arg0: i32) -> (i32, i32) {
    %c0_i32 = arith.constant 0 : i32
    %c0_i32_0 = arith.constant 0 : i32
    %c0_i32_1 = arith.constant 0 : i32
    return %c0_i32, %c0_i32_0 : i32, i32
  }
  func.func @transform_2(%arg0: i32) -> (i32, i32, i32) {
    %c0_i32 = arith.constant 0 : i32
    %c0_i32_0 = arith.constant 0 : i32
    %c0_i32_1 = arith.constant 0 : i32
    %c0_i32_2 = arith.constant 0 : i32
    return %c0_i32, %c0_i32_0, %c0_i32_1 : i32, i32, i32
  }
  func.func @transform_3(%arg0: i32) -> (i32, i32, i32) {
    %c0_i32 = arith.constant 0 : i32
    %c0_i32_0 = arith.constant 0 : i32
    %c0_i32_1 = arith.constant 0 : i32
    %c0_i32_2 = arith.constant 0 : i32
    return %c0_i32, %c0_i32_0, %c0_i32_1 : i32, i32, i32
  }
  func.func @transform_4(%arg0: i32) -> (i32, i32, i32) {
    %c0_i32 = arith.constant 0 : i32
    %c0_i32_0 = arith.constant 0 : i32
    %c0_i32_1 = arith.constant 0 : i32
    %c0_i32_2 = arith.constant 0 : i32
    return %c0_i32, %c0_i32_0, %c0_i32_1 : i32, i32, i32
  }
  func.func @transform_5(%arg0: i32) -> (i32, i32) {
    %c0_i32 = arith.constant 0 : i32
    %c0_i32_0 = arith.constant 0 : i32
    return %arg0, %c0_i32 : i32, i32
  }
}

</mosaic_0001>

<bundles_post_ra>
// kernel: tpu_custom_call.1
= control target key start
LH: loop header
LB: loop body
LE: loop exit
PB: predicated region body
PF: predicated region fallthrough
CT: control target
= control target key end

     0   :  { %10 = vsyncpa [#allocation3], 0  ;;  %s14320_s0 = inlined_call_operand.vmem [shape: f32[128,4], index: 0, kind: input, shape index: {}]   ;;  %s14321_s1 = inlined_call_operand.vmem [shape: f32[4,128], index: 1, kind: input, shape index: {}]   ;;  %s14322_s2 = inlined_call_operand.hbm [shape: f32[4,128,128], index: 2, kind: input, shape index: {}]   ;;  %s14323_s3 = inlined_call_operand.hbm [shape: f32[3,128,128], index: 3, kind: input, shape index: {}]   ;;  %s14324_s4 = inlined_call_operand.vmem [shape: f32[8,1,128], index: 4, kind: input, shape index: {}]   ;;  %s14325_s5 = inlined_call_operand.hbm [shape: f32[128,128], index: 5, kind: output, shape index: {}]  }
   0x1   :  { %11 = vsyncpa [#allocation6], 0 }
   0x2   :  { %12 = vsyncpa [#allocation4], 0 }
   0x3   :  { %14 = vsyncpa [#allocation4 + $0x1], 0  ;;  %s8980_s18 = smov 0   ;;  %s8982_s19 = smov 0  }
   0x4   :  { %s8984_s20 = smov 0   ;;  %s8986_s21 = smov 0  }
   0x5 LB: > { %s9001_s22 = sadd.s32 4294967295, %s8934_s21   ;;  %s7285_s23 = sadd.s32 4294967294, %s8934_s21   ;;  %s8934_s21 = sphi %s8986_s21, %s14645_s21   ;;  %s8930_s20 = sphi %s8984_s20, %s14644_s20   ;;  %s8926_s19 = sphi %s8982_s19, %s14643_s19   ;;  %s8922_s18 = sphi %s8980_s18, %s14642_s18  }
   0x6   : > { %s9005_s24 = sadd.s32 1, %s8934_s21   ;;  %s137_s25 = sadd.s32 1, %s8930_s20 }
   0x7   : > { %s134_s26 = ssub.s32 %s8934_s21, %s9005_s24  ;;  %p147_p0 = scmp.ne.s32.totalorder %s8930_s20, %s8926_s19 }
   0x8   : > { %p135_p1 = scmp.eq.s32.totalorder %s134_s26, 0  ;;  %p148_p2 = scmp.eq.s32.totalorder %s9001_s22, 1 }
   0x9   : > { %p153_p3 = scmp.ne.s32.totalorder %s8926_s19, %s8922_s18  ;;  %p154_p4 = scmp.eq.s32.totalorder %s7285_s23, 1 }
   0xa   : > { %s9016_s27 = scalar_select %p135_p1, %s8930_s20, %s137_s25  }
   0xb   : > { %p9018_p5 = por %p148_p2, %p147_p0  ;;  %p9022_p6 = por %p154_p4, %p153_p3 }
   0xc   : > { %p7286_p7 = scmp.ge.s32.totalorder %s8934_s21, 1  ;;  %p161_p8 = scmp.lt.s32.totalorder %s8934_s21, 3 }
   0xd   : > { %s14423_s28 = scalar_select %p9018_p5, 1, 0 }
   0xe   : > { %s14424_s29 = scalar_select %p9022_p6, 1, 0 }
   0xf   : > { %p14326_p9 = scmp.eq.s32.totalorder %s9001_s22, 0  ;;  %p9029_p10 = pnand %p7286_p7, %p161_p8 }
  0x10   : > { %s8936_s6 = smov [#allocation2]   ;;  %s8937_s9 = smov [#allocation5]  }
  0x11   : > { %s14425_s30 = scalar_select %p9029_p10, 1, 0 }
  0x12   : > { %s176_s7 = sshll.u32 %s8936_s6, 4  ;;  %p8523_p11 = pneg %p9029_p10  ;;  %s177_s7 = int_to_ptr.vmem [resolvable:$true] %s176_s7 }
  0x13   : > { %s189_s10 = sshll.u32 %s8937_s9, 4  ;;  %s8808_s13 = scalar_lea.hbm %s14322_s2, 8192  ;;  %s9041_s10 = int_to_ptr.vmem [resolvable:$true] %s189_s10 }
  0x14   : > { %p9037_p12 = pnand %p14326_p9, %p8523_p11  ;;  %p8809_p13 = scmp.ne.s32.totalorder %s14322_s2, %s8808_s13 }
  0x15   : > { %p8815_p3 = scmp.lt.u32.totalorder %s8808_s13, %s14322_s2 }
  0x16   : > { %p8810_p0 = pneg %p9037_p12 }
  0x18   : > { %p8811_p1 = pnand %p8810_p0, %p8809_p13 }
  0x1a   : > { %p8812_p2 = pneg %p8811_p1 }
  0x1c   : > { %p8817_p4 = pnand %p8815_p3, %p8812_p2 }
  0x1e   : > { %8820 = shalt.err (!%p8817_p4)
}
  0x1f   : > { %s8821_s23 = scalar_lea.vmem %s177_s7, 8192  ;;  %p8829_p9 = scmp.lt.s32.totalorder %s177_s7, %s177_s7 }
  0x20   : > { %p8822_p7 = scmp.ne.s32.totalorder %s177_s7, %s8821_s23  ;;  %p8830_p6 = scmp.lt.s32.totalorder %s8821_s23, %s8821_s23 }
  0x22   : > { %p8824_p8 = pnand %p8822_p7, %p8810_p0  ;;  %p8831_p5 = por %p8830_p6, %p8829_p9 }
  0x24   : > { %p8825_p11 = pneg %p8824_p8 }
  0x26   : > { %p8832_p10 = pnand %p8831_p5, %p8825_p11 }
  0x28   : > { %8835 = shalt.err (!%p8832_p10)
}
  0x29   : > { %s8938_s25 = smov 128   ;;  %s8939_s26 = smov 8  }
  0x2a   : > { %8526 = dma.hbm_to_vmem [thread:$0]  (!%p9037_p12), %s14322_s2, 8192, %s177_s7, [#allocation3], %s8938_s25, %s8938_s25, %s8939_s26  }
  0x2b   : > { %s8836_s13 = scalar_lea.hbm %s14323_s3, 6144 }
  0x2c   : > { %p8837_p13 = scmp.ne.s32.totalorder %s14323_s3, %s8836_s13  ;;  %p8843_p9 = scmp.lt.u32.totalorder %s8836_s13, %s14323_s3 }
  0x2e   : > { %p8839_p5 = pnand %p8837_p13, %p8810_p0 }
  0x30   : > { %p8840_p6 = pneg %p8839_p5 }
  0x32   : > { %p8845_p10 = pnand %p8843_p9, %p8840_p6 }
  0x34   : > { %8848 = shalt.err (!%p8845_p10)
}
  0x35   : > { %s8849_s7 = scalar_lea.vmem %s9041_s10, 6144  ;;  %p8857_p4 = scmp.lt.s32.totalorder %s9041_s10, %s9041_s10 }
  0x36   : > { %p8850_p1 = scmp.ne.s32.totalorder %s9041_s10, %s8849_s7  ;;  %p8858_p7 = scmp.lt.s32.totalorder %s8849_s7, %s8849_s7 }
  0x38   : > { %p8852_p2 = pnand %p8850_p1, %p8810_p0  ;;  %p8859_p8 = por %p8858_p7, %p8857_p4 }
  0x3a   : > { %p8853_p3 = pneg %p8852_p2 }
  0x3c   : > { %p8860_p11 = pnand %p8859_p8, %p8853_p3 }
  0x3e   : > { %8863 = shalt.err (!%p8860_p11)
}
  0x3f   : > { %8529 = dma.hbm_to_vmem [thread:$0]  (!%p9037_p12), %s14323_s3, 6144, %s9041_s10, [#allocation6], %s8938_s25, %s8938_s25, %s8939_s26  }
  0x40   : > { %p14427_p13 = scmp.ne.s32.totalorder %s14425_s30, 0 }
  0x42   : > { %217 = sbr.rel (%p14427_p13) target bundleno = 3129 (0xc39), region = 40 }
  0x49   : > { %p14428_p5 = scmp.eq.s32.totalorder %s9001_s22, 0 }
  0x4b   : > { %8909 = dma.done.wait (%p14428_p5), [#allocation3], 8192   ;;  %p14429_p0 = pmov %p14428_p5 }
  0x4d   : > { %8911 = vsyncadd (%p14429_p0), [#allocation3], 4294959104  ;;  %p14430_p6 = pmov %p14429_p0 }
  0x4e   : > { %p14431_p9 = pmov %p14429_p0 }
  0x4f   : > { %8913 = dma.done.wait (%p14430_p6), [#allocation6], 6144  }
  0x50   : > { %8915 = vsyncadd (%p14431_p9), [#allocation6], 4294961152  ;;  %s7294_s8 = sshll.u32 %s9001_s22, 3  ;;  %vm297_vm0 = vcmask 1043456   ;;  %vm272_vm1 = vcmask 31744   ;;  %s8946_s6 = smov 4  }
  0x51   : > { %p250_p10 = scmp.lt.s32.totalorder %s7294_s8, 15  ;;  %v264_v0 = vld [vmem:[%s14321_s1] sm:$0xf]  ;;  %v14346_v34 = vmov 683565275   ;;  %s246_s11 = sand.u32 1, %s8926_s19  }
  0x52   : > { %7727 = vmatprep.subr.msk.mxu0 %vm297_vm0, %v264_v0  ;;  %v9118_v9 = vld [vmem:[%s14324_s4] ss:$0 sm:$0xff]  ;;  %v14344_v36 = vmov 2475754826   ;;  %v14335_v40 = vmov 2131351028  }
  0x53   : > { %s14647_s8 = smov (!%p250_p10, %s7294_s8), 15  ;;  %7728 = vmatpush3.msk.msra.mxu0 %vm297_vm0, %v264_v0  ;;  %v14341_v43 = vmov 2102212464   ;;  %v14339_v46 = vmov 920167782   ;;  %s7293_s12 = sshll.u32 %s246_s11, 6 }
  0x54   : > { %s7295_s10 = sshll.u32 %s14647_s8, 3  ;;  %v14337_v49 = vmov 1326507024   ;;  %s14242_s15 = scalar_lea.vmem [#allocation7], %s7293_s12 }
  0x55   : > { %s253_s26 = scalar_lea.vmem %s14320_s0, %s7295_s10  ;;  %s7549_s16 = sshll.u32 %s9001_s22, 10 }
  0x56   : > { %v256_v1 = vld [vmem:[%s253_s26] sm:$0xff]  ;;  %v257_v2 = vld [vmem:[%s253_s26 + $0x8] sm:$0xff]  ;;  %v258_v3 = vld [vmem:[%s253_s26 + $0x10] sm:$0xff]  ;;  %s7201_s17 = sshll.u32 %s14242_s15, 4  ;;  %s14279_s22 = scalar_lea.sflag [#allocation4], %s246_s11  ;;  %s14269_s17 = int_to_ptr.vmem [resolvable:$true] %s7201_s17 }
  0x57   : > { %7729 = vmatprep.mubr.msk.f32.mxu0 %vm272_vm1, %v256_v1  ;;  %v259_v4 = vld [vmem:[%s253_s26 + $0x18] sm:$0xff]  ;;  %v260_v5 = vld [vmem:[%s253_s26 + $0x20] sm:$0xff]  ;;  %v261_v6 = vld [vmem:[%s253_s26 + $0x28] sm:$0xff]  ;;  %s8864_s8 = scalar_lea.vmem %s14269_s17, 1024  ;;  %p14640_p1 = scmp.ne.s32.totalorder %s14423_s28, 0 }
  0x58   : > { %7730 = vmatmul.mubr.msk.f32.vlgmr.msra.gmra.mrb[0].mxu0 %vm272_vm1, %v257_v2  ;;  %v262_v7 = vld [vmem:[%s253_s26 + $0x30] sm:$0xff]  ;;  %v263_v8 = vld [vmem:[%s253_s26 + $0x38] sm:$0xff]  ;;  %p8865_p12 = scmp.ne.s32.totalorder %s14269_s17, %s8864_s8  ;;  %s8947_s10 = smov [#allocation7]  }
  0x59   : > { %7732 = vmatprep.mubr.msk.f32.mxu0 %vm272_vm1, %v258_v3  ;;  %s8868_s30 = sshll.u32 %s8947_s10, 4  ;;  %s8869_s30 = int_to_ptr.vmem [resolvable:$false] %s8868_s30 }
  0x5a   : > { %p8866_p2 = pnand %p8865_p12, %p14640_p1  ;;  %s8870_s25 = scalar_lea.vmem %s8869_s30, 2048 }
  0x5b   : > { %p8871_p4 = scmp.lt.s32.totalorder %s14269_s17, %s8869_s30  ;;  %p8872_p7 = scmp.lt.s32.totalorder %s8870_s25, %s8864_s8 }
  0x5c   : > { %7733 = vmatmul.mubr.msk.f32.gmra.mrb[2].mxu0 %vm272_vm1, %v259_v4  ;;  %p8867_p3 = pneg %p8866_p2 }
  0x5d   : > { %7735 = vmatprep.mubr.msk.f32.mxu0 %vm272_vm1, %v260_v5  ;;  %p8873_p8 = por %p8872_p7, %p8871_p4 }
  0x5f   : > { %p8874_p11 = pnand %p8873_p8, %p8867_p3 }
  0x60   : > { %7736 = vmatmul.mubr.msk.f32.gmra.mrb[4].mxu0 %vm272_vm1, %v261_v6 }
  0x61   : > { %7738 = vmatprep.mubr.msk.f32.mxu0 %vm272_vm1, %v262_v7 }
  0x64   : > { %7739 = vmatmul.mubr.msk.f32.gmra.mrb[6].mxu0 %vm272_vm1, %v263_v8 }
 0x12b   : > { %v7731_v10 = vpop.f32.mrb[0].mxu0 }
 0x12c   : > { %v9121_v11 = vadd.f32 %v7731_v10, %v9118_v9  ;;  %v9123_v12 = vpop.f32.mrb[1].mxu0 }
 0x12e   : > { %v513_v13 = vand.u32 2139095040, %v9121_v11  ;;  %v14334_v23 = vand.u32 2147483647, %v9121_v11 }
 0x12f   : > { %v7734_v14 = vpop.f32.mrb[2].mxu0 }
 0x130   : > { %v514_v15 = vshrl.u32 %v513_v13, 23  ;;  %v9127_v16 = vadd.f32 %v7734_v14, %v9118_v9  ;;  %v377_v17 = vpop.f32.mrb[3].mxu0  ;;  %v517_v30 = vand.u32 8388607, %v14334_v23 }
 0x131   : > { %v9136_v24 = vadd.f32 %v9118_v9, %v377_v17 }
 0x132   : > { %v7310_v18 = vadd.s32 4294967169, %v514_v15  ;;  %v721_v19 = vand.u32 2139095040, %v9127_v16  ;;  %v518_v55 = vor.u32 8388608, %v517_v30  ;;  %v14332_v59 = vand.u32 2147483647, %v9127_v16 }
 0x133   : > { %v9130_v20 = vpop.f32.mrb[4].mxu0  ;;  %v617_v32 = vand.u32 2139095040, %v9136_v24 }
 0x134   : > { %v520_v21 = vadd.s32 1, %v7310_v18  ;;  %v9132_v22 = vpop.f32.mrb[5].mxu0  ;;  %v722_v26 = vshrl.u32 %v721_v19, 23  ;;  %v558_v4 = vshll.u32 %v518_v55, 8  ;;  %v725_v8 = vand.u32 8388607, %v14332_v59 }
 0x135   : > { %v618_v54 = vshrl.u32 %v617_v32, 23 }
 0x136   : > { %vm521_vm2 = vcmp.gt.s32.totalorder %v520_v21, 0  ;;  %v7318_v38 = vadd.s32 4294967169, %v722_v26 }
 0x137   : > { %v522_v25 = vsel %vm521_vm2, %v520_v21, 0  ;;  %v9138_v27 = vpop.f32.mrb[6].mxu0  ;;  %v7314_v2 = vadd.s32 4294967169, %v618_v54  ;;  %v9192_v21 = vadd.f32 %v9118_v9, %v9123_v12 }
 0x138   : > { %v524_v28 = vand.u32 31, %v522_v25  ;;  %v9140_v29 = vpop.f32.mrb[7].mxu0  ;;  %v9145_v33 = vshrl.u32 %v522_v25, 5  ;;  %v728_v60 = vadd.s32 1, %v7318_v38 }
 0x139   : > { %v624_v14 = vadd.s32 1, %v7314_v2  ;;  %14432 = vst [vmem:[#allocation11_spill] sm:$0xff] %v9192_v21 }
 0x13a   : > { %v525_v31 = vsub.s32 32, %v524_v28  ;;  %v527_v35 = vshll.u32 %v14346_v34, %v524_v28  ;;  %v530_v37 = vshll.u32 %v14344_v36, %v524_v28  ;;  %v533_v42 = vshll.u32 %v14335_v40, %v524_v28 }
 0x13b   : > { %v536_v45 = vshll.u32 %v14341_v43, %v524_v28  ;;  %v539_v48 = vshll.u32 %v14339_v46, %v524_v28  ;;  %vm542_vm3 = vcmp.lt.s32.totalorder %v9145_v33, 1  ;;  %vm545_vm4 = vcmp.lt.s32.totalorder %v9145_v33, 4 }
 0x13c   : > { %v528_v39 = vshrl.u32 %v14344_v36, %v525_v31  ;;  %v531_v41 = vshrl.u32 %v14335_v40, %v525_v31  ;;  %v534_v44 = vshrl.u32 %v14341_v43, %v525_v31  ;;  %v537_v47 = vshrl.u32 %v14339_v46, %v525_v31 }
 0x13d   : > { %v540_v50 = vshrl.u32 %v14337_v49, %v525_v31  ;;  %vm544_vm5 = vcmp.lt.s32.totalorder %v9145_v33, 3  ;;  %vm543_vm6 = vcmp.lt.s32.totalorder %v9145_v33, 2  ;;  %vm729_vm7 = vcmp.gt.s32.totalorder %v728_v60, 0 }
 0x13e   : > { %v529_v51 = vor.u32 %v528_v39, %v527_v35  ;;  %v532_v52 = vor.u32 %v531_v41, %v530_v37  ;;  %v535_v53 = vor.u32 %v534_v44, %v533_v42  ;;  %v538_v56 = vor.u32 %v537_v47, %v536_v45 }
 0x13f   : > { %v541_v57 = vor.u32 %v540_v50, %v539_v48  ;;  %v730_v13 = vsel %vm729_vm7, %v728_v60, 0  ;;  %v526_v15 = vshrl.u32 %v14346_v34, %v525_v31  ;;  %v726_v28 = vor.u32 8388608, %v725_v8 }
 0x140   : > { %v550_v58 = vsel %vm542_vm3, %v529_v51, %v532_v52  ;;  %v551_v61 = vsel %vm545_vm4, %v538_v56, 920167782  ;;  %v554_v62 = vsel %vm542_vm3, %v532_v52, %v535_v53  ;;  %v547_v10 = vsel %vm545_vm4, %v535_v53, 2102212464 }
 0x141   : > { %v555_v63 = vsel %vm545_vm4, %v541_v57, 1326507024  ;;  %v552_v0 = vsel %vm544_vm5, %v535_v53, %v551_v61  ;;  %v732_v19 = vand.u32 31, %v730_v13  ;;  %v546_v25 = vsel %vm542_vm3, %v526_v15, %v529_v51 }
 0x142   : > { %v556_v1 = vsel %vm544_vm5, %v538_v56, %v555_v63  ;;  %v553_v3 = vsel %vm543_vm6, %v550_v58, %v552_v0  ;;  %v548_v26 = vsel %vm544_vm5, %v532_v52, %v547_v10  ;;  %v9198_v32 = vshrl.u32 %v730_v13, 5 }
 0x143   : > { %v557_v5 = vsel %vm543_vm6, %v554_v62, %v556_v1  ;;  %v9178_v6 = vmul.u32.u64.low %v558_v4, %v553_v3  ;;  %v9179_v7 = vmul.u32.u64.high %v558_v4, %v553_v3, %v9178_v6  ;;  %v733_v30 = vsub.s32 32, %v732_v19 }
 0x144   : > { %v9187_v17 = vmul.u32.u64.low %v558_v4, %v557_v5  ;;  %v9188_v18 = vmul.u32.u64.high %v558_v4, %v557_v5, %v9187_v17  ;;  %v735_v31 = vshll.u32 %v14346_v34, %v732_v19  ;;  %v738_v35 = vshll.u32 %v14344_v36, %v732_v19 }
 0x145   : > { %vm625_vm8 = vcmp.gt.s32.totalorder %v624_v14, 0  ;;  %v736_v37 = vshrl.u32 %v14344_v36, %v733_v30  ;;  %v739_v12 = vshrl.u32 %v14335_v40, %v733_v30  ;;  %v741_v38 = vshll.u32 %v14335_v40, %v732_v19 }
 0x146   : > { %v744_v39 = vshll.u32 %v14341_v43, %v732_v19  ;;  %v742_v41 = vshrl.u32 %v14341_v43, %v733_v30  ;;  %v745_v42 = vshrl.u32 %v14339_v46, %v733_v30  ;;  %v747_v44 = vshll.u32 %v14339_v46, %v732_v19 }
 0x147   : > { %v748_v45 = vshrl.u32 %v14337_v49, %v733_v30  ;;  %v549_v47 = vsel %vm543_vm6, %v546_v25, %v548_v26  ;;  %v568_v48 = vadd.s32 1, %v9179_v7  ;;  %v737_v50 = vor.u32 %v736_v37, %v735_v31 }
 0x148   : > { %v740_v51 = vor.u32 %v739_v12, %v738_v35  ;;  %v743_v52 = vor.u32 %v742_v41, %v741_v38  ;;  %v746_v53 = vor.u32 %v745_v42, %v744_v39  ;;  %vm750_vm9 = vcmp.lt.s32.totalorder %v9198_v32, 1 }
 0x149   : > { %v749_v54 = vor.u32 %v748_v45, %v747_v44  ;;  %vm567_vm10 = vc.u32 %v9188_v18, %v9178_v6  ;;  %vm753_vm11 = vcmp.lt.s32.totalorder %v9198_v32, 4  ;;  %v626_v33 = vsel %vm625_vm8, %v624_v14, 0 }
 0x14a   : > { %v758_v55 = vsel %vm750_vm9, %v737_v50, %v740_v51  ;;  %vm752_vm12 = vcmp.lt.s32.totalorder %v9198_v32, 3  ;;  %v759_v56 = vsel %vm753_vm11, %v746_v53, 920167782  ;;  %v762_v57 = vsel %vm750_vm9, %v740_v51, %v743_v52 }
 0x14b   : > { %v763_v58 = vsel %vm753_vm11, %v749_v54, 1326507024  ;;  %vm751_vm13 = vcmp.lt.s32.totalorder %v9198_v32, 2  ;;  %v760_v60 = vsel %vm752_vm12, %v743_v52, %v759_v56  ;;  %v569_v62 = vsel %vm567_vm10, %v568_v48, %v9179_v7 }
 0x14c   : > { %v764_v61 = vsel %vm752_vm12, %v746_v53, %v763_v58  ;;  %v761_v63 = vsel %vm751_vm13, %v758_v55, %v760_v60  ;;  %v628_v0 = vand.u32 31, %v626_v33  ;;  %v565_v1 = vmul.u32 %v558_v4, %v549_v47 }
 0x14d   : > { %v765_v2 = vsel %vm751_vm13, %v762_v57, %v764_v61  ;;  %v766_v3 = vshll.u32 %v726_v28, 8  ;;  %v409_v5 = vand.u32 2139095040, %v9192_v21  ;;  %v755_v17 = vsel %vm753_vm11, %v743_v52, 2102212464 }
 0x14e   : > { %v9238_v8 = vsub.s32 32, %v628_v0  ;;  %v570_v10 = vadd.s32 %v569_v62, %v565_v1  ;;  %v734_v19 = vshrl.u32 %v14346_v34, %v733_v30  ;;  %v14333_v25 = vand.u32 2147483647, %v9136_v24 }
 0x14f   : > { %v9240_v13 = vmul.u32.u64.low %v766_v3, %v761_v63  ;;  %v9241_v14 = vmul.u32.u64.high %v766_v3, %v761_v63, %v9240_v13  ;;  %v9244_v15 = vmul.u32.u64.low %v766_v3, %v765_v2  ;;  %v9245_v7 = vmul.u32.u64.high %v766_v3, %v765_v2, %v9244_v15 }
 0x150   : > { %v410_v4 = vshrl.u32 %v409_v5, 23  ;;  %v641_v26 = vshrl.u32 %v14339_v46, %v9238_v8  ;;  %v571_v28 = vadd.s32 536870912, %v570_v10  ;;  %v644_v31 = vshrl.u32 %v14337_v49, %v9238_v8 }
 0x151   : > { %v754_v35 = vsel %vm750_vm9, %v734_v19, %v737_v50  ;;  %v756_v37 = vsel %vm752_vm12, %v740_v51, %v755_v17  ;;  %v9259_v12 = vshrl.u32 %v626_v33, 5  ;;  %v640_v38 = vshll.u32 %v14341_v43, %v628_v0 }
 0x152   : > { %v632_v30 = vshrl.u32 %v14344_v36, %v9238_v8  ;;  %v635_v39 = vshrl.u32 %v14335_v40, %v9238_v8  ;;  %v638_v41 = vshrl.u32 %v14341_v43, %v9238_v8  ;;  %v643_v42 = vshll.u32 %v14339_v46, %v628_v0 }
 0x153   : > { %v7306_v44 = vadd.s32 4294967169, %v410_v4  ;;  %v621_v45 = vand.u32 8388607, %v14333_v25  ;;  %v631_v47 = vshll.u32 %v14346_v34, %v628_v0  ;;  %v642_v48 = vor.u32 %v641_v26, %v640_v38 }
 0x154   : > { %v776_v50 = vadd.s32 1, %v9241_v14  ;;  %v634_v51 = vshll.u32 %v14344_v36, %v628_v0  ;;  %v637_v52 = vshll.u32 %v14335_v40, %v628_v0  ;;  %v645_v53 = vor.u32 %v644_v31, %v643_v42 }
 0x155   : > { %v9275_v54 = vshrl.u32 %v571_v28, 30  ;;  %v757_v55 = vsel %vm751_vm13, %v754_v35, %v756_v37  ;;  %vm775_vm14 = vc.u32 %v9245_v7, %v9240_v13  ;;  %v9283_v33 = vadd.f32 %v9130_v20, %v9118_v9 }
 0x156   : > { %v633_v56 = vor.u32 %v632_v30, %v631_v47  ;;  %v636_v57 = vor.u32 %v635_v39, %v634_v51  ;;  %v639_v58 = vor.u32 %v638_v41, %v637_v52  ;;  %vm649_vm15 = vcmp.lt.s32.totalorder %v9259_v12, 4 }
 0x157   : > { %14433 = vst [vmem:[#allocation12_spill] sm:$0xff] %v9283_v33  ;;  %v655_v60 = vsel %vm649_vm15, %v642_v48, 920167782  ;;  %v416_v61 = vadd.s32 1, %v7306_v44  ;;  %v777_v62 = vsel %vm775_vm14, %v776_v50, %v9241_v14  ;;  %v659_v32 = vsel %vm649_vm15, %v645_v53, 1326507024 }
 0x158   : > { %v773_v63 = vmul.u32 %v766_v3, %v757_v55  ;;  %vm646_vm0 = vcmp.lt.s32.totalorder %v9259_v12, 1  ;;  %vm648_vm1 = vcmp.lt.s32.totalorder %v9259_v12, 3  ;;  %v929_v20 = vand.u32 2139095040, %v9283_v33 }
 0x159   : > { %v573_v0 = vshll.u32 %v9275_v54, 30  ;;  %v622_v1 = vor.u32 8388608, %v621_v45  ;;  %v654_v2 = vsel %vm646_vm0, %v633_v56, %v636_v57  ;;  %v656_v5 = vsel %vm648_vm1, %v639_v58, %v655_v60 }
 0x15a   : > { %v9299_v14 = vadd.s32 %v777_v62, %v773_v63  ;;  %v658_v3 = vsel %vm646_vm0, %v636_v57, %v639_v58  ;;  %v660_v15 = vsel %vm648_vm1, %v642_v48, %v659_v32  ;;  %v930_v17 = vshrl.u32 %v929_v20, 23 }
 0x15b   : > { %vm647_vm2 = vcmp.lt.s32.totalorder %v9259_v12, 2  ;;  %v9308_v26 = vsub.s32 %v570_v10, %v573_v0  ;;  %v9312_v31 = vshll.u32 %v622_v1, 8  ;;  %vm417_vm3 = vcmp.gt.s32.totalorder %v416_v61, 0 }
 0x15c   : > { %v657_v4 = vsel %vm647_vm2, %v654_v2, %v656_v5  ;;  %v7326_v19 = vadd.s32 4294967169, %v930_v17  ;;  %v661_v28 = vsel %vm647_vm2, %v658_v3, %v660_v15  ;;  %v779_v35 = vadd.s32 536870912, %v9299_v14 }
 0x15d   : > { %v9317_v38 = vadd.f32 %v9118_v9, %v9132_v22  ;;  %v630_v30 = vshrl.u32 %v14346_v34, %v9238_v8  ;;  %v651_v10 = vsel %vm649_vm15, %v639_v58, 2102212464  ;;  %v576_v45 = vsub.s32 0, %v9308_v26 }
 0x15e   : > { %v936_v37 = vadd.s32 1, %v7326_v19  ;;  %v9324_v39 = vmul.u32.u64.low %v9312_v31, %v657_v4  ;;  %v9325_v41 = vmul.u32.u64.high %v9312_v31, %v657_v4, %v9324_v39  ;;  %v9333_v22 = vsel %vm417_vm3, %v416_v61, 0 }
 0x15f   : > { %14434 = vst [vmem:[#allocation13_spill] sm:$0xff] %v9317_v38  ;;  %v9329_v42 = vmul.u32.u64.low %v9312_v31, %v661_v28  ;;  %v9330_v44 = vmul.u32.u64.high %v9312_v31, %v661_v28, %v9329_v42  ;;  %v650_v8 = vsel %vm646_vm0, %v630_v30, %v633_v56  ;;  %v9337_v48 = vshrl.u32 %v779_v35, 30 }
 0x160   : > { %vm937_vm4 = vcmp.gt.s32.totalorder %v936_v37, 0  ;;  %v652_v50 = vsel %vm648_vm1, %v636_v57, %v651_v10  ;;  %v825_v52 = vand.u32 2139095040, %v9317_v38  ;;  %v14329_v53 = vand.u32 2147483647, %v9283_v33 }
 0x161   : > { %v938_v47 = vsel %vm937_vm4, %v936_v37, 0  ;;  %14435 = vst [vmem:[#allocation14_spill] sm:$0xff] %v9337_v48  ;;  %v9344_v58 = vmin.u32 %v576_v45, %v9308_v26  ;;  %v9347_v60 = vand.u32 31, %v9333_v22  ;;  %v653_v56 = vsel %vm647_vm2, %v650_v8, %v652_v50 }
 0x162   : > { %v940_v51 = vand.u32 31, %v938_v47  ;;  %v14331_v61 = vand.u32 2147483647, %v9192_v21  ;;  %v781_v62 = vshll.u32 %v9337_v48, 30  ;;  %v826_v63 = vshrl.u32 %v825_v52, 23  ;;  %v1246_v21 = vld [vmem:[#allocation2 + $0x40] sm:$0xff] }
 0x163   : > { %v933_v20 = vand.u32 8388607, %v14329_v53  ;;  %vm671_vm5 = vc.u32 %v9330_v44, %v9324_v39  ;;  %v672_v12 = vadd.s32 1, %v9325_v41  ;;  %v939_v5 = vshrl.u32 %v938_v47, 5  ;;  %v1248_v48 = vld [vmem:[#allocation2 + $0x50] sm:$0xff] }
 0x164   : > { %v941_v55 = vsub.s32 32, %v940_v51  ;;  %v943_v0 = vshll.u32 %v14346_v34, %v940_v51  ;;  %v946_v1 = vshll.u32 %v14344_v36, %v940_v51  ;;  %v949_v3 = vshll.u32 %v14335_v40, %v940_v51 }
 0x165   : > { %v952_v4 = vshll.u32 %v14341_v43, %v940_v51  ;;  %v955_v35 = vshll.u32 %v14339_v46, %v940_v51  ;;  %v7322_v30 = vadd.s32 4294967169, %v826_v63  ;;  %v9369_v10 = vsub.s32 32, %v9347_v60 }
 0x166   : > { %v944_v57 = vshrl.u32 %v14344_v36, %v941_v55  ;;  %v947_v32 = vshrl.u32 %v14335_v40, %v941_v55  ;;  %v950_v2 = vshrl.u32 %v14341_v43, %v941_v55  ;;  %v953_v19 = vshrl.u32 %v14339_v46, %v941_v55 }
 0x167   : > { %v956_v37 = vshrl.u32 %v14337_v49, %v941_v55  ;;  %v934_v42 = vor.u32 8388608, %v933_v20  ;;  %v9373_v8 = vand.u32 8388607, %v14331_v61  ;;  %v578_v47 = vclz %v9344_v58 }
 0x168   : > { %v945_v15 = vor.u32 %v944_v57, %v943_v0  ;;  %v948_v17 = vor.u32 %v947_v32, %v946_v1  ;;  %v951_v28 = vor.u32 %v950_v2, %v949_v3  ;;  %v954_v45 = vor.u32 %v953_v19, %v952_v4 }
 0x169   : > { %v669_v50 = vmul.u32 %v9312_v31, %v653_v56  ;;  %v957_v52 = vor.u32 %v956_v37, %v955_v35  ;;  %vm958_vm6 = vcmp.lt.s32.totalorder %v939_v5, 1  ;;  %v9378_v51 = vsub.s32 %v9299_v14, %v781_v62 }
 0x16a   : > { %v673_v57 = vsel %vm671_vm5, %v672_v12, %v9325_v41  ;;  %vm961_vm7 = vcmp.lt.s32.totalorder %v939_v5, 4  ;;  %v966_v32 = vsel %vm958_vm6, %v945_v15, %v948_v17  ;;  %vm960_vm8 = vcmp.lt.s32.totalorder %v939_v5, 3 }
 0x16b   : > { %v967_v63 = vsel %vm961_vm7, %v954_v45, 920167782  ;;  %v970_v20 = vsel %vm958_vm6, %v948_v17, %v951_v28  ;;  %v832_v58 = vadd.s32 1, %v7322_v30  ;;  %vm959_vm9 = vcmp.lt.s32.totalorder %v939_v5, 2 }
 0x16c   : > { %v968_v31 = vsel %vm960_vm8, %v951_v28, %v967_v63  ;;  %v971_v56 = vsel %vm961_vm7, %v957_v52, 1326507024  ;;  %v974_v0 = vshll.u32 %v934_v42, 8  ;;  %v9387_v14 = vadd.s32 %v673_v57, %v669_v50 }
 0x16d   : > { %v969_v62 = vsel %vm959_vm9, %v966_v32, %v968_v31  ;;  %v972_v1 = vsel %vm960_vm8, %v954_v45, %v971_v56  ;;  %v9393_v41 = vadd.f32 %v9138_v27, %v9118_v9  ;;  %v963_v2 = vsel %vm961_vm7, %v951_v28, 2102212464 }
 0x16e   : > { %v973_v12 = vsel %vm959_vm9, %v970_v20, %v972_v1  ;;  %v9396_v3 = vmul.u32.u64.low %v974_v0, %v969_v62  ;;  %v9397_v4 = vmul.u32.u64.high %v974_v0, %v969_v62, %v9396_v3  ;;  %v942_v19 = vshrl.u32 %v14346_v34, %v941_v55 }
 0x16f   : > { %14436 = vst [vmem:[#allocation15_spill] sm:$0xff] %v9393_v41  ;;  %v9401_v35 = vmul.u32.u64.low %v974_v0, %v973_v12  ;;  %v9402_v37 = vmul.u32.u64.high %v974_v0, %v973_v12, %v9401_v35  ;;  %vm833_vm10 = vcmp.gt.s32.totalorder %v832_v58, 0  ;;  %v9405_v30 = vshrl.u32 %v9333_v22, 5 }
 0x170   : > { %v784_v42 = vsub.s32 0, %v9378_v51  ;;  %v14330_v27 = vand.u32 2147483647, %v9317_v38  ;;  %v834_v28 = vsel %vm833_vm10, %v832_v58, 0  ;;  %v9411_v45 = vshll.u32 %v14341_v43, %v9347_v60 }
 0x171   : > { %v675_v50 = vadd.s32 536870912, %v9387_v14  ;;  %v962_v55 = vsel %vm958_vm6, %v942_v19, %v945_v15  ;;  %v964_v52 = vsel %vm960_vm8, %v948_v17, %v963_v2  ;;  %v9418_v57 = vshrl.u32 %v14339_v46, %v9369_v10 }
 0x172   : > { %v9422_v22 = vshll.u32 %v14339_v46, %v9347_v60  ;;  %v984_v32 = vadd.s32 1, %v9397_v4  ;;  %v836_v63 = vand.u32 31, %v834_v28  ;;  %v9425_v20 = vadd.s32 4294967294, %v578_v47 }
 0x173   : > { %v9429_v58 = vshrl.u32 %v14337_v49, %v9369_v10  ;;  %vm983_vm11 = vc.u32 %v9402_v37, %v9396_v3  ;;  %v1137_v15 = vand.u32 2139095040, %v9393_v41  ;;  %v9435_v17 = vmin.u32 %v784_v42, %v9378_v51 }
 0x174   : > { %v965_v31 = vsel %vm959_vm9, %v962_v55, %v964_v52  ;;  %v829_v56 = vand.u32 8388607, %v14330_v27  ;;  %v837_v62 = vsub.s32 32, %v836_v63  ;;  %v9440_v47 = vshrl.u32 %v675_v50, 30 }
 0x175   : > { %v985_v1 = vsel %vm983_vm11, %v984_v32, %v9397_v4  ;;  %v839_v2 = vshll.u32 %v14346_v34, %v836_v63  ;;  %v842_v12 = vshll.u32 %v14344_v36, %v836_v63  ;;  %v845_v42 = vshll.u32 %v14335_v40, %v836_v63 }
 0x176   : > { %14437 = vst [vmem:[#allocation16_spill] sm:$0xff] %v9440_v47  ;;  %v840_v19 = vshrl.u32 %v14344_v36, %v837_v62  ;;  %v843_v35 = vshrl.u32 %v14335_v40, %v837_v62  ;;  %v846_v5 = vshrl.u32 %v14341_v43, %v837_v62  ;;  %v981_v55 = vmul.u32 %v974_v0, %v965_v31 }
 0x177   : > { %v835_v52 = vshrl.u32 %v834_v28, 5  ;;  %v848_v53 = vshll.u32 %v14341_v43, %v836_v63  ;;  %v1138_v50 = vshrl.u32 %v1137_v15, 23  ;;  %v849_v32 = vshrl.u32 %v14339_v46, %v837_v62  ;;  %v1241_v43 = vld [vmem:[#allocation2 + $0x18] sm:$0xff] }
 0x178   : > { %v841_v27 = vor.u32 %v840_v19, %v839_v2  ;;  %v844_v61 = vor.u32 %v843_v35, %v842_v12  ;;  %v847_v4 = vor.u32 %v846_v5, %v845_v42  ;;  %vm7313_vm12 = vcmp.lt.s32.totalorder %v9425_v20, 0 }
 0x179   : > { %v9452_v59 = vadd.s32 %v985_v1, %v981_v55  ;;  %v851_v25 = vshll.u32 %v14339_v46, %v836_v63  ;;  %v852_v23 = vshrl.u32 %v14337_v49, %v837_v62  ;;  %v786_v40 = vclz %v9435_v17  ;;  %v1239_v49 = vld [vmem:[#allocation2 + $0x8] sm:$0xff]  ;;  %v1240_v46 = vld [vmem:[#allocation2 + $0x10] sm:$0xff] }
 0x17a   : > { %v677_v0 = vshll.u32 %v9440_v47, 30  ;;  %v830_v28 = vor.u32 8388608, %v829_v56  ;;  %v850_v31 = vor.u32 %v849_v32, %v848_v53  ;;  %vm854_vm13 = vcmp.lt.s32.totalorder %v835_v52, 1 }
 0x17b   : > { %v853_v15 = vor.u32 %v852_v23, %v851_v25  ;;  %vm857_vm14 = vcmp.lt.s32.totalorder %v835_v52, 4  ;;  %v7334_v2 = vadd.s32 4294967169, %v1138_v50  ;;  %vm856_vm15 = vcmp.lt.s32.totalorder %v835_v52, 3  ;;  %v1238_v25 = vld [vmem:[#allocation2] sm:$0xff] }
 0x17c   : > { %v859_v12 = vsel %vm857_vm14, %v847_v4, 2102212464  ;;  %v862_v19 = vsel %vm854_vm13, %v841_v27, %v844_v61  ;;  %v863_v1 = vsel %vm857_vm14, %v850_v31, 920167782  ;;  %v987_v35 = vadd.s32 536870912, %v9452_v59 }
 0x17d   : > { %v838_v63 = vshrl.u32 %v14346_v34, %v837_v62  ;;  %vm855_vm0 = vcmp.lt.s32.totalorder %v835_v52, 2  ;;  %v864_v42 = vsel %vm856_vm15, %v847_v4, %v863_v1  ;;  %v866_v56 = vsel %vm854_vm13, %v844_v61, %v847_v4 }
 0x17e   : > { %v865_v17 = vsel %vm855_vm0, %v862_v19, %v864_v42  ;;  %v867_v53 = vsel %vm857_vm14, %v853_v15, 1326507024  ;;  %v870_v23 = vshll.u32 %v830_v28, 8  ;;  %v860_v55 = vsel %vm856_vm15, %v844_v61, %v859_v12 }
 0x17f   : > { %v858_v5 = vsel %vm854_vm13, %v838_v63, %v841_v27  ;;  %v868_v50 = vsel %vm856_vm15, %v850_v31, %v867_v53  ;;  %v14343_v32 = vand.u32 2147483647, %v9393_v41  ;;  %v9466_v62 = vsub.s32 %v9387_v14, %v677_v0  ;;  %v1243_v63 = vld [vmem:[#allocation2 + $0x28] sm:$0xff]  ;;  %v1245_v53 = vld [vmem:[#allocation2 + $0x38] sm:$0xff] }
 0x180   : > { %v869_v1 = vsel %vm855_vm0, %v866_v56, %v868_v50  ;;  %v9469_v19 = vmul.u32.u64.low %v870_v23, %v865_v17  ;;  %v9470_v42 = vmul.u32.u64.high %v870_v23, %v865_v17, %v9469_v19  ;;  %v9473_v4 = vshrl.u32 %v987_v35, 30  ;;  %v1244_v56 = vld [vmem:[#allocation2 + $0x30] sm:$0xff]  ;;  %v1247_v41 = vld [vmem:[#allocation2 + $0x48] sm:$0xff] }
 0x181   : > { %v9475_v28 = vmul.u32.u64.low %v870_v23, %v869_v1  ;;  %v9476_v27 = vmul.u32.u64.high %v870_v23, %v869_v1, %v9475_v28  ;;  %v1144_v61 = vadd.s32 1, %v7334_v2  ;;  %v9480_v31 = vor.u32 %v9418_v57, %v9411_v45  ;;  %v1242_v2 = vld [vmem:[#allocation2 + $0x20] sm:$0xff] }
 0x182   : > { %14438 = vst [vmem:[#allocation17_spill] sm:$0xff] %v9473_v4  ;;  %v861_v15 = vsel %vm855_vm0, %v858_v5, %v860_v55  ;;  %v8049_v14 = vpack.c.bf16 %v1239_v49, %v1238_v25  ;;  %v8053_v0 = vpack.c.bf16 %v1241_v43, %v1240_v46  ;;  %v9486_v12 = vsel %vm7313_vm12, 0, %v9425_v20 }
 0x183   : > { %v437_v35 = vor.u32 %v9429_v58, %v9422_v22  ;;  %vm441_vm1 = vcmp.lt.s32.totalorder %v9405_v30, 4  ;;  %vm1145_vm2 = vcmp.gt.s32.totalorder %v1144_v61, 0  ;;  %v7320_v17 = vadd.s32 4294967294, %v786_v40 }
 0x184   : > { %v680_v45 = vsub.s32 0, %v9466_v62  ;;  %v880_v57 = vadd.s32 1, %v9470_v42  ;;  %v1146_v49 = vsel %vm1145_vm2, %v1144_v61, 0  ;;  %8050 = vmatprep.subr.bf16.mxu1 %v8049_v14  ;;  %v989_v43 = vshll.u32 %v9473_v4, 30 }
 0x185   : > { %v877_v46 = vmul.u32 %v870_v23, %v861_v15  ;;  %vm879_vm3 = vc.u32 %v9476_v27, %v9469_v19  ;;  %v1141_v22 = vand.u32 8388607, %v14343_v32  ;;  %8052 = vmatpush3.bf16.msra.mxu1 %v8049_v14  ;;  %v9501_v40 = vsel %vm441_vm1, %v9480_v31, 920167782 }
 0x186   : > { %v881_v20 = vsel %vm879_vm3, %v880_v57, %v9470_v42  ;;  %v1148_v58 = vand.u32 31, %v1146_v49  ;;  %8054 = vmatprep.subr.bf16.mxu1 %v8053_v0  ;;  %v8057_v52 = vpack.c.bf16 %v1243_v63, %v1242_v2  ;;  %v9506_v23 = vadd.s32 %v9178_v6, %v9188_v18 }
 0x187   : > { %v9511_v5 = vsel %vm441_vm1, %v437_v35, 1326507024  ;;  %v882_v55 = vadd.s32 %v881_v20, %v877_v46  ;;  %v586_v50 = vsub.s32 4294967266, %v9486_v12  ;;  %vm7321_vm4 = vcmp.lt.s32.totalorder %v7320_v17, 0 }
 0x188   : > { %v9515_v1 = vmin.u32 %v680_v45, %v9466_v62  ;;  %v1149_v42 = vsub.s32 32, %v1148_v58  ;;  %v9518_v28 = vsub.s32 %v9452_v59, %v989_v43  ;;  %v1142_v6 = vor.u32 8388608, %v1141_v22 }
 0x189   : > { %v883_v61 = vadd.s32 536870912, %v882_v55  ;;  %8056 = vmatpush3.bf16.msra.mxu1 %v8053_v0  ;;  %v8061_v18 = vpack.c.bf16 %v1245_v53, %v1244_v56  ;;  %v1151_v15 = vshll.u32 %v14346_v34, %v1148_v58  ;;  %v1154_v35 = vshll.u32 %v14344_v36, %v1148_v58 }
 0x18a   : > { %v1152_v14 = vshrl.u32 %v14344_v36, %v1149_v42  ;;  %v14439_v2 = vmov 2131351028   ;;  %8058 = vmatprep.subr.bf16.mxu1 %v8057_v52  ;;  %v1147_v45 = vshrl.u32 %v1146_v49, 5  ;;  %v14441_v59 = vmov 2102212464  }
 0x18b   : > { %v1155_v63 = vshrl.u32 %v14439_v2, %v1149_v42  ;;  %v9524_v57 = vshrl.u32 %v883_v61, 30  ;;  %v1157_v46 = vshll.u32 %v14439_v2, %v1148_v58  ;;  %v1158_v43 = vshrl.u32 %v14441_v59, %v1149_v42 }
 0x18c   : > { %v1153_v20 = vor.u32 %v1152_v14, %v1151_v15  ;;  %v1160_v0 = vshll.u32 %v14441_v59, %v1148_v58  ;;  %v14442_v56 = vmov 920167782   ;;  %v587_v32 = vadd.s32 127, %v586_v50 }
 0x18d   : > { %14440 = vst [vmem:[#allocation18_spill] sm:$0xff] %v9524_v57  ;;  %v1156_v22 = vor.u32 %v1155_v63, %v1154_v35  ;;  %v1161_v53 = vshrl.u32 %v14442_v56, %v1149_v42  ;;  %v9531_v25 = vsel %vm7321_vm4, 0, %v7320_v17  ;;  %v1159_v36 = vor.u32 %v1158_v43, %v1157_v46  ;;  %8060 = vmatpush3.bf16.msra.mxu1 %v8057_v52 }
 0x18e   : > { %v9535_v61 = vadd.f32 %v9118_v9, %v9140_v29  ;;  %v682_v49 = vclz %v9515_v1  ;;  %v1163_v15 = vshll.u32 %v14442_v56, %v1148_v58  ;;  %v14443_v14 = vmov 1326507024   ;;  %8062 = vmatprep.subr.bf16.mxu1 %v8061_v18 }
 0x18f   : > { %v1162_v34 = vor.u32 %v1161_v53, %v1160_v0  ;;  %v1164_v35 = vshrl.u32 %v14443_v14, %v1149_v42  ;;  %v992_v63 = vsub.s32 0, %v9518_v28  ;;  %vm1166_vm5 = vcmp.lt.s32.totalorder %v1147_v45, 1 }
 0x190   : > { %vm1169_vm6 = vcmp.lt.s32.totalorder %v1147_v45, 4  ;;  %v1182_v17 = vshll.u32 %v1142_v6, 8  ;;  %v885_v50 = vshll.u32 %v9524_v57, 30  ;;  %v1174_v9 = vsel %vm1166_vm5, %v1153_v20, %v1156_v22 }
 0x191   : > { %v1165_v46 = vor.u32 %v1164_v35, %v1163_v15  ;;  %v1171_v43 = vsel %vm1169_vm6, %v1159_v36, 2102212464  ;;  %v14444_v29 = vmov 683565275   ;;  %vm1168_vm7 = vcmp.lt.s32.totalorder %v1147_v45, 3  ;;  %8064 = vmatpush3.bf16.msra.mxu1 %v8061_v18 }
 0x192   : > { %v1150_v52 = vshrl.u32 %v14444_v29, %v1149_v42  ;;  %v1175_v1 = vsel %vm1169_vm6, %v1162_v34, 920167782  ;;  %v1033_v58 = vand.u32 2139095040, %v9535_v61  ;;  %vm1167_vm8 = vcmp.lt.s32.totalorder %v1147_v45, 2  ;;  %v1249_v42 = vld [vmem:[#allocation2 + $0x58] sm:$0xff] }
 0x193   : > { %v1176_v0 = vsel %vm1168_vm7, %v1159_v36, %v1175_v1  ;;  %v1178_v53 = vsel %vm1166_vm5, %v1156_v22, %v1159_v36  ;;  %v1179_v4 = vsel %vm1169_vm6, %v1165_v46, 1326507024  ;;  %v1172_v57 = vsel %vm1168_vm7, %v1156_v22, %v1171_v43 }
 0x194   : > { %v1170_v6 = vsel %vm1166_vm5, %v1150_v52, %v1153_v20  ;;  %v1177_v15 = vsel %vm1167_vm8, %v1174_v9, %v1176_v0  ;;  %v1180_v35 = vsel %vm1168_vm7, %v1162_v34, %v1179_v4  ;;  %v9548_v47 = vsub.s32 %v882_v55, %v885_v50 }
 0x195   : > { %v1181_v38 = vsel %vm1167_vm8, %v1178_v53, %v1180_v35  ;;  %v9551_v18 = vmul.u32.u64.low %v1182_v17, %v1177_v15  ;;  %v9552_v33 = vmul.u32.u64.high %v1182_v17, %v1177_v15, %v9551_v18  ;;  %v14445_v36 = vsub.s32 32, %v9486_v12  ;;  %v1250_v53 = vld [vmem:[#allocation2 + $0x60] sm:$0xff]  ;;  %v1251_v15 = vld [vmem:[#allocation2 + $0x68] sm:$0xff]  ;;  %v1252_v35 = vld [vmem:[#allocation2 + $0x70] sm:$0xff] }
 0x196   : > { %v588_v20 = vshll.u32 %v587_v32, 23  ;;  %v9558_v22 = vmul.u32.u64.low %v1182_v17, %v1181_v38  ;;  %v9559_v43 = vmul.u32.u64.high %v1182_v17, %v1181_v38, %v9558_v22  ;;  %v1173_v34 = vsel %vm1167_vm8, %v1170_v6, %v1172_v57 }
 0x197   : > { %v584_v46 = vshrl.u32 %v9506_v23, %v14445_v36  ;;  %v1034_v4 = vshrl.u32 %v1033_v58, 23  ;;  %v8065_v9 = vpack.c.bf16 %v1247_v41, %v1246_v21  ;;  %v8069_v55 = vpack.c.bf16 %v1249_v42, %v1248_v48 }
 0x198   : > { %v583_v50 = vshll.u32 %v9308_v26, %v9486_v12  ;;  %v794_v52 = vsub.s32 4294967266, %v9531_v25  ;;  %v7316_v1 = vadd.s32 4294967294, %v682_v49  ;;  %v7327_v0 = vmin.u32 %v992_v63, %v9518_v28 }
 0x199   : > { %v888_v32 = vsub.s32 0, %v9548_v47  ;;  %v1192_v38 = vadd.s32 1, %v9552_v33  ;;  %v14364_v23 = vand.u32 2147483647, %v9535_v61  ;;  %v7330_v57 = vadd.s32 4294967169, %v1034_v4  ;;  %8066 = vmatprep.subr.bf16.mxu1 %v8065_v9 }
 0x19a   : > { %v9569_v21 = vor.u32 %v584_v46, %v583_v50  ;;  %v9571_v48 = vor.u32 4788187, %v588_v20  ;;  %v1189_v26 = vmul.u32 %v1182_v17, %v1173_v34  ;;  %vm1191_vm9 = vc.u32 %v9559_v43, %v9551_v18  ;;  %8068 = vmatpush3.bf16.msra.mxu1 %v8065_v9  ;;  %v1253_v17 = vld [vmem:[#allocation2 + $0x78] sm:$0xff] }
 0x19b   : > { %v774_v41 = vadd.s32 %v9240_v13, %v9245_v7  ;;  %v1193_v12 = vsel %vm1191_vm9, %v1192_v38, %v9552_v33  ;;  %v1040_v45 = vadd.s32 1, %v7330_v57  ;;  %8070 = vmatprep.subr.bf16.mxu1 %v8069_v55  ;;  %v8073_v49 = vpack.c.bf16 %v1251_v15, %v1250_v53 }
 0x19c   : > { %v790_v63 = vsub.s32 32, %v9531_v25  ;;  %v9579_v58 = vadd.s32 127, %v794_v52  ;;  %vm7317_vm10 = vcmp.lt.s32.totalorder %v7316_v1, 0  ;;  %v1194_v6 = vadd.s32 %v1193_v12, %v1189_v26 }
 0x19d   : > { %v994_v42 = vclz %v7327_v0  ;;  %v9582_v36 = vmin.u32 %v888_v32, %v9548_v47  ;;  %v1037_v13 = vand.u32 8388607, %v14364_v23  ;;  %vm1041_vm11 = vcmp.gt.s32.totalorder %v1040_v45, 0 }
 0x19e   : > { %v1195_v46 = vadd.s32 536870912, %v1194_v6  ;;  %v1042_v20 = vsel %vm1041_vm11, %v1040_v45, 0  ;;  %8072 = vmatpush3.bf16.msra.mxu1 %v8069_v55  ;;  %v9592_v34 = vadd.s32 %v9324_v39, %v9330_v44  ;;  %v8077_v9 = vpack.c.bf16 %v1253_v17, %v1252_v35 }
 0x19f   : > { %v1044_v4 = vand.u32 31, %v1042_v20  ;;  %8074 = vmatprep.subr.bf16.mxu1 %v8073_v49  ;;  %v9594_v50 = vshrl.u32 %v774_v41, %v790_v63  ;;  %v796_v52 = vshll.u32 %v9579_v58, 23  ;;  %v9598_v0 = vsel %vm7317_vm10, 0, %v7316_v1 }
 0x1a0   : > { %v9600_v53 = vshrl.u32 %v1195_v46, 30  ;;  %v9602_v55 = vadd.s32 4294967294, %v994_v42  ;;  %v890_v15 = vclz %v9582_v36  ;;  %v1038_v32 = vor.u32 8388608, %v1037_v13 }
 0x1a1   : > { %v1045_v38 = vsub.s32 32, %v1044_v4  ;;  %v1043_v44 = vshrl.u32 %v1042_v20, 5  ;;  %v1047_v57 = vshll.u32 %v14444_v29, %v1044_v4  ;;  %v14447_v26 = vmov 2475754826  }
 0x1a2   : > { %14446 = vst [vmem:[#allocation19_spill] sm:$0xff] %v9600_v53  ;;  %v1197_v39 = vshll.u32 %v9600_v53, 30  ;;  %v1050_v41 = vshll.u32 %v14447_v26, %v1044_v4  ;;  %8076 = vmatpush3.bf16.msra.mxu1 %v8073_v49  ;;  %v1053_v45 = vshll.u32 %v14439_v2, %v1044_v4  ;;  %v1056_v35 = vshll.u32 %v14441_v59, %v1044_v4 }
 0x1a3   : > { %v1048_v12 = vshrl.u32 %v14447_v26, %v1045_v38  ;;  %v1051_v1 = vshrl.u32 %v14439_v2, %v1045_v38  ;;  %v1054_v63 = vshrl.u32 %v14441_v59, %v1045_v38  ;;  %8078 = vmatprep.subr.bf16.mxu1 %v8077_v9  ;;  %v1057_v17 = vshrl.u32 %v14442_v56, %v1045_v38 }
 0x1a4   : > { %v9612_v58 = vsub.s32 %v1194_v6, %v1197_v39  ;;  %v1059_v42 = vshll.u32 %v14442_v56, %v1044_v4  ;;  %v1060_v46 = vshrl.u32 %v14443_v14, %v1045_v38  ;;  %v1078_v22 = vshll.u32 %v1038_v32, 8 }
 0x1a5   : > { %v1049_v36 = vor.u32 %v1048_v12, %v1047_v57  ;;  %v1052_v13 = vor.u32 %v1051_v1, %v1050_v41  ;;  %v1055_v49 = vor.u32 %v1054_v63, %v1053_v45  ;;  %v1058_v23 = vor.u32 %v1057_v17, %v1056_v35 }
 0x1a6   : > { %v1200_v20 = vsub.s32 0, %v9612_v58  ;;  %8080 = vmatpush3.bf16.msra.mxu1 %v8077_v9  ;;  %v423_v6 = vshll.u32 %v14444_v29, %v9347_v60  ;;  %v1061_v39 = vor.u32 %v1060_v46, %v1059_v42  ;;  %v424_v33 = vshrl.u32 %v14447_v26, %v9369_v10 }
 0x1a7   : > { %v426_v4 = vshll.u32 %v14447_v26, %v9347_v60  ;;  %v427_v57 = vshrl.u32 %v14439_v2, %v9369_v10  ;;  %v1046_v41 = vshrl.u32 %v14444_v29, %v1045_v38  ;;  %vm1062_vm12 = vcmp.lt.s32.totalorder %v1043_v44, 1 }
 0x1a8   : > { %vm1065_vm13 = vcmp.lt.s32.totalorder %v1043_v44, 4  ;;  %v429_v9 = vshll.u32 %v14439_v2, %v9347_v60  ;;  %vm1064_vm14 = vcmp.lt.s32.totalorder %v1043_v44, 3  ;;  %v1070_v12 = vsel %vm1062_vm12, %v1049_v36, %v1052_v13 }
 0x1a9   : > { %v1067_v32 = vsel %vm1065_vm13, %v1055_v49, 2102212464  ;;  %v1071_v1 = vsel %vm1065_vm13, %v1058_v23, 920167782  ;;  %v7335_v45 = vmin.u32 %v1200_v20, %v9612_v58  ;;  %vm1063_vm15 = vcmp.lt.s32.totalorder %v1043_v44, 2 }
 0x1aa   : > { %v1072_v63 = vsel %vm1064_vm14, %v1055_v49, %v1071_v1  ;;  %v1074_v35 = vsel %vm1062_vm12, %v1052_v13, %v1055_v49  ;;  %v1066_v17 = vsel %vm1062_vm12, %v1046_v41, %v1049_v36  ;;  %v1075_v46 = vsel %vm1065_vm13, %v1061_v39, 1326507024 }
 0x1ab   : > { %v1073_v42 = vsel %vm1063_vm15, %v1070_v12, %v1072_v63  ;;  %v430_v38 = vshrl.u32 %v14441_v59, %v9369_v10  ;;  %v1068_v7 = vsel %vm1064_vm14, %v1052_v13, %v1067_v32  ;;  %v1076_v14 = vsel %vm1064_vm14, %v1058_v23, %v1075_v46 }
 0x1ac   : > { %v9634_v56 = vmul.u32.u64.low %v1078_v22, %v1073_v42  ;;  %v9635_v60 = vmul.u32.u64.high %v1078_v22, %v1073_v42, %v9634_v56  ;;  %v1077_v2 = vsel %vm1063_vm15, %v1074_v35, %v1076_v14  ;;  %v425_v26 = vor.u32 %v424_v33, %v423_v6 }
 0x1ad   : > { %v428_v20 = vor.u32 %v427_v57, %v426_v4  ;;  %v431_v53 = vor.u32 %v430_v38, %v429_v9  ;;  %v9639_v1 = vor.u32 4788187, %v796_v52  ;;  %v690_v36 = vsub.s32 4294967266, %v9598_v0 }
 0x1ae   : > { %v9642_v49 = vmul.u32.u64.low %v1078_v22, %v1077_v2  ;;  %v9643_v39 = vmul.u32.u64.high %v1078_v22, %v1077_v2, %v9642_v49  ;;  %vm7329_vm0 = vcmp.lt.s32.totalorder %v9602_v55, 0  ;;  %v7324_v13 = vadd.s32 4294967294, %v890_v15 }
 0x1af   : > { %v1069_v23 = vsel %vm1063_vm15, %v1066_v17, %v1068_v7  ;;  %v414_v41 = vor.u32 8388608, %v9373_v8  ;;  %v1202_v32 = vclz %v7335_v45  ;;  %v1088_v14 = vadd.s32 1, %v9635_v60 }
 0x1b0   : > { %vm438_vm2 = vcmp.lt.s32.totalorder %v9405_v30, 1  ;;  %vm440_vm3 = vcmp.lt.s32.totalorder %v9405_v30, 3  ;;  %v691_v7 = vadd.s32 127, %v690_v36  ;;  %v997_v15 = vsel %vm7329_vm0, 0, %v9602_v55 }
 0x1b1   : > { %v446_v33 = vsel %vm438_vm2, %v425_v26, %v428_v20  ;;  %v448_v2 = vsel %vm440_vm3, %v431_v53, %v9501_v40  ;;  %v450_v52 = vsel %vm438_vm2, %v428_v20, %v431_v53  ;;  %v452_v8 = vsel %vm440_vm3, %v9480_v31, %v9511_v5 }
 0x1b2   : > { %v1085_v44 = vmul.u32 %v1078_v22, %v1069_v23  ;;  %vm1087_vm4 = vc.u32 %v9643_v39, %v9634_v56  ;;  %vm7325_vm5 = vcmp.lt.s32.totalorder %v7324_v13, 0  ;;  %vm439_vm6 = vcmp.lt.s32.totalorder %v9405_v30, 2 }
 0x1b3   : > { %v1089_v6 = vsel %vm1087_vm4, %v1088_v14, %v9635_v60  ;;  %v443_v40 = vsel %vm441_vm1, %v431_v53, 2102212464  ;;  %v422_v57 = vshrl.u32 %v14444_v29, %v9369_v10  ;;  %v449_v31 = vsel %vm439_vm6, %v446_v33, %v448_v2 }
 0x1b4   : > { %v1090_v4 = vadd.s32 %v1089_v6, %v1085_v44  ;;  %v453_v5 = vsel %vm439_vm6, %v450_v52, %v452_v8  ;;  %v686_v22 = vsub.s32 32, %v9598_v0  ;;  %v1002_v55 = vsub.s32 4294967266, %v997_v15 }
 0x1b5   : > { %v7336_v9 = vadd.s32 4294967294, %v1202_v32  ;;  %v454_v12 = vshll.u32 %v414_v41, 8  ;;  %v9676_v45 = vsel %vm7325_vm5, 0, %v7324_v13  ;;  %v442_v53 = vsel %vm438_vm2, %v422_v57, %v425_v26 }
 0x1b6   : > { %v1091_v63 = vadd.s32 536870912, %v1090_v4  ;;  %v444_v10 = vsel %vm440_vm3, %v428_v20, %v443_v40  ;;  %v14448_v38 = vand.u32 2147483647, %v9571_v48  ;;  %v14449_v60 = vcvt.s32.f32 %v9569_v21 }
 0x1b7   : > { %v9682_v35 = vmul.u32.u64.low %v454_v12, %v453_v5  ;;  %v9683_v17 = vmul.u32.u64.high %v454_v12, %v453_v5, %v9682_v35  ;;  %v9685_v42 = vmul.u32.u64.low %v454_v12, %v449_v31  ;;  %v9686_v46 = vmul.u32.u64.high %v454_v12, %v449_v31, %v9685_v42 }
 0x1b8   : > { %v593_v36 = vmul.f32 %v14449_v60, %v14448_v38  ;;  %v14450_v49 = vshll.u32 %v9378_v51, %v9531_v25  ;;  %v692_v13 = vshll.u32 %v691_v7, 23  ;;  %v9697_v23 = vshrl.u32 %v1091_v63, 30 }
 0x1b9   : > { %v998_v20 = vsub.s32 32, %v997_v15  ;;  %v1003_v41 = vadd.s32 127, %v1002_v55  ;;  %vm7337_vm1 = vcmp.lt.s32.totalorder %v7336_v9, 0  ;;  %v445_v32 = vsel %vm439_vm6, %v442_v53, %v444_v10 }
 0x1ba   : > { %v793_v26 = vor.u32 %v9594_v50, %v14450_v49  ;;  %v798_v14 = vand.u32 2147483647, %v9639_v1  ;;  %v688_v48 = vshrl.u32 %v9592_v34, %v686_v22  ;;  %v898_v21 = vsub.s32 4294967266, %v9676_v45 }
 0x1bb   : > { %v1093_v33 = vshll.u32 %v9697_v23, 30  ;;  %v687_v51 = vshll.u32 %v9466_v62, %v9598_v0  ;;  %v982_v25 = vadd.s32 %v9396_v3, %v9402_v37  ;;  %vm463_vm7 = vc.u32 %v9683_v17, %v9685_v42 }
 0x1bc   : > { %v464_v30 = vadd.s32 1, %v9686_v46  ;;  %v693_v50 = vor.u32 4788187, %v692_v13  ;;  %v1205_v2 = vsel %vm7337_vm1, 0, %v7336_v9  ;;  %v461_v34 = vmul.u32 %v454_v12, %v445_v32 }
 0x1bd   : > { %v9712_v1 = vsub.s32 %v1090_v4, %v1093_v33  ;;  %v800_v52 = vcvt.s32.f32 %v793_v26  ;;  %v1000_v8 = vshrl.u32 %v982_v25, %v998_v20  ;;  %v1004_v7 = vshll.u32 %v1003_v41, 23 }
 0x1be   : > { %v465_v44 = vsel %vm463_vm7, %v464_v30, %v9686_v46  ;;  %v689_v6 = vor.u32 %v688_v48, %v687_v51  ;;  %v899_v62 = vadd.s32 127, %v898_v21  ;;  %v594_v37 = vxor.u32 2147483648, %v593_v36 }
 0x1bf   : > { %v1096_v0 = vsub.s32 0, %v9712_v1  ;;  %v466_v3 = vadd.s32 %v465_v44, %v461_v34  ;;  %v999_v40 = vshll.u32 %v9518_v28, %v997_v15  ;;  %v1210_v57 = vsub.s32 4294967266, %v1205_v2 }
 0x1c0   : > { %v801_v31 = vmul.f32 %v800_v52, %v798_v14  ;;  %v694_v5 = vand.u32 2147483647, %v693_v50  ;;  %vm512_vm8 = vcmp.lt.s32.totalorder %v9121_v11, 0  ;;  %v1005_v9 = vor.u32 4788187, %v1004_v7 }
 0x1c1   : > { %v7331_v4 = vmin.u32 %v1096_v0, %v9712_v1  ;;  %v467_v22 = vadd.s32 536870912, %v466_v3  ;;  %v1001_v55 = vor.u32 %v1000_v8, %v999_v40  ;;  %v894_v12 = vsub.s32 32, %v9676_v45 }
 0x1c2   : > { %v696_v63 = vcvt.s32.f32 %v689_v6  ;;  %v900_v53 = vshll.u32 %v899_v62, 23  ;;  %v595_v28 = vsel %vm512_vm8, %v594_v37, %v593_v36  ;;  %v878_v15 = vadd.s32 %v9469_v19, %v9476_v27 }
 0x1c3   : > { %v1098_v10 = vclz %v7331_v4  ;;  %v9720_v35 = vshrl.u32 %v467_v22, 30  ;;  %v1206_v46 = vsub.s32 32, %v1205_v2  ;;  %v1211_v38 = vadd.s32 127, %v1210_v57  ;;  %v14454_v4 = vld [vmem:[#allocation12_spill] sm:$0xff] }
 0x1c4   : > { %vm720_vm9 = vcmp.lt.s32.totalorder %v9127_v16, 0  ;;  %v802_v60 = vxor.u32 2147483648, %v801_v31  ;;  %v697_v49 = vmul.f32 %v696_v63, %v694_v5  ;;  %v1006_v20 = vand.u32 2147483647, %v1005_v9 }
 0x1c5   : > { %v7332_v26 = vadd.s32 4294967294, %v1098_v10  ;;  %v469_v13 = vshll.u32 %v9720_v35, 30  ;;  %v1008_v41 = vcvt.s32.f32 %v1001_v55  ;;  %v896_v32 = vshrl.u32 %v878_v15, %v894_v12  ;;  %v14455_v55 = vld [vmem:[#allocation13_spill] sm:$0xff] }
 0x1c6   : > { %v1190_v14 = vadd.s32 %v9551_v18, %v9559_v43  ;;  %v895_v36 = vshll.u32 %v9548_v47, %v9676_v45  ;;  %v901_v48 = vor.u32 4788187, %v900_v53  ;;  %v1212_v21 = vshll.u32 %v1211_v38, 23 }
 0x1c7   : > { %vm7333_vm10 = vcmp.lt.s32.totalorder %v7332_v26, 0  ;;  %v9732_v19 = vsub.s32 %v466_v3, %v469_v13  ;;  %v1086_v33 = vadd.s32 %v9634_v56, %v9643_v39  ;;  %v596_v34 = vsub.s32 4, %v9275_v54 }
 0x1c8   : > { %v1208_v27 = vshrl.u32 %v1190_v14, %v1206_v46  ;;  %v1101_v51 = vsel %vm7333_vm10, 0, %v7332_v26  ;;  %v698_v18 = vxor.u32 2147483648, %v697_v49  ;;  %v1009_v43 = vmul.f32 %v1008_v41, %v1006_v20 }
 0x1c9   : > { %v1102_v25 = vsub.s32 32, %v1101_v51  ;;  %v1106_v30 = vsub.s32 4294967266, %v1101_v51  ;;  %v472_v50 = vsub.s32 0, %v9732_v19  ;;  %v897_v52 = vor.u32 %v896_v32, %v895_v36 }
 0x1ca   : > { %v1207_v47 = vshll.u32 %v9612_v58, %v1205_v2  ;;  %v1103_v45 = vshll.u32 %v9712_v1, %v1101_v51  ;;  %v902_v6 = vand.u32 2147483647, %v901_v48  ;;  %v1213_v39 = vor.u32 4788187, %v1212_v21  ;;  %v14460_v51 = vld [vmem:[#allocation14_spill] sm:$0xff] }
 0x1cb   : > { %v1104_v8 = vshrl.u32 %v1086_v33, %v1102_v25  ;;  %v1107_v7 = vadd.s32 127, %v1106_v30  ;;  %v7307_v44 = vmin.u32 %v472_v50, %v9732_v19  ;;  %v14451_v62 = vand.u32 2147483647, %v9121_v11  ;;  %v14461_v30 = vld [vmem:[#allocation15_spill] sm:$0xff] }
 0x1cc   : > { %v1209_v56 = vor.u32 %v1208_v27, %v1207_v47  ;;  %v597_v58 = vsel %vm512_vm8, %v596_v34, %v9275_v54  ;;  %v803_v2 = vsel %vm720_vm9, %v802_v60, %v801_v31  ;;  %vm616_vm12 = vcmp.lt.s32.totalorder %v9136_v24, 0  ;;  %v14459_v60 = vld [vmem:[#allocation16_spill] sm:$0xff] }
 0x1cd   : > { %vm9743_vm11 = vcmp.le.f32.partialorder %v14451_v62, 0.7853982  ;;  %v1105_v3 = vor.u32 %v1104_v8, %v1103_v45  ;;  %v1108_v37 = vshll.u32 %v1107_v7, 23  ;;  %v474_v40 = vclz %v7307_v44 }
 0x1ce   : > { %v904_v1 = vcvt.s32.f32 %v897_v52  ;;  %v598_v57 = vsel %vm9743_vm11, %v9121_v11, %v595_v28  ;;  %v699_v5 = vsel %vm616_vm12, %v698_v18, %v697_v49  ;;  %vm928_vm13 = vcmp.lt.s32.totalorder %v14454_v4, 0 }
 0x1cf   : > { %v1010_v22 = vxor.u32 2147483648, %v1009_v43  ;;  %vm824_vm14 = vcmp.lt.s32.totalorder %v14455_v55, 0  ;;  %v1109_v9 = vor.u32 4788187, %v1108_v37  ;;  %v7308_v54 = vadd.s32 4294967294, %v474_v40 }
 0x1d0   : > { %v905_v12 = vmul.f32 %v904_v1, %v902_v6  ;;  %v1214_v63 = vand.u32 2147483647, %v1213_v39  ;;  %v1216_v31 = vcvt.s32.f32 %v1209_v56  ;;  %v599_v53 = vsel %vm9743_vm11, 0, %v597_v58 }
 0x1d1   : > { %v1110_v10 = vand.u32 2147483647, %v1109_v9  ;;  %v1112_v15 = vcvt.s32.f32 %v1105_v3  ;;  %vm7309_vm15 = vcmp.lt.s32.totalorder %v7308_v54, 0  ;;  %8584 = vcosq.f32 %v598_v57 }
 0x1d2   : > { %v477_v28 = vsel %vm7309_vm15, 0, %v7308_v54  ;;  %8586 = vsinq.f32 %v598_v57  ;;  %v14456_v46 = vand.u32 2147483647, %v9136_v24  ;;  %v700_v49 = vsub.s32 4, %v14459_v60 }
 0x1d3   : > { %v1113_v26 = vmul.f32 %v1112_v15, %v1110_v10  ;;  %v462_v13 = vadd.s32 %v9685_v42, %v9683_v17  ;;  %v478_v20 = vsub.s32 32, %v477_v28  ;;  %v482_v41 = vsub.s32 4294967266, %v477_v28  ;;  %v14462_v17 = vld [vmem:[#allocation11_spill] sm:$0xff] }
 0x1d4   : > { %vm9764_vm0 = vcmp.le.f32.partialorder %v14456_v46, 0.7853982  ;;  %v906_v32 = vxor.u32 2147483648, %v905_v12  ;;  %v1217_v14 = vmul.f32 %v1216_v31, %v1214_v63  ;;  %v603_v36 = vadd.s32 3, %v599_v53  ;;  %v14475_v31 = vld [vmem:[#allocation18_spill] sm:$0xff] }
 0x1d5   : > { %v702_v48 = vsel %vm9764_vm0, %v9136_v24, %v699_v5  ;;  %v479_v27 = vshll.u32 %v9732_v19, %v477_v28  ;;  %v480_v21 = vshrl.u32 %v462_v13, %v478_v20  ;;  %v483_v33 = vadd.s32 127, %v482_v41 }
 0x1d6   : > { %v804_v25 = vsub.s32 4, %v14460_v51  ;;  %vm1136_vm2 = vcmp.lt.s32.totalorder %v14461_v30, 0  ;;  %vm1032_vm3 = vcmp.lt.s32.totalorder %v9535_v61, 0  ;;  %vm408_vm4 = vcmp.lt.s32.totalorder %v14462_v17, 0 }
 0x1d7   : > { %v701_v42 = vsel %vm616_vm12, %v700_v49, %v14459_v60  ;;  %v14463_v50 = vand.u32 2147483647, %v9127_v16  ;;  %v1114_v19 = vxor.u32 2147483648, %v1113_v26  ;;  %v481_v18 = vor.u32 %v480_v21, %v479_v27 }
 0x1d8   : > { %v484_v52 = vshll.u32 %v483_v33, 23  ;;  %v1011_v45 = vsel %vm928_vm13, %v1010_v22, %v1009_v43  ;;  %v907_v8 = vsel %vm824_vm14, %v906_v32, %v905_v12  ;;  %v1218_v7 = vxor.u32 2147483648, %v1217_v14 }
 0x1d9   : > { %vm9784_vm5 = vcmp.le.f32.partialorder %v14463_v50, 0.7853982  ;;  %8588 = vcosq.f32 %v702_v48  ;;  %v14466_v44 = vand.u32 2147483647, %v14462_v17  ;;  %v604_v39 = vand.u32 3, %v603_v36 }
 0x1da   : > { %v806_v47 = vsel %vm9784_vm5, %v9127_v16, %v803_v2  ;;  %v485_v56 = vor.u32 4788187, %v484_v52  ;;  %8590 = vsinq.f32 %v702_v48  ;;  %v805_v62 = vsel %vm720_vm9, %v804_v25, %v14460_v51 }
 0x1db   : > { %vm9797_vm6 = vcmp.le.f32.partialorder %v14466_v44, 0.7853982  ;;  %v492_v43 = vsub.s32 4, %v9720_v35  ;;  %v703_v0 = vsel %vm9764_vm0, 0, %v701_v42  ;;  %8592 = vcosq.f32 %v806_v47  ;;  %v8585_v40 = vpop.eup %8584 }
 0x1dc   : > { %v14469_v3 = vand.u32 2147483647, %v14455_v55  ;;  %v1115_v58 = vsel %vm1032_vm3, %v1114_v19, %v1113_v26  ;;  %v486_v2 = vand.u32 2147483647, %v485_v56  ;;  %v488_v1 = vcvt.s32.f32 %v481_v18  ;;  %v8587_v5 = vpop.eup %8586 }
 0x1dd   : > { %v1219_v22 = vsel %vm1136_vm2, %v1218_v7, %v1217_v14  ;;  %v807_v9 = vsel %vm9784_vm5, 0, %v805_v62  ;;  %8594 = vsinq.f32 %v806_v47  ;;  %v14472_v54 = vand.u32 2147483647, %v14454_v4  ;;  %v14479_v14 = vld [vmem:[#allocation17_spill] sm:$0xff] }
 0x1de   : > { %vm9809_vm1 = vcmp.le.f32.partialorder %v14469_v3, 0.7853982  ;;  %v489_v63 = vmul.f32 %v488_v1, %v486_v2  ;;  %vm605_vm8 = vcmp.lt.s32.totalorder %v604_v39, 2  ;;  %v908_v53 = vsub.s32 4, %v14475_v31 }
 0x1df   : > { %v910_v57 = vsel %vm9809_vm1, %v14455_v55, %v907_v8  ;;  %vm9824_vm7 = vcmp.le.f32.partialorder %v14472_v54, 0.7853982  ;;  %v14476_v15 = vand.u32 2147483647, %v9535_v61  ;;  %v610_v46 = vxor.u32 2147483648, %v8585_v40 }
 0x1e0   : > { %v1014_v10 = vsel %vm9824_vm7, %v14454_v4, %v1011_v45  ;;  %v707_v38 = vadd.s32 3, %v703_v0  ;;  %8596 = vcosq.f32 %v910_v57  ;;  %v490_v49 = vxor.u32 2147483648, %v489_v63  ;;  %v14483_v0 = vld [vmem:[#allocation19_spill] sm:$0xff] }
 0x1e1   : > { %vm9834_vm9 = vcmp.le.f32.partialorder %v14476_v15, 0.7853982  ;;  %v493_v26 = vsel %vm408_vm4, %v492_v43, %v9720_v35  ;;  %v607_v13 = vxor.u32 2147483648, %v8587_v5  ;;  %8598 = vsinq.f32 %v910_v57 }
 0x1e2   : > { %v1118_v60 = vsel %vm9834_vm9, %v9535_v61, %v1115_v58  ;;  %vm606_vm10 = vcmp.eq.s32.totalorder %v604_v39, 0  ;;  %vm609_vm11 = vcmp.eq.s32.totalorder %v604_v39, 2  ;;  %v811_v20 = vadd.s32 3, %v807_v9 }
 0x1e3   : > { %8600 = vcosq.f32 %v1014_v10  ;;  %v491_v41 = vsel %vm408_vm4, %v490_v49, %v489_v63  ;;  %v909_v32 = vsel %vm824_vm14, %v908_v53, %v14475_v31  ;;  %v1012_v36 = vsub.s32 4, %v14479_v14  ;;  %v8589_v48 = vpop.eup %8588 }
 0x1e4   : > { %8602 = vcosq.f32 %v1118_v60  ;;  %v494_v35 = vsel %vm9797_vm6, %v14462_v17, %v491_v41  ;;  %v495_v27 = vsel %vm9797_vm6, 0, %v493_v26  ;;  %v1116_v21 = vsub.s32 4, %v9697_v23  ;;  %v8591_v33 = vpop.eup %8590 }
 0x1e5   : > { %8604 = vsinq.f32 %v1118_v60  ;;  %v608_v51 = vsel %vm606_vm10, %v8585_v40, %v607_v13  ;;  %v611_v25 = vsel %vm609_vm11, %v610_v46, %v8587_v5  ;;  %v708_v42 = vand.u32 3, %v707_v38  ;;  %v8593_v50 = vpop.eup %8592 }
 0x1e6   : > { %8606 = vcosq.f32 %v494_v35  ;;  %v9856_v34 = vand.u32 3, %v811_v20  ;;  %v911_v19 = vsel %vm9809_vm1, 0, %v909_v32  ;;  %v14480_v18 = vand.u32 2147483647, %v14461_v30 }
 0x1e7   : > { %8608 = vsinq.f32 %v494_v35  ;;  %v499_v47 = vadd.s32 3, %v495_v27  ;;  %v1013_v45 = vsel %vm928_vm13, %v1012_v36, %v14479_v14  ;;  %v8595_v7 = vpop.eup %8594  ;;  %v612_v44 = vsel %vm605_vm8, %v608_v51, %v611_v25 }
 0x1e8   : > { %vm9862_vm12 = vcmp.le.f32.partialorder %v14480_v18, 0.7853982  ;;  %8610 = vsinq.f32 %v1014_v10  ;;  %v711_v6 = vxor.u32 2147483648, %v8591_v33  ;;  %v714_v56 = vxor.u32 2147483648, %v8589_v48 }
 0x1e9   : > { %v1222_v8 = vsel %vm9862_vm12, %v14461_v30, %v1219_v22  ;;  %v1117_v62 = vsel %vm1032_vm3, %v1116_v21, %v9697_v23  ;;  %vm602_vm14 = vweird.f32 %v9121_v11  ;;  %vm709_vm15 = vcmp.lt.s32.totalorder %v708_v42, 2 }
 0x1ea   : > { %v915_v43 = vadd.s32 3, %v911_v19  ;;  %v1220_v3 = vsub.s32 4, %v14483_v0  ;;  %v8597_v37 = vpop.eup %8596  ;;  %vm710_vm13 = vcmp.eq.s32.totalorder %v708_v42, 0  ;;  %vm713_vm0 = vcmp.eq.s32.totalorder %v708_v42, 2 }
 0x1eb   : > { %v1015_v40 = vsel %vm9824_vm7, 0, %v1013_v45  ;;  %8612 = vcosq.f32 %v1222_v8  ;;  %v8599_v39 = vpop.eup %8598  ;;  %v500_v58 = vand.u32 3, %v499_v47  ;;  %v613_v2 = vsel %vm602_vm14, nan, %v612_v44 }
 0x1ec   : > { %vm706_vm4 = vweird.f32 %v9136_v24  ;;  %v1119_v23 = vsel %vm9834_vm9, 0, %v1117_v62  ;;  %8614 = vsinq.f32 %v1222_v8  ;;  %vm498_vm3 = vweird.f32 %v14462_v17 }
 0x1ed   : > { %v9883_v11 = vpop.eup %8600  ;;  %v712_v1 = vsel %vm710_vm13, %v8589_v48, %v711_v6  ;;  %v715_v57 = vsel %vm713_vm0, %v714_v56, %v8591_v33  ;;  %vm813_vm5 = vcmp.lt.s32.totalorder %v9856_v34, 2  ;;  %v815_v5 = vxor.u32 2147483648, %v8595_v7 }
 0x1ee   : > { %v818_v22 = vxor.u32 2147483648, %v8593_v50  ;;  %v8603_v9 = vpop.eup %8602  ;;  %vm814_vm6 = vcmp.eq.s32.totalorder %v9856_v34, 0  ;;  %v916_v54 = vand.u32 3, %v915_v43  ;;  %v1019_v12 = vadd.s32 3, %v1015_v40 }
 0x1ef   : > { %v1221_v63 = vsel %vm1136_vm2, %v1220_v3, %v14483_v0  ;;  %v8605_v31 = vpop.eup %8604  ;;  %vm817_vm1 = vcmp.eq.s32.totalorder %v9856_v34, 2  ;;  %v919_v53 = vxor.u32 2147483648, %v8599_v39  ;;  %v922_v10 = vxor.u32 2147483648, %v8597_v37 }
 0x1f0   : > { %v1123_v15 = vadd.s32 3, %v1119_v23  ;;  %v8607_v28 = vpop.eup %8606  ;;  %vm501_vm7 = vcmp.lt.s32.totalorder %v500_v58, 2  ;;  %vm502_vm8 = vcmp.eq.s32.totalorder %v500_v58, 0  ;;  %vm505_vm9 = vcmp.eq.s32.totalorder %v500_v58, 2 }
 0x1f1   : > { %v716_v46 = vsel %vm709_vm15, %v712_v1, %v715_v57  ;;  %v8609_v38 = vpop.eup %8608  ;;  %v506_v60 = vxor.u32 2147483648, %v8607_v28  ;;  %v816_v49 = vsel %vm814_vm6, %v8593_v50, %v815_v5  ;;  %v819_v26 = vsel %vm817_vm1, %v818_v22, %v8595_v7 }
 0x1f2   : > { %v1223_v13 = vsel %vm9862_vm12, 0, %v1221_v63  ;;  %v8611_v20 = vpop.eup %8610  ;;  %v503_v41 = vxor.u32 2147483648, %v8609_v38  ;;  %vm918_vm2 = vcmp.eq.s32.totalorder %v916_v54, 0  ;;  %vm921_vm10 = vcmp.eq.s32.totalorder %v916_v54, 2 }
 0x1f3   : > { %v1020_v32 = vand.u32 3, %v1019_v12  ;;  %v507_v14 = vsel %vm505_vm9, %v506_v60, %v8609_v38  ;;  %v920_v36 = vsel %vm918_vm2, %v8597_v37, %v919_v53  ;;  %v923_v48 = vsel %vm921_vm10, %v922_v10, %v8599_v39 }
 0x1f4   : > { %v1124_v35 = vand.u32 3, %v1123_v15  ;;  %v504_v27 = vsel %vm502_vm8, %v8607_v28, %v503_v41  ;;  %v1127_v21 = vxor.u32 2147483648, %v8605_v31  ;;  %v1130_v33 = vxor.u32 2147483648, %v8603_v9 }
 0x1f5   : > { %v1227_v51 = vadd.s32 3, %v1223_v13  ;;  %v8613_v25 = vpop.eup %8612  ;;  %v508_v42 = vsel %vm501_vm7, %v504_v27, %v507_v14  ;;  %v717_v50 = vsel %vm706_vm4, nan, %v716_v46  ;;  %v1023_v19 = vxor.u32 2147483648, %v8611_v20 }
 0x1f6   : > { %v1026_v18 = vxor.u32 2147483648, %v9883_v11  ;;  %v8615_v52 = vpop.eup %8614  ;;  %v509_v47 = vsel %vm498_vm3, nan, %v508_v42  ;;  %v820_v45 = vsel %vm813_vm5, %v816_v49, %v819_v26  ;;  %vm914_vm11 = vweird.f32 %v14455_v55 }
 0x1f7   : > { %vm917_vm12 = vcmp.lt.s32.totalorder %v916_v54, 2  ;;  %7773 = vmatprep.mubr.f32.mxu1 %v509_v47  ;;  %vm1022_vm14 = vcmp.eq.s32.totalorder %v1020_v32, 0  ;;  %vm1126_vm15 = vcmp.eq.s32.totalorder %v1124_v35, 0  ;;  %vm1129_vm13 = vcmp.eq.s32.totalorder %v1124_v35, 2 }
 0x1f8   : > { %v924_v8 = vsel %vm917_vm12, %v920_v36, %v923_v48  ;;  %7774 = vmatmul.mubr.f32.vlgmr.msra.gmra.mrb[0].mxu1 %v613_v2  ;;  %vm1025_vm0 = vcmp.eq.s32.totalorder %v1020_v32, 2  ;;  %v1128_v24 = vsel %vm1126_vm15, %v8603_v9, %v1127_v21  ;;  %v1131_v7 = vsel %vm1129_vm13, %v1130_v33, %v8605_v31  ;;  %v9917_v2 = vld [vmem:[%s14324_s4 + $0x1] ss:$0 sm:$0xff] }
 0x1f9   : > { %v1228_v44 = vand.u32 3, %v1227_v51  ;;  %7776 = vmatprep.mubr.f32.mxu1 %v717_v50  ;;  %v1024_v17 = vsel %vm1022_vm14, %v9883_v11, %v1023_v19  ;;  %v1027_v6 = vsel %vm1025_vm0, %v1026_v18, %v8611_v20  ;;  %v1231_v56 = vxor.u32 2147483648, %v8615_v52 }
 0x1fa   : > { %v1234_v34 = vxor.u32 2147483648, %v8613_v25  ;;  %vm810_vm4 = vweird.f32 %v9127_v16  ;;  %v925_v62 = vsel %vm914_vm11, nan, %v924_v8  ;;  %vm1125_vm3 = vcmp.lt.s32.totalorder %v1124_v35, 2 }
 0x1fb   : > { %v821_v43 = vsel %vm810_vm4, nan, %v820_v45  ;;  %vm1021_vm5 = vcmp.lt.s32.totalorder %v1020_v32, 2  ;;  %v1132_v0 = vsel %vm1125_vm3, %v1128_v24, %v1131_v7  ;;  %vm1230_vm6 = vcmp.eq.s32.totalorder %v1228_v44, 0 }
 0x1fc   : > { %7777 = vmatmul.mubr.f32.gmra.mrb[2].mxu1 %v821_v43  ;;  %v1028_v3 = vsel %vm1021_vm5, %v1024_v17, %v1027_v6  ;;  %vm1233_vm1 = vcmp.eq.s32.totalorder %v1228_v44, 2  ;;  %vm1122_vm7 = vweird.f32 %v9535_v61  ;;  %v1232_v37 = vsel %vm1230_vm6, %v8613_v25, %v1231_v56 }
 0x1fd   : > { %7779 = vmatprep.mubr.f32.mxu1 %v925_v62  ;;  %v1235_v40 = vsel %vm1233_vm1, %v1234_v34, %v8615_v52  ;;  %vm1018_vm8 = vweird.f32 %v14454_v4  ;;  %v1133_v39 = vsel %vm1122_vm7, nan, %v1132_v0  ;;  %vm1229_vm9 = vcmp.lt.s32.totalorder %v1228_v44, 2 }
 0x1fe   : > { %v1029_v16 = vsel %vm1018_vm8, nan, %v1028_v3  ;;  %v1236_v55 = vsel %vm1229_vm9, %v1232_v37, %v1235_v40  ;;  %vm1226_vm2 = vweird.f32 %v14461_v30  ;;  %v14484_v7 = vmov 2475754826  }
 0x1ff   : > { %v1237_v58 = vsel %vm1226_vm2, nan, %v1236_v55  ;;  %v14485_v6 = vmov 2131351028   ;;  %v14486_v62 = vmov 920167782  }
 0x200   : > { %7780 = vmatmul.mubr.f32.gmra.mrb[4].mxu1 %v1029_v16  ;;  %v14487_v16 = vmov 1326507024  }
 0x201   : > { %7782 = vmatprep.mubr.f32.mxu1 %v1133_v39 }
 0x204   : > { %7783 = vmatmul.mubr.f32.gmra.mrb[6].mxu1 %v1237_v58 }
 0x2cb   : > { %v7775_v61 = vpop.f32.mrb[0].mxu1 }
 0x2cc   : > { %v9920_v23 = vadd.f32 %v7775_v61, %v9917_v2  ;;  %v1328_v4 = vpop.f32.mrb[1].mxu1 }
 0x2cd   : > { %v9923_v11 = vadd.f32 %v9917_v2, %v1328_v4 }
 0x2ce   : > { %v1471_v1 = vand.u32 2147483647, %v9920_v23  ;;  %v1474_v57 = vand.u32 2139095040, %v9920_v23 }
 0x2cf   : > { %v1367_v30 = vand.u32 2147483647, %v9923_v11  ;;  %v1370_v5 = vand.u32 2139095040, %v9923_v11  ;;  %v7778_v22 = vpop.f32.mrb[2].mxu1 }
 0x2d0   : > { %v1475_v9 = vshrl.u32 %v1474_v57, 23  ;;  %v1478_v54 = vand.u32 8388607, %v1471_v1  ;;  %v9932_v12 = vadd.f32 %v7778_v22, %v9917_v2  ;;  %v1338_v63 = vpop.f32.mrb[3].mxu1 }
 0x2d1   : > { %v1371_v31 = vshrl.u32 %v1370_v5, 23  ;;  %v1374_v53 = vand.u32 8388607, %v1367_v30  ;;  %v9937_v10 = vadd.f32 %v9917_v2, %v1338_v63 }
 0x2d2   : > { %v7344_v15 = vadd.s32 4294967169, %v1475_v9  ;;  %v1679_v28 = vand.u32 2147483647, %v9932_v12  ;;  %v1479_v46 = vor.u32 8388608, %v1478_v54  ;;  %v1682_v60 = vand.u32 2139095040, %v9932_v12 }
 0x2d3   : > { %v7340_v38 = vadd.s32 4294967169, %v1371_v31  ;;  %v9941_v49 = vpop.f32.mrb[4].mxu1  ;;  %v1375_v13 = vor.u32 8388608, %v1374_v53  ;;  %v1578_v36 = vand.u32 2139095040, %v9937_v10  ;;  %v1575_v48 = vand.u32 2147483647, %v9937_v10 }
 0x2d4   : > { %v1481_v26 = vadd.s32 1, %v7344_v15  ;;  %v9943_v20 = vpop.f32.mrb[5].mxu1  ;;  %v1683_v32 = vshrl.u32 %v1682_v60, 23  ;;  %v9947_v14 = vand.u32 8388607, %v1679_v28  ;;  %v9951_v27 = vshll.u32 %v1479_v46, 8 }
 0x2d5   : > { %v1377_v41 = vadd.s32 1, %v7340_v38  ;;  %v9955_v50 = vshll.u32 %v1375_v13, 8  ;;  %v9962_v45 = vshrl.u32 %v1578_v36, 23 }
 0x2d6   : > { %vm1482_vm10 = vcmp.gt.s32.totalorder %v1481_v26, 0  ;;  %v7352_v21 = vadd.s32 4294967169, %v1683_v32  ;;  %v1687_v47 = vor.u32 8388608, %v9947_v14 }
 0x2d7   : > { %v1483_v35 = vsel %vm1482_vm10, %v1481_v26, 0  ;;  %vm1378_vm11 = vcmp.gt.s32.totalorder %v1377_v41, 0  ;;  %v9953_v33 = vpop.f32.mrb[6].mxu1 }
 0x2d8   : > { %v1484_v51 = vshrl.u32 %v1483_v35, 5  ;;  %v1485_v25 = vand.u32 31, %v1483_v35  ;;  %v1379_v42 = vsel %vm1378_vm11, %v1377_v41, 0  ;;  %v9957_v19 = vpop.f32.mrb[7].mxu1  ;;  %v9966_v17 = vadd.s32 1, %v7352_v21 }
 0x2d9   : > { %v9959_v18 = vshrl.u32 %v1379_v42, 5  ;;  %v1381_v52 = vand.u32 31, %v1379_v42 }
 0x2da   : > { %v1486_v8 = vsub.s32 32, %v1485_v25  ;;  %v1488_v24 = vshll.u32 %v14444_v29, %v1485_v25  ;;  %v1491_v44 = vshll.u32 %v14484_v7, %v1485_v25  ;;  %v1494_v56 = vshll.u32 %v14485_v6, %v1485_v25 }
 0x2db   : > { %v1497_v34 = vshll.u32 %v14441_v59, %v1485_v25  ;;  %v1500_v43 = vshll.u32 %v14486_v62, %v1485_v25  ;;  %vm1503_vm12 = vcmp.lt.s32.totalorder %v1484_v51, 1  ;;  %vm1504_vm14 = vcmp.lt.s32.totalorder %v1484_v51, 2 }
 0x2dc   : > { %v1489_v0 = vshrl.u32 %v14484_v7, %v1486_v8  ;;  %v1492_v3 = vshrl.u32 %v14485_v6, %v1486_v8  ;;  %v1495_v37 = vshrl.u32 %v14441_v59, %v1486_v8  ;;  %v1487_v40 = vshrl.u32 %v14444_v29, %v1486_v8 }
 0x2dd   : > { %v1498_v39 = vshrl.u32 %v14486_v62, %v1486_v8  ;;  %v1501_v55 = vshrl.u32 %v14487_v16, %v1486_v8  ;;  %vm1505_vm15 = vcmp.lt.s32.totalorder %v1484_v51, 3  ;;  %v1382_v57 = vsub.s32 32, %v1381_v52 }
 0x2de   : > { %v1490_v58 = vor.u32 %v1489_v0, %v1488_v24  ;;  %v1493_v61 = vor.u32 %v1492_v3, %v1491_v44  ;;  %v1496_v4 = vor.u32 %v1495_v37, %v1494_v56  ;;  %vm1506_vm13 = vcmp.lt.s32.totalorder %v1484_v51, 4 }
 0x2df   : > { %v1499_v5 = vor.u32 %v1498_v39, %v1497_v34  ;;  %v1502_v22 = vor.u32 %v1501_v55, %v1500_v43  ;;  %v1384_v9 = vshll.u32 %v14444_v29, %v1381_v52  ;;  %v1387_v60 = vshll.u32 %v14484_v7, %v1381_v52 }
 0x2e0   : > { %v1507_v54 = vsel %vm1503_vm12, %v1487_v40, %v1490_v58  ;;  %v1508_v63 = vsel %vm1506_vm13, %v1496_v4, 2102212464  ;;  %v1511_v31 = vsel %vm1503_vm12, %v1490_v58, %v1493_v61  ;;  %v1515_v53 = vsel %vm1503_vm12, %v1493_v61, %v1496_v4 }
 0x2e1   : > { %v1509_v15 = vsel %vm1505_vm15, %v1493_v61, %v1508_v63  ;;  %v1512_v46 = vsel %vm1506_vm13, %v1499_v5, 920167782  ;;  %v1516_v38 = vsel %vm1506_vm13, %v1502_v22, 1326507024  ;;  %v1383_v41 = vshrl.u32 %v14444_v29, %v1382_v57 }
 0x2e2   : > { %v1513_v26 = vsel %vm1505_vm15, %v1496_v4, %v1512_v46  ;;  %v1517_v13 = vsel %vm1505_vm15, %v1499_v5, %v1516_v38  ;;  %v1385_v32 = vshrl.u32 %v14484_v7, %v1382_v57  ;;  %v1510_v36 = vsel %vm1504_vm14, %v1507_v54, %v1509_v15 }
 0x2e3   : > { %v1514_v35 = vsel %vm1504_vm14, %v1511_v31, %v1513_v26  ;;  %v1518_v21 = vsel %vm1504_vm14, %v1515_v53, %v1517_v13  ;;  %v1388_v25 = vshrl.u32 %v14485_v6, %v1382_v57  ;;  %v1390_v43 = vshll.u32 %v14485_v6, %v1381_v52 }
 0x2e4   : > { %v9992_v42 = vmul.u32.u64.low %v9951_v27, %v1518_v21  ;;  %v9993_v8 = vmul.u32.u64.high %v9951_v27, %v1518_v21, %v9992_v42  ;;  %v9996_v24 = vmul.u32.u64.low %v9951_v27, %v1514_v35  ;;  %v9997_v44 = vmul.u32.u64.high %v9951_v27, %v1514_v35, %v9996_v24 }
 0x2e5   : > { %v1386_v56 = vor.u32 %v1385_v32, %v1384_v9  ;;  %v1389_v34 = vor.u32 %v1388_v25, %v1387_v60  ;;  %v1391_v0 = vshrl.u32 %v14441_v59, %v1382_v57  ;;  %v1526_v51 = vmul.u32 %v9951_v27, %v1510_v36 }
 0x2e6   : > { %v1393_v3 = vshll.u32 %v14441_v59, %v1381_v52  ;;  %v1394_v37 = vshrl.u32 %v14486_v62, %v1382_v57  ;;  %v1397_v40 = vshrl.u32 %v14487_v16, %v1382_v57  ;;  %v1396_v55 = vshll.u32 %v14486_v62, %v1381_v52 }
 0x2e7   : > { %v1392_v39 = vor.u32 %v1391_v0, %v1390_v43  ;;  %vm1399_vm0 = vcmp.lt.s32.totalorder %v9959_v18, 1  ;;  %vm1400_vm4 = vcmp.lt.s32.totalorder %v9959_v18, 2  ;;  %vm1528_vm3 = vc.u32 %v9993_v8, %v9996_v24 }
 0x2e8   : > { %v1529_v58 = vadd.s32 1, %v9997_v44  ;;  %v1395_v61 = vor.u32 %v1394_v37, %v1393_v3  ;;  %vm1401_vm5 = vcmp.lt.s32.totalorder %v9959_v18, 3  ;;  %v1398_v27 = vor.u32 %v1397_v40, %v1396_v55 }
 0x2e9   : > { %vm1402_vm6 = vcmp.lt.s32.totalorder %v9959_v18, 4  ;;  %v1403_v4 = vsel %vm1399_vm0, %v1383_v41, %v1386_v56  ;;  %v1407_v57 = vsel %vm1399_vm0, %v1386_v56, %v1389_v34  ;;  %v1411_v9 = vsel %vm1399_vm0, %v1389_v34, %v1392_v39 }
 0x2ea   : > { %v1530_v5 = vsel %vm1528_vm3, %v1529_v58, %v9997_v44  ;;  %v1404_v52 = vsel %vm1402_vm6, %v1392_v39, 2102212464  ;;  %v1408_v22 = vsel %vm1402_vm6, %v1395_v61, 920167782  ;;  %v1412_v53 = vsel %vm1402_vm6, %v1398_v27, 1326507024 }
 0x2eb   : > { %v1531_v54 = vadd.s32 %v1530_v5, %v1526_v51  ;;  %v1405_v63 = vsel %vm1401_vm5, %v1389_v34, %v1404_v52  ;;  %v1409_v31 = vsel %vm1401_vm5, %v1392_v39, %v1408_v22  ;;  %v1413_v38 = vsel %vm1401_vm5, %v1395_v61, %v1412_v53 }
 0x2ec   : > { %v1406_v15 = vsel %vm1400_vm4, %v1403_v4, %v1405_v63  ;;  %v1410_v46 = vsel %vm1400_vm4, %v1407_v57, %v1409_v31  ;;  %vm1690_vm1 = vcmp.gt.s32.totalorder %v9966_v17, 0  ;;  %v1414_v26 = vsel %vm1400_vm4, %v1411_v9, %v1413_v38 }
 0x2ed   : > { %v1532_v60 = vadd.s32 536870912, %v1531_v54  ;;  %v10023_v13 = vmul.u32.u64.low %v9955_v50, %v1410_v46  ;;  %v10024_v41 = vmul.u32.u64.high %v9955_v50, %v1410_v46, %v10023_v13  ;;  %v1691_v35 = vsel %vm1690_vm1, %v9966_v17, 0 }
 0x2ee   : > { %v10028_v32 = vmul.u32.u64.low %v9955_v50, %v1414_v26  ;;  %v10029_v36 = vmul.u32.u64.high %v9955_v50, %v1414_v26, %v10028_v32  ;;  %v7348_v21 = vadd.s32 4294967169, %v9962_v45  ;;  %v1693_v42 = vand.u32 31, %v1691_v35 }
 0x2ef   : > { %v10033_v25 = vshrl.u32 %v1532_v60, 30  ;;  %v1422_v44 = vmul.u32 %v9955_v50, %v1406_v15  ;;  %v10038_v18 = vshll.u32 %v1687_v47, 8  ;;  %v10042_v56 = vand.u32 8388607, %v1575_v48 }
 0x2f0   : > { %v1425_v43 = vadd.s32 1, %v10024_v41  ;;  %v1692_v17 = vshrl.u32 %v1691_v35, 5  ;;  %v1694_v0 = vsub.s32 32, %v1693_v42  ;;  %vm1424_vm7 = vc.u32 %v10029_v36, %v10023_v13 }
 0x2f1   : > { %v1534_v34 = vshll.u32 %v10033_v25, 30  ;;  %v1696_v45 = vshll.u32 %v14444_v29, %v1693_v42  ;;  %v1699_v50 = vshll.u32 %v14484_v7, %v1693_v42  ;;  %v1585_v14 = vadd.s32 1, %v7348_v21 }
 0x2f2   : > { %v1426_v51 = vsel %vm1424_vm7, %v1425_v43, %v10024_v41  ;;  %v1697_v3 = vshrl.u32 %v14484_v7, %v1694_v0  ;;  %v1702_v37 = vshll.u32 %v14485_v6, %v1693_v42  ;;  %v1700_v39 = vshrl.u32 %v14485_v6, %v1694_v0 }
 0x2f3   : > { %v10050_v47 = vsub.s32 %v1531_v54, %v1534_v34  ;;  %v1427_v40 = vadd.s32 %v1426_v51, %v1422_v44  ;;  %v1703_v55 = vshrl.u32 %v14441_v59, %v1694_v0  ;;  %v1705_v58 = vshll.u32 %v14441_v59, %v1693_v42 }
 0x2f4   : > { %v1698_v27 = vor.u32 %v1697_v3, %v1696_v45  ;;  %v1706_v4 = vshrl.u32 %v14486_v62, %v1694_v0  ;;  %v1708_v57 = vshll.u32 %v14486_v62, %v1693_v42  ;;  %v1701_v52 = vor.u32 %v1700_v39, %v1699_v50 }
 0x2f5   : > { %v1537_v61 = vsub.s32 0, %v10050_v47  ;;  %v1428_v5 = vadd.s32 536870912, %v1427_v40  ;;  %v1704_v22 = vor.u32 %v1703_v55, %v1702_v37  ;;  %v1709_v9 = vshrl.u32 %v14487_v16, %v1694_v0 }
 0x2f6   : > { %v1695_v63 = vshrl.u32 %v14444_v29, %v1694_v0  ;;  %v1707_v31 = vor.u32 %v1706_v4, %v1705_v58  ;;  %vm1711_vm8 = vcmp.lt.s32.totalorder %v1692_v17, 1  ;;  %vm1713_vm9 = vcmp.lt.s32.totalorder %v1692_v17, 3 }
 0x2f7   : > { %v7345_v54 = vmin.u32 %v1537_v61, %v10050_v47  ;;  %v10064_v53 = vshrl.u32 %v1428_v5, 30  ;;  %v1710_v15 = vor.u32 %v1709_v9, %v1708_v57  ;;  %vm1714_vm2 = vcmp.lt.s32.totalorder %v1692_v17, 4 }
 0x2f8   : > { %v1715_v38 = vsel %vm1711_vm8, %v1695_v63, %v1698_v27  ;;  %v1716_v60 = vsel %vm1714_vm2, %v1704_v22, 2102212464  ;;  %v1719_v26 = vsel %vm1711_vm8, %v1698_v27, %v1701_v52  ;;  %v1720_v35 = vsel %vm1714_vm2, %v1707_v31, 920167782 }
 0x2f9   : > { %v1539_v46 = vclz %v7345_v54  ;;  %v1430_v41 = vshll.u32 %v10064_v53, 30  ;;  %v1717_v32 = vsel %vm1713_vm9, %v1701_v52, %v1716_v60  ;;  %v1723_v21 = vsel %vm1711_vm8, %v1701_v52, %v1704_v22 }
 0x2fa   : > { %vm1712_vm10 = vcmp.lt.s32.totalorder %v1692_v17, 2  ;;  %v1721_v44 = vsel %vm1713_vm9, %v1704_v22, %v1720_v35  ;;  %v1724_v34 = vsel %vm1714_vm2, %v1710_v15, 1326507024  ;;  %vm1586_vm12 = vcmp.gt.s32.totalorder %v1585_v14, 0 }
 0x2fb   : > { %v7346_v42 = vadd.s32 4294967294, %v1539_v46  ;;  %v10069_v43 = vsub.s32 %v1427_v40, %v1430_v41  ;;  %v1718_v0 = vsel %vm1712_vm10, %v1715_v38, %v1717_v32  ;;  %v1722_v45 = vsel %vm1712_vm10, %v1719_v26, %v1721_v44 }
 0x2fc   : > { %v1725_v50 = vsel %vm1713_vm9, %v1707_v31, %v1724_v34  ;;  %v10073_v3 = vmul.u32.u64.low %v10038_v18, %v1722_v45  ;;  %v10074_v37 = vmul.u32.u64.high %v10038_v18, %v1722_v45, %v10073_v3  ;;  %v1527_v40 = vadd.s32 %v9996_v24, %v9993_v8 }
 0x2fd   : > { %vm7347_vm11 = vcmp.lt.s32.totalorder %v7346_v42, 0  ;;  %v1726_v51 = vsel %vm1712_vm10, %v1723_v21, %v1725_v50  ;;  %v1433_v55 = vsub.s32 0, %v10069_v43  ;;  %v1734_v57 = vmul.u32 %v10038_v18, %v1718_v0 }
 0x2fe   : > { %v1542_v39 = vsel %vm7347_vm11, 0, %v7346_v42  ;;  %v10079_v58 = vmul.u32.u64.low %v10038_v18, %v1726_v51  ;;  %v10080_v61 = vmul.u32.u64.high %v10038_v18, %v1726_v51, %v10079_v58  ;;  %v1587_v5 = vsel %vm1586_vm12, %v1585_v14, 0 }
 0x2ff   : > { %v1543_v27 = vsub.s32 32, %v1542_v39  ;;  %v1547_v17 = vsub.s32 4294967266, %v1542_v39  ;;  %v7341_v4 = vmin.u32 %v1433_v55, %v10069_v43  ;;  %v10088_v52 = vadd.f32 %v9941_v49, %v9917_v2 }
 0x300   : > { %v1544_v22 = vshll.u32 %v10050_v47, %v1542_v39  ;;  %v1737_v63 = vadd.s32 1, %v10074_v37  ;;  %vm1736_vm14 = vc.u32 %v10080_v61, %v10073_v3  ;;  %v10094_v8 = vshrl.u32 %v1587_v5, 5 }
 0x301   : > { %v1545_v9 = vshrl.u32 %v1527_v40, %v1543_v27  ;;  %v1548_v54 = vadd.s32 127, %v1547_v17  ;;  %v1435_v31 = vclz %v7341_v4  ;;  %v1589_v24 = vand.u32 31, %v1587_v5 }
 0x302   : > { %v1738_v14 = vsel %vm1736_vm14, %v1737_v63, %v10074_v37  ;;  %v1583_v49 = vor.u32 8388608, %v10042_v56  ;;  %vm1473_vm15 = vcmp.lt.s32.totalorder %v9920_v23, 0  ;;  %v14373_v60 = vand.u32 2147483647, %v10088_v52 }
 0x303   : > { %v1546_v15 = vor.u32 %v1545_v9, %v1544_v22  ;;  %v1549_v18 = vshll.u32 %v1548_v54, 23  ;;  %v7342_v47 = vadd.s32 4294967294, %v1435_v31  ;;  %v1739_v46 = vadd.s32 %v1738_v14, %v1734_v57 }
 0x304   : > { %v1590_v38 = vsub.s32 32, %v1589_v24  ;;  %vm10102_vm13 = vcmp.le.f32.partialorder %v1471_v1, 0.7853982  ;;  %v1423_v32 = vadd.s32 %v10023_v13, %v10029_v36  ;;  %v1592_v35 = vshll.u32 %v14444_v29, %v1589_v24 }
 0x305   : > { %v1550_v41 = vor.u32 4788187, %v1549_v18  ;;  %v1890_v21 = vand.u32 2139095040, %v10088_v52  ;;  %v1553_v42 = vcvt.s32.f32 %v1546_v15  ;;  %vm7343_vm0 = vcmp.lt.s32.totalorder %v7342_v47, 0 }
 0x306   : > { %v1740_v44 = vadd.s32 536870912, %v1739_v46  ;;  %v1593_v34 = vshrl.u32 %v14484_v7, %v1590_v38  ;;  %vm1607_vm4 = vcmp.lt.s32.totalorder %v10094_v8, 1  ;;  %v1438_v1 = vsel %vm7343_vm0, 0, %v7342_v47 }
 0x307   : > { %v1551_v0 = vand.u32 2147483647, %v1550_v41  ;;  %v1595_v45 = vshll.u32 %v14484_v7, %v1589_v24  ;;  %v1596_v50 = vshrl.u32 %v14485_v6, %v1590_v38  ;;  %v1439_v51 = vsub.s32 32, %v1438_v1 }
 0x308   : > { %v1443_v37 = vsub.s32 4294967266, %v1438_v1  ;;  %v10114_v13 = vshrl.u32 %v1740_v44, 30  ;;  %v1599_v36 = vshrl.u32 %v14441_v59, %v1590_v38  ;;  %v1440_v55 = vshll.u32 %v10069_v43, %v1438_v1 }
 0x309   : > { %v1554_v39 = vmul.f32 %v1553_v42, %v1551_v0  ;;  %v1594_v58 = vor.u32 %v1593_v34, %v1592_v35  ;;  %v1598_v40 = vshll.u32 %v14485_v6, %v1589_v24  ;;  %v1441_v27 = vshrl.u32 %v1423_v32, %v1439_v51 }
 0x30a   : > { %v1444_v17 = vadd.s32 127, %v1443_v37  ;;  %v1742_v4 = vshll.u32 %v10114_v13, 30  ;;  %v1601_v57 = vshll.u32 %v14441_v59, %v1589_v24  ;;  %v1602_v22 = vshrl.u32 %v14486_v62, %v1590_v38 }
 0x30b   : > { %v1555_v5 = vxor.u32 2147483648, %v1554_v39  ;;  %v1604_v9 = vshll.u32 %v14486_v62, %v1589_v24  ;;  %v1605_v54 = vshrl.u32 %v14487_v16, %v1590_v38  ;;  %v1597_v43 = vor.u32 %v1596_v50, %v1595_v45 }
 0x30c   : > { %v1445_v63 = vshll.u32 %v1444_v17, 23  ;;  %v10124_v31 = vsub.s32 %v1739_v46, %v1742_v4  ;;  %v1600_v15 = vor.u32 %v1599_v36, %v1598_v40  ;;  %v1591_v14 = vshrl.u32 %v14444_v29, %v1590_v38 }
 0x30d   : > { %v1556_v18 = vsel %vm1473_vm15, %v1555_v5, %v1554_v39  ;;  %v1603_v47 = vor.u32 %v1602_v22, %v1601_v57  ;;  %v1606_v41 = vor.u32 %v1605_v54, %v1604_v9  ;;  %v1442_v35 = vor.u32 %v1441_v27, %v1440_v55 }
 0x30e   : > { %v1559_v32 = vsel %vm10102_vm13, %v9920_v23, %v1556_v18  ;;  %v1446_v24 = vor.u32 4788187, %v1445_v63  ;;  %v1745_v42 = vsub.s32 0, %v10124_v31  ;;  %vm1609_vm3 = vcmp.lt.s32.totalorder %v10094_v8, 3 }
 0x30f   : > { %vm1610_vm5 = vcmp.lt.s32.totalorder %v10094_v8, 4  ;;  %v1611_v46 = vsel %vm1607_vm4, %v1591_v14, %v1594_v58  ;;  %v1891_v44 = vshrl.u32 %v1890_v21, 23  ;;  %v1615_v1 = vsel %vm1607_vm4, %v1594_v58, %v1597_v43 }
 0x310   : > { %v1447_v34 = vand.u32 2147483647, %v1446_v24  ;;  %v7353_v38 = vmin.u32 %v1745_v42, %v10124_v31  ;;  %v1612_v0 = vsel %vm1610_vm5, %v1600_v15, 2102212464  ;;  %v1616_v50 = vsel %vm1610_vm5, %v1603_v47, 920167782 }
 0x311   : > { %v1613_v45 = vsel %vm1609_vm3, %v1597_v43, %v1612_v0  ;;  %v1619_v51 = vsel %vm1607_vm4, %v1597_v43, %v1600_v15  ;;  %v1620_v37 = vsel %vm1610_vm5, %v1606_v41, 1326507024  ;;  %v1449_v36 = vcvt.s32.f32 %v1442_v35 }
 0x312   : > { %v1747_v39 = vclz %v7353_v38  ;;  %vm1608_vm6 = vcmp.lt.s32.totalorder %v10094_v8, 2  ;;  %v1617_v21 = vsel %vm1609_vm3, %v1600_v15, %v1616_v50  ;;  %v1621_v40 = vsel %vm1609_vm3, %v1603_v47, %v1620_v37 }
 0x313   : > { %v1618_v55 = vsel %vm1608_vm6, %v1615_v1, %v1617_v21  ;;  %v1623_v58 = vshll.u32 %v1583_v49, 8  ;;  %v7360_v27 = vadd.s32 4294967169, %v1891_v44  ;;  %v10151_v17 = vmul.f32 %v1449_v36, %v1447_v34 }
 0x314   : > { %v7354_v4 = vadd.s32 4294967294, %v1747_v39  ;;  %v1614_v57 = vsel %vm1608_vm6, %v1611_v46, %v1613_v45  ;;  %v1622_v5 = vsel %vm1608_vm6, %v1619_v51, %v1621_v40  ;;  %8616 = vcosq.f32 %v1559_v32 }
 0x315   : > { %v10153_v22 = vmul.u32.u64.low %v1623_v58, %v1622_v5  ;;  %v10154_v9 = vmul.u32.u64.high %v1623_v58, %v1622_v5, %v10153_v22  ;;  %v10156_v54 = vmul.u32.u64.low %v1623_v58, %v1618_v55  ;;  %v10157_v63 = vmul.u32.u64.high %v1623_v58, %v1618_v55, %v10156_v54 }
 0x316   : > { %vm7355_vm1 = vcmp.lt.s32.totalorder %v7354_v4, 0  ;;  %v1897_v8 = vadd.s32 1, %v7360_v27  ;;  %8618 = vsinq.f32 %v1559_v32  ;;  %v1735_v56 = vadd.s32 %v10073_v3, %v10080_v61 }
 0x317   : > { %v1750_v49 = vsel %vm7355_vm1, 0, %v7354_v4  ;;  %v1894_v43 = vand.u32 8388607, %v14373_v60  ;;  %v1630_v14 = vmul.u32 %v1623_v58, %v1614_v57  ;;  %v1451_v47 = vxor.u32 2147483648, %v10151_v17 }
 0x318   : > { %v1751_v15 = vsub.s32 32, %v1750_v49  ;;  %v1755_v18 = vsub.s32 4294967266, %v1750_v49  ;;  %vm1898_vm7 = vcmp.gt.s32.totalorder %v1897_v8, 0  ;;  %vm1632_vm8 = vc.u32 %v10154_v9, %v10156_v54 }
 0x319   : > { %v1633_v41 = vadd.s32 1, %v10157_v63  ;;  %v1899_v35 = vsel %vm1898_vm7, %v1897_v8, 0  ;;  %v1752_v32 = vshll.u32 %v10124_v31, %v1750_v49  ;;  %v1895_v46 = vor.u32 8388608, %v1894_v43 }
 0x31a   : > { %v1753_v24 = vshrl.u32 %v1735_v56, %v1751_v15  ;;  %v1756_v3 = vadd.s32 127, %v1755_v18  ;;  %v1901_v61 = vand.u32 31, %v1899_v35  ;;  %v10172_v44 = vadd.f32 %v9917_v2, %v9943_v20 }
 0x31b   : > { %v1634_v42 = vsel %vm1632_vm8, %v1633_v41, %v10157_v63  ;;  %v10176_v34 = vadd.f32 %v9953_v33, %v9917_v2  ;;  %v1900_v50 = vshrl.u32 %v1899_v35, 5  ;;  %vm1369_vm9 = vcmp.lt.s32.totalorder %v9923_v11, 0 }
 0x31c   : > { %v1754_v38 = vor.u32 %v1753_v24, %v1752_v32  ;;  %v1757_v0 = vshll.u32 %v1756_v3, 23  ;;  %v1635_v1 = vadd.s32 %v1634_v42, %v1630_v14  ;;  %v1902_v45 = vsub.s32 32, %v1901_v61 }
 0x31d   : > { %v1904_v31 = vshll.u32 %v14444_v29, %v1901_v61  ;;  %v1907_v51 = vshll.u32 %v14484_v7, %v1901_v61  ;;  %v1910_v37 = vshll.u32 %v14485_v6, %v1901_v61  ;;  %v1913_v20 = vshll.u32 %v14441_v59, %v1901_v61 }
 0x31e   : > { %v1758_v36 = vor.u32 4788187, %v1757_v0  ;;  %v1761_v39 = vcvt.s32.f32 %v1754_v38  ;;  %v1636_v21 = vadd.s32 536870912, %v1635_v1  ;;  %v1905_v55 = vshrl.u32 %v14484_v7, %v1902_v45  ;;  %v10186_v27 = vpop.eup %8616 }
 0x31f   : > { %v1908_v33 = vshrl.u32 %v14485_v6, %v1902_v45  ;;  %v1911_v40 = vshrl.u32 %v14441_v59, %v1902_v45  ;;  %v1914_v58 = vshrl.u32 %v14486_v62, %v1902_v45  ;;  %v1916_v5 = vshll.u32 %v14486_v62, %v1901_v61 }
 0x320   : > { %v1759_v4 = vand.u32 2147483647, %v1758_v36  ;;  %v10188_v57 = vshrl.u32 %v1636_v21, 30  ;;  %v1917_v22 = vshrl.u32 %v14487_v16, %v1902_v45  ;;  %v10192_v63 = vpop.eup %8618  ;;  %v1906_v8 = vor.u32 %v1905_v55, %v1904_v31 }
 0x321   : > { %v1909_v56 = vor.u32 %v1908_v33, %v1907_v51  ;;  %v1912_v49 = vor.u32 %v1911_v40, %v1910_v37  ;;  %v1915_v43 = vor.u32 %v1914_v58, %v1913_v20  ;;  %vm1681_vm2 = vcmp.lt.s32.totalorder %v9932_v12, 0 }
 0x322   : > { %v1762_v15 = vmul.f32 %v1761_v39, %v1759_v4  ;;  %v1638_v18 = vshll.u32 %v10188_v57, 30  ;;  %v1918_v14 = vor.u32 %v1917_v22, %v1916_v5  ;;  %v1935_v41 = vshll.u32 %v1895_v46, 8 }
 0x323   : > { %v1903_v35 = vshrl.u32 %v14444_v29, %v1902_v45  ;;  %vm1919_vm10 = vcmp.lt.s32.totalorder %v1900_v50, 1  ;;  %vm1922_vm11 = vcmp.lt.s32.totalorder %v1900_v50, 4  ;;  %v14374_v32 = vand.u32 2147483647, %v10172_v44 }
 0x324   : > { %v10199_v24 = vsub.s32 %v1635_v1, %v1638_v18  ;;  %vm1920_vm12 = vcmp.lt.s32.totalorder %v1900_v50, 2  ;;  %v1924_v3 = vsel %vm1922_vm11, %v1912_v49, 2102212464  ;;  %v1927_v61 = vsel %vm1919_vm10, %v1906_v8, %v1909_v56 }
 0x325   : > { %vm1921_vm14 = vcmp.lt.s32.totalorder %v1900_v50, 3  ;;  %v1928_v42 = vsel %vm1922_vm11, %v1915_v43, 920167782  ;;  %v1931_v38 = vsel %vm1919_vm10, %v1909_v56, %v1912_v49  ;;  %v1932_v0 = vsel %vm1922_vm11, %v1918_v14, 1326507024 }
 0x326   : > { %v1763_v31 = vxor.u32 2147483648, %v1762_v15  ;;  %v1641_v51 = vsub.s32 0, %v10199_v24  ;;  %v1923_v37 = vsel %vm1919_vm10, %v1903_v35, %v1906_v8  ;;  %v1929_v46 = vsel %vm1921_vm14, %v1912_v49, %v1928_v42 }
 0x327   : > { %v1925_v36 = vsel %vm1921_vm14, %v1909_v56, %v1924_v3  ;;  %v1930_v45 = vsel %vm1920_vm12, %v1927_v61, %v1929_v46  ;;  %v1933_v39 = vsel %vm1921_vm14, %v1915_v43, %v1932_v0  ;;  %v1786_v21 = vand.u32 2139095040, %v10172_v44 }
 0x328   : > { %v7349_v1 = vmin.u32 %v1641_v51, %v10199_v24  ;;  %v1934_v20 = vsel %vm1920_vm12, %v1931_v38, %v1933_v39  ;;  %v10206_v55 = vmul.u32.u64.low %v1935_v41, %v1930_v45  ;;  %v10207_v33 = vmul.u32.u64.high %v1935_v41, %v1930_v45, %v10206_v55 }
 0x329   : > { %v10210_v40 = vmul.u32.u64.low %v1935_v41, %v1934_v20  ;;  %v10211_v58 = vmul.u32.u64.high %v1935_v41, %v1934_v20, %v10210_v40  ;;  %v1787_v4 = vshrl.u32 %v1786_v21, 23  ;;  %v1790_v5 = vand.u32 8388607, %v14374_v32 }
 0x32a   : > { %v1643_v22 = vclz %v7349_v1  ;;  %v1926_v8 = vsel %vm1920_vm12, %v1923_v37, %v1925_v36  ;;  %v2098_v56 = vand.u32 2139095040, %v10176_v34  ;;  %v10219_v49 = vadd.f32 %v9917_v2, %v9957_v19 }
 0x32b   : > { %v10226_v43 = vsel %vm1369_vm9, %v1451_v47, %v10151_v17  ;;  %v10230_v18 = vsel %vm1681_vm2, %v1763_v31, %v1762_v15  ;;  %v1631_v50 = vadd.s32 %v10156_v54, %v10154_v9  ;;  %v7356_v14 = vadd.s32 4294967169, %v1787_v4 }
 0x32c   : > { %v7350_v35 = vadd.s32 4294967294, %v1643_v22  ;;  %v1945_v3 = vadd.s32 1, %v10207_v33  ;;  %v14372_v2 = vand.u32 2147483647, %v10176_v34  ;;  %v2099_v19 = vshrl.u32 %v2098_v56, 23 }
 0x32d   : > { %v1942_v61 = vmul.u32 %v1935_v41, %v1926_v8  ;;  %vm1944_vm0 = vc.u32 %v10211_v58, %v10206_v55  ;;  %v1791_v17 = vor.u32 8388608, %v1790_v5  ;;  %v1793_v47 = vadd.s32 1, %v7356_v14 }
 0x32e   : > { %vm7351_vm4 = vcmp.lt.s32.totalorder %v7350_v35, 0  ;;  %v1946_v15 = vsel %vm1944_vm0, %v1945_v3, %v10207_v33  ;;  %v7368_v42 = vadd.s32 4294967169, %v2099_v19  ;;  %v14371_v38 = vand.u32 2147483647, %v10219_v49 }
 0x32f   : > { %v1646_v9 = vsel %vm7351_vm4, 0, %v7350_v35  ;;  %v1947_v54 = vadd.s32 %v1946_v15, %v1942_v61  ;;  %vm1794_vm3 = vcmp.gt.s32.totalorder %v1793_v47, 0  ;;  %v1994_v0 = vand.u32 2139095040, %v10219_v49 }
 0x330   : > { %v1647_v31 = vsub.s32 32, %v1646_v9  ;;  %v1651_v51 = vsub.s32 4294967266, %v1646_v9  ;;  %v1795_v37 = vsel %vm1794_vm3, %v1793_v47, 0  ;;  %v10243_v41 = vand.u32 8388607, %v14372_v2 }
 0x331   : > { %v1648_v46 = vshll.u32 %v10199_v24, %v1646_v9  ;;  %v1948_v36 = vadd.s32 536870912, %v1947_v54  ;;  %v1797_v45 = vand.u32 31, %v1795_v37  ;;  %v10246_v39 = vshll.u32 %v1791_v17, 8 }
 0x332   : > { %v1649_v21 = vshrl.u32 %v1631_v50, %v1647_v31  ;;  %v1652_v1 = vadd.s32 127, %v1651_v51  ;;  %v1796_v20 = vshrl.u32 %v1795_v37, 5  ;;  %v2105_v33 = vadd.s32 1, %v7368_v42 }
 0x333   : > { %v10248_v40 = vshrl.u32 %v1948_v36, 30  ;;  %v1798_v4 = vsub.s32 32, %v1797_v45  ;;  %v1800_v5 = vshll.u32 %v14444_v29, %v1797_v45  ;;  %v1995_v22 = vshrl.u32 %v1994_v0, 23 }
 0x334   : > { %v1650_v8 = vor.u32 %v1649_v21, %v1648_v46  ;;  %v1653_v56 = vshll.u32 %v1652_v1, 23  ;;  %v1803_v14 = vshll.u32 %v14484_v7, %v1797_v45  ;;  %v1806_v24 = vshll.u32 %v14485_v6, %v1797_v45 }
 0x335   : > { %v1950_v35 = vshll.u32 %v10248_v40, 30  ;;  %v1801_v3 = vshrl.u32 %v14484_v7, %v1798_v4  ;;  %v1804_v50 = vshrl.u32 %v14485_v6, %v1798_v4  ;;  %v1809_v19 = vshll.u32 %v14441_v59, %v1797_v45 }
 0x336   : > { %v1654_v61 = vor.u32 4788187, %v1653_v56  ;;  %v1657_v17 = vcvt.s32.f32 %v1650_v8  ;;  %v1807_v47 = vshrl.u32 %v14441_v59, %v1798_v4  ;;  %v1810_v15 = vshrl.u32 %v14486_v62, %v1798_v4 }
 0x337   : > { %v10259_v42 = vsub.s32 %v1947_v54, %v1950_v35  ;;  %v1802_v9 = vor.u32 %v1801_v3, %v1800_v5  ;;  %v1805_v0 = vor.u32 %v1804_v50, %v1803_v14  ;;  %v1812_v31 = vshll.u32 %v14486_v62, %v1797_v45 }
 0x338   : > { %v1655_v51 = vand.u32 2147483647, %v1654_v61  ;;  %v1808_v37 = vor.u32 %v1807_v47, %v1806_v24  ;;  %v1811_v46 = vor.u32 %v1810_v15, %v1809_v19  ;;  %v1813_v36 = vshrl.u32 %v14487_v16, %v1798_v4 }
 0x339   : > { %vm1577_vm5 = vcmp.lt.s32.totalorder %v9937_v10, 0  ;;  %v1953_v21 = vsub.s32 0, %v10259_v42  ;;  %v1799_v1 = vshrl.u32 %v14444_v29, %v1798_v4  ;;  %vm1815_vm6 = vcmp.lt.s32.totalorder %v1796_v20, 1 }
 0x33a   : > { %vm1816_vm1 = vcmp.lt.s32.totalorder %v1796_v20, 2  ;;  %v1658_v8 = vmul.f32 %v1657_v17, %v1655_v51  ;;  %v1814_v54 = vor.u32 %v1813_v36, %v1812_v31  ;;  %vm1817_vm7 = vcmp.lt.s32.totalorder %v1796_v20, 3 }
 0x33b   : > { %vm1818_vm8 = vcmp.lt.s32.totalorder %v1796_v20, 4  ;;  %v7361_v5 = vmin.u32 %v1953_v21, %v10259_v42  ;;  %v1823_v56 = vsel %vm1815_vm6, %v1802_v9, %v1805_v0  ;;  %v1819_v24 = vsel %vm1815_vm6, %v1799_v1, %v1802_v9  ;;  %v2199_v1 = vld [vmem:[#allocation5] sm:$0xff] }
 0x33c   : > { %v1820_v45 = vsel %vm1818_vm8, %v1808_v37, 2102212464  ;;  %v1824_v14 = vsel %vm1818_vm8, %v1811_v46, 920167782  ;;  %v1827_v50 = vsel %vm1815_vm6, %v1805_v0, %v1808_v37  ;;  %v1828_v47 = vsel %vm1818_vm8, %v1814_v54, 1326507024 }
 0x33d   : > { %v1821_v35 = vsel %vm1817_vm7, %v1805_v0, %v1820_v45  ;;  %v1825_v3 = vsel %vm1817_vm7, %v1808_v37, %v1824_v14  ;;  %v1955_v19 = vclz %v7361_v5  ;;  %v2103_v4 = vor.u32 8388608, %v10243_v41  ;;  %v2200_v0 = vld [vmem:[#allocation5 + $0x8] sm:$0xff] }
 0x33e   : > { %v1826_v61 = vsel %vm1816_vm1, %v1823_v56, %v1825_v3  ;;  %v1659_v15 = vxor.u32 2147483648, %v1658_v8  ;;  %v1829_v17 = vsel %vm1817_vm7, %v1811_v46, %v1828_v47  ;;  %v1822_v21 = vsel %vm1816_vm1, %v1819_v24, %v1821_v35 }
 0x33f   : > { %v10270_v31 = vmul.u32.u64.low %v10246_v39, %v1826_v61  ;;  %v10271_v51 = vmul.u32.u64.high %v10246_v39, %v1826_v61, %v10270_v31  ;;  %v7362_v36 = vadd.s32 4294967294, %v1955_v19  ;;  %v1830_v9 = vsel %vm1816_vm1, %v1827_v50, %v1829_v17 }
 0x340   : > { %vm2106_vm10 = vcmp.gt.s32.totalorder %v2105_v33, 0  ;;  %v10276_v37 = vmul.u32.u64.low %v10246_v39, %v1830_v9  ;;  %v10277_v5 = vmul.u32.u64.high %v10246_v39, %v1830_v9, %v10276_v37  ;;  %v7364_v41 = vadd.s32 4294967169, %v1995_v22 }
 0x341   : > { %v2107_v54 = vsel %vm2106_vm10, %v2105_v33, 0  ;;  %v1943_v46 = vadd.s32 %v10206_v55, %v10211_v58  ;;  %vm7363_vm11 = vcmp.lt.s32.totalorder %v7362_v36, 0  ;;  %v10281_v56 = vshll.u32 %v2103_v4, 8 }
 0x342   : > { %v2109_v45 = vand.u32 31, %v2107_v54  ;;  %v10285_v20 = vsel %vm1577_vm5, %v1659_v15, %v1658_v8  ;;  %v1958_v14 = vsel %vm7363_vm11, 0, %v7362_v36  ;;  %v1841_v24 = vadd.s32 1, %v10271_v51 }
 0x343   : > { %v8081_v35 = vpack.c.bf16 %v2200_v0, %v2199_v1  ;;  %v1963_v3 = vsub.s32 4294967266, %v1958_v14  ;;  %v1838_v50 = vmul.u32 %v10246_v39, %v1822_v21  ;;  %v2108_v33 = vshrl.u32 %v2107_v54, 5 }
 0x344   : > { %v2110_v22 = vsub.s32 32, %v2109_v45  ;;  %v1959_v19 = vsub.s32 32, %v1958_v14  ;;  %vm1840_vm12 = vc.u32 %v10277_v5, %v10270_v31  ;;  %v10292_v55 = vand.u32 8388607, %v14371_v38 }
 0x345   : > { %v2001_v58 = vadd.s32 1, %v7364_v41  ;;  %8082 = vmatprep.subr.bf16.mxu0 %v8081_v35  ;;  %v1960_v8 = vshll.u32 %v10259_v42, %v1958_v14  ;;  %v1964_v61 = vadd.s32 127, %v1963_v3  ;;  %v10296_v47 = vadd.s32 %v10270_v31, %v10277_v5 }
 0x346   : > { %v1842_v4 = vsel %vm1840_vm12, %v1841_v24, %v10271_v51  ;;  %8084 = vmatpush3.bf16.msra.mxu0 %v8081_v35  ;;  %v2112_v15 = vshll.u32 %v14444_v29, %v2109_v45  ;;  %v2113_v17 = vshrl.u32 %v14484_v7, %v2110_v22  ;;  %v2116_v36 = vshrl.u32 %v14485_v6, %v2110_v22 }
 0x347   : > { %v1843_v39 = vadd.s32 %v1842_v4, %v1838_v50  ;;  %v1965_v21 = vshll.u32 %v1964_v61, 23  ;;  %v2115_v9 = vshll.u32 %v14484_v7, %v2109_v45  ;;  %v2118_v1 = vshll.u32 %v14485_v6, %v2109_v45 }
 0x348   : > { %v2119_v42 = vshrl.u32 %v14441_v59, %v2110_v22  ;;  %v2114_v31 = vor.u32 %v2113_v17, %v2112_v15  ;;  %v2121_v37 = vshll.u32 %v14441_v59, %v2109_v45  ;;  %v2122_v51 = vshrl.u32 %v14486_v62, %v2110_v22 }
 0x349   : > { %v1844_v0 = vadd.s32 536870912, %v1843_v39  ;;  %v1961_v5 = vshrl.u32 %v1943_v46, %v1959_v19  ;;  %v2111_v54 = vshrl.u32 %v14444_v29, %v2110_v22  ;;  %v2117_v41 = vor.u32 %v2116_v36, %v2115_v9 }
 0x34a   : > { %v2120_v14 = vor.u32 %v2119_v42, %v2118_v1  ;;  %v2123_v35 = vor.u32 %v2122_v51, %v2121_v37  ;;  %v2124_v3 = vshll.u32 %v14486_v62, %v2109_v45  ;;  %v2125_v50 = vshrl.u32 %v14487_v16, %v2110_v22 }
 0x34b   : > { %v10308_v24 = vshrl.u32 %v1844_v0, 30  ;;  %v1966_v61 = vor.u32 4788187, %v1965_v21  ;;  %vm2127_vm14 = vcmp.lt.s32.totalorder %v2108_v33, 1  ;;  %vm2129_vm0 = vcmp.lt.s32.totalorder %v2108_v33, 3 }
 0x34c   : > { %vm2130_vm4 = vcmp.lt.s32.totalorder %v2108_v33, 4  ;;  %v2126_v15 = vor.u32 %v2125_v50, %v2124_v3  ;;  %v2131_v17 = vsel %vm2127_vm14, %v2111_v54, %v2114_v31  ;;  %v1962_v19 = vor.u32 %v1961_v5, %v1960_v8  ;;  %v2202_v3 = vld [vmem:[#allocation5 + $0x18] sm:$0xff] }
 0x34d   : > { %v1846_v4 = vshll.u32 %v10308_v24, 30  ;;  %v2132_v46 = vsel %vm2130_vm4, %v2120_v14, 2102212464  ;;  %v2135_v9 = vsel %vm2127_vm14, %v2114_v31, %v2117_v41  ;;  %v2136_v1 = vsel %vm2130_vm4, %v2123_v35, 920167782 }
 0x34e   : > { %v2133_v36 = vsel %vm2129_vm0, %v2117_v41, %v2132_v46  ;;  %vm2128_vm3 = vcmp.lt.s32.totalorder %v2108_v33, 2  ;;  %v2137_v45 = vsel %vm2129_vm0, %v2120_v14, %v2136_v1  ;;  %v2139_v22 = vsel %vm2127_vm14, %v2117_v41, %v2120_v14  ;;  %v2203_v14 = vld [vmem:[#allocation5 + $0x20] sm:$0xff]  ;;  %v2205_v46 = vld [vmem:[#allocation5 + $0x30] sm:$0xff] }
 0x34f   : > { %v10316_v42 = vsub.s32 %v1843_v39, %v1846_v4  ;;  %v1967_v21 = vand.u32 2147483647, %v1966_v61  ;;  %v2134_v0 = vsel %vm2128_vm3, %v2131_v17, %v2133_v36  ;;  %v2138_v37 = vsel %vm2128_vm3, %v2135_v9, %v2137_v45  ;;  %v2201_v39 = vld [vmem:[#allocation5 + $0x10] sm:$0xff]  ;;  %v2204_v61 = vld [vmem:[#allocation5 + $0x28] sm:$0xff]  ;;  %v2206_v36 = vld [vmem:[#allocation5 + $0x38] sm:$0xff] }
 0x350   : > { %v2140_v51 = vsel %vm2130_vm4, %v2126_v15, 1326507024  ;;  %v10323_v5 = vmul.u32.u64.low %v10281_v56, %v2138_v37  ;;  %v10324_v31 = vmul.u32.u64.high %v10281_v56, %v2138_v37, %v10323_v5  ;;  %v1969_v50 = vcvt.s32.f32 %v1962_v19 }
 0x351   : > { %v1849_v54 = vsub.s32 0, %v10316_v42  ;;  %v2141_v8 = vsel %vm2129_vm0, %v2123_v35, %v2140_v51  ;;  %v1999_v41 = vor.u32 8388608, %v10292_v55  ;;  %vm2002_vm6 = vcmp.gt.s32.totalorder %v2001_v58, 0 }
 0x352   : > { %v2142_v4 = vsel %vm2128_vm3, %v2139_v22, %v2141_v8  ;;  %v2003_v35 = vsel %vm2002_vm6, %v2001_v58, 0  ;;  %v10333_v9 = vmul.f32 %v1969_v50, %v1967_v21  ;;  %v2150_v1 = vmul.u32 %v10281_v56, %v2134_v0 }
 0x353   : > { %v7357_v15 = vmin.u32 %v1849_v54, %v10316_v42  ;;  %v10330_v17 = vmul.u32.u64.low %v10281_v56, %v2142_v4  ;;  %v10331_v33 = vmul.u32.u64.high %v10281_v56, %v2142_v4, %v10330_v17  ;;  %v2005_v19 = vand.u32 31, %v2003_v35 }
 0x354   : > { %v8085_v45 = vpack.c.bf16 %v2202_v3, %v2201_v39  ;;  %v2153_v55 = vadd.s32 1, %v10324_v31  ;;  %v10337_v37 = vshrl.u32 %v2003_v35, 5  ;;  %v8089_v51 = vpack.c.bf16 %v2204_v61, %v2203_v14 }
 0x355   : > { %v1851_v22 = vclz %v7357_v15  ;;  %v2006_v54 = vsub.s32 32, %v2005_v19  ;;  %v2008_v8 = vshll.u32 %v14444_v29, %v2005_v19  ;;  %v10340_v4 = vshll.u32 %v1999_v41, 8 }
 0x356   : > { %8086 = vmatprep.subr.bf16.mxu0 %v8085_v45  ;;  %v8093_v58 = vpack.c.bf16 %v2206_v36, %v2205_v46  ;;  %vm2152_vm1 = vc.u32 %v10331_v33, %v10323_v5  ;;  %v2011_v56 = vshll.u32 %v14484_v7, %v2005_v19  ;;  %v2014_v21 = vshll.u32 %v14485_v6, %v2005_v19 }
 0x357   : > { %v7358_v17 = vadd.s32 4294967294, %v1851_v22  ;;  %8088 = vmatpush3.bf16.msra.mxu0 %v8085_v45  ;;  %v2154_v0 = vsel %vm2152_vm1, %v2153_v55, %v10324_v31  ;;  %v2009_v39 = vshrl.u32 %v14484_v7, %v2006_v54  ;;  %v2012_v3 = vshrl.u32 %v14485_v6, %v2006_v54 }
 0x358   : > { %v2017_v50 = vshll.u32 %v14441_v59, %v2005_v19  ;;  %8090 = vmatprep.subr.bf16.mxu0 %v8089_v51  ;;  %v2155_v41 = vadd.s32 %v2154_v0, %v2150_v1  ;;  %v2015_v14 = vshrl.u32 %v14441_v59, %v2006_v54  ;;  %v2018_v61 = vshrl.u32 %v14486_v62, %v2006_v54 }
 0x359   : > { %vm7359_vm7 = vcmp.lt.s32.totalorder %v7358_v17, 0  ;;  %v2007_v35 = vshrl.u32 %v14444_v29, %v2006_v54  ;;  %v2010_v46 = vor.u32 %v2009_v39, %v2008_v8  ;;  %v2013_v36 = vor.u32 %v2012_v3, %v2011_v56 }
 0x35a   : > { %v1854_v15 = vsel %vm7359_vm7, 0, %v7358_v17  ;;  %v2156_v22 = vadd.s32 536870912, %v2155_v41  ;;  %v2020_v55 = vshll.u32 %v14486_v62, %v2005_v19  ;;  %v2016_v2 = vor.u32 %v2015_v14, %v2014_v21  ;;  %v2208_v21 = vld [vmem:[#allocation5 + $0x48] sm:$0xff] }
 0x35b   : > { %v1855_v45 = vsub.s32 32, %v1854_v15  ;;  %v1859_v31 = vsub.s32 4294967266, %v1854_v15  ;;  %8092 = vmatpush3.bf16.msra.mxu0 %v8089_v51  ;;  %v1856_v38 = vshll.u32 %v10316_v42, %v1854_v15  ;;  %v2019_v60 = vor.u32 %v2018_v61, %v2017_v50  ;;  %v2209_v15 = vld [vmem:[#allocation5 + $0x50] sm:$0xff] }
 0x35c   : > { %v2021_v1 = vshrl.u32 %v14487_v16, %v2006_v54  ;;  %8094 = vmatprep.subr.bf16.mxu0 %v8093_v58  ;;  %v10357_v32 = vshrl.u32 %v2156_v22, 30  ;;  %vm2023_vm8 = vcmp.lt.s32.totalorder %v10337_v37, 1  ;;  %vm10362_vm10 = vcmp.le.f32.partialorder %v1367_v30, 0.7853982  ;;  %v2207_v30 = vld [vmem:[#allocation5 + $0x40] sm:$0xff] }
 0x35d   : > { %v1857_v0 = vshrl.u32 %v10296_v47, %v1855_v45  ;;  %v1860_v17 = vadd.s32 127, %v1859_v31  ;;  %vm2025_vm11 = vcmp.lt.s32.totalorder %v10337_v37, 3  ;;  %vm2026_vm12 = vcmp.lt.s32.totalorder %v10337_v37, 4 }
 0x35e   : > { %v2022_v19 = vor.u32 %v2021_v1, %v2020_v55  ;;  %v2027_v42 = vsel %vm2023_vm8, %v2007_v35, %v2010_v46  ;;  %v2158_v54 = vshll.u32 %v10357_v32, 30  ;;  %v2028_v56 = vsel %vm2026_vm12, %v2016_v2, 2102212464  ;;  %v2210_v35 = vld [vmem:[#allocation5 + $0x58] sm:$0xff] }
 0x35f   : > { %v1858_v47 = vor.u32 %v1857_v0, %v1856_v38  ;;  %v1861_v51 = vshll.u32 %v1860_v17, 23  ;;  %8096 = vmatpush3.bf16.msra.mxu0 %v8093_v58  ;;  %vm2024_vm14 = vcmp.lt.s32.totalorder %v10337_v37, 2  ;;  %v2029_v39 = vsel %vm2025_vm11, %v2013_v36, %v2028_v56  ;;  %v2211_v0 = vld [vmem:[#allocation5 + $0x60] sm:$0xff]  ;;  %v2212_v17 = vld [vmem:[#allocation5 + $0x68] sm:$0xff] }
 0x360   : > { %v2031_v3 = vsel %vm2023_vm8, %v2010_v46, %v2013_v36  ;;  %v2032_v38 = vsel %vm2026_vm12, %v2019_v60, 920167782  ;;  %v10380_v61 = vsub.s32 %v2155_v41, %v2158_v54  ;;  %v2035_v58 = vsel %vm2023_vm8, %v2013_v36, %v2016_v2 }
 0x361   : > { %v1862_v50 = vor.u32 4788187, %v1861_v51  ;;  %v1865_v14 = vcvt.s32.f32 %v1858_v47  ;;  %v2030_v45 = vsel %vm2024_vm14, %v2027_v42, %v2029_v39  ;;  %v2033_v31 = vsel %vm2025_vm11, %v2016_v2, %v2032_v38  ;;  %v2214_v39 = vld [vmem:[#allocation5 + $0x78] sm:$0xff] }
 0x362   : > { %v2036_v46 = vsel %vm2026_vm12, %v2022_v19, 1326507024  ;;  %v8097_v22 = vpack.c.bf16 %v2208_v21, %v2207_v30  ;;  %v2161_v1 = vsub.s32 0, %v10380_v61  ;;  %v2034_v41 = vsel %vm2024_vm14, %v2031_v3, %v2033_v31  ;;  %v2213_v21 = vld [vmem:[#allocation5 + $0x70] sm:$0xff] }
 0x363   : > { %v1863_v55 = vand.u32 2147483647, %v1862_v50  ;;  %v2037_v36 = vsel %vm2025_vm11, %v2019_v60, %v2036_v46  ;;  %v10398_v2 = vmul.u32.u64.low %v10340_v4, %v2034_v41  ;;  %v10399_v47 = vmul.u32.u64.high %v10340_v4, %v2034_v41, %v10398_v2 }
 0x364   : > { %v2038_v42 = vsel %vm2024_vm14, %v2035_v58, %v2037_v36  ;;  %8098 = vmatprep.subr.bf16.mxu0 %v8097_v22  ;;  %v8101_v19 = vpack.c.bf16 %v2210_v35, %v2209_v15  ;;  %v7369_v54 = vmin.u32 %v2161_v1, %v10380_v61  ;;  %v1971_v60 = vxor.u32 2147483648, %v10333_v9 }
 0x365   : > { %v10402_v51 = vmul.f32 %v1865_v14, %v1863_v55  ;;  %v10406_v56 = vmul.u32.u64.low %v10340_v4, %v2038_v42  ;;  %v10407_v30 = vmul.u32.u64.high %v10340_v4, %v2038_v42, %v10406_v56  ;;  %8100 = vmatpush3.bf16.msra.mxu0 %v8097_v22  ;;  %v8105_v37 = vpack.c.bf16 %v2212_v17, %v2211_v0 }
 0x366   : > { %8102 = vmatprep.subr.bf16.mxu0 %v8101_v19  ;;  %v1453_v3 = vsub.s32 4, %v10064_v53  ;;  %v1455_v38 = vsel %vm10362_vm10, %v9923_v11, %v10226_v43  ;;  %v2151_v50 = vadd.s32 %v10323_v5, %v10331_v33  ;;  %v2163_v14 = vclz %v7369_v54 }
 0x367   : > { %8620 = vcosq.f32 %v1455_v38  ;;  %v1557_v58 = vsub.s32 4, %v10033_v25  ;;  %v2046_v15 = vmul.u32 %v10340_v4, %v2030_v45  ;;  %v2049_v35 = vadd.s32 1, %v10399_v47 }
 0x368   : > { %v1454_v31 = vsel %vm1369_vm9, %v1453_v3, %v10064_v53  ;;  %8622 = vsinq.f32 %v1455_v38  ;;  %v1867_v46 = vxor.u32 2147483648, %v10402_v51  ;;  %v7370_v22 = vadd.s32 4294967294, %v2163_v14 }
 0x369   : > { %vm2048_vm0 = vc.u32 %v10407_v30, %v10398_v2  ;;  %8104 = vmatpush3.bf16.msra.mxu0 %v8101_v19  ;;  %v8109_v43 = vpack.c.bf16 %v2214_v39, %v2213_v21  ;;  %v1456_v33 = vsel %vm10362_vm10, 0, %v1454_v31  ;;  %v1558_v4 = vsel %vm1473_vm15, %v1557_v58, %v10033_v25 }
 0x36a   : > { %v2050_v5 = vsel %vm2048_vm0, %v2049_v35, %v10399_v47  ;;  %8106 = vmatprep.subr.bf16.mxu0 %v8105_v37  ;;  %v1568_v53 = vxor.u32 2147483648, %v10192_v63  ;;  %vm7371_vm9 = vcmp.lt.s32.totalorder %v7370_v22, 0  ;;  %v1460_v55 = vadd.s32 3, %v1456_v33 }
 0x36b   : > { %v2051_v45 = vadd.s32 %v2050_v5, %v2046_v15  ;;  %v1560_v1 = vsel %vm10102_vm13, 0, %v1558_v4  ;;  %v2166_v41 = vsel %vm7371_vm9, 0, %v7370_v22  ;;  %v1571_v0 = vxor.u32 2147483648, %v10186_v27 }
 0x36c   : > { %v1564_v36 = vadd.s32 3, %v1560_v1  ;;  %v1661_v17 = vsub.s32 4, %v10188_v57  ;;  %v2167_v8 = vsub.s32 32, %v2166_v41  ;;  %v2171_v42 = vsub.s32 4294967266, %v2166_v41 }
 0x36d   : > { %v2052_v47 = vadd.s32 536870912, %v2051_v45  ;;  %8108 = vmatpush3.bf16.msra.mxu0 %v8105_v37  ;;  %vm1563_vm15 = vweird.f32 %v9920_v23  ;;  %vm10440_vm4 = vcmp.le.f32.partialorder %v1575_v48, 0.7853982  ;;  %v2168_v26 = vshll.u32 %v10380_v61, %v2166_v41 }
 0x36e   : > { %8110 = vmatprep.subr.bf16.mxu0 %v8109_v43  ;;  %vm1459_vm13 = vweird.f32 %v9923_v11  ;;  %v1461_v19 = vand.u32 3, %v1460_v55  ;;  %v1565_v54 = vand.u32 3, %v1564_v36  ;;  %v1662_v56 = vsel %vm1577_vm5, %v1661_v17, %v10188_v57 }
 0x36f   : > { %v2169_v37 = vshrl.u32 %v2151_v50, %v2167_v8  ;;  %v2172_v21 = vadd.s32 127, %v2171_v42  ;;  %v10449_v39 = vshrl.u32 %v2052_v47, 30  ;;  %v1663_v48 = vsel %vm10440_vm4, %v9937_v10, %v10285_v20 }
 0x370   : > { %vm1462_vm3 = vcmp.lt.s32.totalorder %v1461_v19, 2  ;;  %vm1463_vm6 = vcmp.eq.s32.totalorder %v1461_v19, 0  ;;  %vm1466_vm1 = vcmp.eq.s32.totalorder %v1461_v19, 2  ;;  %v1664_v61 = vsel %vm10440_vm4, 0, %v1662_v56 }
 0x371   : > { %v8621_v3 = vpop.eup %8620  ;;  %v2170_v38 = vor.u32 %v2169_v37, %v2168_v26  ;;  %v2173_v14 = vshll.u32 %v2172_v21, 23  ;;  %v2054_v57 = vshll.u32 %v10449_v39, 30  ;;  %8112 = vmatpush3.bf16.msra.mxu0 %v8109_v43  ;;  %vm1567_vm5 = vcmp.eq.s32.totalorder %v1565_v54, 0 }
 0x372   : > { %v8623_v50 = vpop.eup %8622  ;;  %v1467_v58 = vxor.u32 2147483648, %v8621_v3  ;;  %vm1566_vm7 = vcmp.lt.s32.totalorder %v1565_v54, 2  ;;  %v1569_v15 = vsel %vm1567_vm5, %v10186_v27, %v1568_v53  ;;  %8624 = vcosq.f32 %v1663_v48 }
 0x373   : > { %v2174_v20 = vor.u32 4788187, %v2173_v14  ;;  %v10459_v35 = vsub.s32 %v2051_v45, %v2054_v57  ;;  %v1464_v31 = vxor.u32 2147483648, %v8623_v50  ;;  %vm1570_vm8 = vcmp.eq.s32.totalorder %v1565_v54, 2 }
 0x374   : > { %v2177_v22 = vcvt.s32.f32 %v2170_v38  ;;  %v1468_v5 = vsel %vm1466_vm1, %v1467_v58, %v8623_v50  ;;  %v1572_v33 = vsel %vm1570_vm8, %v1571_v0, %v10192_v63  ;;  %8626 = vsinq.f32 %v1663_v48 }
 0x375   : > { %v2175_v4 = vand.u32 2147483647, %v2174_v20  ;;  %v2057_v43 = vsub.s32 0, %v10459_v35  ;;  %v1465_v55 = vsel %vm1463_vm6, %v8621_v3, %v1464_v31  ;;  %v1573_v1 = vsel %vm1566_vm7, %v1569_v15, %v1572_v33 }
 0x376   : > { %v1469_v27 = vsel %vm1462_vm3, %v1465_v55, %v1468_v5  ;;  %v1574_v53 = vsel %vm1563_vm15, nan, %v1573_v1  ;;  %v1668_v45 = vadd.s32 3, %v1664_v61  ;;  %vm10470_vm10 = vcmp.le.f32.partialorder %v1679_v28, 0.7853982 }
 0x377   : > { %v10474_v63 = vmul.f32 %v2177_v22, %v2175_v4  ;;  %v7365_v36 = vmin.u32 %v2057_v43, %v10459_v35  ;;  %v1470_v0 = vsel %vm1459_vm13, nan, %v1469_v27  ;;  %v1765_v17 = vsub.s32 4, %v10114_v13 }
 0x378   : > { %vm1889_vm11 = vcmp.lt.s32.totalorder %v10088_v52, 0  ;;  %vm1785_vm12 = vcmp.lt.s32.totalorder %v10172_v44, 0  ;;  %7817 = vmatprep.mubr.f32.mxu0 %v1470_v0  ;;  %v1669_v23 = vand.u32 3, %v1668_v45  ;;  %v1767_v28 = vsel %vm10470_vm10, %v9932_v12, %v10230_v18 }
 0x379   : > { %v1868_v11 = vsel %vm1785_vm12, %v1867_v46, %v10402_v51  ;;  %v2059_v8 = vclz %v7365_v36  ;;  %7818 = vmatmul.mubr.f32.vlgmr.msra.gmra.mrb[8].mxu0 %v1574_v53  ;;  %v1766_v42 = vsel %vm1681_vm2, %v1765_v17, %v10114_v13  ;;  %8628 = vcosq.f32 %v1767_v28 }
 0x37a   : > { %v1972_v47 = vsel %vm1889_vm11, %v1971_v60, %v10333_v9  ;;  %v2047_v18 = vadd.s32 %v10398_v2, %v10407_v30  ;;  %vm1667_vm14 = vweird.f32 %v9937_v10  ;;  %v1768_v51 = vsel %vm10470_vm10, 0, %v1766_v42 }
 0x37b   : > { %v2179_v46 = vxor.u32 2147483648, %v10474_v63  ;;  %v7366_v25 = vadd.s32 4294967294, %v2059_v8  ;;  %8630 = vsinq.f32 %v1767_v28  ;;  %v14496_v13 = vand.u32 2147483647, %v10172_v44 }
 0x37c   : > { %v8625_v19 = vpop.eup %8624  ;;  %vm1670_vm0 = vcmp.lt.s32.totalorder %v1669_v23, 2  ;;  %v1772_v9 = vadd.s32 3, %v1768_v51  ;;  %v1869_v2 = vsub.s32 4, %v10308_v24  ;;  %vm1671_vm15 = vcmp.eq.s32.totalorder %v1669_v23, 0 }
 0x37d   : > { %vm10507_vm2 = vcmp.le.f32.partialorder %v14496_v13, 0.7853982  ;;  %vm7367_vm9 = vcmp.lt.s32.totalorder %v7366_v25, 0  ;;  %v1675_v60 = vxor.u32 2147483648, %v8625_v19  ;;  %v1973_v21 = vsub.s32 4, %v10248_v40 }
 0x37e   : > { %v1871_v30 = vsel %vm10507_vm2, %v10172_v44, %v1868_v11  ;;  %v8627_v54 = vpop.eup %8626  ;;  %v2062_v56 = vsel %vm7367_vm9, 0, %v7366_v25  ;;  %v1870_v37 = vsel %vm1785_vm12, %v1869_v2, %v10308_v24  ;;  %vm1674_vm4 = vcmp.eq.s32.totalorder %v1669_v23, 2 }
 0x37f   : > { %8632 = vcosq.f32 %v1871_v30  ;;  %v2063_v48 = vsub.s32 32, %v2062_v56  ;;  %v2067_v61 = vsub.s32 4294967266, %v2062_v56  ;;  %v1672_v3 = vxor.u32 2147483648, %v8627_v54 }
 0x380   : > { %8634 = vsinq.f32 %v1871_v30  ;;  %v2064_v38 = vshll.u32 %v10459_v35, %v2062_v56  ;;  %v1676_v14 = vsel %vm1674_vm4, %v1675_v60, %v8627_v54  ;;  %v1773_v57 = vand.u32 3, %v1772_v9 }
 0x381   : > { %v14499_v50 = vand.u32 2147483647, %v10088_v52  ;;  %v2065_v15 = vshrl.u32 %v2047_v18, %v2063_v48  ;;  %v2068_v20 = vadd.s32 127, %v2067_v61  ;;  %v1673_v24 = vsel %vm1671_vm15, %v8625_v19, %v1672_v3 }
 0x382   : > { %v1872_v31 = vsel %vm10507_vm2, 0, %v1870_v37  ;;  %v1677_v22 = vsel %vm1670_vm0, %v1673_v24, %v1676_v14  ;;  %v1974_v35 = vsel %vm1889_vm11, %v1973_v21, %v10248_v40  ;;  %vm2097_vm3 = vcmp.lt.s32.totalorder %v10176_v34, 0 }
 0x383   : > { %vm10522_vm13 = vcmp.le.f32.partialorder %v14499_v50, 0.7853982  ;;  %v1876_v5 = vadd.s32 3, %v1872_v31  ;;  %v8629_v4 = vpop.eup %8628  ;;  %v2066_v43 = vor.u32 %v2065_v15, %v2064_v38  ;;  %v2069_v55 = vshll.u32 %v2068_v20, 23 }
 0x384   : > { %v1975_v33 = vsel %vm10522_vm13, %v10088_v52, %v1972_v47  ;;  %v1678_v1 = vsel %vm1667_vm14, nan, %v1677_v22  ;;  %vm1993_vm6 = vcmp.lt.s32.totalorder %v10219_v49, 0  ;;  %v1779_v27 = vxor.u32 2147483648, %v8629_v4 }
 0x385   : > { %7820 = vmatprep.mubr.f32.mxu0 %v1678_v1  ;;  %v1877_v53 = vand.u32 3, %v1876_v5  ;;  %v1976_v40 = vsel %vm10522_vm13, 0, %v1974_v35  ;;  %8636 = vcosq.f32 %v1975_v33  ;;  %v8631_v45 = vpop.eup %8630  ;;  %v2070_v41 = vor.u32 4788187, %v2069_v55 }
 0x386   : > { %vm1771_vm1 = vweird.f32 %v9932_v12  ;;  %vm1778_vm5 = vcmp.eq.s32.totalorder %v1773_v57, 2  ;;  %8638 = vsinq.f32 %v1975_v33  ;;  %v2180_v10 = vsel %vm2097_vm3, %v2179_v46, %v10474_v63 }
 0x387   : > { %v1776_v36 = vxor.u32 2147483648, %v8631_v45  ;;  %v1780_v0 = vsel %vm1778_vm5, %v1779_v27, %v8631_v45  ;;  %vm1875_vm7 = vweird.f32 %v10172_v44  ;;  %v2071_v23 = vand.u32 2147483647, %v2070_v41 }
 0x388   : > { %v2073_v28 = vcvt.s32.f32 %v2066_v43  ;;  %vm1775_vm8 = vcmp.eq.s32.totalorder %v1773_v57, 0  ;;  %v1980_v11 = vadd.s32 3, %v1976_v40  ;;  %vm1774_vm10 = vcmp.lt.s32.totalorder %v1773_v57, 2 }
 0x389   : > { %v8633_v17 = vpop.eup %8632  ;;  %v1777_v42 = vsel %vm1775_vm8, %v8629_v4, %v1776_v36  ;;  %vm1882_vm11 = vcmp.eq.s32.totalorder %v1877_v53, 2  ;;  %v2077_v13 = vsub.s32 4, %v10449_v39  ;;  %vm1878_vm12 = vcmp.lt.s32.totalorder %v1877_v53, 2 }
 0x38a   : > { %v8635_v8 = vpop.eup %8634  ;;  %v1883_v47 = vxor.u32 2147483648, %v8633_v17  ;;  %v2074_v18 = vmul.f32 %v2073_v28, %v2071_v23  ;;  %v1781_v51 = vsel %vm1774_vm10, %v1777_v42, %v1780_v0  ;;  %vm1879_vm14 = vcmp.eq.s32.totalorder %v1877_v53, 0  ;;  %v10589_v28 = vld [vmem:[%s14324_s4 + $0x2] ss:$0 sm:$0xff] }
 0x38b   : > { %v1880_v25 = vxor.u32 2147483648, %v8635_v8  ;;  %v1782_v63 = vsel %vm1771_vm1, nan, %v1781_v51  ;;  %v1981_v9 = vand.u32 3, %v1980_v11  ;;  %v14502_v2 = vand.u32 2147483647, %v10176_v34 }
 0x38c   : > { %v1884_v46 = vsel %vm1882_vm11, %v1883_v47, %v8635_v8  ;;  %v2075_v26 = vxor.u32 2147483648, %v2074_v18  ;;  %7821 = vmatmul.mubr.f32.gmra.mrb[10].mxu0 %v1782_v63  ;;  %v14505_v54 = vand.u32 2147483647, %v10219_v49  ;;  %v2181_v12 = vsub.s32 4, %v10357_v32 }
 0x38d   : > { %v1881_v19 = vsel %vm1879_vm14, %v8633_v17, %v1880_v25  ;;  %vm10552_vm2 = vcmp.le.f32.partialorder %v14502_v2, 0.7853982  ;;  %v2078_v61 = vsel %vm1993_vm6, %v2077_v13, %v10449_v39  ;;  %vm1986_vm9 = vcmp.eq.s32.totalorder %v1981_v9, 2 }
 0x38e   : > { %v1885_v60 = vsel %vm1878_vm12, %v1881_v19, %v1884_v46  ;;  %vm10558_vm0 = vcmp.le.f32.partialorder %v14505_v54, 0.7853982  ;;  %v2183_v37 = vsel %vm10552_vm2, %v10176_v34, %v2180_v10  ;;  %v2076_v21 = vsel %vm1993_vm6, %v2075_v26, %v2074_v18 }
 0x38f   : > { %v1886_v48 = vsel %vm1875_vm7, nan, %v1885_v60  ;;  %8640 = vcosq.f32 %v2183_v37  ;;  %v8637_v3 = vpop.eup %8636  ;;  %v2079_v38 = vsel %vm10558_vm0, %v10219_v49, %v2076_v21  ;;  %v2182_v14 = vsel %vm2097_vm3, %v2181_v12, %v10357_v32 }
 0x390   : > { %7823 = vmatprep.mubr.f32.mxu0 %v1886_v48  ;;  %8642 = vsinq.f32 %v2183_v37  ;;  %v8639_v57 = vpop.eup %8638  ;;  %v1987_v50 = vxor.u32 2147483648, %v8637_v3  ;;  %v2184_v44 = vsel %vm10552_vm2, 0, %v2182_v14  ;;  %v2080_v39 = vsel %vm10558_vm0, 0, %v2078_v61 }
 0x391   : > { %8644 = vcosq.f32 %v2079_v38  ;;  %v1984_v58 = vxor.u32 2147483648, %v8639_v57  ;;  %vm1983_vm15 = vcmp.eq.s32.totalorder %v1981_v9, 0  ;;  %v2188_v20 = vadd.s32 3, %v2184_v44 }
 0x392   : > { %8646 = vsinq.f32 %v2079_v38  ;;  %v1988_v15 = vsel %vm1986_vm9, %v1987_v50, %v8639_v57  ;;  %vm1982_vm4 = vcmp.lt.s32.totalorder %v1981_v9, 2  ;;  %vm1979_vm13 = vweird.f32 %v10088_v52 }
 0x393   : > { %v1985_v24 = vsel %vm1983_vm15, %v8637_v3, %v1984_v58  ;;  %v2084_v31 = vadd.s32 3, %v2080_v39  ;;  %v2189_v5 = vand.u32 3, %v2188_v20  ;;  %vm2083_vm10 = vweird.f32 %v10219_v49 }
 0x394   : > { %v1989_v32 = vsel %vm1982_vm4, %v1985_v24, %v1988_v15  ;;  %vm2187_vm11 = vweird.f32 %v10176_v34 }
 0x395   : > { %v1990_v22 = vsel %vm1979_vm13, nan, %v1989_v32  ;;  %v2085_v33 = vand.u32 3, %v2084_v31  ;;  %vm2194_vm3 = vcmp.eq.s32.totalorder %v2189_v5, 2  ;;  %vm2191_vm6 = vcmp.eq.s32.totalorder %v2189_v5, 0 }
 0x396   : > { %7824 = vmatmul.mubr.f32.gmra.mrb[12].mxu0 %v1990_v22  ;;  %vm2190_vm7 = vcmp.lt.s32.totalorder %v2189_v5, 2 }
 0x397   : > { %vm2090_vm1 = vcmp.eq.s32.totalorder %v2085_v33, 2  ;;  %vm2087_vm5 = vcmp.eq.s32.totalorder %v2085_v33, 0  ;;  %vm2086_vm8 = vcmp.lt.s32.totalorder %v2085_v33, 2 }
 0x399   : > { %v8641_v35 = vpop.eup %8640 }
 0x39a   : > { %v8643_v4 = vpop.eup %8642  ;;  %v2195_v43 = vxor.u32 2147483648, %v8641_v35 }
 0x39b   : > { %v8645_v55 = vpop.eup %8644  ;;  %v2192_v1 = vxor.u32 2147483648, %v8643_v4 }
 0x39c   : > { %v8647_v27 = vpop.eup %8646  ;;  %v2091_v53 = vxor.u32 2147483648, %v8645_v55  ;;  %v2196_v40 = vsel %vm2194_vm3, %v2195_v43, %v8643_v4 }
 0x39d   : > { %v2088_v45 = vxor.u32 2147483648, %v8647_v27  ;;  %v2193_v41 = vsel %vm2191_vm6, %v8641_v35, %v2192_v1 }
 0x39e   : > { %v2092_v52 = vsel %vm2090_vm1, %v2091_v53, %v8647_v27  ;;  %v2197_v36 = vsel %vm2190_vm7, %v2193_v41, %v2196_v40 }
 0x39f   : > { %v2089_v10 = vsel %vm2087_vm5, %v8645_v55, %v2088_v45  ;;  %v2198_v23 = vsel %vm2187_vm11, nan, %v2197_v36 }
 0x3a0   : > { %v2093_v0 = vsel %vm2086_vm8, %v2089_v10, %v2092_v52 }
 0x3a1   : > { %v2094_v17 = vsel %vm2083_vm10, nan, %v2093_v0 }
 0x3a2   : > { %7826 = vmatprep.mubr.f32.mxu0 %v2094_v17 }
 0x3a3   : > { %7827 = vmatmul.mubr.f32.gmra.mrb[14].mxu0 %v2198_v23 }
 0x44c   : > { %v7819_v11 = vpop.f32.mrb[8].mxu0 }
 0x44d   : > { %v10592_v8 = vadd.f32 %v7819_v11, %v10589_v28  ;;  %v2289_v42 = vpop.f32.mrb[9].mxu0 }
 0x44e   : > { %v10595_v47 = vadd.f32 %v10589_v28, %v2289_v42 }
 0x44f   : > { %v2432_v49 = vand.u32 2147483647, %v10592_v8  ;;  %v2435_v34 = vand.u32 2139095040, %v10592_v8 }
 0x450   : > { %v2328_v18 = vand.u32 2147483647, %v10595_v47  ;;  %v2331_v51 = vand.u32 2139095040, %v10595_v47 }
 0x451   : > { %v2436_v25 = vshrl.u32 %v2435_v34, 23  ;;  %v2439_v13 = vand.u32 8388607, %v2432_v49 }
 0x452   : > { %v2332_v63 = vshrl.u32 %v2331_v51, 23  ;;  %v2335_v46 = vand.u32 8388607, %v2328_v18 }
 0x453   : > { %v7378_v26 = vadd.s32 4294967169, %v2436_v25  ;;  %v2440_v2 = vor.u32 8388608, %v2439_v13 }
 0x454   : > { %v7374_v19 = vadd.s32 4294967169, %v2332_v63  ;;  %v2336_v30 = vor.u32 8388608, %v2335_v46 }
 0x455   : > { %v2442_v9 = vadd.s32 1, %v7378_v26  ;;  %v10605_v21 = vshll.u32 %v2440_v2, 8 }
 0x456   : > { %v2338_v60 = vadd.s32 1, %v7374_v19  ;;  %v10607_v48 = vshll.u32 %v2336_v30, 8 }
 0x457   : > { %vm2443_vm12 = vcmp.gt.s32.totalorder %v2442_v9, 0 }
 0x458   : > { %v2444_v54 = vsel %vm2443_vm12, %v2442_v9, 0  ;;  %vm2339_vm14 = vcmp.gt.s32.totalorder %v2338_v60, 0  ;;  %vm2434_vm12 = vcmp.lt.s32.totalorder %v10592_v8, 0 }
 0x459   : > { %v2445_v56 = vshrl.u32 %v2444_v54, 5  ;;  %v2446_v12 = vand.u32 31, %v2444_v54  ;;  %v2340_v37 = vsel %vm2339_vm14, %v2338_v60, 0 }
 0x45a   : > { %v10610_v38 = vshrl.u32 %v2340_v37, 5  ;;  %v2342_v14 = vand.u32 31, %v2340_v37 }
 0x45b   : > { %v2447_v61 = vsub.s32 32, %v2446_v12  ;;  %v2449_v3 = vshll.u32 %v14444_v29, %v2446_v12  ;;  %v2452_v57 = vshll.u32 %v14484_v7, %v2446_v12  ;;  %v2455_v50 = vshll.u32 %v14485_v6, %v2446_v12 }
 0x45c   : > { %v2458_v44 = vshll.u32 %v14441_v59, %v2446_v12  ;;  %v2461_v58 = vshll.u32 %v14486_v62, %v2446_v12  ;;  %vm2464_vm2 = vcmp.lt.s32.totalorder %v2445_v56, 1  ;;  %vm2465_vm0 = vcmp.lt.s32.totalorder %v2445_v56, 2 }
 0x45d   : > { %v2450_v39 = vshrl.u32 %v14484_v7, %v2447_v61  ;;  %v2453_v15 = vshrl.u32 %v14485_v6, %v2447_v61  ;;  %v2456_v20 = vshrl.u32 %v14441_v59, %v2447_v61  ;;  %v2448_v24 = vshrl.u32 %v14444_v29, %v2447_v61 }
 0x45e   : > { %v2459_v32 = vshrl.u32 %v14486_v62, %v2447_v61  ;;  %v2462_v31 = vshrl.u32 %v14487_v16, %v2447_v61  ;;  %v2343_v4 = vsub.s32 32, %v2342_v14  ;;  %vm2466_vm9 = vcmp.lt.s32.totalorder %v2445_v56, 3 }
 0x45f   : > { %v10622_v22 = vpop.f32.mrb[10].mxu0  ;;  %v2451_v5 = vor.u32 %v2450_v39, %v2449_v3  ;;  %v2454_v35 = vor.u32 %v2453_v15, %v2452_v57  ;;  %v2457_v33 = vor.u32 %v2456_v20, %v2455_v50  ;;  %vm2467_vm15 = vcmp.lt.s32.totalorder %v2445_v56, 4 }
 0x460   : > { %v10624_v43 = vpop.f32.mrb[11].mxu0  ;;  %v2460_v55 = vor.u32 %v2459_v32, %v2458_v44  ;;  %v2463_v1 = vor.u32 %v2462_v31, %v2461_v58  ;;  %v2345_v36 = vshll.u32 %v14444_v29, %v2342_v14  ;;  %v2346_v23 = vshrl.u32 %v14484_v7, %v2343_v4 }
 0x461   : > { %v2468_v27 = vsel %vm2464_vm2, %v2448_v24, %v2451_v5  ;;  %v2469_v53 = vsel %vm2467_vm15, %v2457_v33, 2102212464  ;;  %v2472_v40 = vsel %vm2464_vm2, %v2451_v5, %v2454_v35  ;;  %v2476_v45 = vsel %vm2464_vm2, %v2454_v35, %v2457_v33 }
 0x462   : > { %v2470_v41 = vsel %vm2466_vm9, %v2454_v35, %v2469_v53  ;;  %v2473_v52 = vsel %vm2467_vm15, %v2460_v55, 920167782  ;;  %v2477_v10 = vsel %vm2467_vm15, %v2463_v1, 1326507024  ;;  %v2348_v11 = vshll.u32 %v14484_v7, %v2342_v14 }
 0x463   : > { %v2474_v0 = vsel %vm2466_vm9, %v2457_v33, %v2473_v52  ;;  %v2478_v17 = vsel %vm2466_vm9, %v2460_v55, %v2477_v10  ;;  %v2471_v42 = vsel %vm2465_vm0, %v2468_v27, %v2470_v41  ;;  %v2349_v25 = vshrl.u32 %v14485_v6, %v2343_v4 }
 0x464   : > { %v2475_v34 = vsel %vm2465_vm0, %v2472_v40, %v2474_v0  ;;  %v2479_v51 = vsel %vm2465_vm0, %v2476_v45, %v2478_v17  ;;  %v2347_v19 = vor.u32 %v2346_v23, %v2345_v36  ;;  %v2351_v2 = vshll.u32 %v14485_v6, %v2342_v14 }
 0x465   : > { %v10637_v13 = vmul.u32.u64.low %v10605_v21, %v2479_v51  ;;  %v10638_v63 = vmul.u32.u64.high %v10605_v21, %v2479_v51, %v10637_v13  ;;  %v10641_v46 = vmul.u32.u64.low %v10605_v21, %v2475_v34  ;;  %v10642_v26 = vmul.u32.u64.high %v10605_v21, %v2475_v34, %v10641_v46 }
 0x466   : > { %v2350_v9 = vor.u32 %v2349_v25, %v2348_v11  ;;  %v2352_v30 = vshrl.u32 %v14441_v59, %v2343_v4  ;;  %v2344_v60 = vshrl.u32 %v14444_v29, %v2343_v4  ;;  %v2354_v54 = vshll.u32 %v14441_v59, %v2342_v14 }
 0x467   : > { %v2355_v56 = vshrl.u32 %v14486_v62, %v2343_v4  ;;  %v2358_v12 = vshrl.u32 %v14487_v16, %v2343_v4  ;;  %v2487_v37 = vmul.u32 %v10605_v21, %v2471_v42  ;;  %v2357_v3 = vshll.u32 %v14486_v62, %v2342_v14 }
 0x468   : > { %v2353_v61 = vor.u32 %v2352_v30, %v2351_v2  ;;  %vm2360_vm4 = vcmp.lt.s32.totalorder %v10610_v38, 1  ;;  %vm2489_vm13 = vc.u32 %v10638_v63, %v10641_v46  ;;  %v2490_v50 = vadd.s32 1, %v10642_v26 }
 0x469   : > { %v7825_v57 = vpop.f32.mrb[12].mxu0  ;;  %v2356_v44 = vor.u32 %v2355_v56, %v2354_v54  ;;  %vm2361_vm3 = vcmp.lt.s32.totalorder %v10610_v38, 2  ;;  %v2359_v39 = vor.u32 %v2358_v12, %v2357_v3  ;;  %vm2362_vm6 = vcmp.lt.s32.totalorder %v10610_v38, 3 }
 0x46a   : > { %v10658_v58 = vpop.f32.mrb[13].mxu0  ;;  %vm2363_vm1 = vcmp.lt.s32.totalorder %v10610_v38, 4  ;;  %v2368_v21 = vsel %vm2360_vm4, %v2347_v19, %v2350_v9  ;;  %v2491_v14 = vsel %vm2489_vm13, %v2490_v50, %v10642_v26  ;;  %v2372_v24 = vsel %vm2360_vm4, %v2350_v9, %v2353_v61 }
 0x46b   : > { %v2365_v15 = vsel %vm2363_vm1, %v2353_v61, 2102212464  ;;  %v2369_v20 = vsel %vm2363_vm1, %v2356_v44, 920167782  ;;  %v2492_v32 = vadd.s32 %v2491_v14, %v2487_v37  ;;  %v2364_v31 = vsel %vm2360_vm4, %v2344_v60, %v2347_v19 }
 0x46c   : > { %v2370_v5 = vsel %vm2362_vm6, %v2353_v61, %v2369_v20  ;;  %v2373_v35 = vsel %vm2363_vm1, %v2359_v39, 1326507024  ;;  %v2366_v33 = vsel %vm2362_vm6, %v2350_v9, %v2365_v15  ;;  %v10673_v1 = vadd.f32 %v10622_v22, %v10589_v28 }
 0x46d   : > { %v2371_v4 = vsel %vm2361_vm3, %v2368_v21, %v2370_v5  ;;  %v2374_v55 = vsel %vm2362_vm6, %v2356_v44, %v2373_v35  ;;  %v2493_v27 = vadd.s32 536870912, %v2492_v32  ;;  %v2367_v22 = vsel %vm2361_vm3, %v2364_v31, %v2366_v33 }
 0x46e   : > { %v2375_v53 = vsel %vm2361_vm3, %v2372_v24, %v2374_v55  ;;  %v10678_v40 = vmul.u32.u64.low %v10607_v48, %v2371_v4  ;;  %v10679_v45 = vmul.u32.u64.high %v10607_v48, %v2371_v4, %v10678_v40  ;;  %v14379_v10 = vand.u32 2147483647, %v10673_v1 }
 0x46f   : > { %v10682_v41 = vmul.u32.u64.low %v10607_v48, %v2375_v53  ;;  %v10683_v52 = vmul.u32.u64.high %v10607_v48, %v2375_v53, %v10682_v41  ;;  %v10686_v36 = vshrl.u32 %v2493_v27, 30  ;;  %v2643_v0 = vand.u32 2139095040, %v10673_v1 }
 0x470   : > { %v10693_v17 = vadd.f32 %v10589_v28, %v10624_v43  ;;  %v2386_v11 = vadd.s32 1, %v10679_v45  ;;  %v2647_v34 = vand.u32 8388607, %v14379_v10  ;;  %v2383_v51 = vmul.u32 %v10607_v48, %v2367_v22  ;;  %v3176_v10 = vld [vmem:[#allocation5 + $0xf8] sm:$0xff] }
 0x471   : > { %v2495_v23 = vshll.u32 %v10686_v36, 30  ;;  %v2644_v42 = vshrl.u32 %v2643_v0, 23  ;;  %vm2385_vm5 = vc.u32 %v10683_v52, %v10678_v40  ;;  %v10703_v25 = vadd.f32 %v7825_v57, %v10589_v28 }
 0x472   : > { %v14380_v38 = vand.u32 2147483647, %v10693_v17  ;;  %v2387_v43 = vsel %vm2385_vm5, %v2386_v11, %v10679_v45  ;;  %v2539_v19 = vand.u32 2139095040, %v10693_v17  ;;  %v2648_v48 = vor.u32 8388608, %v2647_v34 }
 0x473   : > { %v2496_v13 = vsub.s32 %v2492_v32, %v2495_v23  ;;  %v7386_v26 = vadd.s32 4294967169, %v2644_v42  ;;  %v2388_v2 = vadd.s32 %v2387_v43, %v2383_v51  ;;  %v14377_v61 = vand.u32 2147483647, %v10703_v25 }
 0x474   : > { %v2540_v12 = vshrl.u32 %v2539_v19, 23  ;;  %v10713_v37 = vand.u32 8388607, %v14380_v38  ;;  %v2851_v57 = vand.u32 2139095040, %v10703_v25  ;;  %v2488_v50 = vadd.s32 %v10641_v46, %v10638_v63 }
 0x475   : > { %v2498_v60 = vsub.s32 0, %v2496_v13  ;;  %v2650_v54 = vadd.s32 1, %v7386_v26  ;;  %v2389_v56 = vadd.s32 536870912, %v2388_v2  ;;  %v10722_v14 = vadd.s32 %v10678_v40, %v10683_v52 }
 0x476   : > { %v10707_v9 = vpop.f32.mrb[14].mxu0  ;;  %v10724_v20 = vshll.u32 %v2648_v48, 8  ;;  %v7382_v32 = vadd.s32 4294967169, %v2540_v12  ;;  %v2544_v31 = vor.u32 8388608, %v10713_v37  ;;  %v10730_v5 = vand.u32 8388607, %v14377_v61 }
 0x477   : > { %v10709_v30 = vpop.f32.mrb[15].mxu0  ;;  %v7379_v3 = vmin.u32 %v2498_v60, %v2496_v13  ;;  %vm2651_vm7 = vcmp.gt.s32.totalorder %v2650_v54, 0  ;;  %v10719_v44 = vshrl.u32 %v2389_v56, 30  ;;  %v10734_v33 = vshrl.u32 %v2851_v57, 23 }
 0x478   : > { %v2652_v39 = vsel %vm2651_vm7, %v2650_v54, 0  ;;  %v2546_v57 = vadd.s32 1, %v7382_v32  ;;  %vm10761_vm2 = vcmp.le.f32.partialorder %v2432_v49, 0.7853982 }
 0x479   : > { %v2500_v21 = vclz %v7379_v3  ;;  %v2654_v15 = vand.u32 31, %v2652_v39  ;;  %v2391_v24 = vshll.u32 %v10719_v44, 30  ;;  %v10732_v46 = vshrl.u32 %v2652_v39, 5 }
 0x47a   : > { %vm2547_vm15 = vcmp.gt.s32.totalorder %v2546_v57, 0 }
 0x47b   : > { %v7380_v63 = vadd.s32 4294967294, %v2500_v21  ;;  %v2655_v35 = vsub.s32 32, %v2654_v15  ;;  %v10736_v4 = vsub.s32 %v2388_v2, %v2391_v24  ;;  %v2657_v55 = vshll.u32 %v14444_v29, %v2654_v15 }
 0x47c   : > { %v2660_v27 = vshll.u32 %v14484_v7, %v2654_v15  ;;  %v2663_v53 = vshll.u32 %v14485_v6, %v2654_v15  ;;  %v2666_v41 = vshll.u32 %v14441_v59, %v2654_v15  ;;  %v2669_v51 = vshll.u32 %v14486_v62, %v2654_v15 }
 0x47d   : > { %vm7381_vm8 = vcmp.lt.s32.totalorder %v7380_v63, 0  ;;  %v2658_v40 = vshrl.u32 %v14484_v7, %v2655_v35  ;;  %v2661_v45 = vshrl.u32 %v14485_v6, %v2655_v35  ;;  %v2394_v22 = vsub.s32 0, %v10736_v4 }
 0x47e   : > { %v2503_v52 = vsel %vm7381_vm8, 0, %v7380_v63  ;;  %v2664_v0 = vshrl.u32 %v14441_v59, %v2655_v35  ;;  %v2667_v23 = vshrl.u32 %v14486_v62, %v2655_v35  ;;  %v2670_v56 = vshrl.u32 %v14487_v16, %v2655_v35 }
 0x47f   : > { %v2504_v11 = vsub.s32 32, %v2503_v52  ;;  %v2505_v42 = vshll.u32 %v2496_v13, %v2503_v52  ;;  %v2508_v34 = vsub.s32 4294967266, %v2503_v52  ;;  %v7375_v43 = vmin.u32 %v2394_v22, %v10736_v4 }
 0x480   : > { %v2659_v26 = vor.u32 %v2658_v40, %v2657_v55  ;;  %v2662_v19 = vor.u32 %v2661_v45, %v2660_v27  ;;  %v2668_v2 = vor.u32 %v2667_v23, %v2666_v41  ;;  %v2665_v54 = vor.u32 %v2664_v0, %v2663_v53 }
 0x481   : > { %v2506_v60 = vshrl.u32 %v2488_v50, %v2504_v11  ;;  %v2509_v48 = vadd.s32 127, %v2508_v34  ;;  %v2396_v12 = vclz %v7375_v43  ;;  %v2656_v3 = vshrl.u32 %v14444_v29, %v2655_v35 }
 0x482   : > { %vm2672_vm10 = vcmp.lt.s32.totalorder %v10732_v46, 1  ;;  %v2671_v21 = vor.u32 %v2670_v56, %v2669_v51  ;;  %vm2675_vm11 = vcmp.lt.s32.totalorder %v10732_v46, 4  ;;  %vm2674_vm14 = vcmp.lt.s32.totalorder %v10732_v46, 3 }
 0x483   : > { %v2507_v13 = vor.u32 %v2506_v60, %v2505_v42  ;;  %v2510_v39 = vshll.u32 %v2509_v48, 23  ;;  %v7376_v15 = vadd.s32 4294967294, %v2396_v12  ;;  %v2680_v50 = vsel %vm2672_vm10, %v2659_v26, %v2662_v19 }
 0x484   : > { %v2681_v24 = vsel %vm2675_vm11, %v2668_v2, 920167782  ;;  %vm2673_vm0 = vcmp.lt.s32.totalorder %v10732_v46, 2  ;;  %v2677_v35 = vsel %vm2675_vm11, %v2665_v54, 2102212464  ;;  %v2676_v27 = vsel %vm2672_vm10, %v2656_v3, %v2659_v26 }
 0x485   : > { %v2511_v63 = vor.u32 4788187, %v2510_v39  ;;  %v2682_v55 = vsel %vm2674_vm14, %v2665_v54, %v2681_v24  ;;  %vm7377_vm9 = vcmp.lt.s32.totalorder %v7376_v15, 0  ;;  %v2684_v49 = vsel %vm2672_vm10, %v2662_v19, %v2665_v54 }
 0x486   : > { %v2683_v53 = vsel %vm2673_vm0, %v2680_v50, %v2682_v55  ;;  %v2514_v45 = vcvt.s32.f32 %v2507_v13  ;;  %v2399_v41 = vsel %vm7377_vm9, 0, %v7376_v15  ;;  %v2685_v52 = vsel %vm2675_vm11, %v2671_v21, 1326507024 }
 0x487   : > { %v2512_v40 = vand.u32 2147483647, %v2511_v63  ;;  %v2400_v22 = vsub.s32 32, %v2399_v41  ;;  %v2404_v0 = vsub.s32 4294967266, %v2399_v41  ;;  %v2678_v23 = vsel %vm2674_vm14, %v2662_v19, %v2677_v35 }
 0x488   : > { %v2686_v11 = vsel %vm2674_vm14, %v2668_v2, %v2685_v52  ;;  %v10785_v51 = vmul.u32.u64.low %v10724_v20, %v2683_v53  ;;  %v10786_v43 = vmul.u32.u64.high %v10724_v20, %v2683_v53, %v10785_v51  ;;  %v7394_v2 = vadd.s32 4294967169, %v10734_v33 }
 0x489   : > { %v2515_v42 = vmul.f32 %v2514_v45, %v2512_v40  ;;  %v2687_v34 = vsel %vm2673_vm0, %v2684_v49, %v2686_v11  ;;  %v2402_v26 = vshrl.u32 %v10722_v14, %v2400_v22  ;;  %v2405_v60 = vadd.s32 127, %v2404_v0 }
 0x48a   : > { %v10791_v48 = vmul.u32.u64.low %v10724_v20, %v2687_v34  ;;  %v10792_v54 = vmul.u32.u64.high %v10724_v20, %v2687_v34, %v10791_v48  ;;  %v10797_v56 = vadd.f32 %v10589_v28, %v10658_v58  ;;  %v2401_v12 = vshll.u32 %v10736_v4, %v2399_v41 }
 0x48b   : > { %v2516_v19 = vxor.u32 2147483648, %v2515_v42  ;;  %v2406_v3 = vshll.u32 %v2405_v60, 23  ;;  %v2679_v13 = vsel %vm2673_vm0, %v2676_v27, %v2678_v23  ;;  %v2548_v14 = vsel %vm2547_vm15, %v2546_v57, 0 }
 0x48c   : > { %v2698_v21 = vadd.s32 1, %v10786_v43  ;;  %v2550_v15 = vand.u32 31, %v2548_v14  ;;  %v10807_v33 = vshll.u32 %v2544_v31, 8  ;;  %v2403_v4 = vor.u32 %v2402_v26, %v2401_v12 }
 0x48d   : > { %v2517_v39 = vsel %vm2434_vm12, %v2516_v19, %v2515_v42  ;;  %v2407_v50 = vor.u32 4788187, %v2406_v3  ;;  %v2856_v46 = vor.u32 8388608, %v10730_v5  ;;  %v2695_v57 = vmul.u32 %v10724_v20, %v2679_v13 }
 0x48e   : > { %v10812_v58 = vsel %vm10761_vm2, %v10592_v8, %v2517_v39  ;;  %vm2697_vm4 = vc.u32 %v10792_v54, %v10785_v51  ;;  %v2551_v24 = vsub.s32 32, %v2550_v15  ;;  %v2858_v63 = vadd.s32 1, %v7394_v2 }
 0x48f   : > { %v2408_v35 = vand.u32 2147483647, %v2407_v50  ;;  %v2699_v37 = vsel %vm2697_vm4, %v2698_v21, %v10786_v43  ;;  %v2549_v31 = vshrl.u32 %v2548_v14, 5  ;;  %v2553_v55 = vshll.u32 %v14444_v29, %v2550_v15 }
 0x490   : > { %v2700_v27 = vadd.s32 %v2699_v37, %v2695_v57  ;;  %v2554_v53 = vshrl.u32 %v14484_v7, %v2551_v24  ;;  %v2556_v49 = vshll.u32 %v14484_v7, %v2550_v15  ;;  %v2557_v5 = vshrl.u32 %v14485_v6, %v2551_v24 }
 0x491   : > { %v2410_v40 = vcvt.s32.f32 %v2403_v4  ;;  %v2559_v20 = vshll.u32 %v14485_v6, %v2550_v15  ;;  %v2560_v45 = vshrl.u32 %v14441_v59, %v2551_v24  ;;  %v2562_v41 = vshll.u32 %v14441_v59, %v2550_v15 }
 0x492   : > { %v2701_v52 = vadd.s32 536870912, %v2700_v27  ;;  %v2555_v22 = vor.u32 %v2554_v53, %v2553_v55  ;;  %v2558_v0 = vor.u32 %v2557_v5, %v2556_v49  ;;  %v2563_v23 = vshrl.u32 %v14486_v62, %v2551_v24 }
 0x493   : > { %v2561_v11 = vor.u32 %v2560_v45, %v2559_v20  ;;  %v2565_v42 = vshll.u32 %v14486_v62, %v2550_v15  ;;  %v2566_v34 = vshrl.u32 %v14487_v16, %v2551_v24  ;;  %v2747_v43 = vand.u32 2139095040, %v10797_v56 }
 0x494   : > { %v10830_v26 = vmul.f32 %v2410_v40, %v2408_v35  ;;  %v10832_v60 = vshrl.u32 %v2701_v52, 30  ;;  %v2552_v48 = vshrl.u32 %v14444_v29, %v2551_v24  ;;  %v2564_v19 = vor.u32 %v2563_v23, %v2562_v41 }
 0x495   : > { %v2567_v2 = vor.u32 %v2566_v34, %v2565_v42  ;;  %vm2568_vm13 = vcmp.lt.s32.totalorder %v2549_v31, 1  ;;  %vm2570_vm3 = vcmp.lt.s32.totalorder %v2549_v31, 3  ;;  %vm2571_vm6 = vcmp.lt.s32.totalorder %v2549_v31, 4 }
 0x496   : > { %v2703_v12 = vshll.u32 %v10832_v60, 30  ;;  %v2572_v3 = vsel %vm2568_vm13, %v2552_v48, %v2555_v22  ;;  %v2573_v13 = vsel %vm2571_vm6, %v2561_v11, 2102212464  ;;  %v2576_v14 = vsel %vm2568_vm13, %v2555_v22, %v2558_v0 }
 0x497   : > { %v2574_v39 = vsel %vm2570_vm3, %v2558_v0, %v2573_v13  ;;  %v2577_v21 = vsel %vm2571_vm6, %v2564_v19, 920167782  ;;  %v2580_v15 = vsel %vm2568_vm13, %v2558_v0, %v2561_v11  ;;  %v2581_v4 = vsel %vm2571_vm6, %v2567_v2, 1326507024 }
 0x498   : > { %v10836_v50 = vsub.s32 %v2700_v27, %v2703_v12  ;;  %vm2569_vm1 = vcmp.lt.s32.totalorder %v2549_v31, 2  ;;  %v2578_v57 = vsel %vm2570_vm3, %v2561_v11, %v2577_v21  ;;  %v2582_v35 = vsel %vm2570_vm3, %v2564_v19, %v2581_v4 }
 0x499   : > { %v2575_v24 = vsel %vm2569_vm1, %v2572_v3, %v2574_v39  ;;  %v2579_v37 = vsel %vm2569_vm1, %v2576_v14, %v2578_v57  ;;  %v2583_v55 = vsel %vm2569_vm1, %v2580_v15, %v2582_v35  ;;  %vm2859_vm5 = vcmp.gt.s32.totalorder %v2858_v63, 0 }
 0x49a   : > { %v2706_v53 = vsub.s32 0, %v10836_v50  ;;  %v10840_v49 = vmul.u32.u64.low %v10807_v33, %v2583_v55  ;;  %v10841_v5 = vmul.u32.u64.high %v10807_v33, %v2583_v55, %v10840_v49  ;;  %v2860_v40 = vsel %vm2859_vm5, %v2858_v63, 0 }
 0x49b   : > { %v10844_v20 = vmul.u32.u64.low %v10807_v33, %v2579_v37  ;;  %v10845_v45 = vmul.u32.u64.high %v10807_v33, %v2579_v37, %v10844_v20  ;;  %v2862_v27 = vand.u32 31, %v2860_v40  ;;  %v2696_v31 = vadd.s32 %v10785_v51, %v10792_v54 }
 0x49c   : > { %v7387_v41 = vmin.u32 %v2706_v53, %v10836_v50  ;;  %v10851_v52 = vshll.u32 %v2856_v46, 8  ;;  %v14378_v22 = vand.u32 2147483647, %v10797_v56  ;;  %v2412_v0 = vxor.u32 2147483648, %v10830_v26 }
 0x49d   : > { %v2591_v23 = vmul.u32 %v10807_v33, %v2575_v24  ;;  %v10856_v63 = vshrl.u32 %v2860_v40, 5  ;;  %v2863_v11 = vsub.s32 32, %v2862_v27  ;;  %vm2593_vm7 = vc.u32 %v10841_v5, %v10844_v20 }
 0x49e   : > { %v2708_v42 = vclz %v7387_v41  ;;  %v2865_v34 = vshll.u32 %v14444_v29, %v2862_v27  ;;  %v2748_v51 = vshrl.u32 %v2747_v43, 23  ;;  %v2594_v54 = vadd.s32 1, %v10845_v45 }
 0x49f   : > { %v2866_v46 = vshrl.u32 %v14484_v7, %v2863_v11  ;;  %v2868_v48 = vshll.u32 %v14484_v7, %v2862_v27  ;;  %v2869_v19 = vshrl.u32 %v14485_v6, %v2863_v11  ;;  %v2871_v33 = vshll.u32 %v14485_v6, %v2862_v27 }
 0x4a0   : > { %v7388_v2 = vadd.s32 4294967294, %v2708_v42  ;;  %v2872_v12 = vshrl.u32 %v14441_v59, %v2863_v11  ;;  %v2875_v3 = vshrl.u32 %v14486_v62, %v2863_v11  ;;  %v2595_v13 = vsel %vm2593_vm7, %v2594_v54, %v10845_v45 }
 0x4a1   : > { %v2874_v14 = vshll.u32 %v14441_v59, %v2862_v27  ;;  %v2877_v43 = vshll.u32 %v14486_v62, %v2862_v27  ;;  %v2878_v39 = vshrl.u32 %v14487_v16, %v2863_v11  ;;  %v2596_v21 = vadd.s32 %v2595_v13, %v2591_v23 }
 0x4a2   : > { %vm7389_vm8 = vcmp.lt.s32.totalorder %v7388_v2, 0  ;;  %v2867_v15 = vor.u32 %v2866_v46, %v2865_v34  ;;  %v2870_v4 = vor.u32 %v2869_v19, %v2868_v48  ;;  %v2873_v35 = vor.u32 %v2872_v12, %v2871_v33 }
 0x4a3   : > { %v2711_v57 = vsel %vm7389_vm8, 0, %v7388_v2  ;;  %v2876_v24 = vor.u32 %v2875_v3, %v2874_v14  ;;  %v2879_v37 = vor.u32 %v2878_v39, %v2877_v43  ;;  %v2597_v53 = vadd.s32 536870912, %v2596_v21 }
 0x4a4   : > { %v2716_v55 = vsub.s32 4294967266, %v2711_v57  ;;  %v10874_v49 = vand.u32 8388607, %v14378_v22  ;;  %v10878_v40 = vadd.f32 %v10707_v9, %v10589_v28  ;;  %vm2330_vm10 = vcmp.lt.s32.totalorder %v10595_v47, 0  ;;  %v3175_v22 = vld [vmem:[#allocation5 + $0xf0] sm:$0xff] }
 0x4a5   : > { %v2712_v45 = vsub.s32 32, %v2711_v57  ;;  %v2864_v27 = vshrl.u32 %v14444_v29, %v2863_v11  ;;  %vm2880_vm11 = vcmp.lt.s32.totalorder %v10856_v63, 1  ;;  %vm2881_vm14 = vcmp.lt.s32.totalorder %v10856_v63, 2 }
 0x4a6   : > { %v2713_v41 = vshll.u32 %v10836_v50, %v2711_v57  ;;  %v2717_v23 = vadd.s32 127, %v2716_v55  ;;  %v10885_v42 = vshrl.u32 %v2597_v53, 30  ;;  %vm2883_vm0 = vcmp.lt.s32.totalorder %v10856_v63, 4 }
 0x4a7   : > { %v2885_v34 = vsel %vm2883_vm0, %v2873_v35, 2102212464  ;;  %v2888_v9 = vsel %vm2880_vm11, %v2867_v15, %v2870_v4  ;;  %v2889_v54 = vsel %vm2883_vm0, %v2876_v24, 920167782  ;;  %v2893_v46 = vsel %vm2883_vm0, %v2879_v37, 1326507024 }
 0x4a8   : > { %v2718_v48 = vshll.u32 %v2717_v23, 23  ;;  %v2599_v11 = vshll.u32 %v10885_v42, 30  ;;  %vm2882_vm9 = vcmp.lt.s32.totalorder %v10856_v63, 3  ;;  %v2892_v19 = vsel %vm2880_vm11, %v2870_v4, %v2873_v35 }
 0x4a9   : > { %v2714_v50 = vshrl.u32 %v2696_v31, %v2712_v45  ;;  %v2890_v2 = vsel %vm2882_vm9, %v2873_v35, %v2889_v54  ;;  %v2894_v33 = vsel %vm2882_vm9, %v2876_v24, %v2893_v46  ;;  %v7390_v12 = vadd.s32 4294967169, %v2748_v51 }
 0x4aa   : > { %v10894_v3 = vsub.s32 %v2596_v21, %v2599_v11  ;;  %v2884_v13 = vsel %vm2880_vm11, %v2864_v27, %v2867_v15  ;;  %v2886_v14 = vsel %vm2882_vm9, %v2870_v4, %v2885_v34  ;;  %v2891_v43 = vsel %vm2881_vm14, %v2888_v9, %v2890_v2  ;;  %v3161_v15 = vld [vmem:[#allocation5 + $0x80] sm:$0xff]  ;;  %v3162_v4 = vld [vmem:[#allocation5 + $0x88] sm:$0xff] }
 0x4ab   : > { %v2719_v39 = vor.u32 4788187, %v2718_v48  ;;  %v2895_v57 = vsel %vm2881_vm14, %v2892_v19, %v2894_v33  ;;  %v10903_v37 = vmul.u32.u64.low %v10851_v52, %v2891_v43  ;;  %v10904_v55 = vmul.u32.u64.high %v10851_v52, %v2891_v43, %v10903_v37 }
 0x4ac   : > { %8648 = vcosq.f32 %v10812_v58  ;;  %v2602_v31 = vsub.s32 0, %v10894_v3  ;;  %v10910_v51 = vmul.u32.u64.low %v10851_v52, %v2895_v57  ;;  %v10911_v21 = vmul.u32.u64.high %v10851_v52, %v2895_v57, %v10910_v51 }
 0x4ad   : > { %8650 = vsinq.f32 %v10812_v58  ;;  %v2715_v35 = vor.u32 %v2714_v50, %v2713_v41  ;;  %v2887_v24 = vsel %vm2881_vm14, %v2884_v13, %v2886_v14  ;;  %v2754_v53 = vadd.s32 1, %v7390_v12 }
 0x4ae   : > { %v10921_v45 = vsel %vm2330_vm10, %v2412_v0, %v10830_v26  ;;  %v7383_v27 = vmin.u32 %v2602_v31, %v10894_v3  ;;  %v2752_v23 = vor.u32 8388608, %v10874_v49  ;;  %v3059_v34 = vand.u32 2139095040, %v10878_v40 }
 0x4af   : > { %v2720_v9 = vand.u32 2147483647, %v2719_v39  ;;  %v2906_v58 = vadd.s32 1, %v10904_v55  ;;  %vm2755_vm15 = vcmp.gt.s32.totalorder %v2754_v53, 0  ;;  %v8113_v63 = vpack.c.bf16 %v3162_v4, %v3161_v15 }
 0x4b0   : > { %v2604_v41 = vclz %v7383_v27  ;;  %v2903_v54 = vmul.u32 %v10851_v52, %v2887_v24  ;;  %vm2905_vm4 = vc.u32 %v10911_v21, %v10903_v37  ;;  %v14376_v26 = vand.u32 2147483647, %v10878_v40 }
 0x4b1   : > { %v2722_v0 = vcvt.s32.f32 %v2715_v35  ;;  %v2907_v46 = vsel %vm2905_vm4, %v2906_v58, %v10904_v55  ;;  %v2756_v48 = vsel %vm2755_vm15, %v2754_v53, 0  ;;  %v3060_v49 = vshrl.u32 %v3059_v34, 23  ;;  %8114 = vmatprep.subr.bf16.mxu1 %v8113_v63 }
 0x4b2   : > { %v2592_v11 = vadd.s32 %v10844_v20, %v10841_v5  ;;  %v7384_v19 = vadd.s32 4294967294, %v2604_v41  ;;  %v2908_v50 = vadd.s32 %v2907_v46, %v2903_v54  ;;  %v10934_v2 = vshrl.u32 %v2756_v48, 5  ;;  %8116 = vmatpush3.bf16.msra.mxu1 %v8113_v63 }
 0x4b3   : > { %v10936_v52 = vmul.f32 %v2722_v0, %v2720_v9  ;;  %v2758_v33 = vand.u32 31, %v2756_v48  ;;  %v10938_v12 = vshll.u32 %v2752_v23, 8  ;;  %v10942_v13 = vadd.f32 %v10589_v28, %v10709_v30 }
 0x4b4   : > { %vm7385_vm13 = vcmp.lt.s32.totalorder %v7384_v19, 0  ;;  %v2909_v14 = vadd.s32 536870912, %v2908_v50  ;;  %v10944_v43 = vadd.s32 4294967169, %v3060_v49  ;;  %v10948_v5 = vand.u32 8388607, %v14376_v26 }
 0x4b5   : > { %v2607_v20 = vsel %vm7385_vm13, 0, %v7384_v19  ;;  %v2759_v39 = vsub.s32 32, %v2758_v33  ;;  %v2761_v57 = vshll.u32 %v14444_v29, %v2758_v33  ;;  %vm2776_vm3 = vcmp.lt.s32.totalorder %v10934_v2, 1 }
 0x4b6   : > { %v10952_v55 = vpop.eup %8648  ;;  %v2608_v31 = vsub.s32 32, %v2607_v20  ;;  %v2612_v51 = vsub.s32 4294967266, %v2607_v20  ;;  %v10954_v28 = vshrl.u32 %v2909_v14, 30  ;;  %v2764_v30 = vshll.u32 %v14484_v7, %v2758_v33 }
 0x4b7   : > { %v10957_v15 = vpop.eup %8650  ;;  %v2609_v4 = vshll.u32 %v10894_v3, %v2607_v20  ;;  %v2762_v35 = vshrl.u32 %v14484_v7, %v2759_v39  ;;  %v2765_v24 = vshrl.u32 %v14485_v6, %v2759_v39  ;;  %v2767_v53 = vshll.u32 %v14485_v6, %v2758_v33 }
 0x4b8   : > { %v2610_v27 = vshrl.u32 %v2592_v11, %v2608_v31  ;;  %v2613_v23 = vadd.s32 127, %v2612_v51  ;;  %v2911_v34 = vshll.u32 %v10954_v28, 30  ;;  %v2768_v9 = vshrl.u32 %v14441_v59, %v2759_v39 }
 0x4b9   : > { %v2763_v58 = vor.u32 %v2762_v35, %v2761_v57  ;;  %v2766_v63 = vor.u32 %v2765_v24, %v2764_v30  ;;  %v2770_v41 = vshll.u32 %v14441_v59, %v2758_v33  ;;  %v2771_v54 = vshrl.u32 %v14486_v62, %v2759_v39 }
 0x4ba   : > { %v2611_v0 = vor.u32 %v2610_v27, %v2609_v4  ;;  %v2614_v3 = vshll.u32 %v2613_v23, 23  ;;  %v10967_v46 = vsub.s32 %v2908_v50, %v2911_v34  ;;  %v2769_v48 = vor.u32 %v2768_v9, %v2767_v53 }
 0x4bb   : > { %v2772_v49 = vor.u32 %v2771_v54, %v2770_v41  ;;  %v2773_v19 = vshll.u32 %v14486_v62, %v2758_v33  ;;  %v2774_v11 = vshrl.u32 %v14487_v16, %v2759_v39  ;;  %vm2777_vm6 = vcmp.lt.s32.totalorder %v10934_v2, 2  ;;  %v3163_v54 = vld [vmem:[#allocation5 + $0x90] sm:$0xff] }
 0x4bc   : > { %v2615_v14 = vor.u32 4788187, %v2614_v3  ;;  %v2914_v20 = vsub.s32 0, %v10967_v46  ;;  %v2760_v57 = vshrl.u32 %v14444_v29, %v2759_v39  ;;  %vm2779_vm1 = vcmp.lt.s32.totalorder %v10934_v2, 4 }
 0x4bd   : > { %v2775_v31 = vor.u32 %v2774_v11, %v2773_v19  ;;  %vm2778_vm5 = vcmp.lt.s32.totalorder %v10934_v2, 3  ;;  %v2781_v50 = vsel %vm2779_vm1, %v2769_v48, 2102212464  ;;  %v2784_v51 = vsel %vm2776_vm3, %v2763_v58, %v2766_v63  ;;  %v3164_v19 = vld [vmem:[#allocation5 + $0x98] sm:$0xff]  ;;  %v3165_v11 = vld [vmem:[#allocation5 + $0xa0] sm:$0xff] }
 0x4be   : > { %v2616_v30 = vand.u32 2147483647, %v2615_v14  ;;  %v2618_v33 = vcvt.s32.f32 %v2611_v0  ;;  %v7395_v4 = vmin.u32 %v2914_v20, %v10967_v46  ;;  %v2785_v35 = vsel %vm2779_vm1, %v2772_v49, 920167782  ;;  %v3166_v14 = vld [vmem:[#allocation5 + $0xa8] sm:$0xff] }
 0x4bf   : > { %v2780_v24 = vsel %vm2776_vm3, %v2760_v57, %v2763_v58  ;;  %v2786_v53 = vsel %vm2778_vm5, %v2769_v48, %v2785_v35  ;;  %v2788_v39 = vsel %vm2776_vm3, %v2766_v63, %v2769_v48  ;;  %v2789_v27 = vsel %vm2779_vm1, %v2775_v31, 1326507024 }
 0x4c0   : > { %vm2642_vm7 = vcmp.lt.s32.totalorder %v10673_v1, 0  ;;  %v2916_v23 = vclz %v7395_v4  ;;  %v2782_v34 = vsel %vm2778_vm5, %v2766_v63, %v2781_v50  ;;  %v2787_v9 = vsel %vm2777_vm6, %v2784_v51, %v2786_v53 }
 0x4c1   : > { %v2790_v41 = vsel %vm2778_vm5, %v2772_v49, %v2789_v27  ;;  %vm2538_vm8 = vcmp.lt.s32.totalorder %v10693_v17, 0  ;;  %v10990_v58 = vmul.u32.u64.low %v10938_v12, %v2787_v9  ;;  %v10991_v3 = vmul.u32.u64.high %v10938_v12, %v2787_v9, %v10990_v58 }
 0x4c2   : > { %v2791_v0 = vsel %vm2777_vm6, %v2788_v39, %v2790_v41  ;;  %v14375_v48 = vand.u32 2147483647, %v10942_v13  ;;  %v2619_v63 = vmul.f32 %v2618_v33, %v2616_v30  ;;  %v7396_v20 = vadd.s32 4294967294, %v2916_v23 }
 0x4c3   : > { %v10995_v57 = vmul.u32.u64.low %v10938_v12, %v2791_v0  ;;  %v10996_v49 = vmul.u32.u64.high %v10938_v12, %v2791_v0, %v10995_v57  ;;  %v2724_v31 = vxor.u32 2147483648, %v10936_v52  ;;  %v2783_v50 = vsel %vm2777_vm6, %v2780_v24, %v2782_v34 }
 0x4c4   : > { %v3066_v51 = vadd.s32 1, %v10944_v43  ;;  %v2955_v4 = vand.u32 2139095040, %v10942_v13  ;;  %vm7397_vm11 = vcmp.lt.s32.totalorder %v7396_v20, 0  ;;  %v3064_v35 = vor.u32 8388608, %v10948_v5 }
 0x4c5   : > { %v8117_v53 = vpack.c.bf16 %v3164_v19, %v3163_v54  ;;  %v8121_v39 = vpack.c.bf16 %v3166_v14, %v3165_v11  ;;  %v11004_v30 = vsel %vm7397_vm11, 0, %v7396_v20  ;;  %v2802_v33 = vadd.s32 1, %v10991_v3 }
 0x4c6   : > { %vm3067_vm14 = vcmp.gt.s32.totalorder %v3066_v51, 0  ;;  %v2956_v27 = vshrl.u32 %v2955_v4, 23  ;;  %v2620_v23 = vxor.u32 2147483648, %v2619_v63  ;;  %v2924_v9 = vsub.s32 4294967266, %v11004_v30 }
 0x4c7   : > { %v2799_v2 = vmul.u32 %v10938_v12, %v2783_v50  ;;  %v11011_v43 = vand.u32 8388607, %v14375_v48  ;;  %8118 = vmatprep.subr.bf16.mxu1 %v8117_v53  ;;  %v2920_v5 = vsub.s32 32, %v11004_v30  ;;  %vm2801_vm0 = vc.u32 %v10996_v49, %v10990_v58 }
 0x4c8   : > { %v3068_v24 = vsel %vm3067_vm14, %v3066_v51, 0  ;;  %v7398_v34 = vadd.s32 4294967169, %v2956_v27  ;;  %8120 = vmatpush3.bf16.msra.mxu1 %v8117_v53  ;;  %v2904_v41 = vadd.s32 %v10903_v37, %v10911_v21  ;;  %v2925_v54 = vadd.s32 127, %v2924_v9 }
 0x4c9   : > { %v2803_v0 = vsel %vm2801_vm0, %v2802_v33, %v10991_v3  ;;  %v3069_v19 = vshrl.u32 %v3068_v24, 5  ;;  %8122 = vmatprep.subr.bf16.mxu1 %v8121_v39  ;;  %v11021_v12 = vsel %vm2642_vm7, %v2724_v31, %v10936_v52  ;;  %v3070_v14 = vand.u32 31, %v3068_v24 }
 0x4ca   : > { %v2804_v11 = vadd.s32 %v2803_v0, %v2799_v2  ;;  %v11023_v20 = vshll.u32 %v3064_v35, 8  ;;  %v11027_v57 = vsel %vm2538_vm8, %v2620_v23, %v2619_v63  ;;  %v2921_v37 = vshll.u32 %v10967_v46, %v11004_v30 }
 0x4cb   : > { %v11032_v21 = vadd.s32 %v10990_v58, %v10996_v49  ;;  %v2960_v3 = vor.u32 8388608, %v11011_v43  ;;  %v2922_v50 = vshrl.u32 %v2904_v41, %v2920_v5  ;;  %v3071_v52 = vsub.s32 32, %v3070_v14 }
 0x4cc   : > { %v2805_v51 = vadd.s32 536870912, %v2804_v11  ;;  %v2962_v31 = vadd.s32 1, %v7398_v34  ;;  %8124 = vmatpush3.bf16.msra.mxu1 %v8121_v39  ;;  %v2926_v4 = vshll.u32 %v2925_v54, 23  ;;  %v3073_v35 = vshll.u32 %v14444_v29, %v3070_v14 }
 0x4cd   : > { %v3076_v53 = vshll.u32 %v14484_v7, %v3070_v14  ;;  %vm3088_vm9 = vcmp.lt.s32.totalorder %v3069_v19, 1  ;;  %v3074_v46 = vshrl.u32 %v14484_v7, %v3071_v52  ;;  %v3077_v58 = vshrl.u32 %v14485_v6, %v3071_v52 }
 0x4ce   : > { %v11037_v63 = vshrl.u32 %v2805_v51, 30  ;;  %v3079_v49 = vshll.u32 %v14485_v6, %v3070_v14  ;;  %v3080_v30 = vshrl.u32 %v14441_v59, %v3071_v52  ;;  %v3082_v33 = vshll.u32 %v14441_v59, %v3070_v14 }
 0x4cf   : > { %v3083_v39 = vshrl.u32 %v14486_v62, %v3071_v52  ;;  %v3085_v27 = vshll.u32 %v14486_v62, %v3070_v14  ;;  %v3075_v9 = vor.u32 %v3074_v46, %v3073_v35  ;;  %v3078_v2 = vor.u32 %v3077_v58, %v3076_v53  ;;  %v3167_v58 = vld [vmem:[#allocation5 + $0xb0] sm:$0xff] }
 0x4d0   : > { %v2807_v23 = vshll.u32 %v11037_v63, 30  ;;  %v3086_v5 = vshrl.u32 %v14487_v16, %v3071_v52  ;;  %v3072_v24 = vshrl.u32 %v14444_v29, %v3071_v52  ;;  %v3081_v34 = vor.u32 %v3080_v30, %v3079_v49 }
 0x4d1   : > { %v3084_v41 = vor.u32 %v3083_v39, %v3082_v33  ;;  %vm3089_vm15 = vcmp.lt.s32.totalorder %v3069_v19, 2  ;;  %vm3090_vm4 = vcmp.lt.s32.totalorder %v3069_v19, 3  ;;  %vm3091_vm13 = vcmp.lt.s32.totalorder %v3069_v19, 4 }
 0x4d2   : > { %v11049_v54 = vsub.s32 %v2804_v11, %v2807_v23  ;;  %v3087_v0 = vor.u32 %v3086_v5, %v3085_v27  ;;  %v3092_v51 = vsel %vm3088_vm9, %v3072_v24, %v3075_v9  ;;  %v3093_v48 = vsel %vm3091_vm13, %v3081_v34, 2102212464  ;;  %v3168_v11 = vld [vmem:[#allocation5 + $0xb8] sm:$0xff] }
 0x4d3   : > { %v3096_v14 = vsel %vm3088_vm9, %v3075_v9, %v3078_v2  ;;  %v3097_v26 = vsel %vm3091_vm13, %v3084_v41, 920167782  ;;  %v3094_v53 = vsel %vm3090_vm4, %v3078_v2, %v3093_v48  ;;  %v3100_v46 = vsel %vm3088_vm9, %v3078_v2, %v3081_v34  ;;  %v3170_v2 = vld [vmem:[#allocation5 + $0xc8] sm:$0xff] }
 0x4d4   : > { %v2810_v35 = vsub.s32 0, %v11049_v54  ;;  %v3098_v52 = vsel %vm3090_vm4, %v3081_v34, %v3097_v26  ;;  %v11057_v49 = vor.u32 %v2922_v50, %v2921_v37  ;;  %v11059_v30 = vor.u32 4788187, %v2926_v4  ;;  %v3169_v26 = vld [vmem:[#allocation5 + $0xc0] sm:$0xff]  ;;  %v3171_v4 = vld [vmem:[#allocation5 + $0xd0] sm:$0xff] }
 0x4d5   : > { %v3099_v33 = vsel %vm3089_vm15, %v3096_v14, %v3098_v52  ;;  %v3101_v39 = vsel %vm3091_vm13, %v3087_v0, 1326507024  ;;  %v3095_v5 = vsel %vm3089_vm15, %v3092_v51, %v3094_v53  ;;  %vm2963_vm3 = vcmp.gt.s32.totalorder %v2962_v31, 0  ;;  %v3172_v14 = vld [vmem:[#allocation5 + $0xd8] sm:$0xff]  ;;  %v3174_v52 = vld [vmem:[#allocation5 + $0xe8] sm:$0xff] }
 0x4d6   : > { %v7391_v27 = vmin.u32 %v2810_v35, %v11049_v54  ;;  %v3102_v23 = vsel %vm3090_vm4, %v3084_v41, %v3101_v39  ;;  %v11065_v9 = vmul.u32.u64.low %v11023_v20, %v3099_v33  ;;  %v11066_v48 = vmul.u32.u64.high %v11023_v20, %v3099_v33, %v11065_v9  ;;  %v3173_v35 = vld [vmem:[#allocation5 + $0xe0] sm:$0xff] }
 0x4d7   : > { %v3103_v37 = vsel %vm3089_vm15, %v3100_v46, %v3102_v23  ;;  %v8125_v50 = vpack.c.bf16 %v3168_v11, %v3167_v58  ;;  %v2964_v41 = vsel %vm2963_vm3, %v2962_v31, 0  ;;  %v2928_v33 = vand.u32 2147483647, %v11059_v30 }
 0x4d8   : > { %v2812_v24 = vclz %v7391_v27  ;;  %v11072_v34 = vmul.u32.u64.low %v11023_v20, %v3103_v37  ;;  %v11073_v0 = vmul.u32.u64.high %v11023_v20, %v3103_v37, %v11072_v34  ;;  %v2930_v39 = vcvt.s32.f32 %v11057_v49 }
 0x4d9   : > { %v2966_v61 = vand.u32 31, %v2964_v41  ;;  %8126 = vmatprep.subr.bf16.mxu1 %v8125_v50  ;;  %v8129_v19 = vpack.c.bf16 %v3170_v2, %v3169_v26  ;;  %v3111_v53 = vmul.u32 %v11023_v20, %v3095_v5  ;;  %v3114_v46 = vadd.s32 1, %v11066_v48 }
 0x4da   : > { %v7392_v51 = vadd.s32 4294967294, %v2812_v24  ;;  %v11079_v58 = vshrl.u32 %v2964_v41, 5  ;;  %8128 = vmatpush3.bf16.msra.mxu1 %v8125_v50  ;;  %v8133_v27 = vpack.c.bf16 %v3172_v14, %v3171_v4  ;;  %v8137_v23 = vpack.c.bf16 %v3174_v52, %v3173_v35 }
 0x4db   : > { %v2967_v11 = vsub.s32 32, %v2966_v61  ;;  %v2969_v31 = vshll.u32 %v14444_v29, %v2966_v61  ;;  %8130 = vmatprep.subr.bf16.mxu1 %v8129_v19  ;;  %vm3113_vm1 = vc.u32 %v11073_v0, %v11065_v9  ;;  %v2972_v49 = vshll.u32 %v14484_v7, %v2966_v61 }
 0x4dc   : > { %vm7393_vm6 = vcmp.lt.s32.totalorder %v7392_v51, 0  ;;  %v2975_v30 = vshll.u32 %v14485_v6, %v2966_v61  ;;  %v3115_v26 = vsel %vm3113_vm1, %v3114_v46, %v11066_v48  ;;  %v2978_v5 = vshll.u32 %v14441_v59, %v2966_v61 }
 0x4dd   : > { %v2815_v20 = vsel %vm7393_vm6, 0, %v7392_v51  ;;  %v2970_v2 = vshrl.u32 %v14484_v7, %v2967_v11  ;;  %v3116_v24 = vadd.s32 %v3115_v26, %v3111_v53  ;;  %v2973_v41 = vshrl.u32 %v14485_v6, %v2967_v11 }
 0x4de   : > { %v2816_v37 = vsub.s32 32, %v2815_v20  ;;  %v2817_v50 = vshll.u32 %v11049_v54, %v2815_v20  ;;  %v2820_v4 = vsub.s32 4294967266, %v2815_v20  ;;  %8132 = vmatpush3.bf16.msra.mxu1 %v8129_v19  ;;  %v2976_v14 = vshrl.u32 %v14441_v59, %v2967_v11 }
 0x4df   : > { %v2971_v34 = vor.u32 %v2970_v2, %v2969_v31  ;;  %v2979_v35 = vshrl.u32 %v14486_v62, %v2967_v11  ;;  %8134 = vmatprep.subr.bf16.mxu1 %v8133_v27  ;;  %v3117_v51 = vadd.s32 536870912, %v3116_v24  ;;  %v2981_v46 = vshll.u32 %v14486_v62, %v2966_v61 }
 0x4e0   : > { %v2818_v48 = vshrl.u32 %v11032_v21, %v2816_v37  ;;  %v2821_v52 = vadd.s32 127, %v2820_v4  ;;  %v2974_v54 = vor.u32 %v2973_v41, %v2972_v49  ;;  %v2977_v20 = vor.u32 %v2976_v14, %v2975_v30 }
 0x4e1   : > { %v2980_v53 = vor.u32 %v2979_v35, %v2978_v5  ;;  %v2982_v19 = vshrl.u32 %v14487_v16, %v2967_v11  ;;  %v11096_v31 = vmul.f32 %v2930_v39, %v2928_v33  ;;  %v11098_v2 = vshrl.u32 %v3117_v51, 30 }
 0x4e2   : > { %v2822_v26 = vshll.u32 %v2821_v52, 23  ;;  %v3000_v38 = vshll.u32 %v2960_v3, 8  ;;  %8136 = vmatpush3.bf16.msra.mxu1 %v8133_v27  ;;  %vm11104_vm5 = vcmp.le.f32.partialorder %v2328_v18, 0.7853982  ;;  %v2819_v21 = vor.u32 %v2818_v48, %v2817_v50 }
 0x4e3   : > { %v2968_v49 = vshrl.u32 %v14444_v29, %v2967_v11  ;;  %v2983_v30 = vor.u32 %v2982_v19, %v2981_v46  ;;  %8138 = vmatprep.subr.bf16.mxu1 %v8137_v23  ;;  %v8141_v33 = vpack.c.bf16 %v3176_v10, %v3175_v22  ;;  %v3119_v5 = vshll.u32 %v11098_v2, 30 }
 0x4e4   : > { %v2823_v39 = vor.u32 4788187, %v2822_v26  ;;  %vm2984_vm11 = vcmp.lt.s32.totalorder %v11079_v58, 1  ;;  %vm2987_vm14 = vcmp.lt.s32.totalorder %v11079_v58, 4  ;;  %vm2986_vm0 = vcmp.lt.s32.totalorder %v11079_v58, 3 }
 0x4e5   : > { %v2989_v43 = vsel %vm2987_vm14, %v2977_v20, 2102212464  ;;  %v2992_v18 = vsel %vm2984_vm11, %v2971_v34, %v2974_v54  ;;  %v2993_v3 = vsel %vm2987_vm14, %v2980_v53, 920167782  ;;  %v11113_v27 = vsub.s32 %v3116_v24, %v3119_v5 }
 0x4e6   : > { %vm2985_vm9 = vcmp.lt.s32.totalorder %v11079_v58, 2  ;;  %v2994_v11 = vsel %vm2986_vm0, %v2977_v20, %v2993_v3  ;;  %v2996_v10 = vsel %vm2984_vm11, %v2974_v54, %v2977_v20  ;;  %8140 = vmatpush3.bf16.msra.mxu1 %v8137_v23  ;;  %v2988_v22 = vsel %vm2984_vm11, %v2968_v49, %v2971_v34 }
 0x4e7   : > { %v2995_v37 = vsel %vm2985_vm9, %v2992_v18, %v2994_v11  ;;  %v2997_v50 = vsel %vm2987_vm14, %v2983_v30, 1326507024  ;;  %8142 = vmatprep.subr.bf16.mxu1 %v8141_v33  ;;  %v2414_v4 = vsub.s32 4, %v10719_v44  ;;  %v2824_v41 = vand.u32 2147483647, %v2823_v39 }
 0x4e8   : > { %v3122_v14 = vsub.s32 0, %v11113_v27  ;;  %v2990_v24 = vsel %vm2986_vm0, %v2974_v54, %v2989_v43  ;;  %v2998_v35 = vsel %vm2986_vm0, %v2980_v53, %v2997_v50  ;;  %v2826_v51 = vcvt.s32.f32 %v2819_v21 }
 0x4e9   : > { %v2999_v23 = vsel %vm2985_vm9, %v2996_v10, %v2998_v35  ;;  %v11128_v34 = vmul.u32.u64.low %v3000_v38, %v2995_v37  ;;  %v11129_v48 = vmul.u32.u64.high %v3000_v38, %v2995_v37, %v11128_v34  ;;  %v2415_v52 = vsel %vm2330_vm10, %v2414_v4, %v10719_v44 }
 0x4ea   : > { %v7403_v46 = vmin.u32 %v3122_v14, %v11113_v27  ;;  %v11136_v20 = vmul.u32.u64.low %v3000_v38, %v2999_v23  ;;  %v11137_v19 = vmul.u32.u64.high %v3000_v38, %v2999_v23, %v11136_v20  ;;  %8144 = vmatpush3.bf16.msra.mxu1 %v8141_v33  ;;  %v2991_v54 = vsel %vm2985_vm9, %v2988_v22, %v2990_v24 }
 0x4eb   : > { %v2416_v53 = vsel %vm11104_vm5, %v10595_v47, %v10921_v45  ;;  %v2417_v26 = vsel %vm11104_vm5, 0, %v2415_v52  ;;  %v2518_v44 = vsub.s32 4, %v10686_v36  ;;  %v11148_v21 = vmul.f32 %v2826_v51, %v2824_v41 }
 0x4ec   : > { %v3124_v49 = vclz %v7403_v46  ;;  %8652 = vcosq.f32 %v2416_v53  ;;  %v2421_v30 = vadd.s32 3, %v2417_v26  ;;  %v2932_v33 = vxor.u32 2147483648, %v11096_v31 }
 0x4ed   : > { %v3010_v58 = vadd.s32 1, %v11129_v48  ;;  %8654 = vsinq.f32 %v2416_v53  ;;  %v2519_v39 = vsel %vm2434_vm12, %v2518_v44, %v10686_v36  ;;  %v3112_v45 = vadd.s32 %v11065_v9, %v11073_v0 }
 0x4ee   : > { %v7404_v61 = vadd.s32 4294967294, %v3124_v49  ;;  %v3007_v5 = vmul.u32 %v3000_v38, %v2991_v54  ;;  %vm3009_vm10 = vc.u32 %v11137_v19, %v11128_v34  ;;  %v2422_v18 = vand.u32 3, %v2421_v30 }
 0x4ef   : > { %v3011_v43 = vsel %vm3009_vm10, %v3010_v58, %v11129_v48  ;;  %v2521_v3 = vsel %vm10761_vm2, 0, %v2519_v39  ;;  %v2622_v11 = vsub.s32 4, %v10885_v42  ;;  %v2828_v10 = vxor.u32 2147483648, %v11148_v21 }
 0x4f0   : > { %vm7405_vm15 = vcmp.lt.s32.totalorder %v7404_v61, 0  ;;  %v3012_v36 = vadd.s32 %v3011_v43, %v3007_v5  ;;  %v2529_v22 = vxor.u32 2147483648, %v10957_v15  ;;  %vm2524_vm12 = vweird.f32 %v10592_v8 }
 0x4f1   : > { %v3127_v9 = vsel %vm7405_vm15, 0, %v7404_v61  ;;  %v2525_v38 = vadd.s32 3, %v2521_v3  ;;  %v2532_v0 = vxor.u32 2147483648, %v10952_v55  ;;  %v14512_v37 = vand.u32 2147483647, %v10693_v17 }
 0x4f2   : > { %vm2746_vm2 = vcmp.lt.s32.totalorder %v10797_v56, 0  ;;  %v3128_v32 = vsub.s32 32, %v3127_v9  ;;  %v3132_v4 = vsub.s32 4294967266, %v3127_v9  ;;  %v3013_v41 = vadd.s32 536870912, %v3012_v36 }
 0x4f3   : > { %vm11169_vm4 = vcmp.le.f32.partialorder %v14512_v37, 0.7853982  ;;  %v2623_v14 = vsel %vm2538_vm8, %v2622_v11, %v10885_v42  ;;  %vm2420_vm13 = vweird.f32 %v10595_v47  ;;  %vm2423_vm3 = vcmp.lt.s32.totalorder %v2422_v18, 2 }
 0x4f4   : > { %vm2427_vm6 = vcmp.eq.s32.totalorder %v2422_v18, 2  ;;  %v2526_v24 = vand.u32 3, %v2525_v38  ;;  %v2624_v35 = vsel %vm11169_vm4, %v10693_v17, %v11027_v57  ;;  %vm2850_vm1 = vcmp.lt.s32.totalorder %v10703_v25, 0 }
 0x4f5   : > { %v3130_v23 = vshrl.u32 %v3112_v45, %v3128_v32  ;;  %v3133_v48 = vadd.s32 127, %v3132_v4  ;;  %v11183_v52 = vshrl.u32 %v3013_v41, 30  ;;  %8656 = vcosq.f32 %v2624_v35 }
 0x4f6   : > { %v3129_v51 = vshll.u32 %v11113_v27, %v3127_v9  ;;  %vm2528_vm8 = vcmp.eq.s32.totalorder %v2526_v24, 0  ;;  %v2625_v42 = vsel %vm11169_vm4, 0, %v2623_v14  ;;  %8658 = vsinq.f32 %v2624_v35  ;;  %v8653_v46 = vpop.eup %8652 }
 0x4f7   : > { %v3134_v20 = vshll.u32 %v3133_v48, 23  ;;  %v3015_v54 = vshll.u32 %v11183_v52, 30  ;;  %v2530_v57 = vsel %vm2528_vm8, %v10952_v55, %v2529_v22  ;;  %vm2531_vm5 = vcmp.eq.s32.totalorder %v2526_v24, 2  ;;  %v8655_v53 = vpop.eup %8654 }
 0x4f8   : > { %v3131_v26 = vor.u32 %v3130_v23, %v3129_v51  ;;  %v2428_v44 = vxor.u32 2147483648, %v8653_v46  ;;  %vm2527_vm11 = vcmp.lt.s32.totalorder %v2526_v24, 2  ;;  %v2533_v49 = vsel %vm2531_vm5, %v2532_v0, %v10957_v15 }
 0x4f9   : > { %v3135_v30 = vor.u32 4788187, %v3134_v20  ;;  %v11191_v27 = vsub.s32 %v3012_v36, %v3015_v54  ;;  %v2425_v58 = vxor.u32 2147483648, %v8655_v53  ;;  %v2629_v39 = vadd.s32 3, %v2625_v42 }
 0x4fa   : > { %vm2424_vm14 = vcmp.eq.s32.totalorder %v2422_v18, 0  ;;  %v2429_v45 = vsel %vm2427_vm6, %v2428_v44, %v8655_v53  ;;  %v2534_v61 = vsel %vm2527_vm11, %v2530_v57, %v2533_v49  ;;  %v2726_v5 = vsub.s32 4, %v10832_v60 }
 0x4fb   : > { %v3136_v43 = vand.u32 2147483647, %v3135_v30  ;;  %v3018_v55 = vsub.s32 0, %v11191_v27  ;;  %v2426_v3 = vsel %vm2424_vm14, %v8653_v46, %v2425_v58  ;;  %v2535_v11 = vsel %vm2524_vm12, nan, %v2534_v61 }
 0x4fc   : > { %v2829_v15 = vsel %vm2746_vm2, %v2828_v10, %v11148_v21  ;;  %v3138_v36 = vcvt.s32.f32 %v3131_v26  ;;  %v2430_v22 = vsel %vm2423_vm3, %v2426_v3, %v2429_v45  ;;  %v14515_v9 = vand.u32 2147483647, %v10673_v1 }
 0x4fd   : > { %v7399_v0 = vmin.u32 %v3018_v55, %v11191_v27  ;;  %v2431_v37 = vsel %vm2420_vm13, nan, %v2430_v22  ;;  %v2630_v8 = vand.u32 3, %v2629_v39  ;;  %v2727_v50 = vsel %vm2642_vm7, %v2726_v5, %v10832_v60 }
 0x4fe   : > { %vm11204_vm0 = vcmp.le.f32.partialorder %v14515_v9, 0.7853982  ;;  %v2933_v21 = vsel %vm2850_vm1, %v2932_v33, %v11096_v31  ;;  %v3139_v18 = vmul.f32 %v3138_v36, %v3136_v43  ;;  %7861 = vmatprep.mubr.f32.mxu1 %v2431_v37  ;;  %v14518_v60 = vand.u32 2147483647, %v10797_v56 }
 0x4ff   : > { %v2728_v10 = vsel %vm11204_vm0, %v10673_v1, %v11021_v12  ;;  %v8657_v47 = vpop.eup %8656  ;;  %v3020_v32 = vclz %v7399_v0  ;;  %7862 = vmatmul.mubr.f32.vlgmr.msra.gmra.mrb[8].mxu1 %v2535_v11  ;;  %v2729_v4 = vsel %vm11204_vm0, 0, %v2727_v50  ;;  %v2830_v14 = vsub.s32 4, %v11037_v63 }
 0x500   : > { %8660 = vcosq.f32 %v2728_v10  ;;  %vm11227_vm7 = vcmp.le.f32.partialorder %v14518_v60, 0.7853982  ;;  %v8659_v31 = vpop.eup %8658  ;;  %v2636_v33 = vxor.u32 2147483648, %v8657_v47  ;;  %vm2632_vm9 = vcmp.eq.s32.totalorder %v2630_v8, 0 }
 0x501   : > { %8662 = vsinq.f32 %v2728_v10  ;;  %v2832_v12 = vsel %vm11227_vm7, %v10797_v56, %v2829_v15  ;;  %v7400_v24 = vadd.s32 4294967294, %v3020_v32  ;;  %v2633_v35 = vxor.u32 2147483648, %v8659_v31 }
 0x502   : > { %vm2635_vm10 = vcmp.eq.s32.totalorder %v2630_v8, 2  ;;  %v2733_v48 = vadd.s32 3, %v2729_v4  ;;  %v2831_v51 = vsel %vm2746_vm2, %v2830_v14, %v11037_v63  ;;  %8664 = vcosq.f32 %v2832_v12 }
 0x503   : > { %v2637_v23 = vsel %vm2635_vm10, %v2636_v33, %v8659_v31  ;;  %v3008_v42 = vadd.s32 %v11128_v34, %v11137_v19  ;;  %vm7401_vm15 = vcmp.lt.s32.totalorder %v7400_v24, 0  ;;  %vm2631_vm12 = vcmp.lt.s32.totalorder %v2630_v8, 2 }
 0x504   : > { %v2634_v46 = vsel %vm2632_vm9, %v8657_v47, %v2633_v35  ;;  %v3140_v20 = vxor.u32 2147483648, %v3139_v18  ;;  %v3023_v54 = vsel %vm7401_vm15, 0, %v7400_v24  ;;  %vm2628_vm4 = vweird.f32 %v10693_v17 }
 0x505   : > { %v2638_v57 = vsel %vm2631_vm12, %v2634_v46, %v2637_v23  ;;  %v3024_v53 = vsub.s32 32, %v3023_v54  ;;  %v3028_v26 = vsub.s32 4294967266, %v3023_v54  ;;  %v2833_v49 = vsel %vm11227_vm7, 0, %v2831_v51 }
 0x506   : > { %v2639_v44 = vsel %vm2628_vm4, nan, %v2638_v57  ;;  %v2734_v63 = vand.u32 3, %v2733_v48  ;;  %8666 = vsinq.f32 %v2832_v12  ;;  %v14521_v30 = vand.u32 2147483647, %v10703_v25 }
 0x507   : > { %7864 = vmatprep.mubr.f32.mxu1 %v2639_v44  ;;  %v2934_v19 = vsub.s32 4, %v10954_v28  ;;  %v3025_v17 = vshll.u32 %v11191_v27, %v3023_v54  ;;  %v3026_v58 = vshrl.u32 %v3008_v42, %v3024_v53  ;;  %v3029_v39 = vadd.s32 127, %v3028_v26 }
 0x508   : > { %vm11245_vm2 = vcmp.le.f32.partialorder %v14521_v30, 0.7853982  ;;  %vm3058_vm13 = vcmp.lt.s32.totalorder %v10878_v40, 0  ;;  %v2837_v61 = vadd.s32 3, %v2833_v49  ;;  %vm2732_vm3 = vweird.f32 %v10673_v1 }
 0x509   : > { %v2936_v45 = vsel %vm11245_vm2, %v10703_v25, %v2933_v21  ;;  %v2935_v5 = vsel %vm2850_vm1, %v2934_v19, %v10954_v28  ;;  %v3027_v55 = vor.u32 %v3026_v58, %v3025_v17  ;;  %v3030_v3 = vshll.u32 %v3029_v39, 23 }
 0x50a   : > { %8668 = vcosq.f32 %v2936_v45  ;;  %v8661_v43 = vpop.eup %8660  ;;  %v2937_v27 = vsel %vm11245_vm2, 0, %v2935_v5  ;;  %v3141_v15 = vsel %vm3058_vm13, %v3140_v20, %v3139_v18  ;;  %vm2735_vm6 = vcmp.lt.s32.totalorder %v2734_v63, 2 }
 0x50b   : > { %8670 = vsinq.f32 %v2936_v45  ;;  %v8663_v11 = vpop.eup %8662  ;;  %v2740_v36 = vxor.u32 2147483648, %v8661_v43  ;;  %v3031_v22 = vor.u32 4788187, %v3030_v3  ;;  %vm2739_vm8 = vcmp.eq.s32.totalorder %v2734_v63, 2 }
 0x50c   : > { %v2737_v9 = vxor.u32 2147483648, %v8663_v11  ;;  %v2941_v28 = vadd.s32 3, %v2937_v27  ;;  %v8665_v38 = vpop.eup %8664  ;;  %v3034_v0 = vcvt.s32.f32 %v3027_v55  ;;  %vm2736_vm1 = vcmp.eq.s32.totalorder %v2734_v63, 0 }
 0x50d   : > { %v2741_v37 = vsel %vm2739_vm8, %v2740_v36, %v8663_v11  ;;  %v2838_v8 = vand.u32 3, %v2837_v61  ;;  %v3032_v50 = vand.u32 2147483647, %v3031_v22  ;;  %v2844_v10 = vxor.u32 2147483648, %v8665_v38 }
 0x50e   : > { %v2738_v21 = vsel %vm2736_vm1, %v8661_v43, %v2737_v9  ;;  %v14524_v47 = vand.u32 2147483647, %v10878_v40  ;;  %v3038_v4 = vsub.s32 4, %v11183_v52  ;;  %v3142_v60 = vsub.s32 4, %v11098_v2 }
 0x50f   : > { %v2742_v32 = vsel %vm2735_vm6, %v2738_v21, %v2741_v37  ;;  %vm2954_vm11 = vcmp.lt.s32.totalorder %v10942_v13, 0  ;;  %v3035_v31 = vmul.f32 %v3034_v0, %v3032_v50  ;;  %v2942_v14 = vand.u32 3, %v2941_v28 }
 0x510   : > { %vm11265_vm5 = vcmp.le.f32.partialorder %v14524_v47, 0.7853982  ;;  %v2743_v33 = vsel %vm2732_vm3, nan, %v2742_v32  ;;  %v8667_v12 = vpop.eup %8666  ;;  %vm2836_vm14 = vweird.f32 %v10797_v56  ;;  %vm2843_vm0 = vcmp.eq.s32.totalorder %v2838_v8, 2 }
 0x511   : > { %v3144_v41 = vsel %vm11265_vm5, %v10878_v40, %v3141_v15  ;;  %7865 = vmatmul.mubr.f32.gmra.mrb[10].mxu1 %v2743_v33  ;;  %v14527_v24 = vand.u32 2147483647, %v10942_v13  ;;  %v3036_v23 = vxor.u32 2147483648, %v3035_v31  ;;  %v2841_v48 = vxor.u32 2147483648, %v8667_v12 }
 0x512   : > { %8672 = vcosq.f32 %v3144_v41  ;;  %v2845_v51 = vsel %vm2843_vm0, %v2844_v10, %v8667_v12  ;;  %v3143_v1 = vsel %vm3058_vm13, %v3142_v60, %v11098_v2  ;;  %vm2839_vm9 = vcmp.lt.s32.totalorder %v2838_v8, 2 }
 0x513   : > { %vm11280_vm7 = vcmp.le.f32.partialorder %v14527_v24, 0.7853982  ;;  %vm2840_vm10 = vcmp.eq.s32.totalorder %v2838_v8, 0  ;;  %v3039_v46 = vsel %vm2954_vm11, %v3038_v4, %v11183_v52  ;;  %8674 = vsinq.f32 %v3144_v41  ;;  %v11307_v8 = vld [vmem:[%s14324_s4 + $0x3] ss:$0 sm:$0xff] }
 0x514   : > { %v8669_v42 = vpop.eup %8668  ;;  %v3037_v54 = vsel %vm2954_vm11, %v3036_v23, %v3035_v31  ;;  %v2842_v57 = vsel %vm2840_vm10, %v8665_v38, %v2841_v48  ;;  %vm2947_vm15 = vcmp.eq.s32.totalorder %v2942_v14, 2  ;;  %v3145_v49 = vsel %vm11265_vm5, 0, %v3143_v1 }
 0x515   : > { %v8671_v20 = vpop.eup %8670  ;;  %v2948_v53 = vxor.u32 2147483648, %v8669_v42  ;;  %v2846_v26 = vsel %vm2839_vm9, %v2842_v57, %v2845_v51  ;;  %v3040_v2 = vsel %vm11280_vm7, %v10942_v13, %v3037_v54  ;;  %vm2944_vm12 = vcmp.eq.s32.totalorder %v2942_v14, 0 }
 0x516   : > { %v2945_v44 = vxor.u32 2147483648, %v8671_v20  ;;  %v2847_v52 = vsel %vm2836_vm14, nan, %v2846_v26  ;;  %8676 = vcosq.f32 %v3040_v2  ;;  %vm2943_vm4 = vcmp.lt.s32.totalorder %v2942_v14, 2 }
 0x517   : > { %v2949_v63 = vsel %vm2947_vm15, %v2948_v53, %v8671_v20  ;;  %7867 = vmatprep.mubr.f32.mxu1 %v2847_v52  ;;  %v3041_v34 = vsel %vm11280_vm7, 0, %v3039_v46  ;;  %8678 = vsinq.f32 %v3040_v2  ;;  %vm2940_vm2 = vweird.f32 %v10703_v25 }
 0x518   : > { %v2946_v30 = vsel %vm2944_vm12, %v8669_v42, %v2945_v44  ;;  %v3149_v17 = vadd.s32 3, %v3145_v49  ;;  %v3045_v39 = vadd.s32 3, %v3041_v34  ;;  %vm3044_vm11 = vweird.f32 %v10942_v13 }
 0x519   : > { %v2950_v19 = vsel %vm2943_vm4, %v2946_v30, %v2949_v63  ;;  %vm3148_vm14 = vweird.f32 %v10878_v40 }
 0x51a   : > { %v2951_v58 = vsel %vm2940_vm2, nan, %v2950_v19  ;;  %v3150_v56 = vand.u32 3, %v3149_v17  ;;  %v3046_v43 = vand.u32 3, %v3045_v39 }
 0x51b   : > { %7868 = vmatmul.mubr.f32.gmra.mrb[12].mxu1 %v2951_v58 }
 0x51c   : > { %v8673_v45 = vpop.eup %8672  ;;  %vm3152_vm13 = vcmp.eq.s32.totalorder %v3150_v56, 0  ;;  %vm3155_vm3 = vcmp.eq.s32.totalorder %v3150_v56, 2  ;;  %vm3051_vm6 = vcmp.eq.s32.totalorder %v3046_v43, 2  ;;  %vm3048_vm8 = vcmp.eq.s32.totalorder %v3046_v43, 0 }
 0x51d   : > { %v8675_v61 = vpop.eup %8674  ;;  %v3156_v5 = vxor.u32 2147483648, %v8673_v45  ;;  %vm3151_vm1 = vcmp.lt.s32.totalorder %v3150_v56, 2  ;;  %vm3047_vm5 = vcmp.lt.s32.totalorder %v3046_v43, 2 }
 0x51e   : > { %v3153_v55 = vxor.u32 2147483648, %v8675_v61 }
 0x51f   : > { %v3157_v36 = vsel %vm3155_vm3, %v3156_v5, %v8675_v61 }
 0x520   : > { %v8677_v3 = vpop.eup %8676  ;;  %v3154_v15 = vsel %vm3152_vm13, %v8673_v45, %v3153_v55 }
 0x521   : > { %v8679_v27 = vpop.eup %8678  ;;  %v3052_v11 = vxor.u32 2147483648, %v8677_v3  ;;  %v3158_v28 = vsel %vm3151_vm1, %v3154_v15, %v3157_v36  ;;  %v4123_v36 = vld [vmem:[#allocation5 + $0x100] sm:$0xff] }
 0x522   : > { %v3049_v22 = vxor.u32 2147483648, %v8679_v27  ;;  %v3159_v37 = vsel %vm3148_vm14, nan, %v3158_v28 }
 0x523   : > { %v3053_v25 = vsel %vm3051_vm6, %v3052_v11, %v8679_v27 }
 0x524   : > { %v3050_v9 = vsel %vm3048_vm8, %v8677_v3, %v3049_v22 }
 0x525   : > { %v3054_v38 = vsel %vm3047_vm5, %v3050_v9, %v3053_v25 }
 0x526   : > { %v3055_v0 = vsel %vm3044_vm11, nan, %v3054_v38  ;;  %v4124_v38 = vld [vmem:[#allocation5 + $0x108] sm:$0xff] }
 0x527   : > { %7870 = vmatprep.mubr.f32.mxu1 %v3055_v0  ;;  %v4125_v0 = vld [vmem:[#allocation5 + $0x110] sm:$0xff] }
 0x528   : > { %7871 = vmatmul.mubr.f32.gmra.mrb[14].mxu1 %v3159_v37  ;;  %v4126_v37 = vld [vmem:[#allocation5 + $0x118] sm:$0xff] }
 0x5d2   : > { %v7863_v50 = vpop.f32.mrb[8].mxu1 }
 0x5d3   : > { %v3251_v21 = vpop.f32.mrb[9].mxu1  ;;  %v11313_v47 = vadd.f32 %v7863_v50, %v11307_v8 }
 0x5d4   : > { %v11310_v10 = vadd.f32 %v11307_v8, %v3251_v21 }
 0x5d5   : > { %14530 = vst [vmem:[#allocation12_spill] sm:$0xff] %v11313_v47  ;;  %v3397_v40 = vand.u32 2139095040, %v11313_v47 }
 0x5d6   : > { %v3293_v13 = vand.u32 2139095040, %v11310_v10  ;;  %v14385_v4 = vand.u32 2147483647, %v11310_v10 }
 0x5d7   : > { %v3398_v41 = vshrl.u32 %v3397_v40, 23 }
 0x5d8   : > { %v3294_v18 = vshrl.u32 %v3293_v13, 23  ;;  %v3297_v31 = vand.u32 8388607, %v14385_v4 }
 0x5d9   : > { %v7412_v12 = vadd.s32 4294967169, %v3398_v41  ;;  %v8149_v41 = vpack.c.bf16 %v4126_v37, %v4125_v0 }
 0x5da   : > { %v7408_v32 = vadd.s32 4294967169, %v3294_v18  ;;  %v3298_v35 = vor.u32 8388608, %v3297_v31 }
 0x5db   : > { %v3404_v30 = vadd.s32 1, %v7412_v12 }
 0x5dc   : > { %v3300_v60 = vadd.s32 1, %v7408_v32  ;;  %v3338_v17 = vshll.u32 %v3298_v35, 8 }
 0x5dd   : > { %vm3405_vm12 = vcmp.gt.s32.totalorder %v3404_v30, 0 }
 0x5de   : > { %vm3301_vm0 = vcmp.gt.s32.totalorder %v3300_v60, 0  ;;  %v11355_v12 = vsel %vm3405_vm12, %v3404_v30, 0 }
 0x5df   : > { %v3302_v33 = vsel %vm3301_vm0, %v3300_v60, 0  ;;  %v8145_v60 = vpack.c.bf16 %v4124_v38, %v4123_v36 }
 0x5e0   : > { %v3304_v14 = vand.u32 31, %v3302_v33  ;;  %v3303_v23 = vshrl.u32 %v3302_v33, 5 }
 0x5e1   : > { %8146 = vmatprep.subr.bf16.mxu0 %v8145_v60 }
 0x5e2   : > { %v3305_v24 = vsub.s32 32, %v3304_v14  ;;  %v3307_v48 = vshll.u32 %v14444_v29, %v3304_v14  ;;  %v3310_v51 = vshll.u32 %v14484_v7, %v3304_v14  ;;  %v3313_v20 = vshll.u32 %v14485_v6, %v3304_v14  ;;  %8148 = vmatpush3.bf16.msra.mxu0 %v8145_v60 }
 0x5e3   : > { %v3316_v53 = vshll.u32 %v14441_v59, %v3304_v14  ;;  %v3319_v44 = vshll.u32 %v14486_v62, %v3304_v14  ;;  %vm3322_vm7 = vcmp.lt.s32.totalorder %v3303_v23, 1  ;;  %vm3324_vm9 = vcmp.lt.s32.totalorder %v3303_v23, 3  ;;  %8150 = vmatprep.subr.bf16.mxu0 %v8149_v41 }
 0x5e4   : > { %v11322_v1 = vpop.f32.mrb[10].mxu1  ;;  %v3308_v42 = vshrl.u32 %v14484_v7, %v3305_v24  ;;  %v3311_v46 = vshrl.u32 %v14485_v6, %v3305_v24  ;;  %v3314_v54 = vshrl.u32 %v14441_v59, %v3305_v24  ;;  %v3317_v26 = vshrl.u32 %v14486_v62, %v3305_v24 }
 0x5e5   : > { %v3261_v57 = vpop.f32.mrb[11].mxu1  ;;  %v3320_v2 = vshrl.u32 %v14487_v16, %v3305_v24  ;;  %v3306_v58 = vshrl.u32 %v14444_v29, %v3305_v24  ;;  %vm3325_vm10 = vcmp.lt.s32.totalorder %v3303_v23, 4  ;;  %vm3323_vm15 = vcmp.lt.s32.totalorder %v3303_v23, 2 }
 0x5e6   : > { %v3309_v49 = vor.u32 %v3308_v42, %v3307_v48  ;;  %v3312_v52 = vor.u32 %v3311_v46, %v3310_v51  ;;  %v3315_v63 = vor.u32 %v3314_v54, %v3313_v20  ;;  %v3318_v34 = vor.u32 %v3317_v26, %v3316_v53  ;;  %8152 = vmatpush3.bf16.msra.mxu0 %v8149_v41 }
 0x5e7   : > { %v3321_v19 = vor.u32 %v3320_v2, %v3319_v44  ;;  %v11335_v15 = vadd.f32 %v11307_v8, %v3261_v57  ;;  %v11361_v46 = vand.u32 31, %v11355_v12 }
 0x5e8   : > { %v3327_v39 = vsel %vm3325_vm10, %v3315_v63, 2102212464  ;;  %v3330_v45 = vsel %vm3322_vm7, %v3309_v49, %v3312_v52  ;;  %v3331_v56 = vsel %vm3325_vm10, %v3318_v34, 920167782  ;;  %v3334_v61 = vsel %vm3322_vm7, %v3312_v52, %v3315_v63 }
 0x5e9   : > { %v3326_v5 = vsel %vm3322_vm7, %v3306_v58, %v3309_v49  ;;  %v3332_v43 = vsel %vm3324_vm9, %v3315_v63, %v3331_v56  ;;  %v3335_v55 = vsel %vm3325_vm10, %v3321_v19, 1326507024  ;;  %v3328_v3 = vsel %vm3324_vm9, %v3312_v52, %v3327_v39 }
 0x5ea   : > { %v3333_v27 = vsel %vm3323_vm15, %v3330_v45, %v3332_v43  ;;  %v3336_v11 = vsel %vm3324_vm9, %v3318_v34, %v3335_v55  ;;  %v3329_v18 = vsel %vm3323_vm15, %v3326_v5, %v3328_v3  ;;  %v3501_v40 = vand.u32 2139095040, %v11335_v15 }
 0x5eb   : > { %v3337_v22 = vsel %vm3323_vm15, %v3334_v61, %v3336_v11  ;;  %v11338_v25 = vmul.u32.u64.low %v3338_v17, %v3333_v27  ;;  %v11339_v9 = vmul.u32.u64.high %v3338_v17, %v3333_v27, %v11338_v25  ;;  %v3345_v14 = vmul.u32 %v3338_v17, %v3329_v18 }
 0x5ec   : > { %v11342_v50 = vmul.u32.u64.low %v3338_v17, %v3337_v22  ;;  %v11343_v21 = vmul.u32.u64.high %v3338_v17, %v3337_v22, %v11342_v50  ;;  %v3502_v33 = vshrl.u32 %v3501_v40, 23  ;;  %v14384_v35 = vand.u32 2147483647, %v11335_v15 }
 0x5ed   : > { %v3348_v31 = vadd.s32 1, %v11339_v9  ;;  %v11368_v2 = vsub.s32 32, %v11361_v46  ;;  %v14383_v49 = vand.u32 2147483647, %v11313_v47  ;;  %v11373_v52 = vadd.f32 %v11322_v1, %v11307_v8 }
 0x5ee   : > { %v7869_v28 = vpop.f32.mrb[12].mxu1  ;;  %vm3347_vm4 = vc.u32 %v11343_v21, %v11338_v25  ;;  %v7416_v23 = vadd.s32 4294967169, %v3502_v33  ;;  %v3505_v54 = vand.u32 8388607, %v14384_v35 }
 0x5ef   : > { %v11345_v13 = vpop.f32.mrb[13].mxu1  ;;  %v11350_v32 = vadd.f32 %v7869_v28, %v11307_v8  ;;  %v3349_v24 = vsel %vm3347_vm4, %v3348_v31, %v11339_v9  ;;  %v3421_v43 = vshrl.u32 %v14486_v62, %v11368_v2  ;;  %v11391_v27 = vand.u32 8388607, %v14383_v49 }
 0x5f0   : > { %v3350_v48 = vadd.s32 %v3349_v24, %v3345_v14  ;;  %v3508_v42 = vadd.s32 1, %v7416_v23  ;;  %v3506_v63 = vor.u32 8388608, %v3505_v54  ;;  %v3605_v38 = vand.u32 2139095040, %v11373_v52 }
 0x5f1   : > { %14531 = vst [vmem:[#allocation13_spill] sm:$0xff] %v11350_v32  ;;  %v3813_v51 = vand.u32 2139095040, %v11350_v32  ;;  %v14381_v37 = vand.u32 2147483647, %v11350_v32 }
 0x5f2   : > { %v3351_v20 = vadd.s32 536870912, %v3350_v48  ;;  %vm3509_vm2 = vcmp.gt.s32.totalorder %v3508_v42, 0  ;;  %v3546_v0 = vshll.u32 %v3506_v63, 8 }
 0x5f3   : > { %v3510_v53 = vsel %vm3509_vm2, %v3508_v42, 0  ;;  %v3814_v26 = vshrl.u32 %v3813_v51, 23 }
 0x5f4   : > { %v11365_v57 = vshrl.u32 %v3351_v20, 30  ;;  %v3512_v44 = vand.u32 31, %v3510_v53  ;;  %v3511_v55 = vshrl.u32 %v3510_v53, 5 }
 0x5f5   : > { %v7428_v39 = vadd.s32 4294967169, %v3814_v26 }
 0x5f6   : > { %v3513_v30 = vsub.s32 32, %v3512_v44  ;;  %v3353_v19 = vshll.u32 %v11365_v57, 30  ;;  %v3515_v17 = vshll.u32 %v14444_v29, %v3512_v44  ;;  %v3518_v58 = vshll.u32 %v14484_v7, %v3512_v44 }
 0x5f7   : > { %v3521_v1 = vshll.u32 %v14485_v6, %v3512_v44  ;;  %v3524_v3 = vshll.u32 %v14441_v59, %v3512_v44  ;;  %v3527_v18 = vshll.u32 %v14486_v62, %v3512_v44  ;;  %v3820_v60 = vadd.s32 1, %v7428_v39 }
 0x5f8   : > { %v3516_v56 = vshrl.u32 %v14484_v7, %v3513_v30  ;;  %v3519_v61 = vshrl.u32 %v14485_v6, %v3513_v30  ;;  %v3522_v5 = vshrl.u32 %v14441_v59, %v3513_v30  ;;  %v3525_v9 = vshrl.u32 %v14486_v62, %v3513_v30 }
 0x5f9   : > { %v11394_v28 = vsub.s32 %v3350_v48, %v3353_v19  ;;  %v3528_v40 = vshrl.u32 %v14487_v16, %v3513_v30  ;;  %v3514_v41 = vshrl.u32 %v14444_v29, %v3513_v30  ;;  %vm3530_vm13 = vcmp.lt.s32.totalorder %v3511_v55, 1 }
 0x5fa   : > { %v3517_v11 = vor.u32 %v3516_v56, %v3515_v17  ;;  %v3520_v36 = vor.u32 %v3519_v61, %v3518_v58  ;;  %v3523_v22 = vor.u32 %v3522_v5, %v3521_v1  ;;  %v3526_v50 = vor.u32 %v3525_v9, %v3524_v3 }
 0x5fb   : > { %v11375_v34 = vpop.f32.mrb[14].mxu1  ;;  %vm3532_vm3 = vcmp.lt.s32.totalorder %v3511_v55, 3  ;;  %vm3533_vm6 = vcmp.lt.s32.totalorder %v3511_v55, 4  ;;  %v3529_v31 = vor.u32 %v3528_v40, %v3527_v18  ;;  %v3356_v23 = vsub.s32 0, %v11394_v28 }
 0x5fc   : > { %v11380_v45 = vpop.f32.mrb[15].mxu1  ;;  %v3535_v33 = vsel %vm3533_vm6, %v3523_v22, 2102212464  ;;  %v3538_v14 = vsel %vm3530_vm13, %v3517_v11, %v3520_v36  ;;  %v3539_v24 = vsel %vm3533_vm6, %v3526_v50, 920167782  ;;  %vm3531_vm8 = vcmp.lt.s32.totalorder %v3511_v55, 2 }
 0x5fd   : > { %v3540_v48 = vsel %vm3532_vm3, %v3523_v22, %v3539_v24  ;;  %v3542_v51 = vsel %vm3530_vm13, %v3520_v36, %v3523_v22  ;;  %v3534_v42 = vsel %vm3530_vm13, %v3514_v41, %v3517_v11  ;;  %v3543_v54 = vsel %vm3533_vm6, %v3529_v31, 1326507024 }
 0x5fe   : > { %v3541_v20 = vsel %vm3531_vm8, %v3538_v14, %v3540_v48  ;;  %vm3821_vm1 = vcmp.gt.s32.totalorder %v3820_v60, 0  ;;  %v3536_v53 = vsel %vm3532_vm3, %v3520_v36, %v3535_v33  ;;  %v3544_v26 = vsel %vm3532_vm3, %v3526_v50, %v3543_v54 }
 0x5ff   : > { %v11403_v44 = vmul.u32.u64.low %v3546_v0, %v3541_v20  ;;  %v11404_v63 = vmul.u32.u64.high %v3546_v0, %v3541_v20, %v11403_v44  ;;  %v3606_v30 = vshrl.u32 %v3605_v38, 23  ;;  %v3545_v19 = vsel %vm3531_vm8, %v3542_v51, %v3544_v26 }
 0x600   : > { %v3817_v17 = vand.u32 8388607, %v14381_v37  ;;  %v3822_v58 = vsel %vm3821_vm1, %v3820_v60, 0  ;;  %v3420_v39 = vshll.u32 %v14441_v59, %v11361_v46  ;;  %v7409_v56 = vmin.u32 %v3356_v23, %v11394_v28 }
 0x601   : > { %v11415_v61 = vadd.f32 %v11307_v8, %v11345_v13  ;;  %v3537_v1 = vsel %vm3531_vm8, %v3534_v42, %v3536_v53  ;;  %v11418_v5 = vmul.u32.u64.low %v3546_v0, %v3545_v19  ;;  %v11419_v3 = vmul.u32.u64.high %v3546_v0, %v3545_v19, %v11418_v5 }
 0x602   : > { %v3824_v11 = vand.u32 31, %v3822_v58  ;;  %v11422_v36 = vshrl.u32 %v11355_v12, 5  ;;  %v11426_v22 = vshrl.u32 %v14487_v16, %v11368_v2  ;;  %v3556_v9 = vadd.s32 1, %v11404_v63 }
 0x603   : > { %v3402_v38 = vor.u32 8388608, %v11391_v27  ;;  %v11430_v50 = vor.u32 %v3421_v43, %v3420_v39  ;;  %v7420_v13 = vadd.s32 4294967169, %v3606_v30  ;;  %v3818_v55 = vor.u32 8388608, %v3817_v17 }
 0x604   : > { %v3825_v18 = vsub.s32 32, %v3824_v11  ;;  %v3358_v40 = vclz %v7409_v56  ;;  %v3553_v60 = vmul.u32 %v3546_v0, %v3537_v1  ;;  %v11432_v41 = vshrl.u32 %v3822_v58, 5 }
 0x605   : > { %v3709_v12 = vand.u32 2139095040, %v11415_v61  ;;  %vm3555_vm5 = vc.u32 %v11419_v3, %v11403_v44  ;;  %v3827_v31 = vshll.u32 %v14444_v29, %v3824_v11  ;;  %v3830_v14 = vshll.u32 %v14484_v7, %v3824_v11 }
 0x606   : > { %v3828_v33 = vshrl.u32 %v14484_v7, %v3825_v18  ;;  %v3557_v43 = vsel %vm3555_vm5, %v3556_v9, %v11404_v63  ;;  %v3831_v24 = vshrl.u32 %v14485_v6, %v3825_v18  ;;  %v3833_v23 = vshll.u32 %v14485_v6, %v3824_v11 }
 0x607   : > { %v3836_v0 = vshll.u32 %v14441_v59, %v3824_v11  ;;  %v3558_v48 = vadd.s32 %v3557_v43, %v3553_v60  ;;  %v3834_v42 = vshrl.u32 %v14441_v59, %v3825_v18  ;;  %v3837_v20 = vshrl.u32 %v14486_v62, %v3825_v18 }
 0x608   : > { %v3829_v51 = vor.u32 %v3828_v33, %v3827_v31  ;;  %v3832_v54 = vor.u32 %v3831_v24, %v3830_v14  ;;  %v3839_v53 = vshll.u32 %v14486_v62, %v3824_v11  ;;  %v3840_v26 = vshrl.u32 %v14487_v16, %v3825_v18 }
 0x609   : > { %v3710_v30 = vshrl.u32 %v3709_v12, 23  ;;  %v3559_v19 = vadd.s32 536870912, %v3558_v48  ;;  %v3835_v63 = vor.u32 %v3834_v42, %v3833_v23  ;;  %v3838_v17 = vor.u32 %v3837_v20, %v3836_v0  ;;  %v4127_v0 = vld [vmem:[#allocation5 + $0x120] sm:$0xff]  ;;  %v4128_v42 = vld [vmem:[#allocation5 + $0x128] sm:$0xff] }
 0x60a   : > { %v11448_v58 = vshll.u32 %v3818_v55, 8  ;;  %v7410_v39 = vadd.s32 4294967294, %v3358_v40  ;;  %v3841_v56 = vor.u32 %v3840_v26, %v3839_v53  ;;  %vm3842_vm11 = vcmp.lt.s32.totalorder %v11432_v41, 1 }
 0x60b   : > { %vm3845_vm14 = vcmp.lt.s32.totalorder %v11432_v41, 4  ;;  %v11452_v1 = vshrl.u32 %v3559_v19, 30  ;;  %vm3844_vm0 = vcmp.lt.s32.totalorder %v11432_v41, 3  ;;  %v3850_v5 = vsel %vm3842_vm11, %v3829_v51, %v3832_v54 }
 0x60c   : > { %v3851_v11 = vsel %vm3845_vm14, %v3838_v17, 920167782  ;;  %vm3843_vm7 = vcmp.lt.s32.totalorder %v11432_v41, 2  ;;  %v3854_v55 = vsel %vm3842_vm11, %v3832_v54, %v3835_v63  ;;  %v7424_v40 = vadd.s32 4294967169, %v3710_v30 }
 0x60d   : > { %14532 = vst [vmem:[#allocation16_spill] sm:$0xff] %v11452_v1  ;;  %v3852_v9 = vsel %vm3844_vm0, %v3835_v63, %v3851_v11  ;;  %v3612_v60 = vadd.s32 1, %v7420_v13  ;;  %v3561_v12 = vshll.u32 %v11452_v1, 30  ;;  %v3855_v33 = vsel %vm3845_vm14, %v3841_v56, 1326507024 }
 0x60e   : > { %v3853_v31 = vsel %vm3843_vm7, %v3850_v5, %v3852_v9  ;;  %v3847_v14 = vsel %vm3845_vm14, %v3835_v63, 2102212464  ;;  %v3856_v43 = vsel %vm3844_vm0, %v3838_v17, %v3855_v33  ;;  %v3826_v13 = vshrl.u32 %v14444_v29, %v3825_v18 }
 0x60f   : > { %v11468_v24 = vmul.u32.u64.low %v11448_v58, %v3853_v31  ;;  %v11469_v23 = vmul.u32.u64.high %v11448_v58, %v3853_v31, %v11468_v24  ;;  %v11472_v20 = vsub.s32 %v3558_v48, %v3561_v12  ;;  %v3857_v53 = vsel %vm3843_vm7, %v3854_v55, %v3856_v43 }
 0x610   : > { %v14382_v26 = vand.u32 2147483647, %v11415_v61  ;;  %vm7411_vm9 = vcmp.lt.s32.totalorder %v7410_v39, 0  ;;  %v11479_v30 = vmul.u32.u64.low %v11448_v58, %v3857_v53  ;;  %v11480_v19 = vmul.u32.u64.high %v11448_v58, %v3857_v53, %v11479_v30 }
 0x611   : > { %v3716_v63 = vadd.s32 1, %v7424_v40  ;;  %v3564_v17 = vsub.s32 0, %v11472_v20  ;;  %v3846_v56 = vsel %vm3842_vm11, %v3826_v13, %v3829_v51  ;;  %v3848_v48 = vsel %vm3844_vm0, %v3832_v54, %v3847_v14 }
 0x612   : > { %v8153_v18 = vpack.c.bf16 %v4128_v42, %v4127_v0  ;;  %vm3613_vm10 = vcmp.gt.s32.totalorder %v3612_v60, 0  ;;  %v3868_v5 = vadd.s32 1, %v11469_v23  ;;  %v11490_v11 = vshll.u32 %v3402_v38, 8 }
 0x613   : > { %vm3717_vm15 = vcmp.gt.s32.totalorder %v3716_v63, 0  ;;  %v3423_v9 = vshll.u32 %v14486_v62, %v11361_v46  ;;  %v11494_v55 = vsel %vm7411_vm9, 0, %v7410_v39  ;;  %v7417_v40 = vmin.u32 %v3564_v17, %v11472_v20 }
 0x614   : > { %v3718_v51 = vsel %vm3717_vm15, %v3716_v63, 0  ;;  %8154 = vmatprep.subr.bf16.mxu0 %v8153_v18  ;;  %vm3429_vm12 = vcmp.lt.s32.totalorder %v11422_v36, 4  ;;  %v3849_v54 = vsel %vm3843_vm7, %v3846_v56, %v3848_v48  ;;  %vm3867_vm4 = vc.u32 %v11480_v19, %v11468_v24 }
 0x615   : > { %v3720_v27 = vand.u32 31, %v3718_v51  ;;  %8156 = vmatpush3.bf16.msra.mxu0 %v8153_v18  ;;  %v3425_v38 = vor.u32 %v11426_v22, %v3423_v9  ;;  %v11506_v39 = vsel %vm3429_vm12, %v11430_v50, 920167782  ;;  %v3614_v12 = vsel %vm3613_vm10, %v3612_v60, 0 }
 0x616   : > { %v3713_v31 = vand.u32 8388607, %v14382_v26  ;;  %v3362_v41 = vsub.s32 32, %v11494_v55  ;;  %v3366_v33 = vsub.s32 4294967266, %v11494_v55  ;;  %v3869_v14 = vsel %vm3867_vm4, %v3868_v5, %v11469_v23 }
 0x617   : > { %v3721_v43 = vsub.s32 32, %v3720_v27  ;;  %v3566_v0 = vclz %v7417_v40  ;;  %v3865_v22 = vmul.u32 %v11448_v58, %v3849_v54  ;;  %v11515_v42 = vshrl.u32 %v3718_v51, 5 }
 0x618   : > { %v11519_v13 = vadd.f32 %v11375_v34, %v11307_v8  ;;  %v3723_v60 = vshll.u32 %v14444_v29, %v3720_v27  ;;  %v3726_v30 = vshll.u32 %v14484_v7, %v3720_v27  ;;  %v3729_v23 = vshll.u32 %v14485_v6, %v3720_v27 }
 0x619   : > { %v3724_v53 = vshrl.u32 %v14484_v7, %v3721_v43  ;;  %v3727_v63 = vshrl.u32 %v14485_v6, %v3721_v43  ;;  %v11525_v17 = vadd.s32 %v3869_v14, %v3865_v22  ;;  %v3730_v58 = vshrl.u32 %v14441_v59, %v3721_v43 }
 0x61a   : > { %14533 = vst [vmem:[#allocation14_spill] sm:$0xff] %v11519_v13  ;;  %v3733_v56 = vshrl.u32 %v14486_v62, %v3721_v43  ;;  %v3732_v34 = vshll.u32 %v14441_v59, %v3720_v27  ;;  %v3736_v5 = vshrl.u32 %v14487_v16, %v3721_v43  ;;  %v11534_v9 = vsel %vm3429_vm12, %v3425_v38, 1326507024 }
 0x61b   : > { %v3725_v48 = vor.u32 %v3724_v53, %v3723_v60  ;;  %v3728_v18 = vor.u32 %v3727_v63, %v3726_v30  ;;  %v3346_v40 = vadd.s32 %v11338_v25, %v11343_v21  ;;  %v3367_v51 = vadd.s32 127, %v3366_v33 }
 0x61c   : > { %v4021_v54 = vand.u32 2139095040, %v11519_v13  ;;  %v3714_v14 = vor.u32 8388608, %v3713_v31  ;;  %v3731_v22 = vor.u32 %v3730_v58, %v3729_v23  ;;  %v3734_v37 = vor.u32 %v3733_v56, %v3732_v34 }
 0x61d   : > { %v3735_v60 = vshll.u32 %v14486_v62, %v3720_v27  ;;  %v3364_v53 = vshrl.u32 %v3346_v40, %v3362_v41  ;;  %v11540_v30 = vand.u32 31, %v3614_v12  ;;  %v7418_v63 = vadd.s32 4294967294, %v3566_v0 }
 0x61e   : > { %vm3738_vm2 = vcmp.lt.s32.totalorder %v11515_v42, 1  ;;  %v3871_v38 = vadd.s32 536870912, %v11525_v17  ;;  %vm3741_vm13 = vcmp.lt.s32.totalorder %v11515_v42, 4  ;;  %v3368_v21 = vshll.u32 %v3367_v51, 23 }
 0x61f   : > { %v3737_v26 = vor.u32 %v3736_v5, %v3735_v60  ;;  %v3746_v25 = vsel %vm3738_vm2, %v3725_v48, %v3728_v18  ;;  %vm3740_vm3 = vcmp.lt.s32.totalorder %v11515_v42, 3  ;;  %v3747_v31 = vsel %vm3741_vm13, %v3734_v37, 920167782 }
 0x620   : > { %v4022_v33 = vshrl.u32 %v4021_v54, 23  ;;  %vm3739_vm6 = vcmp.lt.s32.totalorder %v11515_v42, 2  ;;  %v3743_v27 = vsel %vm3741_vm13, %v3731_v22, 2102212464  ;;  %v3748_v41 = vsel %vm3740_vm3, %v3731_v22, %v3747_v31  ;;  %v4129_v31 = vld [vmem:[#allocation5 + $0x130] sm:$0xff] }
 0x621   : > { %v3754_v0 = vshll.u32 %v3714_v14, 8  ;;  %vm7419_vm8 = vcmp.lt.s32.totalorder %v7418_v63, 0  ;;  %v3722_v23 = vshrl.u32 %v14444_v29, %v3721_v43  ;;  %v3749_v58 = vsel %vm3739_vm6, %v3746_v25, %v3748_v41 }
 0x622   : > { %v3750_v56 = vsel %vm3738_vm2, %v3728_v18, %v3731_v22  ;;  %v11556_v34 = vshrl.u32 %v3871_v38, 30  ;;  %v3751_v5 = vsel %vm3741_vm13, %v3737_v26, 1326507024  ;;  %v3744_v14 = vsel %vm3740_vm3, %v3728_v18, %v3743_v27 }
 0x623   : > { %v11558_v40 = vmul.u32.u64.low %v3754_v0, %v3749_v58  ;;  %v11559_v51 = vmul.u32.u64.high %v3754_v0, %v3749_v58, %v11558_v40  ;;  %v3742_v54 = vsel %vm3738_vm2, %v3722_v23, %v3725_v48  ;;  %v3752_v43 = vsel %vm3740_vm3, %v3734_v37, %v3751_v5  ;;  %v4130_v48 = vld [vmem:[#allocation5 + $0x138] sm:$0xff] }
 0x624   : > { %14534 = vst [vmem:[#allocation15_spill] sm:$0xff] %v11556_v34  ;;  %v7436_v60 = vadd.s32 4294967169, %v4022_v33  ;;  %v3363_v22 = vshll.u32 %v11394_v28, %v11494_v55  ;;  %v11570_v38 = vshrl.u32 %v3614_v12, 5  ;;  %v11573_v26 = vsub.s32 32, %v11540_v30  ;;  %v4131_v33 = vld [vmem:[#allocation5 + $0x140] sm:$0xff]  ;;  %v4132_v28 = vld [vmem:[#allocation5 + $0x148] sm:$0xff] }
 0x625   : > { %v3753_v25 = vsel %vm3739_vm6, %v3750_v56, %v3752_v43  ;;  %v11582_v37 = vadd.f32 %v11307_v8, %v11380_v45  ;;  %v11585_v55 = vsel %vm7419_vm8, 0, %v7418_v63  ;;  %v3873_v12 = vshll.u32 %v11556_v34, 30 }
 0x626   : > { %v11577_v41 = vmul.u32.u64.low %v3754_v0, %v3753_v25  ;;  %v11578_v23 = vmul.u32.u64.high %v3754_v0, %v3753_v25, %v11577_v41  ;;  %v4028_v18 = vadd.s32 1, %v7436_v60  ;;  %v3745_v27 = vsel %vm3739_vm6, %v3742_v54, %v3744_v14 }
 0x627   : > { %14535 = vst [vmem:[#allocation11_spill] sm:$0xff] %v11582_v37  ;;  %v3764_v58 = vadd.s32 1, %v11559_v51  ;;  %v11591_v56 = vor.u32 %v3364_v53, %v3363_v22  ;;  %v11593_v5 = vor.u32 4788187, %v3368_v21  ;;  %v8157_v43 = vpack.c.bf16 %v4130_v48, %v4129_v31  ;;  %v4133_v53 = vld [vmem:[#allocation5 + $0x150] sm:$0xff]  ;;  %v4134_v21 = vld [vmem:[#allocation5 + $0x158] sm:$0xff] }
 0x628   : > { %vm4029_vm1 = vcmp.gt.s32.totalorder %v4028_v18, 0  ;;  %v11597_v8 = vshrl.u32 %v14486_v62, %v11573_v26  ;;  %v14386_v45 = vand.u32 2147483647, %v11519_v13  ;;  %v8161_v60 = vpack.c.bf16 %v4132_v28, %v4131_v33 }
 0x629   : > { %v4030_v63 = vsel %vm4029_vm1, %v4028_v18, 0  ;;  %v3570_v25 = vsub.s32 32, %v11585_v55  ;;  %v3574_v42 = vsub.s32 4294967266, %v11585_v55  ;;  %v3761_v54 = vmul.u32 %v3754_v0, %v3745_v27  ;;  %8158 = vmatprep.subr.bf16.mxu0 %v8157_v43 }
 0x62a   : > { %vm3763_vm5 = vc.u32 %v11578_v23, %v11558_v40  ;;  %v3554_v14 = vadd.s32 %v11403_v44, %v11419_v3  ;;  %v11607_v22 = vsub.s32 %v11525_v17, %v3873_v12  ;;  %v3917_v48 = vand.u32 2139095040, %v11582_v37  ;;  %8160 = vmatpush3.bf16.msra.mxu0 %v8157_v43 }
 0x62b   : > { %v3765_v31 = vsel %vm3763_vm5, %v3764_v58, %v11559_v51  ;;  %v4032_v33 = vand.u32 31, %v4030_v63  ;;  %8162 = vmatprep.subr.bf16.mxu0 %v8161_v60  ;;  %v4025_v44 = vand.u32 8388607, %v14386_v45  ;;  %v8165_v17 = vpack.c.bf16 %v4134_v21, %v4133_v53 }
 0x62c   : > { %v3766_v18 = vadd.s32 %v3765_v31, %v3761_v54  ;;  %v3572_v51 = vshrl.u32 %v3554_v14, %v3570_v25  ;;  %v11618_v12 = vadd.s32 127, %v3574_v42  ;;  %v3876_v43 = vsub.s32 0, %v11607_v22 }
 0x62d   : > { %v4033_v58 = vsub.s32 32, %v4032_v33  ;;  %v4031_v49 = vshrl.u32 %v4030_v63, 5  ;;  %v4035_v54 = vshll.u32 %v14444_v29, %v4032_v33  ;;  %v3918_v31 = vshrl.u32 %v3917_v48, 23 }
 0x62e   : > { %v3767_v27 = vadd.s32 536870912, %v3766_v18  ;;  %8164 = vmatpush3.bf16.msra.mxu0 %v8161_v60  ;;  %v4038_v45 = vshll.u32 %v14484_v7, %v4032_v33  ;;  %v4041_v25 = vshll.u32 %v14485_v6, %v4032_v33  ;;  %v4044_v21 = vshll.u32 %v14441_v59, %v4032_v33 }
 0x62f   : > { %v4036_v4 = vshrl.u32 %v14484_v7, %v4033_v58  ;;  %v4039_v53 = vshrl.u32 %v14485_v6, %v4033_v58  ;;  %8166 = vmatprep.subr.bf16.mxu0 %v8165_v17  ;;  %v4042_v42 = vshrl.u32 %v14441_v59, %v4033_v58  ;;  %v4045_v63 = vshrl.u32 %v14486_v62, %v4033_v58 }
 0x630   : > { %v11622_v35 = vshrl.u32 %v3767_v27, 30  ;;  %v4026_v60 = vor.u32 8388608, %v4025_v44  ;;  %v4047_v41 = vshll.u32 %v14486_v62, %v4032_v33  ;;  %v4048_v3 = vshrl.u32 %v14487_v16, %v4033_v58 }
 0x631   : > { %v4037_v48 = vor.u32 %v4036_v4, %v4035_v54  ;;  %v4040_v27 = vor.u32 %v4039_v53, %v4038_v45  ;;  %v4043_v28 = vor.u32 %v4042_v42, %v4041_v25  ;;  %v4046_v0 = vor.u32 %v4045_v63, %v4044_v21 }
 0x632   : > { %14536 = vst [vmem:[#allocation18_spill] sm:$0xff] %v11622_v35  ;;  %v3769_v14 = vshll.u32 %v11622_v35, 30  ;;  %8168 = vmatpush3.bf16.msra.mxu0 %v8165_v17  ;;  %v7429_v34 = vmin.u32 %v3876_v43, %v11607_v22  ;;  %v4034_v32 = vshrl.u32 %v14444_v29, %v4033_v58  ;;  %v7432_v1 = vadd.s32 4294967169, %v3918_v31 }
 0x633   : > { %v4049_v47 = vor.u32 %v4048_v3, %v4047_v41  ;;  %vm4050_vm11 = vcmp.lt.s32.totalorder %v4031_v49, 1  ;;  %vm4052_vm14 = vcmp.lt.s32.totalorder %v4031_v49, 3  ;;  %vm4053_vm0 = vcmp.lt.s32.totalorder %v4031_v49, 4  ;;  %v4135_v41 = vld [vmem:[#allocation5 + $0x160] sm:$0xff]  ;;  %v4136_v3 = vld [vmem:[#allocation5 + $0x168] sm:$0xff] }
 0x634   : > { %v11635_v13 = vsub.s32 %v3766_v18, %v3769_v14  ;;  %v4055_v45 = vsel %vm4053_vm0, %v4043_v28, 2102212464  ;;  %v4058_v44 = vsel %vm4050_vm11, %v4037_v48, %v4040_v27  ;;  %v4059_v54 = vsel %vm4053_vm0, %v4046_v0, 920167782  ;;  %v4137_v14 = vld [vmem:[#allocation5 + $0x170] sm:$0xff] }
 0x635   : > { %vm4051_vm7 = vcmp.lt.s32.totalorder %v4031_v49, 2  ;;  %v4060_v33 = vsel %vm4052_vm14, %v4043_v28, %v4059_v54  ;;  %v4062_v17 = vsel %vm4050_vm11, %v4040_v27, %v4043_v28  ;;  %v4066_v53 = vshll.u32 %v4026_v60, 8  ;;  %v4138_v54 = vld [vmem:[#allocation5 + $0x178] sm:$0xff] }
 0x636   : > { %v3772_v4 = vsub.s32 0, %v11635_v13  ;;  %v4054_v43 = vsel %vm4050_vm11, %v4034_v32, %v4037_v48  ;;  %v4056_v18 = vsel %vm4052_vm14, %v4040_v27, %v4055_v45  ;;  %v4061_v58 = vsel %vm4051_vm7, %v4058_v44, %v4060_v33 }
 0x637   : > { %v4063_v31 = vsel %vm4053_vm0, %v4049_v47, 1326507024  ;;  %v11644_v21 = vmul.u32.u64.low %v4066_v53, %v4061_v58  ;;  %v11645_v63 = vmul.u32.u64.high %v4066_v53, %v4061_v58, %v11644_v21  ;;  %v3576_v28 = vshll.u32 %v11618_v12, 23 }
 0x638   : > { %v7425_v25 = vmin.u32 %v3772_v4, %v11635_v13  ;;  %v4064_v42 = vsel %vm4052_vm14, %v4046_v0, %v4063_v31  ;;  %v14538_v60 = vand.u32 2147483647, %v11582_v37  ;;  %v3924_v47 = vadd.s32 1, %v7432_v1 }
 0x639   : > { %14537 = vst [vmem:[#allocation17_spill] sm:$0xff] %v11644_v21  ;;  %v4065_v32 = vsel %vm4051_vm7, %v4062_v17, %v4064_v42  ;;  %v14539_v27 = vand.u32 2147483647, %v11593_v5  ;;  %v14540_v4 = vcvt.s32.f32 %v11591_v56  ;;  %v8169_v33 = vpack.c.bf16 %v4136_v3, %v4135_v41 }
 0x63a   : > { %v3921_v48 = vand.u32 8388607, %v14538_v60  ;;  %v11658_v0 = vmul.u32.u64.low %v4066_v53, %v4065_v32  ;;  %v11659_v44 = vmul.u32.u64.high %v4066_v53, %v4065_v32, %v11658_v0  ;;  %v14541_v58 = vshll.u32 %v11472_v20, %v11585_v55 }
 0x63b   : > { %v11656_v45 = vmul.f32 %v14540_v4, %v14539_v27  ;;  %v4057_v17 = vsel %vm4051_vm7, %v4054_v43, %v4056_v18  ;;  %vm3925_vm9 = vcmp.gt.s32.totalorder %v3924_v47, 0  ;;  %v8173_v31 = vpack.c.bf16 %v4138_v54, %v4137_v14  ;;  %8170 = vmatprep.subr.bf16.mxu0 %v8169_v33 }
 0x63c   : > { %v11664_v12 = vor.u32 %v3572_v51, %v14541_v58  ;;  %v3878_v1 = vclz %v7429_v34  ;;  %v3774_v42 = vclz %v7425_v25  ;;  %v4076_v5 = vadd.s32 1, %v11645_v63  ;;  %8172 = vmatpush3.bf16.msra.mxu0 %v8169_v33 }
 0x63d   : > { %v3926_v56 = vsel %vm3925_vm9, %v3924_v47, 0  ;;  %v3628_v32 = vshll.u32 %v14441_v59, %v11540_v30  ;;  %v11670_v60 = vor.u32 4788187, %v3576_v28  ;;  %v3922_v41 = vor.u32 8388608, %v3921_v48  ;;  %8174 = vmatprep.subr.bf16.mxu0 %v8173_v31 }
 0x63e   : > { %v3928_v3 = vand.u32 31, %v3926_v56  ;;  %v11674_v49 = vshll.u32 %v14486_v62, %v11540_v30  ;;  %v11678_v20 = vshrl.u32 %v14487_v16, %v11573_v26  ;;  %v4073_v34 = vmul.u32 %v4066_v53, %v4057_v17 }
 0x63f   : > { %vm4075_vm10 = vc.u32 %v11659_v44, %v11644_v21  ;;  %v3374_v55 = vxor.u32 2147483648, %v11656_v45  ;;  %v11684_v51 = vor.u32 %v11597_v8, %v3628_v32  ;;  %v3580_v43 = vcvt.s32.f32 %v11664_v12 }
 0x640   : > { %v4077_v18 = vsel %vm4075_vm10, %v4076_v5, %v11645_v63  ;;  %v7430_v25 = vadd.s32 4294967294, %v3878_v1  ;;  %v7426_v14 = vadd.s32 4294967294, %v3774_v42  ;;  %v3929_v28 = vsub.s32 32, %v3928_v3  ;;  %8176 = vmatpush3.bf16.msra.mxu0 %v8173_v31 }
 0x641   : > { %v4078_v54 = vadd.s32 %v4077_v18, %v4073_v34  ;;  %v3578_v48 = vand.u32 2147483647, %v11670_v60  ;;  %v3927_v53 = vshrl.u32 %v3926_v56, 5  ;;  %v3931_v47 = vshll.u32 %v14444_v29, %v3928_v3 }
 0x642   : > { %v11690_v27 = vshll.u32 %v3922_v41, 8  ;;  %v3932_v8 = vshrl.u32 %v14484_v7, %v3929_v28  ;;  %v3934_v0 = vshll.u32 %v14484_v7, %v3928_v3  ;;  %v3935_v33 = vshrl.u32 %v14485_v6, %v3929_v28 }
 0x643   : > { %v4079_v4 = vadd.s32 536870912, %v4078_v54  ;;  %v3937_v63 = vshll.u32 %v14485_v6, %v3928_v3  ;;  %v3938_v58 = vshrl.u32 %v14441_v59, %v3929_v28  ;;  %v3940_v12 = vshll.u32 %v14441_v59, %v3928_v3 }
 0x644   : > { %v3941_v17 = vshrl.u32 %v14486_v62, %v3929_v28  ;;  %vm7431_vm15 = vcmp.lt.s32.totalorder %v7430_v25, 0  ;;  %vm7427_vm4 = vcmp.lt.s32.totalorder %v7426_v14, 0  ;;  %v3933_v31 = vor.u32 %v3932_v8, %v3931_v47 }
 0x645   : > { %v11699_v1 = vshrl.u32 %v4079_v4, 30  ;;  %v3936_v42 = vor.u32 %v3935_v33, %v3934_v0  ;;  %vm3292_vm2 = vcmp.lt.s32.totalorder %v11310_v10, 0  ;;  %v3939_v5 = vor.u32 %v3938_v58, %v3937_v63 }
 0x646   : > { %v3942_v56 = vor.u32 %v3941_v17, %v3940_v12  ;;  %v3411_v32 = vshll.u32 %v14444_v29, %v11361_v46  ;;  %v3412_v60 = vshrl.u32 %v14484_v7, %v11368_v2  ;;  %v3943_v34 = vshll.u32 %v14486_v62, %v3928_v3 }
 0x647   : > { %14542 = vst [vmem:[#allocation19_spill] sm:$0xff] %v11699_v1  ;;  %v4081_v41 = vshll.u32 %v11699_v1, 30  ;;  %v3944_v18 = vshrl.u32 %v14487_v16, %v3929_v28  ;;  %v3414_v47 = vshll.u32 %v14484_v7, %v11361_v46  ;;  %v11711_v4 = vsel %vm7427_vm4, 0, %v7426_v14 }
 0x648   : > { %v3930_v8 = vshrl.u32 %v14444_v29, %v3929_v28  ;;  %vm3946_vm13 = vcmp.lt.s32.totalorder %v3927_v53, 1  ;;  %vm3949_vm3 = vcmp.lt.s32.totalorder %v3927_v53, 4  ;;  %vm3947_vm6 = vcmp.lt.s32.totalorder %v3927_v53, 2 }
 0x649   : > { %v11714_v0 = vsub.s32 %v4078_v54, %v4081_v41  ;;  %v3945_v33 = vor.u32 %v3944_v18, %v3943_v34  ;;  %v3951_v63 = vsel %vm3949_vm3, %v3939_v5, 2102212464  ;;  %v3954_v58 = vsel %vm3946_vm13, %v3933_v31, %v3936_v42 }
 0x64a   : > { %vm3948_vm8 = vcmp.lt.s32.totalorder %v3927_v53, 3  ;;  %v3955_v12 = vsel %vm3949_vm3, %v3942_v56, 920167782  ;;  %v3958_v3 = vsel %vm3946_vm13, %v3936_v42, %v3939_v5  ;;  %v3950_v17 = vsel %vm3946_vm13, %v3930_v8, %v3933_v31 }
 0x64b   : > { %v3952_v16 = vsel %vm3948_vm8, %v3936_v42, %v3951_v63  ;;  %v3956_v62 = vsel %vm3948_vm8, %v3939_v5, %v3955_v12  ;;  %v3959_v1 = vsel %vm3949_vm3, %v3945_v33, 1326507024  ;;  %v3782_v14 = vsub.s32 4294967266, %v11711_v4 }
 0x64c   : > { %v3957_v37 = vsel %vm3947_vm6, %v3954_v58, %v3956_v62  ;;  %v3960_v35 = vsel %vm3948_vm8, %v3942_v56, %v3959_v1  ;;  %v3413_v28 = vor.u32 %v3412_v60, %v3411_v32  ;;  %v4084_v21 = vsub.s32 0, %v11714_v0 }
 0x64d   : > { %v3961_v54 = vsel %vm3947_vm6, %v3958_v3, %v3960_v35  ;;  %v11719_v41 = vmul.u32.u64.low %v11690_v27, %v3957_v37  ;;  %v11720_v34 = vmul.u32.u64.high %v11690_v27, %v3957_v37, %v11719_v41  ;;  %v3953_v53 = vsel %vm3947_vm6, %v3950_v17, %v3952_v16 }
 0x64e   : > { %v11724_v18 = vmul.u32.u64.low %v11690_v27, %v3961_v54  ;;  %v11725_v31 = vmul.u32.u64.high %v11690_v27, %v3961_v54, %v11724_v18  ;;  %v3415_v42 = vshrl.u32 %v14485_v6, %v11368_v2  ;;  %v3375_v62 = vsel %vm3292_vm2, %v3374_v55, %v11656_v45 }
 0x64f   : > { %v11732_v1 = vmul.f32 %v3580_v43, %v3578_v48  ;;  %v3417_v35 = vshll.u32 %v14485_v6, %v11361_v46  ;;  %v3418_v37 = vshrl.u32 %v14441_v59, %v11368_v2  ;;  %v11739_v16 = vsel %vm7431_vm15, 0, %v7430_v25 }
 0x650   : > { %v3783_v5 = vadd.s32 127, %v3782_v14  ;;  %v3410_v56 = vshrl.u32 %v14444_v29, %v11368_v2  ;;  %v3416_v32 = vor.u32 %v3415_v42, %v3414_v47  ;;  %v14543_v60 = vand.u32 2147483647, %v11310_v10 }
 0x651   : > { %v3969_v55 = vmul.u32 %v11690_v27, %v3953_v53  ;;  %v3972_v46 = vadd.s32 1, %v11720_v34  ;;  %v3419_v43 = vor.u32 %v3418_v37, %v3417_v35  ;;  %vm3426_vm5 = vcmp.lt.s32.totalorder %v11422_v36, 1 }
 0x652   : > { %vm11745_vm1 = vcmp.le.f32.partialorder %v14543_v60, 0.7853982  ;;  %v7437_v25 = vmin.u32 %v4084_v21, %v11714_v0  ;;  %vm3971_vm11 = vc.u32 %v11725_v31, %v11719_v41  ;;  %vm3428_vm14 = vcmp.lt.s32.totalorder %v11422_v36, 3 }
 0x653   : > { %v3434_v2 = vsel %vm3426_vm5, %v3413_v28, %v3416_v32  ;;  %v3973_v48 = vsel %vm3971_vm11, %v3972_v46, %v11720_v34  ;;  %vm3427_vm0 = vcmp.lt.s32.totalorder %v11422_v36, 2  ;;  %v3431_v27 = vsel %vm3429_vm12, %v3419_v43, 2102212464 }
 0x654   : > { %v3436_v47 = vsel %vm3428_vm14, %v3419_v43, %v11506_v39  ;;  %v3974_v8 = vadd.s32 %v3973_v48, %v3969_v55  ;;  %v3440_v33 = vsel %vm3428_vm14, %v11430_v50, %v11534_v9  ;;  %v3376_v63 = vsub.s32 4, %v11365_v57 }
 0x655   : > { %v3437_v21 = vsel %vm3427_vm0, %v3434_v2, %v3436_v47  ;;  %v3886_v58 = vsub.s32 4294967266, %v11739_v16  ;;  %v3778_v12 = vsub.s32 32, %v11711_v4  ;;  %v3430_v3 = vsel %vm3426_vm5, %v3410_v56, %v3413_v28 }
 0x656   : > { %v3432_v17 = vsel %vm3428_vm14, %v3416_v32, %v3431_v27  ;;  %v3975_v14 = vadd.s32 536870912, %v3974_v8  ;;  %v3438_v39 = vsel %vm3426_vm5, %v3416_v32, %v3419_v43  ;;  %v3762_v50 = vadd.s32 %v11558_v40, %v11578_v23 }
 0x657   : > { %v11775_v54 = vmul.u32.u64.low %v11490_v11, %v3437_v21  ;;  %v11776_v34 = vmul.u32.u64.high %v11490_v11, %v3437_v21, %v11775_v54  ;;  %v3784_v9 = vshll.u32 %v3783_v5, 23  ;;  %v4086_v53 = vclz %v7437_v25 }
 0x658   : > { %v3441_v18 = vsel %vm3427_vm0, %v3438_v39, %v3440_v33  ;;  %vm3500_vm12 = vcmp.lt.s32.totalorder %v11335_v15, 0  ;;  %v11784_v28 = vshrl.u32 %v3975_v14, 30  ;;  %v3377_v37 = vsel %vm3292_vm2, %v3376_v63, %v11365_v57 }
 0x659   : > { %v11787_v42 = vmul.u32.u64.low %v11490_v11, %v3441_v18  ;;  %v11788_v35 = vmul.u32.u64.high %v11490_v11, %v3441_v18, %v11787_v42  ;;  %v3780_v56 = vshrl.u32 %v3762_v50, %v3778_v12  ;;  %v3433_v40 = vsel %vm3427_vm0, %v3430_v3, %v3432_v17 }
 0x65a   : > { %v3378_v23 = vsel %vm11745_vm1, %v11310_v10, %v3375_v62  ;;  %v3379_v5 = vsel %vm11745_vm1, 0, %v3377_v37  ;;  %v3887_v32 = vadd.s32 127, %v3886_v58  ;;  %v3977_v60 = vshll.u32 %v11784_v28, 30 }
 0x65b   : > { %v3452_v55 = vadd.s32 1, %v11776_v34  ;;  %8680 = vcosq.f32 %v3378_v23  ;;  %v3779_v57 = vshll.u32 %v11635_v13, %v11711_v4  ;;  %v3785_v46 = vor.u32 4788187, %v3784_v9 }
 0x65c   : > { %8682 = vsinq.f32 %v3378_v23  ;;  %v3383_v36 = vadd.s32 3, %v3379_v5  ;;  %v7438_v43 = vadd.s32 4294967294, %v4086_v53  ;;  %v11804_v25 = vsub.s32 %v3974_v8, %v3977_v60 }
 0x65d   : > { %v3449_v62 = vmul.u32 %v11490_v11, %v3433_v40  ;;  %vm3451_vm7 = vc.u32 %v11788_v35, %v11775_v54  ;;  %v3633_v45 = vor.u32 %v11678_v20, %v11674_v49  ;;  %v3582_v2 = vxor.u32 2147483648, %v11732_v1 }
 0x65e   : > { %v3781_v48 = vor.u32 %v3780_v56, %v3779_v57  ;;  %v3453_v27 = vsel %vm3451_vm7, %v3452_v55, %v11776_v34  ;;  %vm3637_vm9 = vcmp.lt.s32.totalorder %v11570_v38, 4  ;;  %v3882_v13 = vsub.s32 32, %v11739_v16 }
 0x65f   : > { %v3980_v4 = vsub.s32 0, %v11804_v25  ;;  %v3454_v47 = vadd.s32 %v3453_v27, %v3449_v62  ;;  %v11819_v11 = vsel %vm3637_vm9, %v11684_v51, 920167782  ;;  %v3888_v8 = vshll.u32 %v3887_v32, 23 }
 0x660   : > { %v3786_v21 = vand.u32 2147483647, %v3785_v46  ;;  %v3384_v49 = vand.u32 3, %v3383_v36  ;;  %v3866_v20 = vadd.s32 %v11468_v24, %v11480_v19  ;;  %vm7439_vm10 = vcmp.lt.s32.totalorder %v7438_v43, 0 }
 0x661   : > { %v7433_v33 = vmin.u32 %v3980_v4, %v11804_v25  ;;  %v3455_v63 = vadd.s32 536870912, %v3454_v47  ;;  %v3647_v58 = vsel %vm3637_vm9, %v3633_v45, 1326507024  ;;  %v11829_v12 = vsel %vm3500_vm12, %v3582_v2, %v11732_v1 }
 0x662   : > { %v3788_v3 = vcvt.s32.f32 %v3781_v48  ;;  %v3602_v17 = vand.u32 2147483647, %v11373_v52  ;;  %v3883_v14 = vshll.u32 %v11607_v22, %v11739_v16  ;;  %v11834_v39 = vshrl.u32 %v3866_v20, %v3882_v13 }
 0x663   : > { %v3982_v24 = vclz %v7433_v33  ;;  %v11836_v19 = vshrl.u32 %v3455_v63, 30  ;;  %vm3382_vm15 = vweird.f32 %v11310_v10  ;;  %v11839_v34 = vor.u32 4788187, %v3888_v8 }
 0x664   : > { %v11841_v50 = vmul.f32 %v3788_v3, %v3786_v21  ;;  %v11843_v9 = vsel %vm7439_vm10, 0, %v7438_v43  ;;  %vm3385_vm4 = vcmp.lt.s32.totalorder %v3384_v49, 2  ;;  %vm3389_vm2 = vcmp.eq.s32.totalorder %v3384_v49, 2 }
 0x665   : > { %v8681_v1 = vpop.eup %8680  ;;  %v7434_v53 = vadd.s32 4294967294, %v3982_v24  ;;  %v3457_v18 = vshll.u32 %v11836_v19, 30  ;;  %v3620_v42 = vshrl.u32 %v14484_v7, %v11573_v26  ;;  %v3609_v40 = vand.u32 8388607, %v3602_v17 }
 0x666   : > { %v8683_v37 = vpop.eup %8682  ;;  %v3390_v56 = vxor.u32 2147483648, %v8681_v1  ;;  %v3623_v23 = vshrl.u32 %v14485_v6, %v11573_v26  ;;  %v3626_v5 = vshrl.u32 %v14441_v59, %v11573_v26  ;;  %v3619_v55 = vshll.u32 %v14444_v29, %v11540_v30 }
 0x667   : > { %vm7435_vm13 = vcmp.lt.s32.totalorder %v7434_v53, 0  ;;  %v11854_v32 = vsub.s32 %v3454_v47, %v3457_v18  ;;  %v3387_v60 = vxor.u32 2147483648, %v8683_v37  ;;  %v3622_v36 = vshll.u32 %v14484_v7, %v11540_v30 }
 0x668   : > { %v3985_v57 = vsel %vm7435_vm13, 0, %v7434_v53  ;;  %v3391_v46 = vsel %vm3389_vm2, %v3390_v56, %v8683_v37  ;;  %v3625_v43 = vshll.u32 %v14485_v6, %v11540_v30  ;;  %vm3386_vm3 = vcmp.eq.s32.totalorder %v3384_v49, 0 }
 0x669   : > { %v3990_v62 = vsub.s32 4294967266, %v3985_v57  ;;  %v3460_v45 = vsub.s32 0, %v11854_v32  ;;  %v3621_v2 = vor.u32 %v3620_v42, %v3619_v55  ;;  %v3986_v48 = vsub.s32 32, %v3985_v57 }
 0x66a   : > { %v3388_v27 = vsel %vm3386_vm3, %v8681_v1, %v3387_v60  ;;  %v3624_v13 = vor.u32 %v3623_v23, %v3622_v36  ;;  %v3627_v4 = vor.u32 %v3626_v5, %v3625_v43  ;;  %v3790_v47 = vxor.u32 2147483648, %v11841_v50 }
 0x66b   : > { %v3991_v8 = vadd.s32 127, %v3990_v62  ;;  %v7413_v21 = vmin.u32 %v3460_v45, %v11854_v32  ;;  %v3392_v20 = vsel %vm3385_vm4, %v3388_v27, %v3391_v46  ;;  %v4094_v33 = vsub.s32 4294967266, %v11843_v9 }
 0x66c   : > { %v3970_v30 = vadd.s32 %v11719_v41, %v11725_v31  ;;  %v11871_v63 = vsel %vm3382_vm15, nan, %v3392_v20  ;;  %v3610_v3 = vor.u32 8388608, %v3609_v40  ;;  %vm3634_vm6 = vcmp.lt.s32.totalorder %v11570_v38, 1 }
 0x66d   : > { %v3992_v24 = vshll.u32 %v3991_v8, 23  ;;  %v3462_v1 = vclz %v7413_v21  ;;  %7905 = vmatprep.mubr.f32.mxu0 %v11871_v63  ;;  %vm3636_vm8 = vcmp.lt.s32.totalorder %v11570_v38, 3  ;;  %v3642_v53 = vsel %vm3634_vm6, %v3621_v2, %v3624_v13 }
 0x66e   : > { %v3988_v49 = vshrl.u32 %v3970_v30, %v3986_v48  ;;  %v3644_v41 = vsel %vm3636_vm8, %v3627_v4, %v11819_v11  ;;  %v3646_v10 = vsel %vm3634_vm6, %v3624_v13, %v3627_v4  ;;  %vm3635_vm1 = vcmp.lt.s32.totalorder %v11570_v38, 2  ;;  %v14550_v30 = vld [vmem:[#allocation16_spill] sm:$0xff] }
 0x66f   : > { %v7414_v31 = vadd.s32 4294967294, %v3462_v1  ;;  %v3639_v18 = vsel %vm3637_vm9, %v3627_v4, 2102212464  ;;  %v3648_v42 = vsel %vm3636_vm8, %v11684_v51, %v3647_v58  ;;  %vm3708_vm5 = vcmp.lt.s32.totalorder %v11415_v61, 0 }
 0x670   : > { %v3987_v37 = vshll.u32 %v11804_v25, %v3985_v57  ;;  %v3993_v56 = vor.u32 4788187, %v3992_v24  ;;  %v3649_v11 = vsel %vm3635_vm1, %v3646_v10, %v3648_v42  ;;  %v3650_v40 = vshll.u32 %v3610_v3, 8  ;;  %v14546_v25 = vld [vmem:[#allocation12_spill] sm:$0xff] }
 0x671   : > { %v3450_v23 = vadd.s32 %v11775_v54, %v11788_v35  ;;  %vm7415_vm11 = vcmp.lt.s32.totalorder %v7414_v31, 0  ;;  %v3618_v5 = vshrl.u32 %v14444_v29, %v11573_v26  ;;  %v3645_v60 = vsel %vm3635_vm1, %v3642_v53, %v3644_v41 }
 0x672   : > { %v3989_v51 = vor.u32 %v3988_v49, %v3987_v37  ;;  %v3465_v58 = vsel %vm7415_vm11, 0, %v7414_v31  ;;  %v11899_v55 = vmul.u32.u64.low %v3650_v40, %v3649_v11  ;;  %v11900_v46 = vmul.u32.u64.high %v3650_v40, %v3649_v11, %v11899_v55 }
 0x673   : > { %vm3396_vm14 = vcmp.lt.s32.totalorder %v14546_v25, 0  ;;  %v3466_v57 = vsub.s32 32, %v3465_v58  ;;  %v3470_v36 = vsub.s32 4294967266, %v3465_v58  ;;  %v3638_v43 = vsel %vm3634_vm6, %v3618_v5, %v3621_v2 }
 0x674   : > { %v3640_v54 = vsel %vm3636_vm8, %v3624_v13, %v3639_v18  ;;  %v3994_v35 = vand.u32 2147483647, %v3993_v56  ;;  %v11907_v26 = vmul.u32.u64.low %v3650_v40, %v3645_v60  ;;  %v11908_v62 = vmul.u32.u64.high %v3650_v40, %v3645_v60, %v11907_v26  ;;  %v14554_v18 = vld [vmem:[#allocation17_spill] sm:$0xff] }
 0x675   : > { %v14547_v45 = vand.u32 2147483647, %v11335_v15  ;;  %v3467_v27 = vshll.u32 %v11854_v32, %v3465_v58  ;;  %v3468_v4 = vshrl.u32 %v3450_v23, %v3466_v57  ;;  %v3471_v8 = vadd.s32 127, %v3470_v36 }
 0x676   : > { %v4095_v13 = vadd.s32 127, %v4094_v33  ;;  %v3996_v21 = vcvt.s32.f32 %v3989_v51  ;;  %v3641_v20 = vsel %vm3635_vm1, %v3638_v43, %v3640_v54  ;;  %v3584_v3 = vsub.s32 4, %v14550_v30  ;;  %v14558_v43 = vld [vmem:[#allocation18_spill] sm:$0xff] }
 0x677   : > { %vm11913_vm0 = vcmp.le.f32.partialorder %v14547_v45, 0.7853982  ;;  %v4090_v24 = vsub.s32 32, %v11843_v9  ;;  %v14551_v1 = vand.u32 2147483647, %v14546_v25  ;;  %v3469_v49 = vor.u32 %v3468_v4, %v3467_v27  ;;  %v14559_v45 = vld [vmem:[#allocation11_spill] sm:$0xff] }
 0x678   : > { %v3586_v2 = vsel %vm11913_vm0, %v11335_v15, %v11829_v12  ;;  %v3472_v53 = vshll.u32 %v3471_v8, 23  ;;  %vm3659_vm9 = vc.u32 %v11900_v46, %v11907_v26  ;;  %v3997_v12 = vmul.f32 %v3996_v21, %v3994_v35 }
 0x679   : > { %vm11928_vm7 = vcmp.le.f32.partialorder %v14551_v1, 0.7853982  ;;  %v3480_v33 = vsub.s32 4, %v11836_v19  ;;  %v3660_v38 = vadd.s32 1, %v11908_v62  ;;  %8684 = vcosq.f32 %v3586_v2 }
 0x67a   : > { %v3791_v41 = vsel %vm3708_vm5, %v3790_v47, %v11841_v50  ;;  %v3473_v10 = vor.u32 4788187, %v3472_v53  ;;  %v3657_v31 = vmul.u32 %v3650_v40, %v3641_v20  ;;  %8686 = vsinq.f32 %v3586_v2 }
 0x67b   : > { %v4074_v42 = vadd.s32 %v14554_v18, %v11659_v44  ;;  %v4096_v37 = vshll.u32 %v4095_v13, 23  ;;  %v3661_v56 = vsel %vm3659_vm9, %v3660_v38, %v11908_v62  ;;  %v3585_v11 = vsel %vm3500_vm12, %v3584_v3, %v14550_v30 }
 0x67c   : > { %v3474_v23 = vand.u32 2147483647, %v3473_v10  ;;  %v3476_v5 = vcvt.s32.f32 %v3469_v49  ;;  %v3662_v60 = vadd.s32 %v3661_v56, %v3657_v31  ;;  %v14555_v51 = vand.u32 2147483647, %v11415_v61 }
 0x67d   : > { %v4092_v47 = vshrl.u32 %v4074_v42, %v4090_v24  ;;  %v3998_v40 = vxor.u32 2147483648, %v3997_v12  ;;  %v3481_v44 = vsel %vm3396_vm14, %v3480_v33, %v11836_v19  ;;  %v3587_v36 = vsel %vm11913_vm0, 0, %v3585_v11 }
 0x67e   : > { %vm11947_vm10 = vcmp.le.f32.partialorder %v14555_v51, 0.7853982  ;;  %v3477_v55 = vmul.f32 %v3476_v5, %v3474_v23  ;;  %v3663_v57 = vadd.s32 536870912, %v3662_v60  ;;  %v3792_v54 = vsub.s32 4, %v14558_v43 }
 0x67f   : > { %v3794_v58 = vsel %vm11947_vm10, %v11415_v61, %v3791_v41  ;;  %v3885_v35 = vor.u32 %v11834_v39, %v3883_v14  ;;  %v4091_v62 = vshll.u32 %v11714_v0, %v11843_v9  ;;  %v4097_v19 = vor.u32 4788187, %v4096_v37 }
 0x680   : > { %vm3916_vm12 = vcmp.lt.s32.totalorder %v14559_v45, 0  ;;  %v3890_v27 = vand.u32 2147483647, %v11839_v34  ;;  %v3478_v4 = vxor.u32 2147483648, %v3477_v55  ;;  %v11968_v8 = vshrl.u32 %v3663_v57, 30 }
 0x681   : > { %8688 = vcosq.f32 %v3794_v58  ;;  %v4093_v48 = vor.u32 %v4092_v47, %v4091_v62  ;;  %v3999_v2 = vsel %vm3916_vm12, %v3998_v40, %v3997_v12  ;;  %v3483_v22 = vsel %vm11928_vm7, 0, %v3481_v44 }
 0x682   : > { %v3591_v16 = vadd.s32 3, %v3587_v36  ;;  %v3479_v0 = vsel %vm3396_vm14, %v3478_v4, %v3477_v55  ;;  %v3665_v14 = vshll.u32 %v11968_v8, 30  ;;  %v3793_v39 = vsel %vm3708_vm5, %v3792_v54, %v14558_v43 }
 0x683   : > { %8690 = vsinq.f32 %v3794_v58  ;;  %v8685_v34 = vpop.eup %8684  ;;  %v3892_v9 = vcvt.s32.f32 %v3885_v35  ;;  %v4098_v13 = vand.u32 2147483647, %v4097_v19  ;;  %v3482_v21 = vsel %vm11928_vm7, %v14546_v25, %v3479_v0 }
 0x684   : > { %v14560_v20 = vand.u32 2147483647, %v14559_v45  ;;  %v8687_v3 = vpop.eup %8686  ;;  %8692 = vcosq.f32 %v3482_v21  ;;  %v3487_v24 = vadd.s32 3, %v3483_v22  ;;  %v11989_v1 = vsub.s32 %v3662_v60, %v3665_v14 }
 0x685   : > { %v4100_v53 = vcvt.s32.f32 %v4093_v48  ;;  %8694 = vsinq.f32 %v3482_v21  ;;  %v3795_v32 = vsel %vm11947_vm10, 0, %v3793_v39  ;;  %v4000_v12 = vsub.s32 4, %v11784_v28 }
 0x686   : > { %vm11985_vm15 = vcmp.le.f32.partialorder %v14560_v20, 0.7853982  ;;  %v11997_v33 = vmul.f32 %v3892_v9, %v3890_v27  ;;  %v3668_v38 = vsub.s32 0, %v11989_v1  ;;  %v3592_v41 = vand.u32 3, %v3591_v16 }
 0x687   : > { %v4002_v49 = vsel %vm11985_vm15, %v14559_v45, %v3999_v2  ;;  %v12000_v10 = vmul.f32 %v4100_v53, %v4098_v13  ;;  %v3595_v31 = vxor.u32 2147483648, %v8687_v3  ;;  %v3598_v18 = vxor.u32 2147483648, %v8685_v34  ;;  %v14563_v53 = vld [vmem:[#allocation13_spill] sm:$0xff] }
 0x688   : > { %8696 = vcosq.f32 %v4002_v49  ;;  %v3488_v42 = vand.u32 3, %v3487_v24  ;;  %v7421_v37 = vmin.u32 %v3668_v38, %v11989_v1  ;;  %v3799_v56 = vadd.s32 3, %v3795_v32  ;;  %v14564_v32 = vld [vmem:[#allocation14_spill] sm:$0xff] }
 0x689   : > { %v4001_v11 = vsel %vm3916_vm12, %v4000_v12, %v11784_v28  ;;  %8698 = vsinq.f32 %v4002_v49  ;;  %vm3594_vm4 = vcmp.eq.s32.totalorder %v3592_v41, 0  ;;  %vm3597_vm2 = vcmp.eq.s32.totalorder %v3592_v41, 2 }
 0x68a   : > { %v3670_v5 = vclz %v7421_v37  ;;  %v3894_v60 = vxor.u32 2147483648, %v11997_v33  ;;  %v4102_v51 = vxor.u32 2147483648, %v12000_v10  ;;  %vm3486_vm13 = vweird.f32 %v14546_v25 }
 0x68b   : > { %v8689_v23 = vpop.eup %8688  ;;  %v3596_v50 = vsel %vm3594_vm4, %v8685_v34, %v3595_v31  ;;  %v3599_v47 = vsel %vm3597_vm2, %v3598_v18, %v8687_v3  ;;  %vm3489_vm3 = vcmp.lt.s32.totalorder %v3488_v42, 2  ;;  %v3800_v58 = vand.u32 3, %v3799_v56 }
 0x68c   : > { %v7422_v44 = vadd.s32 4294967294, %v3670_v5  ;;  %v4003_v28 = vsel %vm11985_vm15, 0, %v4001_v11  ;;  %vm3490_vm6 = vcmp.eq.s32.totalorder %v3488_v42, 0  ;;  %vm3493_vm8 = vcmp.eq.s32.totalorder %v3488_v42, 2 }
 0x68d   : > { %v8691_v40 = vpop.eup %8690  ;;  %vm3593_vm1 = vcmp.lt.s32.totalorder %v3592_v41, 2  ;;  %v3806_v55 = vxor.u32 2147483648, %v8689_v23  ;;  %v3658_v36 = vadd.s32 %v11907_v26, %v11900_v46  ;;  %vm3590_vm11 = vweird.f32 %v11335_v15 }
 0x68e   : > { %v8693_v57 = vpop.eup %8692  ;;  %vm7423_vm5 = vcmp.lt.s32.totalorder %v7422_v44, 0  ;;  %v3600_v43 = vsel %vm3593_vm1, %v3596_v50, %v3599_v47  ;;  %v3803_v19 = vxor.u32 2147483648, %v8691_v40  ;;  %v4007_v27 = vadd.s32 3, %v4003_v28 }
 0x68f   : > { %v8695_v54 = vpop.eup %8694  ;;  %v3494_v35 = vxor.u32 2147483648, %v8693_v57  ;;  %v3673_v62 = vsel %vm7423_vm5, 0, %v7422_v44  ;;  %vm3805_vm14 = vcmp.eq.s32.totalorder %v3800_v58, 2  ;;  %v12015_v0 = vsel %vm3590_vm11, nan, %v3600_v43 }
 0x690   : > { %v3491_v4 = vxor.u32 2147483648, %v8695_v54  ;;  %v3674_v48 = vsub.s32 32, %v3673_v62  ;;  %v3678_v2 = vsub.s32 4294967266, %v3673_v62  ;;  %vm3802_vm0 = vcmp.eq.s32.totalorder %v3800_v58, 0 }
 0x691   : > { %v3495_v16 = vsel %vm3493_vm8, %v3494_v35, %v8695_v54  ;;  %v3807_v46 = vsel %vm3805_vm14, %v3806_v55, %v8691_v40  ;;  %v3675_v15 = vshll.u32 %v11989_v1, %v3673_v62  ;;  %v3804_v13 = vsel %vm3802_vm0, %v8689_v23, %v3803_v19 }
 0x692   : > { %v8697_v22 = vpop.eup %8696  ;;  %v3492_v26 = vsel %vm3490_vm6, %v8693_v57, %v3491_v4  ;;  %v3676_v14 = vshrl.u32 %v3658_v36, %v3674_v48  ;;  %v3679_v39 = vadd.s32 127, %v3678_v2  ;;  %v4008_v21 = vand.u32 3, %v4007_v27  ;;  %v14574_v57 = vld [vmem:[#allocation19_spill] sm:$0xff] }
 0x693   : > { %v8699_v34 = vpop.eup %8698  ;;  %v3496_v9 = vsel %vm3489_vm3, %v3492_v26, %v3495_v16  ;;  %v4014_v20 = vxor.u32 2147483648, %v8697_v22  ;;  %vm3812_vm7 = vcmp.lt.s32.totalorder %v14563_v53, 0  ;;  %vm4020_vm9 = vcmp.lt.s32.totalorder %v14564_v32, 0 }
 0x694   : > { %v3497_v30 = vsel %vm3486_vm13, nan, %v3496_v9  ;;  %v3677_v3 = vor.u32 %v3676_v14, %v3675_v15  ;;  %v3680_v24 = vshll.u32 %v3679_v39, 23  ;;  %v4011_v49 = vxor.u32 2147483648, %v8699_v34 }
 0x695   : > { %7156 = vrot.lane.b32.xlu0 %v3497_v30, %s8946_s6  ;;  %7906 = vmatmul.mubr.f32.vlgmr.msra.gmra.mrb[16].mxu0 %v3497_v30  ;;  %v3895_v1 = vsel %vm3812_vm7, %v3894_v60, %v11997_v33  ;;  %v4103_v25 = vsel %vm4020_vm9, %v4102_v51, %v12000_v10  ;;  %vm3801_vm10 = vcmp.lt.s32.totalorder %v3800_v58, 2  ;;  %v14565_v41 = vand.u32 2147483647, %v14563_v53  ;;  %v14568_v10 = vld [vmem:[#allocation15_spill] sm:$0xff] }
 0x696   : > { %v3681_v12 = vor.u32 4788187, %v3680_v24  ;;  %7908 = vmatprep.mubr.f32.mxu0 %v12015_v0  ;;  %v3808_v38 = vsel %vm3801_vm10, %v3804_v13, %v3807_v46  ;;  %vm4010_vm15 = vcmp.eq.s32.totalorder %v4008_v21, 0  ;;  %vm4013_vm4 = vcmp.eq.s32.totalorder %v4008_v21, 2 }
 0x697   : > { %vm12034_vm12 = vcmp.le.f32.partialorder %v14565_v41, 0.7853982  ;;  %v3684_v42 = vcvt.s32.f32 %v3677_v3  ;;  %v4012_v33 = vsel %vm4010_vm15, %v8697_v22, %v4011_v49  ;;  %v4015_v37 = vsel %vm4013_vm4, %v4014_v20, %v8699_v34 }
 0x698   : > { %v3682_v18 = vand.u32 2147483647, %v3681_v12  ;;  %v3688_v56 = vsub.s32 4, %v11968_v8  ;;  %vm3798_vm2 = vweird.f32 %v11415_v61  ;;  %v3896_v11 = vsub.s32 4, %v14568_v10 }
 0x699   : > { %7154 = vrot.lane.b32.xlu0 %v11871_v63, %s8946_s6  ;;  %v3898_v23 = vsel %vm12034_vm12, %v14563_v53, %v3895_v1  ;;  %v3809_v60 = vsel %vm3798_vm2, nan, %v3808_v38  ;;  %vm4009_vm13 = vcmp.lt.s32.totalorder %v4008_v21, 2  ;;  %v14569_v51 = vand.u32 2147483647, %v14564_v32 }
 0x69a   : > { %v3685_v5 = vmul.f32 %v3684_v42, %v3682_v18  ;;  %v4016_v47 = vsel %vm4009_vm13, %v4012_v33, %v4015_v37  ;;  %vm3604_vm6 = vcmp.lt.s32.totalorder %v11373_v52, 0  ;;  %8700 = vsinq.f32 %v3898_v23 }
 0x69b   : > { %vm12048_vm3 = vcmp.le.f32.partialorder %v14569_v51, 0.7853982  ;;  %vm12058_vm8 = vcmp.le.f32.partialorder %v3602_v17, 0.7853982  ;;  %v3689_v44 = vsel %vm3604_vm6, %v3688_v56, %v11968_v8  ;;  %8702 = vcosq.f32 %v3898_v23 }
 0x69c   : > { %v4106_v61 = vsel %vm12048_vm3, %v14564_v32, %v4103_v25  ;;  %v3686_v63 = vxor.u32 2147483648, %v3685_v5  ;;  %vm4006_vm1 = vweird.f32 %v14559_v45  ;;  %v3897_v28 = vsel %vm3812_vm7, %v3896_v11, %v14568_v10 }
 0x69d   : > { %7162 = vrot.lane.b32.xlu0 %v3809_v60, %s8946_s6  ;;  %v4017_v55 = vsel %vm4006_vm1, nan, %v4016_v47  ;;  %8704 = vcosq.f32 %v4106_v61  ;;  %v4104_v36 = vsub.s32 4, %v14574_v57  ;;  %v3691_v8 = vsel %vm12058_vm8, 0, %v3689_v44 }
 0x69e   : > { %v3687_v58 = vsel %vm3604_vm6, %v3686_v63, %v3685_v5  ;;  %8706 = vsinq.f32 %v4106_v61  ;;  %v3899_v45 = vsel %vm12034_vm12, 0, %v3897_v28  ;;  %v3695_v43 = vadd.s32 3, %v3691_v8 }
 0x69f   : > { %v3690_v17 = vsel %vm12058_vm8, %v11373_v52, %v3687_v58  ;;  %v4105_v54 = vsel %vm4020_vm9, %v4104_v36, %v14574_v57  ;;  %v3903_v35 = vadd.s32 3, %v3899_v45  ;;  %vm3694_vm9 = vweird.f32 %v11373_v52 }
 0x6a0   : > { %8708 = vcosq.f32 %v3690_v17  ;;  %v4107_v19 = vsel %vm12048_vm3, 0, %v4105_v54  ;;  %v3696_v4 = vand.u32 3, %v3695_v43  ;;  %vm3902_vm4 = vweird.f32 %v14563_v53  ;;  %v12093_v53 = vld [vmem:[%s14324_s4 + $0x4] ss:$0 sm:$0xff] }
 0x6a1   : > { %8710 = vsinq.f32 %v3690_v17  ;;  %7166 = vrot.lane.b32.xlu0 %v4017_v55, %s8946_s6  ;;  %v3904_v2 = vand.u32 3, %v3903_v35  ;;  %v4111_v46 = vadd.s32 3, %v4107_v19  ;;  %vm4110_vm13 = vweird.f32 %v14564_v32 }
 0x6a2   : > { %vm3697_vm5 = vcmp.lt.s32.totalorder %v3696_v4, 2  ;;  %vm3698_vm11 = vcmp.eq.s32.totalorder %v3696_v4, 0  ;;  %vm3701_vm14 = vcmp.eq.s32.totalorder %v3696_v4, 2  ;;  %v14575_v19 = vmov 920167782  }
 0x6a3   : > { %vm3906_vm0 = vcmp.eq.s32.totalorder %v3904_v2, 0  ;;  %vm3909_vm7 = vcmp.eq.s32.totalorder %v3904_v2, 2  ;;  %v4112_v21 = vand.u32 3, %v4111_v46  ;;  %vm3905_vm10 = vcmp.lt.s32.totalorder %v3904_v2, 2 }
 0x6a4   : > { %v8701_v62 = vpop.eup %8700  ;;  %v14576_v46 = vmov 1326507024  }
 0x6a5   : > { %v8703_v27 = vpop.eup %8702  ;;  %v3907_v16 = vxor.u32 2147483648, %v8701_v62  ;;  %vm4114_vm12 = vcmp.eq.s32.totalorder %v4112_v21, 0  ;;  %vm4117_vm15 = vcmp.eq.s32.totalorder %v4112_v21, 2  ;;  %vm4113_vm2 = vcmp.lt.s32.totalorder %v4112_v21, 2 }
 0x6a6   : > { %v3910_v15 = vxor.u32 2147483648, %v8703_v27 }
 0x6a7   : > { %v8705_v48 = vpop.eup %8704  ;;  %v3908_v13 = vsel %vm3906_vm0, %v8703_v27, %v3907_v16 }
 0x6a8   : > { %v8707_v22 = vpop.eup %8706  ;;  %v3911_v30 = vsel %vm3909_vm7, %v3910_v15, %v8701_v62  ;;  %v4118_v24 = vxor.u32 2147483648, %v8705_v48 }
 0x6a9   : > { %v4115_v3 = vxor.u32 2147483648, %v8707_v22  ;;  %v3912_v25 = vsel %vm3905_vm10, %v3908_v13, %v3911_v30 }
 0x6aa   : > { %v8709_v26 = vpop.eup %8708  ;;  %v4119_v38 = vsel %vm4117_vm15, %v4118_v24, %v8707_v22  ;;  %v3913_v41 = vsel %vm3902_vm4, nan, %v3912_v25 }
 0x6ab   : > { %v8711_v14 = vpop.eup %8710  ;;  %v3702_v39 = vxor.u32 2147483648, %v8709_v26  ;;  %v4116_v12 = vsel %vm4114_vm12, %v8705_v48, %v4115_v3 }
 0x6ac   : > { %v3699_v34 = vxor.u32 2147483648, %v8711_v14  ;;  %v4120_v52 = vsel %vm4113_vm2, %v4116_v12, %v4119_v38 }
 0x6ad   : > { %v3703_v9 = vsel %vm3701_vm14, %v3702_v39, %v8711_v14  ;;  %v4121_v31 = vsel %vm4110_vm13, nan, %v4120_v52 }
 0x6ae   : > { %v3700_v20 = vsel %vm3698_vm11, %v8709_v26, %v3699_v34 }
 0x6af   : > { %v3704_v49 = vsel %vm3697_vm5, %v3700_v20, %v3703_v9 }
 0x6b0   : > { %v3705_v1 = vsel %vm3694_vm9, nan, %v3704_v49 }
 0x6b1   : > { %7160 = vrot.lane.b32.xlu1 %v3705_v1, %s8946_s6  ;;  %7909 = vmatmul.mubr.f32.gmra.mrb[18].mxu0 %v3705_v1 }
 0x6b2   : > { %7911 = vmatprep.mubr.f32.mxu0 %v3809_v60 }
 0x6b5   : > { %7158 = vrot.lane.b32.xlu1 %v12015_v0, %s8946_s6  ;;  %7912 = vmatmul.mubr.f32.gmra.mrb[20].mxu0 %v3913_v41 }
 0x6b6   : > { %7914 = vmatprep.mubr.f32.mxu0 %v4017_v55 }
 0x6b9   : > { %7164 = vrot.lane.b32.xlu1 %v3913_v41, %s8946_s6  ;;  %7915 = vmatmul.mubr.f32.gmra.mrb[22].mxu0 %v4121_v31 }
 0x6bd   : > { %7168 = vrot.lane.b32.xlu1 %v4121_v31, %s8946_s6  ;;  %s14267_s6 = scalar_lea.hbm %s14325_s5, %s7549_s16 }
 0x768   : > { %v7907_v18 = vpop.f32.mrb[16].mxu0 }
 0x769   : > { %v12096_v42 = vadd.f32 %v7907_v18, %v12093_v53  ;;  %v4213_v0 = vpop.f32.mrb[17].mxu0 }
 0x76a   : > { %v12099_v33 = vadd.f32 %v12093_v53, %v4213_v0 }
 0x76b   : > { %v4356_v32 = vand.u32 2147483647, %v12096_v42  ;;  %v4359_v37 = vand.u32 2139095040, %v12096_v42 }
 0x76c   : > { %v4252_v56 = vand.u32 2147483647, %v12099_v33  ;;  %v4255_v10 = vand.u32 2139095040, %v12099_v33 }
 0x76d   : > { %v4360_v11 = vshrl.u32 %v4359_v37, 23  ;;  %v4363_v23 = vand.u32 8388607, %v4356_v32 }
 0x76e   : > { %v4256_v5 = vshrl.u32 %v4255_v10, 23  ;;  %v4259_v60 = vand.u32 8388607, %v4252_v56 }
 0x76f   : > { %v7446_v51 = vadd.s32 4294967169, %v4360_v11  ;;  %v4364_v61 = vor.u32 8388608, %v4363_v23 }
 0x770   : > { %v7442_v50 = vadd.s32 4294967169, %v4256_v5  ;;  %v4260_v63 = vor.u32 8388608, %v4259_v60 }
 0x771   : > { %v4366_v47 = vadd.s32 1, %v7446_v51  ;;  %v12109_v17 = vshll.u32 %v4364_v61, 8 }
 0x772   : > { %v4262_v40 = vadd.s32 1, %v7442_v50  ;;  %v12111_v57 = vshll.u32 %v4260_v63, 8 }
 0x773   : > { %vm4367_vm3 = vcmp.gt.s32.totalorder %v4366_v47, 0 }
 0x774   : > { %v4368_v44 = vsel %vm4367_vm3, %v4366_v47, 0  ;;  %vm4263_vm6 = vcmp.gt.s32.totalorder %v4262_v40, 0  ;;  %vm4358_vm3 = vcmp.lt.s32.totalorder %v12096_v42, 0 }
 0x775   : > { %v4369_v58 = vshrl.u32 %v4368_v44, 5  ;;  %v4370_v28 = vand.u32 31, %v4368_v44  ;;  %v4264_v55 = vsel %vm4263_vm6, %v4262_v40, 0 }
 0x776   : > { %v12114_v45 = vshrl.u32 %v4264_v55, 5  ;;  %v4266_v43 = vand.u32 31, %v4264_v55 }
 0x777   : > { %v4371_v36 = vsub.s32 32, %v4370_v28  ;;  %v4373_v8 = vshll.u32 %v14444_v29, %v4370_v28  ;;  %v4376_v54 = vshll.u32 %v14484_v7, %v4370_v28  ;;  %v4379_v35 = vshll.u32 %v14485_v6, %v4370_v28 }
 0x778   : > { %v4382_v62 = vshll.u32 %v14441_v59, %v4370_v28  ;;  %v4385_v27 = vshll.u32 %v14575_v19, %v4370_v28  ;;  %vm4388_vm8 = vcmp.lt.s32.totalorder %v4369_v58, 1  ;;  %vm4389_vm1 = vcmp.lt.s32.totalorder %v4369_v58, 2 }
 0x779   : > { %v4374_v4 = vshrl.u32 %v14484_v7, %v4371_v36  ;;  %v4377_v48 = vshrl.u32 %v14485_v6, %v4371_v36  ;;  %v4380_v2 = vshrl.u32 %v14441_v59, %v4371_v36  ;;  %v4372_v22 = vshrl.u32 %v14444_v29, %v4371_v36 }
 0x77a   : > { %v4383_v16 = vshrl.u32 %v14575_v19, %v4371_v36  ;;  %v4386_v26 = vshrl.u32 %v14576_v46, %v4371_v36  ;;  %v4267_v34 = vsub.s32 32, %v4266_v43  ;;  %vm4390_vm5 = vcmp.lt.s32.totalorder %v4369_v58, 3 }
 0x77b   : > { %v4375_v15 = vor.u32 %v4374_v4, %v4373_v8  ;;  %v4378_v14 = vor.u32 %v4377_v48, %v4376_v54  ;;  %v4381_v39 = vor.u32 %v4380_v2, %v4379_v35  ;;  %vm4391_vm11 = vcmp.lt.s32.totalorder %v4369_v58, 4 }
 0x77c   : > { %v4384_v9 = vor.u32 %v4383_v16, %v4382_v62  ;;  %v4387_v13 = vor.u32 %v4386_v26, %v4385_v27  ;;  %v4269_v25 = vshll.u32 %v14444_v29, %v4266_v43  ;;  %v4270_v41 = vshrl.u32 %v14484_v7, %v4267_v34 }
 0x77d   : > { %v4392_v21 = vsel %vm4388_vm8, %v4372_v22, %v4375_v15  ;;  %v4393_v20 = vsel %vm4391_vm11, %v4381_v39, 2102212464  ;;  %v4396_v30 = vsel %vm4388_vm8, %v4375_v15, %v4378_v14  ;;  %v4400_v3 = vsel %vm4388_vm8, %v4378_v14, %v4381_v39 }
 0x77e   : > { %v4394_v24 = vsel %vm4390_vm5, %v4378_v14, %v4393_v20  ;;  %v4397_v49 = vsel %vm4391_vm11, %v4384_v9, 920167782  ;;  %v4401_v1 = vsel %vm4391_vm11, %v4387_v13, 1326507024  ;;  %v4272_v52 = vshll.u32 %v14484_v7, %v4266_v43 }
 0x77f   : > { %v4398_v12 = vsel %vm4390_vm5, %v4381_v39, %v4397_v49  ;;  %v4402_v38 = vsel %vm4390_vm5, %v4384_v9, %v4401_v1  ;;  %v4395_v31 = vsel %vm4389_vm1, %v4392_v21, %v4394_v24  ;;  %v4273_v37 = vshrl.u32 %v14485_v6, %v4267_v34 }
 0x780   : > { %v4399_v18 = vsel %vm4389_vm1, %v4396_v30, %v4398_v12  ;;  %v4403_v0 = vsel %vm4389_vm1, %v4400_v3, %v4402_v38  ;;  %v4271_v60 = vor.u32 %v4270_v41, %v4269_v25  ;;  %v4275_v50 = vshll.u32 %v14485_v6, %v4266_v43 }
 0x781   : > { %v12137_v10 = vmul.u32.u64.low %v12109_v17, %v4403_v0  ;;  %v12138_v11 = vmul.u32.u64.high %v12109_v17, %v4403_v0, %v12137_v10  ;;  %v12141_v23 = vmul.u32.u64.low %v12109_v17, %v4399_v18  ;;  %v12142_v5 = vmul.u32.u64.high %v12109_v17, %v4399_v18, %v12141_v23 }
 0x782   : > { %v4274_v51 = vor.u32 %v4273_v37, %v4272_v52  ;;  %v4276_v47 = vshrl.u32 %v14441_v59, %v4267_v34  ;;  %v4268_v61 = vshrl.u32 %v14444_v29, %v4267_v34  ;;  %v4278_v63 = vshll.u32 %v14441_v59, %v4266_v43 }
 0x783   : > { %v4279_v40 = vshrl.u32 %v14575_v19, %v4267_v34  ;;  %v4282_v44 = vshrl.u32 %v14576_v46, %v4267_v34  ;;  %v4411_v58 = vmul.u32 %v12109_v17, %v4395_v31  ;;  %v4281_v55 = vshll.u32 %v14575_v19, %v4266_v43 }
 0x784   : > { %v4277_v28 = vor.u32 %v4276_v47, %v4275_v50  ;;  %vm4284_vm14 = vcmp.lt.s32.totalorder %v12114_v45, 1  ;;  %v7910_v36 = vpop.f32.mrb[18].mxu0  ;;  %vm4413_vm0 = vc.u32 %v12138_v11, %v12141_v23  ;;  %v4414_v8 = vadd.s32 1, %v12142_v5 }
 0x785   : > { %v4280_v54 = vor.u32 %v4279_v40, %v4278_v63  ;;  %vm4285_vm7 = vcmp.lt.s32.totalorder %v12114_v45, 2  ;;  %v4223_v35 = vpop.f32.mrb[19].mxu0  ;;  %v4283_v62 = vor.u32 %v4282_v44, %v4281_v55  ;;  %vm4286_vm9 = vcmp.lt.s32.totalorder %v12114_v45, 3 }
 0x786   : > { %vm4287_vm10 = vcmp.lt.s32.totalorder %v12114_v45, 4  ;;  %v4292_v17 = vsel %vm4284_vm14, %v4271_v60, %v4274_v51  ;;  %v4415_v43 = vsel %vm4413_vm0, %v4414_v8, %v12142_v5  ;;  %v4296_v48 = vsel %vm4284_vm14, %v4274_v51, %v4277_v28 }
 0x787   : > { %v4289_v27 = vsel %vm4287_vm10, %v4277_v28, 2102212464  ;;  %v4293_v4 = vsel %vm4287_vm10, %v4280_v54, 920167782  ;;  %v4416_v2 = vadd.s32 %v4415_v43, %v4411_v58  ;;  %v4288_v22 = vsel %vm4284_vm14, %v4268_v61, %v4271_v60 }
 0x788   : > { %v4294_v16 = vsel %vm4286_vm9, %v4277_v28, %v4293_v4  ;;  %v4297_v26 = vsel %vm4287_vm10, %v4283_v62, 1326507024  ;;  %v7913_v15 = vpop.f32.mrb[20].mxu0  ;;  %v4290_v14 = vsel %vm4286_vm9, %v4274_v51, %v4289_v27  ;;  %v12170_v9 = vadd.f32 %v7910_v36, %v12093_v53 }
 0x789   : > { %v4295_v39 = vsel %vm4285_vm7, %v4292_v17, %v4294_v16  ;;  %v4298_v34 = vsel %vm4286_vm9, %v4280_v54, %v4297_v26  ;;  %v4233_v13 = vpop.f32.mrb[21].mxu0  ;;  %v4417_v21 = vadd.s32 536870912, %v4416_v2  ;;  %v4291_v12 = vsel %vm4285_vm7, %v4288_v22, %v4290_v14 }
 0x78a   : > { %v4299_v20 = vsel %vm4285_vm7, %v4296_v48, %v4298_v34  ;;  %v12175_v30 = vmul.u32.u64.low %v12111_v57, %v4295_v39  ;;  %v12176_v3 = vmul.u32.u64.high %v12111_v57, %v4295_v39, %v12175_v30  ;;  %v14410_v1 = vand.u32 2147483647, %v12170_v9 }
 0x78b   : > { %v12180_v24 = vmul.u32.u64.low %v12111_v57, %v4299_v20  ;;  %v12181_v49 = vmul.u32.u64.high %v12111_v57, %v4299_v20, %v12180_v24  ;;  %v12184_v25 = vshrl.u32 %v4417_v21, 30  ;;  %v4567_v38 = vand.u32 2139095040, %v12170_v9 }
 0x78c   : > { %v12190_v41 = vadd.f32 %v12093_v53, %v4223_v35  ;;  %v7916_v52 = vpop.f32.mrb[22].mxu0  ;;  %v4310_v0 = vadd.s32 1, %v12176_v3  ;;  %v4571_v10 = vand.u32 8388607, %v14410_v1  ;;  %v4307_v5 = vmul.u32 %v12111_v57, %v4291_v12 }
 0x78d   : > { %v12192_v31 = vpop.f32.mrb[23].mxu0  ;;  %v4419_v18 = vshll.u32 %v12184_v25, 30  ;;  %v4568_v37 = vshrl.u32 %v4567_v38, 23  ;;  %vm4309_vm12 = vc.u32 %v12181_v49, %v12175_v30  ;;  %v12205_v28 = vadd.f32 %v7913_v15, %v12093_v53 }
 0x78e   : > { %v4311_v60 = vsel %vm4309_vm12, %v4310_v0, %v12176_v3  ;;  %v4463_v50 = vand.u32 2139095040, %v12190_v41  ;;  %v4572_v63 = vor.u32 8388608, %v4571_v10  ;;  %v14411_v58 = vand.u32 2147483647, %v12190_v41 }
 0x78f   : > { %v4420_v45 = vsub.s32 %v4416_v2, %v4419_v18  ;;  %v7454_v51 = vadd.s32 4294967169, %v4568_v37  ;;  %v4312_v47 = vadd.s32 %v4311_v60, %v4307_v5  ;;  %v4412_v36 = vadd.s32 %v12141_v23, %v12138_v11 }
 0x790   : > { %v4464_v55 = vshrl.u32 %v4463_v50, 23  ;;  %v12212_v35 = vadd.f32 %v12093_v53, %v4233_v13  ;;  %v12214_v43 = vshll.u32 %v4572_v63, 8  ;;  %v12217_v27 = vadd.f32 %v7916_v52, %v12093_v53 }
 0x791   : > { %v4422_v61 = vsub.s32 0, %v4420_v45  ;;  %v4574_v40 = vadd.s32 1, %v7454_v51  ;;  %v4313_v44 = vadd.s32 536870912, %v4312_v47  ;;  %v12222_v48 = vand.u32 8388607, %v14411_v58 }
 0x792   : > { %v14408_v11 = vand.u32 2147483647, %v12205_v28  ;;  %v4775_v23 = vand.u32 2139095040, %v12205_v28  ;;  %v7450_v26 = vadd.s32 4294967169, %v4464_v55  ;;  %vm12252_vm8 = vcmp.le.f32.partialorder %v4356_v32, 0.7853982 }
 0x793   : > { %v7447_v57 = vmin.u32 %v4422_v61, %v4420_v45  ;;  %vm4575_vm15 = vcmp.gt.s32.totalorder %v4574_v40, 0  ;;  %v12209_v8 = vshrl.u32 %v4313_v44, 30 }
 0x794   : > { %v4576_v54 = vsel %vm4575_vm15, %v4574_v40, 0  ;;  %v4470_v44 = vadd.s32 1, %v7450_v26 }
 0x795   : > { %v4424_v62 = vclz %v7447_v57  ;;  %v4578_v17 = vand.u32 31, %v4576_v54  ;;  %v4315_v4 = vshll.u32 %v12209_v8, 30  ;;  %v12226_v22 = vshrl.u32 %v4576_v54, 5 }
 0x796   : > { %v4776_v57 = vshrl.u32 %v4775_v23, 23  ;;  %vm4471_vm11 = vcmp.gt.s32.totalorder %v4470_v44, 0 }
 0x797   : > { %v7448_v2 = vadd.s32 4294967294, %v4424_v62  ;;  %v4579_v16 = vsub.s32 32, %v4578_v17  ;;  %v12228_v15 = vsub.s32 %v4312_v47, %v4315_v4  ;;  %v4581_v14 = vshll.u32 %v14444_v29, %v4578_v17 }
 0x798   : > { %v4584_v39 = vshll.u32 %v14484_v7, %v4578_v17  ;;  %v4587_v34 = vshll.u32 %v14485_v6, %v4578_v17  ;;  %v4590_v20 = vshll.u32 %v14441_v59, %v4578_v17  ;;  %v4593_v37 = vshll.u32 %v14575_v19, %v4578_v17 }
 0x799   : > { %vm7449_vm4 = vcmp.lt.s32.totalorder %v7448_v2, 0  ;;  %v4582_v13 = vshrl.u32 %v14484_v7, %v4579_v16  ;;  %v4585_v21 = vshrl.u32 %v14485_v6, %v4579_v16  ;;  %v4318_v24 = vsub.s32 0, %v12228_v15 }
 0x79a   : > { %v4427_v3 = vsel %vm7449_vm4, 0, %v7448_v2  ;;  %v4588_v12 = vshrl.u32 %v14441_v59, %v4579_v16  ;;  %v4591_v38 = vshrl.u32 %v14575_v19, %v4579_v16  ;;  %v4594_v63 = vshrl.u32 %v14576_v46, %v4579_v16 }
 0x79b   : > { %v4428_v52 = vsub.s32 32, %v4427_v3  ;;  %v4429_v18 = vshll.u32 %v4420_v45, %v4427_v3  ;;  %v4432_v0 = vsub.s32 4294967266, %v4427_v3  ;;  %v7443_v10 = vmin.u32 %v4318_v24, %v12228_v15 }
 0x79c   : > { %v4583_v5 = vor.u32 %v4582_v13, %v4581_v14  ;;  %v4586_v60 = vor.u32 %v4585_v21, %v4584_v39  ;;  %v4592_v51 = vor.u32 %v4591_v38, %v4590_v20  ;;  %v4589_v61 = vor.u32 %v4588_v12, %v4587_v34 }
 0x79d   : > { %v4430_v50 = vshrl.u32 %v4412_v36, %v4428_v52  ;;  %v4433_v47 = vadd.s32 127, %v4432_v0  ;;  %v4320_v40 = vclz %v7443_v10  ;;  %vm4596_vm2 = vcmp.lt.s32.totalorder %v12226_v22, 1 }
 0x79e   : > { %v4595_v54 = vor.u32 %v4594_v63, %v4593_v37  ;;  %vm4599_vm13 = vcmp.lt.s32.totalorder %v12226_v22, 4  ;;  %vm4598_vm6 = vcmp.lt.s32.totalorder %v12226_v22, 3  ;;  %v4604_v36 = vsel %vm4596_vm2, %v4583_v5, %v4586_v60 }
 0x79f   : > { %v4431_v55 = vor.u32 %v4430_v50, %v4429_v18  ;;  %v4434_v45 = vshll.u32 %v4433_v47, 23  ;;  %v7444_v62 = vadd.s32 4294967294, %v4320_v40  ;;  %v4605_v17 = vsel %vm4599_vm13, %v4592_v51, 920167782 }
 0x7a0   : > { %vm4597_vm1 = vcmp.lt.s32.totalorder %v12226_v22, 2  ;;  %v4601_v2 = vsel %vm4599_vm13, %v4589_v61, 2102212464  ;;  %v4606_v26 = vsel %vm4598_vm6, %v4589_v61, %v4605_v17  ;;  %v4580_v14 = vshrl.u32 %v14444_v29, %v4579_v16 }
 0x7a1   : > { %v4435_v23 = vor.u32 4788187, %v4434_v45  ;;  %vm7445_vm5 = vcmp.lt.s32.totalorder %v7444_v62, 0  ;;  %v4607_v39 = vsel %vm4597_vm1, %v4604_v36, %v4606_v26  ;;  %v4608_v32 = vsel %vm4596_vm2, %v4586_v60, %v4589_v61 }
 0x7a2   : > { %v4438_v13 = vcvt.s32.f32 %v4431_v55  ;;  %v12266_v21 = vsel %vm7445_vm5, 0, %v7444_v62  ;;  %v4609_v20 = vsel %vm4599_vm13, %v4595_v54, 1326507024  ;;  %v4600_v24 = vsel %vm4596_vm2, %v4580_v14, %v4583_v5 }
 0x7a3   : > { %v4436_v34 = vand.u32 2147483647, %v4435_v23  ;;  %v4328_v3 = vsub.s32 4294967266, %v12266_v21  ;;  %v4602_v16 = vsel %vm4598_vm6, %v4586_v60, %v4601_v2  ;;  %v4610_v12 = vsel %vm4598_vm6, %v4592_v51, %v4609_v20 }
 0x7a4   : > { %v4611_v52 = vsel %vm4597_vm1, %v4608_v32, %v4610_v12  ;;  %v12280_v18 = vmul.u32.u64.low %v12214_v43, %v4607_v39  ;;  %v12281_v0 = vmul.u32.u64.high %v12214_v43, %v4607_v39, %v12280_v18  ;;  %v4468_v5 = vor.u32 8388608, %v12222_v48 }
 0x7a5   : > { %v4439_v38 = vmul.f32 %v4438_v13, %v4436_v34  ;;  %v12285_v37 = vmul.u32.u64.low %v12214_v43, %v4611_v52  ;;  %v12286_v10 = vmul.u32.u64.high %v12214_v43, %v4611_v52, %v12285_v37  ;;  %v12291_v60 = vand.u32 8388607, %v14408_v11  ;;  %v5094_v11 = vld [vmem:[#allocation2 + $0xc8] sm:$0xff] }
 0x7a6   : > { %v4324_v50 = vsub.s32 32, %v12266_v21  ;;  %v4603_v47 = vsel %vm4597_vm1, %v4600_v24, %v4602_v16  ;;  %v4308_v61 = vadd.s32 %v12175_v30, %v12181_v49  ;;  %v4329_v63 = vadd.s32 127, %v4328_v3 }
 0x7a7   : > { %v4440_v51 = vxor.u32 2147483648, %v4439_v38  ;;  %v4472_v40 = vsel %vm4471_vm11, %v4470_v44, 0  ;;  %v7462_v55 = vadd.s32 4294967169, %v4776_v57  ;;  %v4622_v45 = vadd.s32 1, %v12281_v0 }
 0x7a8   : > { %v4474_v54 = vand.u32 31, %v4472_v40  ;;  %v14409_v62 = vand.u32 2147483647, %v12212_v35  ;;  %v4619_v36 = vmul.u32 %v12214_v43, %v4603_v47  ;;  %v12308_v17 = vshll.u32 %v4468_v5, 8 }
 0x7a9   : > { %v4441_v48 = vsel %vm4358_vm3, %v4440_v51, %v4439_v38  ;;  %v4780_v30 = vor.u32 8388608, %v12291_v60  ;;  %v4325_v49 = vshll.u32 %v12228_v15, %v12266_v21  ;;  %v4326_v44 = vshrl.u32 %v4308_v61, %v4324_v50 }
 0x7aa   : > { %v12305_v22 = vsel %vm12252_vm8, %v12096_v42, %v4441_v48  ;;  %vm4621_vm14 = vc.u32 %v12286_v10, %v12280_v18  ;;  %v4475_v57 = vsub.s32 32, %v4474_v54  ;;  %v4330_v23 = vshll.u32 %v4329_v63, 23 }
 0x7ab   : > { %v4623_v2 = vsel %vm4621_vm14, %v4622_v45, %v12281_v0  ;;  %v4477_v26 = vshll.u32 %v14444_v29, %v4474_v54  ;;  %v4782_v14 = vadd.s32 1, %v7462_v55  ;;  %v4480_v32 = vshll.u32 %v14484_v7, %v4474_v54 }
 0x7ac   : > { %v4624_v39 = vadd.s32 %v4623_v2, %v4619_v36  ;;  %v4478_v43 = vshrl.u32 %v14484_v7, %v4475_v57  ;;  %v4481_v34 = vshrl.u32 %v14485_v6, %v4475_v57  ;;  %v4473_v13 = vshrl.u32 %v4472_v40, 5 }
 0x7ad   : > { %v4483_v15 = vshll.u32 %v14485_v6, %v4474_v54  ;;  %v4484_v21 = vshrl.u32 %v14441_v59, %v4475_v57  ;;  %v4486_v20 = vshll.u32 %v14441_v59, %v4474_v54  ;;  %v4487_v12 = vshrl.u32 %v14575_v19, %v4475_v57 }
 0x7ae   : > { %v4625_v3 = vadd.s32 536870912, %v4624_v39  ;;  %v4479_v24 = vor.u32 %v4478_v43, %v4477_v26  ;;  %v4482_v16 = vor.u32 %v4481_v34, %v4480_v32  ;;  %v4489_v52 = vshll.u32 %v14575_v19, %v4474_v54 }
 0x7af   : > { %v4485_v38 = vor.u32 %v4484_v21, %v4483_v15  ;;  %v4490_v0 = vshrl.u32 %v14576_v46, %v4475_v57  ;;  %v4671_v37 = vand.u32 2139095040, %v12212_v35  ;;  %v12327_v5 = vor.u32 4788187, %v4330_v23 }
 0x7b0   : > { %v12329_v60 = vshrl.u32 %v4625_v3, 30  ;;  %v4476_v51 = vshrl.u32 %v14444_v29, %v4475_v57  ;;  %v4488_v50 = vor.u32 %v4487_v12, %v4486_v20  ;;  %vm4492_vm0 = vcmp.lt.s32.totalorder %v4473_v13, 1 }
 0x7b1   : > { %v4491_v47 = vor.u32 %v4490_v0, %v4489_v52  ;;  %vm4494_vm7 = vcmp.lt.s32.totalorder %v4473_v13, 3  ;;  %vm4495_vm9 = vcmp.lt.s32.totalorder %v4473_v13, 4  ;;  %v4500_v55 = vsel %vm4492_vm0, %v4479_v24, %v4482_v16 }
 0x7b2   : > { %v4627_v61 = vshll.u32 %v12329_v60, 30  ;;  %v4496_v63 = vsel %vm4492_vm0, %v4476_v51, %v4479_v24  ;;  %v4497_v40 = vsel %vm4495_vm9, %v4485_v38, 2102212464  ;;  %v4501_v45 = vsel %vm4495_vm9, %v4488_v50, 920167782 }
 0x7b3   : > { %v4498_v48 = vsel %vm4494_vm7, %v4482_v16, %v4497_v40  ;;  %v4504_v54 = vsel %vm4492_vm0, %v4482_v16, %v4485_v38  ;;  %v4505_v36 = vsel %vm4495_vm9, %v4491_v47, 1326507024  ;;  %vm4493_vm10 = vcmp.lt.s32.totalorder %v4473_v13, 2 }
 0x7b4   : > { %v12333_v23 = vsub.s32 %v4624_v39, %v4627_v61  ;;  %v4502_v2 = vsel %vm4494_vm7, %v4485_v38, %v4501_v45  ;;  %v4506_v26 = vsel %vm4494_vm7, %v4488_v50, %v4505_v36  ;;  %v4499_v57 = vsel %vm4493_vm10, %v4496_v63, %v4498_v48 }
 0x7b5   : > { %v4503_v43 = vsel %vm4493_vm10, %v4500_v55, %v4502_v2  ;;  %v4507_v32 = vsel %vm4493_vm10, %v4504_v54, %v4506_v26  ;;  %vm4783_vm12 = vcmp.gt.s32.totalorder %v4782_v14, 0  ;;  %v12345_v13 = vshll.u32 %v4780_v30, 8 }
 0x7b6   : > { %v4630_v34 = vsub.s32 0, %v12333_v23  ;;  %v12337_v15 = vmul.u32.u64.low %v12308_v17, %v4507_v32  ;;  %v12338_v21 = vmul.u32.u64.high %v12308_v17, %v4507_v32, %v12337_v15  ;;  %v4784_v20 = vsel %vm4783_vm12, %v4782_v14, 0 }
 0x7b7   : > { %v12341_v3 = vmul.u32.u64.low %v12308_v17, %v4503_v43  ;;  %v12342_v24 = vmul.u32.u64.high %v12308_v17, %v4503_v43, %v12341_v3  ;;  %v4786_v39 = vand.u32 31, %v4784_v20  ;;  %v12347_v16 = vor.u32 %v4326_v44, %v4325_v49 }
 0x7b8   : > { %v4332_v12 = vand.u32 2147483647, %v12327_v5  ;;  %v4620_v38 = vadd.s32 %v12280_v18, %v12286_v10  ;;  %v7455_v52 = vmin.u32 %v4630_v34, %v12333_v23  ;;  %v4515_v0 = vmul.u32 %v12308_v17, %v4499_v57 }
 0x7b9   : > { %v12354_v14 = vshrl.u32 %v4784_v20, 5  ;;  %v4787_v51 = vsub.s32 32, %v4786_v39  ;;  %v4672_v50 = vshrl.u32 %v4671_v37, 23  ;;  %vm4517_vm15 = vc.u32 %v12338_v21, %v12341_v3 }
 0x7ba   : > { %v4632_v47 = vclz %v7455_v52  ;;  %v4789_v30 = vshll.u32 %v14444_v29, %v4786_v39  ;;  %v12361_v49 = vand.u32 8388607, %v14409_v62  ;;  %v4518_v18 = vadd.s32 1, %v12342_v24 }
 0x7bb   : > { %v4790_v10 = vshrl.u32 %v14484_v7, %v4787_v51  ;;  %v4792_v17 = vshll.u32 %v14484_v7, %v4786_v39  ;;  %v4793_v44 = vshrl.u32 %v14485_v6, %v4787_v51  ;;  %v4795_v37 = vshll.u32 %v14485_v6, %v4786_v39 }
 0x7bc   : > { %v7456_v61 = vadd.s32 4294967294, %v4632_v47  ;;  %v4796_v63 = vshrl.u32 %v14441_v59, %v4787_v51  ;;  %v4799_v40 = vshrl.u32 %v14575_v19, %v4787_v51  ;;  %v4519_v55 = vsel %vm4517_vm15, %v4518_v18, %v12342_v24 }
 0x7bd   : > { %v4798_v48 = vshll.u32 %v14441_v59, %v4786_v39  ;;  %v4801_v45 = vshll.u32 %v14575_v19, %v4786_v39  ;;  %v4802_v54 = vshrl.u32 %v14576_v46, %v4787_v51  ;;  %v4520_v36 = vadd.s32 %v4519_v55, %v4515_v0 }
 0x7be   : > { %vm7457_vm4 = vcmp.lt.s32.totalorder %v7456_v61, 0  ;;  %v4791_v2 = vor.u32 %v4790_v10, %v4789_v30  ;;  %v4797_v26 = vor.u32 %v4796_v63, %v4795_v37  ;;  %v4794_v43 = vor.u32 %v4793_v44, %v4792_v17 }
 0x7bf   : > { %v4635_v57 = vsel %vm7457_vm4, 0, %v7456_v61  ;;  %v4800_v32 = vor.u32 %v4799_v40, %v4798_v48  ;;  %v4803_v34 = vor.u32 %v4802_v54, %v4801_v45  ;;  %v4521_v52 = vadd.s32 536870912, %v4520_v36 }
 0x7c0   : > { %v4636_v15 = vsub.s32 32, %v4635_v57  ;;  %v4640_v20 = vsub.s32 4294967266, %v4635_v57  ;;  %v4788_v47 = vshrl.u32 %v14444_v29, %v4787_v51  ;;  %v4637_v24 = vshll.u32 %v12333_v23, %v4635_v57 }
 0x7c1   : > { %vm4804_vm2 = vcmp.lt.s32.totalorder %v12354_v14, 1  ;;  %vm4805_vm13 = vcmp.lt.s32.totalorder %v12354_v14, 2  ;;  %vm4807_vm6 = vcmp.lt.s32.totalorder %v12354_v14, 4  ;;  %v12379_v30 = vshrl.u32 %v4521_v52, 30  ;;  %v5086_v52 = vld [vmem:[#allocation2 + $0x88] sm:$0xff] }
 0x7c2   : > { %v4638_v39 = vshrl.u32 %v4620_v38, %v4636_v15  ;;  %v4641_v0 = vadd.s32 127, %v4640_v20  ;;  %v4809_v18 = vsel %vm4807_vm6, %v4797_v26, 2102212464  ;;  %vm4806_vm1 = vcmp.lt.s32.totalorder %v12354_v14, 3 }
 0x7c3   : > { %v4812_v10 = vsel %vm4804_vm2, %v4791_v2, %v4794_v43  ;;  %v4813_v17 = vsel %vm4807_vm6, %v4800_v32, 920167782  ;;  %v4817_v44 = vsel %vm4807_vm6, %v4803_v34, 1326507024  ;;  %v4523_v51 = vshll.u32 %v12379_v30, 30 }
 0x7c4   : > { %v4642_v61 = vshll.u32 %v4641_v0, 23  ;;  %v4808_v23 = vsel %vm4804_vm2, %v4788_v47, %v4791_v2  ;;  %v4816_v37 = vsel %vm4804_vm2, %v4794_v43, %v4797_v26  ;;  %v4810_v63 = vsel %vm4806_vm1, %v4794_v43, %v4809_v18 }
 0x7c5   : > { %v4814_v40 = vsel %vm4806_vm1, %v4797_v26, %v4813_v17  ;;  %v4818_v55 = vsel %vm4806_vm1, %v4800_v32, %v4817_v44  ;;  %v7458_v48 = vadd.s32 4294967169, %v4672_v50  ;;  %v4639_v45 = vor.u32 %v4638_v39, %v4637_v24  ;;  %v5085_v32 = vld [vmem:[#allocation2 + $0x80] sm:$0xff] }
 0x7c6   : > { %v4643_v38 = vor.u32 4788187, %v4642_v61  ;;  %v12383_v54 = vsub.s32 %v4520_v36, %v4523_v51  ;;  %v4815_v57 = vsel %vm4805_vm13, %v4812_v10, %v4814_v40  ;;  %v4334_v15 = vcvt.s32.f32 %v12347_v16 }
 0x7c7   : > { %v4819_v34 = vsel %vm4805_vm13, %v4816_v37, %v4818_v55  ;;  %v12391_v20 = vmul.u32.u64.low %v12345_v13, %v4815_v57  ;;  %v12392_v2 = vmul.u32.u64.high %v12345_v13, %v4815_v57, %v12391_v20  ;;  %v4811_v16 = vsel %vm4805_vm13, %v4808_v23, %v4810_v63 }
 0x7c8   : > { %v4644_v26 = vand.u32 2147483647, %v4643_v38  ;;  %v4526_v50 = vsub.s32 0, %v12383_v54  ;;  %v12397_v43 = vmul.u32.u64.low %v12345_v13, %v4819_v34  ;;  %v12398_v36 = vmul.u32.u64.high %v12345_v13, %v4819_v34, %v12397_v43 }
 0x7c9   : > { %v4678_v47 = vadd.s32 1, %v7458_v48  ;;  %v14406_v24 = vand.u32 2147483647, %v12217_v27  ;;  %v4983_v39 = vand.u32 2139095040, %v12217_v27  ;;  %v12406_v0 = vmul.f32 %v4334_v15, %v4332_v12 }
 0x7ca   : > { %v4646_v18 = vcvt.s32.f32 %v4639_v45  ;;  %v7451_v10 = vmin.u32 %v4526_v50, %v12383_v54  ;;  %v4676_v17 = vor.u32 8388608, %v12361_v49  ;;  %v4830_v44 = vadd.s32 1, %v12392_v2 }
 0x7cb   : > { %vm4679_vm5 = vcmp.gt.s32.totalorder %v4678_v47, 0  ;;  %v4984_v61 = vshrl.u32 %v4983_v39, 23  ;;  %v8177_v14 = vpack.c.bf16 %v5086_v52, %v5085_v32  ;;  %v4827_v37 = vmul.u32 %v12345_v13, %v4811_v16 }
 0x7cc   : > { %v12411_v51 = vmul.f32 %v4646_v18, %v4644_v26  ;;  %v4528_v23 = vclz %v7451_v10  ;;  %vm4829_vm11 = vc.u32 %v12398_v36, %v12391_v20  ;;  %8712 = vcosq.f32 %v12305_v22 }
 0x7cd   : > { %v4831_v5 = vsel %vm4829_vm11, %v4830_v44, %v12392_v2  ;;  %v4680_v12 = vsel %vm4679_vm5, %v4678_v47, 0  ;;  %v12420_v49 = vand.u32 8388607, %v14406_v24  ;;  %8178 = vmatprep.subr.bf16.mxu1 %v8177_v14  ;;  %8714 = vsinq.f32 %v12305_v22 }
 0x7ce   : > { %v7452_v63 = vadd.s32 4294967294, %v4528_v23  ;;  %v4832_v40 = vadd.s32 %v4831_v5, %v4827_v37  ;;  %v7470_v55 = vadd.s32 4294967169, %v4984_v61  ;;  %8180 = vmatpush3.bf16.msra.mxu1 %v8177_v14  ;;  %v4336_v13 = vxor.u32 2147483648, %v12406_v0 }
 0x7cf   : > { %v4516_v48 = vadd.s32 %v12341_v3, %v12338_v21  ;;  %v4682_v45 = vand.u32 31, %v4680_v12  ;;  %v12426_v38 = vshll.u32 %v4676_v17, 8  ;;  %v4648_v57 = vxor.u32 2147483648, %v12411_v51 }
 0x7d0   : > { %vm7453_vm14 = vcmp.lt.s32.totalorder %v7452_v63, 0  ;;  %v4833_v15 = vadd.s32 536870912, %v4832_v40  ;;  %v12431_v34 = vadd.f32 %v12093_v53, %v12192_v31  ;;  %v12433_v2 = vshrl.u32 %v4680_v12, 5 }
 0x7d1   : > { %v4531_v22 = vsel %vm7453_vm14, 0, %v7452_v63  ;;  %v4683_v26 = vsub.s32 32, %v4682_v45  ;;  %v4988_v50 = vor.u32 8388608, %v12420_v49  ;;  %v4685_v21 = vshll.u32 %v14444_v29, %v4682_v45 }
 0x7d2   : > { %v4536_v43 = vsub.s32 4294967266, %v4531_v22  ;;  %v12436_v32 = vshrl.u32 %v4833_v15, 30  ;;  %v4990_v3 = vadd.s32 1, %v7470_v55  ;;  %v4532_v52 = vsub.s32 32, %v4531_v22 }
 0x7d3   : > { %v4686_v16 = vshrl.u32 %v14484_v7, %v4683_v26  ;;  %v4688_v47 = vshll.u32 %v14484_v7, %v4682_v45  ;;  %v4689_v53 = vshrl.u32 %v14485_v6, %v4683_v26  ;;  %v4691_v18 = vshll.u32 %v14485_v6, %v4682_v45 }
 0x7d4   : > { %v4537_v31 = vadd.s32 127, %v4536_v43  ;;  %v4835_v39 = vshll.u32 %v12436_v32, 30  ;;  %v4692_v10 = vshrl.u32 %v14441_v59, %v4683_v26  ;;  %v4694_v61 = vshll.u32 %v14441_v59, %v4682_v45 }
 0x7d5   : > { %v4687_v17 = vor.u32 %v4686_v16, %v4685_v21  ;;  %v4690_v44 = vor.u32 %v4689_v53, %v4688_v47  ;;  %v4695_v14 = vshrl.u32 %v14575_v19, %v4683_v26  ;;  %vm4254_vm0 = vcmp.lt.s32.totalorder %v12099_v33, 0 }
 0x7d6   : > { %v4538_v23 = vshll.u32 %v4537_v31, 23  ;;  %v12448_v37 = vsub.s32 %v4832_v40, %v4835_v39  ;;  %v4693_v5 = vor.u32 %v4692_v10, %v4691_v18  ;;  %vm4700_vm7 = vcmp.lt.s32.totalorder %v12433_v2, 1  ;;  %v12451_v12 = vpop.eup %8712 }
 0x7d7   : > { %v4534_v63 = vshrl.u32 %v4516_v48, %v4532_v52  ;;  %v4696_v55 = vor.u32 %v4695_v14, %v4694_v61  ;;  %v4697_v15 = vshll.u32 %v14575_v19, %v4682_v45  ;;  %v4698_v43 = vshrl.u32 %v14576_v46, %v4683_v26  ;;  %v12455_v21 = vpop.eup %8714 }
 0x7d8   : > { %vm4566_vm9 = vcmp.lt.s32.totalorder %v12170_v9, 0  ;;  %v4533_v16 = vshll.u32 %v12383_v54, %v4531_v22  ;;  %v4838_v40 = vsub.s32 0, %v12448_v37  ;;  %v4684_v47 = vshrl.u32 %v14444_v29, %v4683_v26 }
 0x7d9   : > { %vm4701_vm10 = vcmp.lt.s32.totalorder %v12433_v2, 2  ;;  %v4699_v53 = vor.u32 %v4698_v43, %v4697_v15  ;;  %vm4702_vm12 = vcmp.lt.s32.totalorder %v12433_v2, 3  ;;  %vm4703_vm15 = vcmp.lt.s32.totalorder %v12433_v2, 4 }
 0x7da   : > { %v4708_v48 = vsel %vm4700_vm7, %v4687_v17, %v4690_v44  ;;  %v4539_v45 = vor.u32 4788187, %v4538_v23  ;;  %v7463_v52 = vmin.u32 %v4838_v40, %v12448_v37  ;;  %v4705_v31 = vsel %vm4703_vm15, %v4693_v5, 2102212464 }
 0x7db   : > { %v4709_v39 = vsel %vm4703_vm15, %v4696_v55, 920167782  ;;  %v4535_v54 = vor.u32 %v4534_v63, %v4533_v16  ;;  %v4712_v26 = vsel %vm4700_vm7, %v4690_v44, %v4693_v5  ;;  %v4713_v18 = vsel %vm4703_vm15, %v4699_v53, 1326507024  ;;  %v5087_v16 = vld [vmem:[#allocation2 + $0x90] sm:$0xff] }
 0x7dc   : > { %v4710_v22 = vsel %vm4702_vm12, %v4693_v5, %v4709_v39  ;;  %v4840_v10 = vclz %v7463_v52  ;;  %v4704_v61 = vsel %vm4700_vm7, %v4684_v47, %v4687_v17  ;;  %v4714_v15 = vsel %vm4702_vm12, %v4696_v55, %v4713_v18  ;;  %v5088_v5 = vld [vmem:[#allocation2 + $0x98] sm:$0xff] }
 0x7dd   : > { %v4711_v14 = vsel %vm4701_vm10, %v4708_v48, %v4710_v22  ;;  %v4706_v43 = vsel %vm4702_vm12, %v4690_v44, %v4705_v31  ;;  %v4715_v23 = vsel %vm4701_vm10, %v4712_v26, %v4714_v15  ;;  %v4540_v53 = vand.u32 2147483647, %v4539_v45 }
 0x7de   : > { %v12476_v40 = vmul.u32.u64.low %v12426_v38, %v4711_v14  ;;  %v12477_v63 = vmul.u32.u64.high %v12426_v38, %v4711_v14, %v12476_v40  ;;  %v7464_v52 = vadd.s32 4294967294, %v4840_v10  ;;  %v12489_v44 = vsel %vm4254_vm0, %v4336_v13, %v12406_v0 }
 0x7df   : > { %v12481_v39 = vmul.u32.u64.low %v12426_v38, %v4715_v23  ;;  %v12482_v17 = vmul.u32.u64.high %v12426_v38, %v4715_v23, %v12481_v39  ;;  %v4542_v55 = vcvt.s32.f32 %v4535_v54  ;;  %v4828_v47 = vadd.s32 %v12391_v20, %v12398_v36 }
 0x7e0   : > { %vm4991_vm4 = vcmp.gt.s32.totalorder %v4990_v3, 0  ;;  %vm7465_vm2 = vcmp.lt.s32.totalorder %v7464_v52, 0  ;;  %v4707_v48 = vsel %vm4701_vm10, %v4704_v61, %v4706_v43  ;;  %v8181_v31 = vpack.c.bf16 %v5088_v5, %v5087_v16 }
 0x7e1   : > { %v4992_v45 = vsel %vm4991_vm4, %v4990_v3, 0  ;;  %v12500_v22 = vsel %vm4566_vm9, %v4648_v57, %v12411_v51  ;;  %v4843_v0 = vsel %vm7465_vm2, 0, %v7464_v52  ;;  %v4726_v13 = vadd.s32 1, %v12477_v63 }
 0x7e2   : > { %v4994_v54 = vand.u32 31, %v4992_v45  ;;  %v12503_v26 = vmul.f32 %v4542_v55, %v4540_v53  ;;  %v4848_v20 = vsub.s32 4294967266, %v4843_v0  ;;  %v12507_v36 = vshll.u32 %v4988_v50, 8  ;;  %8182 = vmatprep.subr.bf16.mxu1 %v8181_v31 }
 0x7e3   : > { %v14407_v2 = vand.u32 2147483647, %v12431_v34  ;;  %v4723_v3 = vmul.u32 %v12426_v38, %v4707_v48  ;;  %vm4725_vm13 = vc.u32 %v12482_v17, %v12476_v40  ;;  %v4879_v57 = vand.u32 2139095040, %v12431_v34  ;;  %8184 = vmatpush3.bf16.msra.mxu1 %v8181_v31 }
 0x7e4   : > { %v4995_v51 = vsub.s32 32, %v4994_v54  ;;  %v4844_v18 = vsub.s32 32, %v4843_v0  ;;  %v4849_v10 = vadd.s32 127, %v4848_v20  ;;  %v4727_v61 = vsel %vm4725_vm13, %v4726_v13, %v12477_v63 }
 0x7e5   : > { %v4993_v14 = vshrl.u32 %v4992_v45, 5  ;;  %v4728_v49 = vadd.s32 %v4727_v61, %v4723_v3  ;;  %v4997_v50 = vshll.u32 %v14444_v29, %v4994_v54  ;;  %v5000_v23 = vshll.u32 %v14484_v7, %v4994_v54 }
 0x7e6   : > { %v4998_v15 = vshrl.u32 %v14484_v7, %v4995_v51  ;;  %v5001_v43 = vshrl.u32 %v14485_v6, %v4995_v51  ;;  %v4850_v38 = vshll.u32 %v4849_v10, 23  ;;  %v5003_v16 = vshll.u32 %v14485_v6, %v4994_v54 }
 0x7e7   : > { %v5004_v5 = vshrl.u32 %v14441_v59, %v4995_v51  ;;  %v4845_v53 = vshll.u32 %v12448_v37, %v4843_v0  ;;  %v4729_v52 = vadd.s32 536870912, %v4728_v49  ;;  %v5006_v63 = vshll.u32 %v14441_v59, %v4994_v54 }
 0x7e8   : > { %v5007_v39 = vshrl.u32 %v14575_v19, %v4995_v51  ;;  %v4846_v55 = vshrl.u32 %v4828_v47, %v4844_v18  ;;  %v4999_v48 = vor.u32 %v4998_v15, %v4997_v50  ;;  %v5002_v45 = vor.u32 %v5001_v43, %v5000_v23 }
 0x7e9   : > { %v5005_v31 = vor.u32 %v5004_v5, %v5003_v16  ;;  %v12524_v13 = vshrl.u32 %v4729_v52, 30  ;;  %v5009_v3 = vshll.u32 %v14575_v19, %v4994_v54  ;;  %v5010_v10 = vshrl.u32 %v14576_v46, %v4995_v51 }
 0x7ea   : > { %v5008_v20 = vor.u32 %v5007_v39, %v5006_v63  ;;  %v4851_v61 = vor.u32 4788187, %v4850_v38  ;;  %v4996_v24 = vshrl.u32 %v14444_v29, %v4995_v51  ;;  %vm5012_vm6 = vcmp.lt.s32.totalorder %v4993_v14, 1  ;;  %v5089_v63 = vld [vmem:[#allocation2 + $0xa0] sm:$0xff] }
 0x7eb   : > { %vm5015_vm1 = vcmp.lt.s32.totalorder %v4993_v14, 4  ;;  %v4731_v37 = vshll.u32 %v12524_v13, 30  ;;  %v5011_v0 = vor.u32 %v5010_v10, %v5009_v3  ;;  %vm5013_vm5 = vcmp.lt.s32.totalorder %v4993_v14, 2 }
 0x7ec   : > { %v5017_v47 = vsel %vm5015_vm1, %v5005_v31, 2102212464  ;;  %vm5014_vm11 = vcmp.lt.s32.totalorder %v4993_v14, 3  ;;  %v5016_v18 = vsel %vm5012_vm6, %v4996_v24, %v4999_v48  ;;  %v5020_v50 = vsel %vm5012_vm6, %v4999_v48, %v5002_v45 }
 0x7ed   : > { %v5021_v15 = vsel %vm5015_vm1, %v5008_v20, 920167782  ;;  %vm12534_vm14 = vcmp.le.f32.partialorder %v4252_v56, 0.7853982  ;;  %v12538_v51 = vsub.s32 %v4728_v49, %v4731_v37  ;;  %v5018_v43 = vsel %vm5014_vm11, %v5002_v45, %v5017_v47  ;;  %v5090_v56 = vld [vmem:[#allocation2 + $0xa8] sm:$0xff] }
 0x7ee   : > { %v5022_v38 = vsel %vm5014_vm11, %v5005_v31, %v5021_v15  ;;  %v5024_v23 = vsel %vm5012_vm6, %v5002_v45, %v5005_v31  ;;  %v4847_v16 = vor.u32 %v4846_v55, %v4845_v53  ;;  %v5025_v24 = vsel %vm5015_vm1, %v5011_v0, 1326507024  ;;  %v5091_v45 = vld [vmem:[#allocation2 + $0xb0] sm:$0xff]  ;;  %v5092_v53 = vld [vmem:[#allocation2 + $0xb8] sm:$0xff] }
 0x7ef   : > { %v5023_v5 = vsel %vm5013_vm5, %v5020_v50, %v5022_v38  ;;  %v4883_v52 = vand.u32 8388607, %v14407_v2  ;;  %v4734_v39 = vsub.s32 0, %v12538_v51  ;;  %v5026_v49 = vsel %vm5014_vm11, %v5008_v20, %v5025_v24  ;;  %v5093_v2 = vld [vmem:[#allocation2 + $0xc0] sm:$0xff] }
 0x7f0   : > { %v12549_v48 = vmul.u32.u64.low %v12507_v36, %v5023_v5  ;;  %v12550_v3 = vmul.u32.u64.high %v12507_v36, %v5023_v5, %v12549_v48  ;;  %v4852_v55 = vand.u32 2147483647, %v4851_v61  ;;  %v5019_v31 = vsel %vm5013_vm5, %v5016_v18, %v5018_v43  ;;  %v5095_v43 = vld [vmem:[#allocation2 + $0xd0] sm:$0xff] }
 0x7f1   : > { %v5027_v10 = vsel %vm5013_vm5, %v5024_v23, %v5026_v49  ;;  %v4880_v37 = vshrl.u32 %v4879_v57, 23  ;;  %v7459_v0 = vmin.u32 %v4734_v39, %v12538_v51  ;;  %v8185_v20 = vpack.c.bf16 %v5090_v56, %v5089_v63  ;;  %v5096_v23 = vld [vmem:[#allocation2 + $0xd8] sm:$0xff]  ;;  %v5098_v49 = vld [vmem:[#allocation2 + $0xe8] sm:$0xff] }
 0x7f2   : > { %v12557_v47 = vmul.u32.u64.low %v12507_v36, %v5027_v10  ;;  %v12558_v50 = vmul.u32.u64.high %v12507_v36, %v5027_v10, %v12557_v47  ;;  %v4854_v15 = vcvt.s32.f32 %v4847_v16  ;;  %v4884_v5 = vor.u32 8388608, %v4883_v52  ;;  %v5100_v10 = vld [vmem:[#allocation2 + $0xf8] sm:$0xff] }
 0x7f3   : > { %v7466_v38 = vadd.s32 4294967169, %v4880_v37  ;;  %v8189_v24 = vpack.c.bf16 %v5092_v53, %v5091_v45  ;;  %v4544_v61 = vxor.u32 2147483648, %v12503_v26  ;;  %v12563_v14 = vadd.s32 %v12476_v40, %v12482_v17  ;;  %8186 = vmatprep.subr.bf16.mxu1 %v8185_v20  ;;  %v5097_v17 = vld [vmem:[#allocation2 + $0xe0] sm:$0xff] }
 0x7f4   : > { %v4736_v57 = vclz %v7459_v0  ;;  %v5038_v18 = vadd.s32 1, %v12550_v3  ;;  %v12566_v39 = vmul.f32 %v4854_v15, %v4852_v55  ;;  %v5035_v16 = vmul.u32 %v12507_v36, %v5019_v31  ;;  %8188 = vmatpush3.bf16.msra.mxu1 %v8185_v20  ;;  %v5099_v31 = vld [vmem:[#allocation2 + $0xf0] sm:$0xff] }
 0x7f5   : > { %v4886_v52 = vadd.s32 1, %v7466_v38  ;;  %v4338_v63 = vsub.s32 4, %v12209_v8  ;;  %vm5037_vm7 = vc.u32 %v12558_v50, %v12549_v48  ;;  %8190 = vmatprep.subr.bf16.mxu1 %v8189_v24  ;;  %v8193_v40 = vpack.c.bf16 %v5094_v11, %v5093_v2 }
 0x7f6   : > { %v7460_v56 = vadd.s32 4294967294, %v4736_v57  ;;  %v4340_v45 = vsel %vm12534_vm14, %v12099_v33, %v12489_v44  ;;  %v5039_v53 = vsel %vm5037_vm7, %v5038_v18, %v12550_v3  ;;  %v12577_v36 = vshll.u32 %v4884_v5, 8 }
 0x7f7   : > { %vm4887_vm10 = vcmp.gt.s32.totalorder %v4886_v52, 0  ;;  %v8197_v55 = vpack.c.bf16 %v5096_v23, %v5095_v43  ;;  %v5040_v37 = vadd.s32 %v5039_v53, %v5035_v16  ;;  %v4339_v11 = vsel %vm4254_vm0, %v4338_v63, %v12209_v8 }
 0x7f8   : > { %vm7461_vm12 = vcmp.lt.s32.totalorder %v7460_v56, 0  ;;  %v4888_v0 = vsel %vm4887_vm10, %v4886_v52, 0  ;;  %8192 = vmatpush3.bf16.msra.mxu1 %v8189_v24  ;;  %v8201_v20 = vpack.c.bf16 %v5098_v49, %v5097_v17  ;;  %8716 = vcosq.f32 %v4340_v45 }
 0x7f9   : > { %v4739_v2 = vsel %vm7461_vm12, 0, %v7460_v56  ;;  %v4890_v47 = vand.u32 31, %v4888_v0  ;;  %v5041_v3 = vadd.s32 536870912, %v5040_v37  ;;  %8194 = vmatprep.subr.bf16.mxu1 %v8193_v40  ;;  %v12582_v15 = vpack.c.bf16 %v5100_v10, %v5099_v31 }
 0x7fa   : > { %v4744_v44 = vsub.s32 4294967266, %v4739_v2  ;;  %8718 = vsinq.f32 %v4340_v45  ;;  %v4740_v38 = vsub.s32 32, %v4739_v2  ;;  %v12584_v5 = vshrl.u32 %v4888_v0, 5 }
 0x7fb   : > { %v4891_v57 = vsub.s32 32, %v4890_v47  ;;  %v4341_v18 = vsel %vm12534_vm14, 0, %v4339_v11  ;;  %v12588_v8 = vshrl.u32 %v5041_v3, 30  ;;  %v4893_v24 = vshll.u32 %v14444_v29, %v4890_v47 }
 0x7fc   : > { %v4745_v43 = vadd.s32 127, %v4744_v44  ;;  %v4896_v23 = vshll.u32 %v14484_v7, %v4890_v47  ;;  %v4899_v63 = vshll.u32 %v14485_v6, %v4890_v47  ;;  %8196 = vmatpush3.bf16.msra.mxu1 %v8193_v40  ;;  %v4902_v49 = vshll.u32 %v14441_v59, %v4890_v47 }
 0x7fd   : > { %v4894_v16 = vshrl.u32 %v14484_v7, %v4891_v57  ;;  %v4897_v52 = vshrl.u32 %v14485_v6, %v4891_v57  ;;  %v4900_v56 = vshrl.u32 %v14441_v59, %v4891_v57  ;;  %v5043_v54 = vshll.u32 %v12588_v8, 30  ;;  %8198 = vmatprep.subr.bf16.mxu1 %v8197_v55 }
 0x7fe   : > { %v4746_v17 = vshll.u32 %v4745_v43, 23  ;;  %v4903_v45 = vshrl.u32 %v14575_v19, %v4891_v57  ;;  %vm4462_vm0 = vcmp.lt.s32.totalorder %v12190_v41, 0  ;;  %v4345_v0 = vadd.s32 3, %v4341_v18 }
 0x7ff   : > { %v4895_v53 = vor.u32 %v4894_v16, %v4893_v24  ;;  %v4898_v31 = vor.u32 %v4897_v52, %v4896_v23  ;;  %v4901_v10 = vor.u32 %v4900_v56, %v4899_v63  ;;  %v4741_v11 = vshll.u32 %v12538_v51, %v4739_v2 }
 0x800   : > { %v4742_v44 = vshrl.u32 %v12563_v14, %v4740_v38  ;;  %v12602_v3 = vsub.s32 %v5040_v37, %v5043_v54  ;;  %v4904_v40 = vor.u32 %v4903_v45, %v4902_v49  ;;  %v4747_v43 = vor.u32 4788187, %v4746_v17  ;;  %8200 = vmatpush3.bf16.msra.mxu1 %v8197_v55 }
 0x801   : > { %v4892_v62 = vshrl.u32 %v14444_v29, %v4891_v57  ;;  %v4905_v1 = vshll.u32 %v14575_v19, %v4890_v47  ;;  %v4906_v58 = vshrl.u32 %v14576_v46, %v4891_v57  ;;  %vm4908_vm15 = vcmp.lt.s32.totalorder %v12584_v5, 1  ;;  %8202 = vmatprep.subr.bf16.mxu1 %v8201_v20 }
 0x802   : > { %v5046_v24 = vsub.s32 0, %v12602_v3  ;;  %vm4910_vm4 = vcmp.lt.s32.totalorder %v12584_v5, 3  ;;  %vm4911_vm2 = vcmp.lt.s32.totalorder %v12584_v5, 4  ;;  %v8717_v51 = vpop.eup %8716  ;;  %v4916_v2 = vsel %vm4908_vm15, %v4895_v53, %v4898_v31 }
 0x803   : > { %v4907_v14 = vor.u32 %v4906_v58, %v4905_v1  ;;  %v4913_v37 = vsel %vm4911_vm2, %v4901_v10, 2102212464  ;;  %v4917_v38 = vsel %vm4911_vm2, %v4904_v40, 920167782  ;;  %v4743_v18 = vor.u32 %v4742_v44, %v4741_v11 }
 0x804   : > { %v8719_v47 = vpop.eup %8718  ;;  %v7471_v55 = vmin.u32 %v5046_v24, %v12602_v3  ;;  %vm4909_vm13 = vcmp.lt.s32.totalorder %v12584_v5, 2  ;;  %v4918_v57 = vsel %vm4910_vm4, %v4901_v10, %v4917_v38  ;;  %v4748_v23 = vand.u32 2147483647, %v4747_v43  ;;  %8204 = vmatpush3.bf16.msra.mxu1 %v8201_v20 }
 0x805   : > { %v4919_v16 = vsel %vm4909_vm13, %v4916_v2, %v4918_v57  ;;  %v4920_v1 = vsel %vm4908_vm15, %v4898_v31, %v4901_v10  ;;  %v4921_v58 = vsel %vm4911_vm2, %v4907_v14, 1326507024  ;;  %v4912_v63 = vsel %vm4908_vm15, %v4892_v62, %v4895_v53  ;;  %8206 = vmatprep.subr.bf16.mxu1 %v12582_v15 }
 0x806   : > { %v5048_v52 = vclz %v7471_v55  ;;  %v4914_v56 = vsel %vm4910_vm4, %v4898_v31, %v4913_v37  ;;  %v4922_v17 = vsel %vm4910_vm4, %v4904_v40, %v4921_v58  ;;  %vm4344_vm6 = vweird.f32 %v12099_v33 }
 0x807   : > { %v4923_v54 = vsel %vm4909_vm13, %v4920_v1, %v4922_v17  ;;  %v12632_v49 = vmul.u32.u64.low %v12577_v36, %v4919_v16  ;;  %v12633_v20 = vmul.u32.u64.high %v12577_v36, %v4919_v16, %v12632_v49  ;;  %v4346_v45 = vand.u32 3, %v4345_v0 }
 0x808   : > { %v4545_v62 = vsel %vm4462_vm0, %v4544_v61, %v12503_v26  ;;  %v7472_v53 = vadd.s32 4294967294, %v5048_v52  ;;  %v12642_v31 = vmul.u32.u64.low %v12577_v36, %v4923_v54  ;;  %v12643_v10 = vmul.u32.u64.high %v12577_v36, %v4923_v54, %v12642_v31  ;;  %8208 = vmatpush3.bf16.msra.mxu1 %v12582_v15 }
 0x809   : > { %v4856_v11 = vxor.u32 2147483648, %v12566_v39  ;;  %v4750_v44 = vcvt.s32.f32 %v4743_v18  ;;  %v4915_v40 = vsel %vm4909_vm13, %v4912_v63, %v4914_v56  ;;  %v4349_v0 = vxor.u32 2147483648, %v8719_v47 }
 0x80a   : > { %vm7473_vm1 = vcmp.lt.s32.totalorder %v7472_v53, 0  ;;  %vm4348_vm5 = vcmp.eq.s32.totalorder %v4346_v45, 0  ;;  %v4352_v43 = vxor.u32 2147483648, %v8717_v51  ;;  %v4442_v24 = vsub.s32 4, %v12184_v25 }
 0x80b   : > { %v4751_v26 = vmul.f32 %v4750_v44, %v4748_v23  ;;  %v5051_v61 = vsel %vm7473_vm1, 0, %v7472_v53  ;;  %v4934_v14 = vadd.s32 1, %v12633_v20  ;;  %v4350_v37 = vsel %vm4348_vm5, %v8717_v51, %v4349_v0 }
 0x80c   : > { %v5056_v2 = vsub.s32 4294967266, %v5051_v61  ;;  %v4931_v38 = vmul.u32 %v12577_v36, %v4915_v40  ;;  %vm4347_vm11 = vcmp.lt.s32.totalorder %v4346_v45, 2  ;;  %vm4351_vm14 = vcmp.eq.s32.totalorder %v4346_v45, 2 }
 0x80d   : > { %v5052_v5 = vsub.s32 32, %v5051_v61  ;;  %vm4933_vm7 = vc.u32 %v12643_v10, %v12632_v49  ;;  %v4353_v15 = vsel %vm4351_vm14, %v4352_v43, %v8719_v47  ;;  %v4443_v18 = vsel %vm4358_vm3, %v4442_v24, %v12184_v25 }
 0x80e   : > { %vm4774_vm10 = vcmp.lt.s32.totalorder %v12205_v28, 0  ;;  %v5057_v55 = vadd.s32 127, %v5056_v2  ;;  %v4935_v57 = vsel %vm4933_vm7, %v4934_v14, %v12633_v20  ;;  %v4354_v51 = vsel %vm4347_vm11, %v4350_v37, %v4353_v15 }
 0x80f   : > { %vm4448_vm12 = vweird.f32 %v12096_v42  ;;  %v14581_v36 = vand.u32 2147483647, %v12190_v41  ;;  %vm4670_vm4 = vcmp.lt.s32.totalorder %v12212_v35, 0  ;;  %v4936_v47 = vadd.s32 %v4935_v57, %v4931_v38 }
 0x810   : > { %v4355_v25 = vsel %vm4344_vm6, nan, %v4354_v51  ;;  %v4445_v16 = vsel %vm12252_vm8, 0, %v4443_v18  ;;  %v4546_v1 = vsub.s32 4, %v12379_v30  ;;  %v5036_v58 = vadd.s32 %v12549_v48, %v12558_v50 }
 0x811   : > { %vm12662_vm15 = vcmp.le.f32.partialorder %v14581_v36, 0.7853982  ;;  %7949 = vmatprep.mubr.f32.mxu1 %v4355_v25  ;;  %v4449_v52 = vadd.s32 3, %v4445_v16  ;;  %v4453_v63 = vxor.u32 2147483648, %v12455_v21  ;;  %v4937_v17 = vadd.s32 536870912, %v4936_v47 }
 0x812   : > { %v4548_v56 = vsel %vm12662_vm15, %v12190_v41, %v4545_v62  ;;  %v4456_v33 = vxor.u32 2147483648, %v12451_v12  ;;  %v4547_v4 = vsel %vm4462_vm0, %v4546_v1, %v12379_v30  ;;  %v4752_v54 = vxor.u32 2147483648, %v4751_v26 }
 0x813   : > { %8720 = vcosq.f32 %v4548_v56  ;;  %v5058_v20 = vshll.u32 %v5057_v55, 23  ;;  %v4450_v45 = vand.u32 3, %v4449_v52  ;;  %v4549_v48 = vsel %vm12662_vm15, 0, %v4547_v4 }
 0x814   : > { %v5053_v50 = vshll.u32 %v12602_v3, %v5051_v61  ;;  %v5054_v53 = vshrl.u32 %v5036_v58, %v5052_v5  ;;  %v12685_v31 = vshrl.u32 %v4937_v17, 30  ;;  %8722 = vsinq.f32 %v4548_v56 }
 0x815   : > { %vm4452_vm3 = vcmp.eq.s32.totalorder %v4450_v45, 0  ;;  %vm4455_vm8 = vcmp.eq.s32.totalorder %v4450_v45, 2  ;;  %v4553_v62 = vadd.s32 3, %v4549_v48  ;;  %v14584_v44 = vand.u32 2147483647, %v12170_v9 }
 0x816   : > { %v4939_v40 = vshll.u32 %v12685_v31, 30  ;;  %vm4451_vm0 = vcmp.lt.s32.totalorder %v4450_v45, 2  ;;  %v4454_v0 = vsel %vm4452_vm3, %v12451_v12, %v4453_v63  ;;  %v4457_v3 = vsel %vm4455_vm8, %v4456_v33, %v12455_v21 }
 0x817   : > { %vm12689_vm2 = vcmp.le.f32.partialorder %v14584_v44, 0.7853982  ;;  %v5059_v43 = vor.u32 4788187, %v5058_v20  ;;  %v4458_v24 = vsel %vm4451_vm0, %v4454_v0, %v4457_v3  ;;  %v4650_v61 = vsub.s32 4, %v12329_v60 }
 0x818   : > { %v4652_v14 = vsel %vm12689_vm2, %v12170_v9, %v12500_v22  ;;  %v4857_v37 = vsel %vm4774_vm10, %v4856_v11, %v12566_v39  ;;  %v5055_v2 = vor.u32 %v5054_v53, %v5053_v50  ;;  %v12706_v38 = vsub.s32 %v4936_v47, %v4939_v40 }
 0x819   : > { %v4459_v12 = vsel %vm4448_vm12, nan, %v4458_v24  ;;  %v4753_v21 = vsel %vm4670_vm4, %v4752_v54, %v4751_v26  ;;  %v4554_v5 = vand.u32 3, %v4553_v62  ;;  %v4651_v22 = vsel %vm4566_vm9, %v4650_v61, %v12329_v60 }
 0x81a   : > { %7950 = vmatmul.mubr.f32.vlgmr.msra.gmra.mrb[16].mxu1 %v4459_v12  ;;  %8724 = vcosq.f32 %v4652_v14  ;;  %v4932_v15 = vadd.s32 %v12632_v49, %v12643_v10  ;;  %v4942_v39 = vsub.s32 0, %v12706_v38  ;;  %v4653_v11 = vsel %vm12689_vm2, 0, %v4651_v22 }
 0x81b   : > { %8726 = vsinq.f32 %v4652_v14  ;;  %v5060_v42 = vand.u32 2147483647, %v5059_v43  ;;  %vm4552_vm13 = vweird.f32 %v12190_v41  ;;  %v14587_v26 = vand.u32 2147483647, %v12212_v35 }
 0x81c   : > { %v4754_v60 = vsub.s32 4, %v12524_v13  ;;  %v5062_v57 = vcvt.s32.f32 %v5055_v2  ;;  %v7467_v49 = vmin.u32 %v4942_v39, %v12706_v38  ;;  %v4657_v10 = vadd.s32 3, %v4653_v11 }
 0x81d   : > { %vm12723_vm6 = vcmp.le.f32.partialorder %v14587_v26, 0.7853982  ;;  %v8721_v55 = vpop.eup %8720  ;;  %vm4559_vm9 = vcmp.eq.s32.totalorder %v4554_v5, 2  ;;  %vm4982_vm1 = vcmp.lt.s32.totalorder %v12217_v27, 0  ;;  %v4858_v1 = vsub.s32 4, %v12436_v32 }
 0x81e   : > { %v4756_v51 = vsel %vm12723_vm6, %v12212_v35, %v4753_v21  ;;  %v4560_v36 = vxor.u32 2147483648, %v8721_v55  ;;  %v4755_v23 = vsel %vm4670_vm4, %v4754_v60, %v12524_v13  ;;  %v8723_v47 = vpop.eup %8722  ;;  %v4944_v25 = vclz %v7467_v49 }
 0x81f   : > { %8728 = vcosq.f32 %v4756_v51  ;;  %v4757_v16 = vsel %vm12723_vm6, 0, %v4755_v23  ;;  %v5063_v58 = vmul.f32 %v5062_v57, %v5060_v42  ;;  %vm4556_vm5 = vcmp.eq.s32.totalorder %v4554_v5, 0 }
 0x820   : > { %8730 = vsinq.f32 %v4756_v51  ;;  %v4557_v52 = vxor.u32 2147483648, %v8723_v47  ;;  %v4561_v63 = vsel %vm4559_vm9, %v4560_v36, %v8723_v47  ;;  %v7468_v56 = vadd.s32 4294967294, %v4944_v25 }
 0x821   : > { %v4658_v17 = vand.u32 3, %v4657_v10  ;;  %v14590_v33 = vand.u32 2147483647, %v12205_v28  ;;  %v4859_v4 = vsel %vm4774_vm10, %v4858_v1, %v12436_v32  ;;  %vm4555_vm14 = vcmp.lt.s32.totalorder %v4554_v5, 2 }
 0x822   : > { %v4558_v54 = vsel %vm4556_vm5, %v8721_v55, %v4557_v52  ;;  %v4761_v20 = vadd.s32 3, %v4757_v16  ;;  %vm7469_vm7 = vcmp.lt.s32.totalorder %v7468_v56, 0  ;;  %v5064_v62 = vxor.u32 2147483648, %v5063_v58 }
 0x823   : > { %vm12741_vm11 = vcmp.le.f32.partialorder %v14590_v33, 0.7853982  ;;  %v4562_v48 = vsel %vm4555_vm14, %v4558_v54, %v4561_v63  ;;  %v4947_v44 = vsel %vm7469_vm7, 0, %v7468_v56  ;;  %vm4660_vm10 = vcmp.eq.s32.totalorder %v4658_v17, 0 }
 0x824   : > { %v4860_v45 = vsel %vm12741_vm11, %v12205_v28, %v4857_v37  ;;  %v4861_v50 = vsel %vm12741_vm11, 0, %v4859_v4  ;;  %v8725_v53 = vpop.eup %8724  ;;  %v4563_v30 = vsel %vm4552_vm13, nan, %v4562_v48  ;;  %v4948_v40 = vsub.s32 32, %v4947_v44 }
 0x825   : > { %8732 = vcosq.f32 %v4860_v45  ;;  %v8727_v32 = vpop.eup %8726  ;;  %v4952_v0 = vsub.s32 4294967266, %v4947_v44  ;;  %7952 = vmatprep.mubr.f32.mxu1 %v4563_v30  ;;  %v4664_v3 = vxor.u32 2147483648, %v8725_v53  ;;  %vm4663_vm12 = vcmp.eq.s32.totalorder %v4658_v17, 2 }
 0x826   : > { %8734 = vsinq.f32 %v4860_v45  ;;  %v4661_v43 = vxor.u32 2147483648, %v8727_v32  ;;  %v4762_v24 = vand.u32 3, %v4761_v20  ;;  %v4865_v61 = vadd.s32 3, %v4861_v50 }
 0x827   : > { %v4949_v14 = vshll.u32 %v12706_v38, %v4947_v44  ;;  %v4950_v37 = vshrl.u32 %v4932_v15, %v4948_v40  ;;  %v4953_v2 = vadd.s32 127, %v4952_v0  ;;  %v4665_v12 = vsel %vm4663_vm12, %v4664_v3, %v8727_v32 }
 0x828   : > { %v5065_v41 = vsel %vm4982_vm1, %v5064_v62, %v5063_v58  ;;  %vm4656_vm15 = vweird.f32 %v12170_v9  ;;  %vm4659_vm4 = vcmp.lt.s32.totalorder %v4658_v17, 2  ;;  %v4662_v5 = vsel %vm4660_vm10, %v8725_v53, %v4661_v43 }
 0x829   : > { %v8729_v21 = vpop.eup %8728  ;;  %v4951_v39 = vor.u32 %v4950_v37, %v4949_v14  ;;  %v4954_v11 = vshll.u32 %v4953_v2, 23  ;;  %v4666_v42 = vsel %vm4659_vm4, %v4662_v5, %v4665_v12  ;;  %vm4760_vm3 = vweird.f32 %v12212_v35 }
 0x82a   : > { %v8731_v22 = vpop.eup %8730  ;;  %v4768_v26 = vxor.u32 2147483648, %v8729_v21  ;;  %v4667_v18 = vsel %vm4656_vm15, nan, %v4666_v42  ;;  %vm4767_vm8 = vcmp.eq.s32.totalorder %v4762_v24, 2  ;;  %vm4764_vm2 = vcmp.eq.s32.totalorder %v4762_v24, 0 }
 0x82b   : > { %v4765_v38 = vxor.u32 2147483648, %v8731_v22  ;;  %v4955_v15 = vor.u32 4788187, %v4954_v11  ;;  %7953 = vmatmul.mubr.f32.gmra.mrb[18].mxu1 %v4667_v18  ;;  %v4866_v55 = vand.u32 3, %v4865_v61  ;;  %v4958_v57 = vcvt.s32.f32 %v4951_v39  ;;  %v12789_v39 = vld [vmem:[%s14324_s4 + $0x5] ss:$0 sm:$0xff] }
 0x82c   : > { %v4769_v60 = vsel %vm4767_vm8, %v4768_v26, %v8731_v22  ;;  %vm4763_vm0 = vcmp.lt.s32.totalorder %v4762_v24, 2  ;;  %v14593_v49 = vand.u32 2147483647, %v12217_v27  ;;  %v5066_v47 = vsub.s32 4, %v12588_v8 }
 0x82d   : > { %v4766_v9 = vsel %vm4764_vm2, %v8729_v21, %v4765_v38  ;;  %v4956_v36 = vand.u32 2147483647, %v4955_v15  ;;  %v4962_v52 = vsub.s32 4, %v12685_v31  ;;  %vm4871_vm6 = vcmp.eq.s32.totalorder %v4866_v55, 2 }
 0x82e   : > { %vm12762_vm13 = vcmp.le.f32.partialorder %v14593_v49, 0.7853982  ;;  %v4770_v23 = vsel %vm4763_vm0, %v4766_v9, %v4769_v60  ;;  %vm4868_vm9 = vcmp.eq.s32.totalorder %v4866_v55, 0  ;;  %vm4867_vm5 = vcmp.lt.s32.totalorder %v4866_v55, 2 }
 0x82f   : > { %v8733_v51 = vpop.eup %8732  ;;  %v5068_v25 = vsel %vm12762_vm13, %v12217_v27, %v5065_v41  ;;  %v4771_v1 = vsel %vm4760_vm3, nan, %v4770_v23  ;;  %v4959_v63 = vmul.f32 %v4958_v57, %v4956_v36  ;;  %v5067_v4 = vsel %vm4982_vm1, %v5066_v47, %v12588_v8 }
 0x830   : > { %v8735_v16 = vpop.eup %8734  ;;  %v4872_v58 = vxor.u32 2147483648, %v8733_v51  ;;  %7955 = vmatprep.mubr.f32.mxu1 %v4771_v1  ;;  %8736 = vcosq.f32 %v5068_v25  ;;  %vm4878_vm11 = vcmp.lt.s32.totalorder %v12431_v34, 0  ;;  %vm4864_vm14 = vweird.f32 %v12205_v28 }
 0x831   : > { %v4869_v56 = vxor.u32 2147483648, %v8735_v16  ;;  %8738 = vsinq.f32 %v5068_v25  ;;  %v4960_v33 = vxor.u32 2147483648, %v4959_v63  ;;  %v14596_v45 = vand.u32 2147483647, %v12431_v34 }
 0x832   : > { %v4873_v17 = vsel %vm4871_vm6, %v4872_v58, %v8735_v16  ;;  %v4963_v48 = vsel %vm4878_vm11, %v4962_v52, %v12685_v31  ;;  %v5069_v53 = vsel %vm12762_vm13, 0, %v5067_v4  ;;  %vm4968_vm8 = vweird.f32 %v12431_v34 }
 0x833   : > { %v4870_v13 = vsel %vm4868_vm9, %v8733_v51, %v4869_v56  ;;  %v4961_v54 = vsel %vm4878_vm11, %v4960_v33, %v4959_v63  ;;  %vm4877_vm7 = vcmp.le.f32.partialorder %v14596_v45, 0.7853982  ;;  %v5073_v62 = vadd.s32 3, %v5069_v53 }
 0x834   : > { %v4874_v35 = vsel %vm4867_vm5, %v4870_v13, %v4873_v17  ;;  %v4964_v50 = vsel %vm4877_vm7, %v12431_v34, %v4961_v54  ;;  %v4965_v8 = vsel %vm4877_vm7, 0, %v4963_v48  ;;  %vm5072_vm2 = vweird.f32 %v12217_v27 }
 0x835   : > { %v4875_v20 = vsel %vm4864_vm14, nan, %v4874_v35  ;;  %8740 = vcosq.f32 %v4964_v50  ;;  %v4969_v28 = vadd.s32 3, %v4965_v8  ;;  %v5074_v32 = vand.u32 3, %v5073_v62 }
 0x836   : > { %7956 = vmatmul.mubr.f32.gmra.mrb[20].mxu1 %v4875_v20  ;;  %8742 = vsinq.f32 %v4964_v50 }
 0x837   : > { %v4970_v3 = vand.u32 3, %v4969_v28  ;;  %vm5076_vm1 = vcmp.eq.s32.totalorder %v5074_v32, 0  ;;  %vm5079_vm10 = vcmp.eq.s32.totalorder %v5074_v32, 2  ;;  %vm5075_vm4 = vcmp.lt.s32.totalorder %v5074_v32, 2 }
 0x839   : > { %vm4975_vm12 = vcmp.eq.s32.totalorder %v4970_v3, 2  ;;  %vm4972_vm15 = vcmp.eq.s32.totalorder %v4970_v3, 0  ;;  %vm4971_vm3 = vcmp.lt.s32.totalorder %v4970_v3, 2 }
 0x83a   : > { %v8737_v44 = vpop.eup %8736 }
 0x83b   : > { %v8739_v30 = vpop.eup %8738  ;;  %v5080_v0 = vxor.u32 2147483648, %v8737_v44 }
 0x83c   : > { %v5077_v40 = vxor.u32 2147483648, %v8739_v30 }
 0x83d   : > { %v5081_v14 = vsel %vm5079_vm10, %v5080_v0, %v8739_v30 }
 0x83e   : > { %v5078_v61 = vsel %vm5076_vm1, %v8737_v44, %v5077_v40 }
 0x83f   : > { %v8741_v43 = vpop.eup %8740  ;;  %v5082_v21 = vsel %vm5075_vm4, %v5078_v61, %v5081_v14 }
 0x840   : > { %v8743_v31 = vpop.eup %8742  ;;  %v4976_v24 = vxor.u32 2147483648, %v8741_v43  ;;  %v5083_v22 = vsel %vm5072_vm2, nan, %v5082_v21 }
 0x841   : > { %v4973_v37 = vxor.u32 2147483648, %v8743_v31 }
 0x842   : > { %v4977_v2 = vsel %vm4975_vm12, %v4976_v24, %v8743_v31 }
 0x843   : > { %v4974_v12 = vsel %vm4972_vm15, %v8741_v43, %v4973_v37 }
 0x844   : > { %v4978_v41 = vsel %vm4971_vm3, %v4974_v12, %v4977_v2 }
 0x845   : > { %v4979_v5 = vsel %vm4968_vm8, nan, %v4978_v41 }
 0x846   : > { %7958 = vmatprep.mubr.f32.mxu1 %v4979_v5 }
 0x847   : > { %7959 = vmatmul.mubr.f32.gmra.mrb[22].mxu1 %v5083_v22 }
 0x8ed   : > { %v7951_v11 = vpop.f32.mrb[16].mxu1 }
 0x8ee   : > { %v12792_v42 = vadd.f32 %v7951_v11, %v12789_v39  ;;  %v5175_v26 = vpop.f32.mrb[17].mxu1 }
 0x8ef   : > { %v12795_v18 = vadd.f32 %v12789_v39, %v5175_v26 }
 0x8f0   : > { %v5318_v34 = vand.u32 2147483647, %v12792_v42  ;;  %v5321_v27 = vand.u32 2139095040, %v12792_v42 }
 0x8f1   : > { %v5214_v38 = vand.u32 2147483647, %v12795_v18  ;;  %v5217_v15 = vand.u32 2139095040, %v12795_v18 }
 0x8f2   : > { %v5322_v60 = vshrl.u32 %v5321_v27, 23  ;;  %v5325_v55 = vand.u32 8388607, %v5318_v34 }
 0x8f3   : > { %v5218_v57 = vshrl.u32 %v5217_v15, 23  ;;  %v5221_v9 = vand.u32 8388607, %v5214_v38 }
 0x8f4   : > { %v7480_v49 = vadd.s32 4294967169, %v5322_v60  ;;  %v5326_v36 = vor.u32 8388608, %v5325_v55 }
 0x8f5   : > { %v7476_v10 = vadd.s32 4294967169, %v5218_v57  ;;  %v5222_v23 = vor.u32 8388608, %v5221_v9 }
 0x8f6   : > { %v5328_v51 = vadd.s32 1, %v7480_v49  ;;  %v12805_v52 = vshll.u32 %v5326_v36, 8 }
 0x8f7   : > { %v5224_v47 = vadd.s32 1, %v7476_v10  ;;  %v12807_v63 = vshll.u32 %v5222_v23, 8 }
 0x8f8   : > { %vm5329_vm0 = vcmp.gt.s32.totalorder %v5328_v51, 0 }
 0x8f9   : > { %v5330_v25 = vsel %vm5329_vm0, %v5328_v51, 0  ;;  %vm5225_vm13 = vcmp.gt.s32.totalorder %v5224_v47, 0  ;;  %vm5320_vm0 = vcmp.lt.s32.totalorder %v12792_v42, 0 }
 0x8fa   : > { %v5331_v16 = vshrl.u32 %v5330_v25, 5  ;;  %v5332_v1 = vand.u32 31, %v5330_v25  ;;  %v5226_v58 = vsel %vm5225_vm13, %v5224_v47, 0 }
 0x8fb   : > { %v12810_v33 = vshrl.u32 %v5226_v58, 5  ;;  %v5228_v13 = vand.u32 31, %v5226_v58 }
 0x8fc   : > { %v5333_v56 = vsub.s32 32, %v5332_v1  ;;  %v5335_v17 = vshll.u32 %v14444_v29, %v5332_v1  ;;  %v5338_v4 = vshll.u32 %v14484_v7, %v5332_v1  ;;  %v5341_v35 = vshll.u32 %v14485_v6, %v5332_v1 }
 0x8fd   : > { %v5344_v54 = vshll.u32 %v14441_v59, %v5332_v1  ;;  %v5347_v20 = vshll.u32 %v14575_v19, %v5332_v1  ;;  %vm5350_vm6 = vcmp.lt.s32.totalorder %v5331_v16, 1  ;;  %vm5351_vm9 = vcmp.lt.s32.totalorder %v5331_v16, 2 }
 0x8fe   : > { %v5336_v45 = vshrl.u32 %v14484_v7, %v5333_v56  ;;  %v5339_v48 = vshrl.u32 %v14485_v6, %v5333_v56  ;;  %v5342_v50 = vshrl.u32 %v14441_v59, %v5333_v56  ;;  %v12819_v53 = vpop.f32.mrb[18].mxu1  ;;  %v5334_v8 = vshrl.u32 %v14444_v29, %v5333_v56 }
 0x8ff   : > { %v5345_v62 = vshrl.u32 %v14575_v19, %v5333_v56  ;;  %v5348_v44 = vshrl.u32 %v14576_v46, %v5333_v56  ;;  %v12824_v28 = vpop.f32.mrb[19].mxu1  ;;  %v5229_v0 = vsub.s32 32, %v5228_v13  ;;  %vm5352_vm5 = vcmp.lt.s32.totalorder %v5331_v16, 3 }
 0x900   : > { %v5337_v30 = vor.u32 %v5336_v45, %v5335_v17  ;;  %v5340_v32 = vor.u32 %v5339_v48, %v5338_v4  ;;  %v5343_v40 = vor.u32 %v5342_v50, %v5341_v35  ;;  %vm5353_vm11 = vcmp.lt.s32.totalorder %v5331_v16, 4 }
 0x901   : > { %v5346_v3 = vor.u32 %v5345_v62, %v5344_v54  ;;  %v5349_v43 = vor.u32 %v5348_v44, %v5347_v20  ;;  %v5231_v21 = vshll.u32 %v14444_v29, %v5228_v13  ;;  %v5232_v22 = vshrl.u32 %v14484_v7, %v5229_v0 }
 0x902   : > { %v5354_v31 = vsel %vm5350_vm6, %v5334_v8, %v5337_v30  ;;  %v5355_v24 = vsel %vm5353_vm11, %v5343_v40, 2102212464  ;;  %v5358_v61 = vsel %vm5350_vm6, %v5337_v30, %v5340_v32  ;;  %v5362_v14 = vsel %vm5350_vm6, %v5340_v32, %v5343_v40 }
 0x903   : > { %v5356_v37 = vsel %vm5352_vm5, %v5340_v32, %v5355_v24  ;;  %v5359_v2 = vsel %vm5353_vm11, %v5346_v3, 920167782  ;;  %v5363_v12 = vsel %vm5353_vm11, %v5349_v43, 1326507024  ;;  %v5234_v11 = vshll.u32 %v14484_v7, %v5228_v13 }
 0x904   : > { %v5360_v41 = vsel %vm5352_vm5, %v5343_v40, %v5359_v2  ;;  %v5364_v5 = vsel %vm5352_vm5, %v5346_v3, %v5363_v12  ;;  %v5357_v26 = vsel %vm5351_vm9, %v5354_v31, %v5356_v37  ;;  %v5235_v60 = vshrl.u32 %v14485_v6, %v5229_v0 }
 0x905   : > { %v5361_v27 = vsel %vm5351_vm9, %v5358_v61, %v5360_v41  ;;  %v5365_v15 = vsel %vm5351_vm9, %v5362_v14, %v5364_v5  ;;  %v5233_v10 = vor.u32 %v5232_v22, %v5231_v21  ;;  %v5237_v36 = vshll.u32 %v14485_v6, %v5228_v13 }
 0x906   : > { %v12837_v55 = vmul.u32.u64.low %v12805_v52, %v5365_v15  ;;  %v12838_v57 = vmul.u32.u64.high %v12805_v52, %v5365_v15, %v12837_v55  ;;  %v12841_v9 = vmul.u32.u64.low %v12805_v52, %v5361_v27  ;;  %v12842_v49 = vmul.u32.u64.high %v12805_v52, %v5361_v27, %v12841_v9 }
 0x907   : > { %v5236_v51 = vor.u32 %v5235_v60, %v5234_v11  ;;  %v5238_v23 = vshrl.u32 %v14441_v59, %v5229_v0  ;;  %v5230_v25 = vshrl.u32 %v14444_v29, %v5229_v0  ;;  %v5240_v16 = vshll.u32 %v14441_v59, %v5228_v13 }
 0x908   : > { %v5241_v1 = vshrl.u32 %v14575_v19, %v5229_v0  ;;  %v5244_v58 = vshrl.u32 %v14576_v46, %v5229_v0  ;;  %v5373_v17 = vmul.u32 %v12805_v52, %v5357_v26  ;;  %v5243_v35 = vshll.u32 %v14575_v19, %v5228_v13 }
 0x909   : > { %v7957_v47 = vpop.f32.mrb[20].mxu1  ;;  %v5239_v4 = vor.u32 %v5238_v23, %v5237_v36  ;;  %vm5246_vm14 = vcmp.lt.s32.totalorder %v12810_v33, 1  ;;  %vm5375_vm7 = vc.u32 %v12838_v57, %v12841_v9  ;;  %v5376_v54 = vadd.s32 1, %v12842_v49 }
 0x90a   : > { %v12851_v56 = vpop.f32.mrb[21].mxu1  ;;  %v5242_v20 = vor.u32 %v5241_v1, %v5240_v16  ;;  %vm5247_vm1 = vcmp.lt.s32.totalorder %v12810_v33, 2  ;;  %v5245_v45 = vor.u32 %v5244_v58, %v5243_v35  ;;  %vm5248_vm10 = vcmp.lt.s32.totalorder %v12810_v33, 3 }
 0x90b   : > { %vm5249_vm12 = vcmp.lt.s32.totalorder %v12810_v33, 4  ;;  %v5254_v48 = vsel %vm5246_vm14, %v5233_v10, %v5236_v51  ;;  %v5377_v52 = vsel %vm5375_vm7, %v5376_v54, %v12842_v49  ;;  %v5258_v8 = vsel %vm5246_vm14, %v5236_v51, %v5239_v4 }
 0x90c   : > { %v5251_v50 = vsel %vm5249_vm12, %v5239_v4, 2102212464  ;;  %v5255_v13 = vsel %vm5249_vm12, %v5242_v20, 920167782  ;;  %v5378_v62 = vadd.s32 %v5377_v52, %v5373_v17  ;;  %v5250_v44 = vsel %vm5246_vm14, %v5230_v25, %v5233_v10 }
 0x90d   : > { %v5256_v30 = vsel %vm5248_vm10, %v5239_v4, %v5255_v13  ;;  %v5259_v32 = vsel %vm5249_vm12, %v5245_v45, 1326507024  ;;  %v5252_v40 = vsel %vm5248_vm10, %v5236_v51, %v5251_v50  ;;  %v12867_v43 = vadd.f32 %v12819_v53, %v12789_v39 }
 0x90e   : > { %v5257_v0 = vsel %vm5247_vm1, %v5254_v48, %v5256_v30  ;;  %v5260_v3 = vsel %vm5248_vm10, %v5242_v20, %v5259_v32  ;;  %v5379_v31 = vadd.s32 536870912, %v5378_v62  ;;  %v5253_v53 = vsel %vm5247_vm1, %v5250_v44, %v5252_v40 }
 0x90f   : > { %v5261_v24 = vsel %vm5247_vm1, %v5258_v8, %v5260_v3  ;;  %v12872_v61 = vmul.u32.u64.low %v12807_v63, %v5257_v0  ;;  %v12873_v14 = vmul.u32.u64.high %v12807_v63, %v5257_v0, %v12872_v61  ;;  %v14416_v12 = vand.u32 2147483647, %v12867_v43 }
 0x910   : > { %v12876_v37 = vmul.u32.u64.low %v12807_v63, %v5261_v24  ;;  %v12877_v2 = vmul.u32.u64.high %v12807_v63, %v5261_v24, %v12876_v37  ;;  %v12880_v21 = vshrl.u32 %v5379_v31, 30  ;;  %v5529_v41 = vand.u32 2139095040, %v12867_v43 }
 0x911   : > { %v12887_v5 = vadd.f32 %v12789_v39, %v12824_v28  ;;  %v5272_v11 = vadd.s32 1, %v12873_v14  ;;  %v5533_v27 = vand.u32 8388607, %v14416_v12  ;;  %v5269_v15 = vmul.u32 %v12807_v63, %v5253_v53  ;;  %v6062_v12 = vld [vmem:[#allocation2 + $0x178] sm:$0xff] }
 0x912   : > { %v5381_v22 = vshll.u32 %v12880_v21, 30  ;;  %v5530_v26 = vshrl.u32 %v5529_v41, 23  ;;  %vm5271_vm15 = vc.u32 %v12877_v2, %v12872_v61  ;;  %v12897_v60 = vadd.f32 %v7957_v47, %v12789_v39 }
 0x913   : > { %v14417_v33 = vand.u32 2147483647, %v12887_v5  ;;  %v5273_v28 = vsel %vm5271_vm15, %v5272_v11, %v12873_v14  ;;  %v5425_v10 = vand.u32 2139095040, %v12887_v5  ;;  %v5534_v23 = vor.u32 8388608, %v5533_v27 }
 0x914   : > { %v5382_v55 = vsub.s32 %v5378_v62, %v5381_v22  ;;  %v7488_v49 = vadd.s32 4294967169, %v5530_v26  ;;  %v5274_v51 = vadd.s32 %v5273_v28, %v5269_v15  ;;  %v14414_v58 = vand.u32 2147483647, %v12897_v60 }
 0x915   : > { %v5426_v1 = vshrl.u32 %v5425_v10, 23  ;;  %v12903_v63 = vand.u32 8388607, %v14417_v33  ;;  %v5737_v17 = vand.u32 2139095040, %v12897_v60  ;;  %v5374_v4 = vadd.s32 %v12841_v9, %v12838_v57 }
 0x916   : > { %v5384_v36 = vsub.s32 0, %v5382_v55  ;;  %v5536_v25 = vadd.s32 1, %v7488_v49  ;;  %v5275_v16 = vadd.s32 536870912, %v5274_v51  ;;  %v12914_v48 = vadd.s32 %v12872_v61, %v12877_v2 }
 0x917   : > { %v12916_v50 = vshll.u32 %v5534_v23, 8  ;;  %v7484_v62 = vadd.s32 4294967169, %v5426_v1  ;;  %v5430_v44 = vor.u32 8388608, %v12903_v63  ;;  %v12924_v57 = vand.u32 8388607, %v14414_v58 }
 0x918   : > { %v7481_v47 = vmin.u32 %v5384_v36, %v5382_v55  ;;  %vm5537_vm4 = vcmp.gt.s32.totalorder %v5536_v25, 0  ;;  %v12909_v35 = vshrl.u32 %v5275_v16, 30  ;;  %v12928_v40 = vshrl.u32 %v5737_v17, 23 }
 0x919   : > { %v5538_v54 = vsel %vm5537_vm4, %v5536_v25, 0  ;;  %v5432_v17 = vadd.s32 1, %v7484_v62  ;;  %vm12955_vm6 = vcmp.le.f32.partialorder %v5318_v34, 0.7853982 }
 0x91a   : > { %v12911_v20 = vpop.f32.mrb[22].mxu1  ;;  %v5386_v45 = vclz %v7481_v47  ;;  %v5540_v52 = vand.u32 31, %v5538_v54  ;;  %v5277_v8 = vshll.u32 %v12909_v35, 30  ;;  %v12926_v30 = vshrl.u32 %v5538_v54, 5 }
 0x91b   : > { %v12918_v13 = vpop.f32.mrb[23].mxu1  ;;  %vm5433_vm11 = vcmp.gt.s32.totalorder %v5432_v17, 0 }
 0x91c   : > { %v7482_v9 = vadd.s32 4294967294, %v5386_v45  ;;  %v5541_v32 = vsub.s32 32, %v5540_v52  ;;  %v12930_v0 = vsub.s32 %v5274_v51, %v5277_v8  ;;  %v5543_v3 = vshll.u32 %v14444_v29, %v5540_v52 }
 0x91d   : > { %v5546_v31 = vshll.u32 %v14484_v7, %v5540_v52  ;;  %v5549_v24 = vshll.u32 %v14485_v6, %v5540_v52  ;;  %v5552_v37 = vshll.u32 %v14441_v59, %v5540_v52  ;;  %v5555_v15 = vshll.u32 %v14575_v19, %v5540_v52 }
 0x91e   : > { %vm7483_vm3 = vcmp.lt.s32.totalorder %v7482_v9, 0  ;;  %v5544_v61 = vshrl.u32 %v14484_v7, %v5541_v32  ;;  %v5547_v14 = vshrl.u32 %v14485_v6, %v5541_v32  ;;  %v5280_v53 = vsub.s32 0, %v12930_v0 }
 0x91f   : > { %v5389_v2 = vsel %vm7483_vm3, 0, %v7482_v9  ;;  %v5550_v41 = vshrl.u32 %v14441_v59, %v5541_v32  ;;  %v5553_v22 = vshrl.u32 %v14575_v19, %v5541_v32  ;;  %v5556_v16 = vshrl.u32 %v14576_v46, %v5541_v32 }
 0x920   : > { %v5390_v11 = vsub.s32 32, %v5389_v2  ;;  %v5391_v26 = vshll.u32 %v5382_v55, %v5389_v2  ;;  %v5394_v27 = vsub.s32 4294967266, %v5389_v2  ;;  %v7477_v28 = vmin.u32 %v5280_v53, %v12930_v0 }
 0x921   : > { %v5545_v49 = vor.u32 %v5544_v61, %v5543_v3  ;;  %v5548_v10 = vor.u32 %v5547_v14, %v5546_v31  ;;  %v5554_v51 = vor.u32 %v5553_v22, %v5552_v37  ;;  %v5551_v25 = vor.u32 %v5550_v41, %v5549_v24 }
 0x922   : > { %v5392_v36 = vshrl.u32 %v5374_v4, %v5390_v11  ;;  %v5395_v23 = vadd.s32 127, %v5394_v27  ;;  %v5282_v1 = vclz %v7477_v28  ;;  %v5542_v47 = vshrl.u32 %v14444_v29, %v5541_v32 }
 0x923   : > { %vm5558_vm8 = vcmp.lt.s32.totalorder %v12926_v30, 1  ;;  %v5557_v45 = vor.u32 %v5556_v16, %v5555_v15  ;;  %vm5561_vm2 = vcmp.lt.s32.totalorder %v12926_v30, 4  ;;  %vm5560_vm13 = vcmp.lt.s32.totalorder %v12926_v30, 3 }
 0x924   : > { %v5393_v55 = vor.u32 %v5392_v36, %v5391_v26  ;;  %v5396_v54 = vshll.u32 %v5395_v23, 23  ;;  %v7478_v52 = vadd.s32 4294967294, %v5282_v1  ;;  %v5566_v4 = vsel %vm5558_vm8, %v5545_v49, %v5548_v10 }
 0x925   : > { %v5567_v8 = vsel %vm5561_vm2, %v5554_v51, 920167782  ;;  %vm5559_vm9 = vcmp.lt.s32.totalorder %v12926_v30, 2  ;;  %v5563_v32 = vsel %vm5561_vm2, %v5551_v25, 2102212464  ;;  %v5562_v31 = vsel %vm5558_vm8, %v5542_v47, %v5545_v49 }
 0x926   : > { %v5397_v9 = vor.u32 4788187, %v5396_v54  ;;  %v5568_v3 = vsel %vm5560_vm13, %v5551_v25, %v5567_v8  ;;  %vm7479_vm5 = vcmp.lt.s32.totalorder %v7478_v52, 0  ;;  %v5570_v34 = vsel %vm5558_vm8, %v5548_v10, %v5551_v25 }
 0x927   : > { %v5569_v24 = vsel %vm5559_vm9, %v5566_v4, %v5568_v3  ;;  %v5400_v14 = vcvt.s32.f32 %v5393_v55  ;;  %v5285_v37 = vsel %vm7479_vm5, 0, %v7478_v52  ;;  %v5571_v2 = vsel %vm5561_vm2, %v5557_v45, 1326507024 }
 0x928   : > { %v5398_v61 = vand.u32 2147483647, %v5397_v9  ;;  %v5286_v53 = vsub.s32 32, %v5285_v37  ;;  %v5290_v41 = vsub.s32 4294967266, %v5285_v37  ;;  %v5564_v22 = vsel %vm5560_vm13, %v5548_v10, %v5563_v32 }
 0x929   : > { %v5572_v11 = vsel %vm5560_vm13, %v5554_v51, %v5571_v2  ;;  %v12979_v15 = vmul.u32.u64.low %v12916_v50, %v5569_v24  ;;  %v12980_v28 = vmul.u32.u64.high %v12916_v50, %v5569_v24, %v12979_v15  ;;  %v7496_v51 = vadd.s32 4294967169, %v12928_v40 }
 0x92a   : > { %v5401_v26 = vmul.f32 %v5400_v14, %v5398_v61  ;;  %v5573_v27 = vsel %vm5559_vm9, %v5570_v34, %v5572_v11  ;;  %v5288_v49 = vshrl.u32 %v12914_v48, %v5286_v53  ;;  %v5291_v36 = vadd.s32 127, %v5290_v41 }
 0x92b   : > { %v12985_v23 = vmul.u32.u64.low %v12916_v50, %v5573_v27  ;;  %v12986_v25 = vmul.u32.u64.high %v12916_v50, %v5573_v27, %v12985_v23  ;;  %v12991_v16 = vadd.f32 %v12789_v39, %v12851_v56  ;;  %v5287_v1 = vshll.u32 %v12930_v0, %v5285_v37 }
 0x92c   : > { %v5402_v10 = vxor.u32 2147483648, %v5401_v26  ;;  %v5292_v47 = vshll.u32 %v5291_v36, 23  ;;  %v5565_v55 = vsel %vm5559_vm9, %v5562_v31, %v5564_v22  ;;  %v5434_v48 = vsel %vm5433_vm11, %v5432_v17, 0 }
 0x92d   : > { %v5584_v45 = vadd.s32 1, %v12980_v28  ;;  %v5436_v52 = vand.u32 31, %v5434_v48  ;;  %v13001_v40 = vshll.u32 %v5430_v44, 8  ;;  %v5289_v0 = vor.u32 %v5288_v49, %v5287_v1 }
 0x92e   : > { %v5403_v54 = vsel %vm5320_vm0, %v5402_v10, %v5401_v26  ;;  %v5293_v4 = vor.u32 4788187, %v5292_v47  ;;  %v5742_v30 = vor.u32 8388608, %v12924_v57  ;;  %v5581_v17 = vmul.u32 %v12916_v50, %v5565_v55 }
 0x92f   : > { %v13006_v56 = vsel %vm12955_vm6, %v12792_v42, %v5403_v54  ;;  %vm5583_vm14 = vc.u32 %v12986_v25, %v12979_v15  ;;  %v5437_v8 = vsub.s32 32, %v5436_v52  ;;  %v5744_v9 = vadd.s32 1, %v7496_v51 }
 0x930   : > { %v5294_v32 = vand.u32 2147483647, %v5293_v4  ;;  %v5585_v63 = vsel %vm5583_vm14, %v5584_v45, %v12980_v28  ;;  %v5435_v44 = vshrl.u32 %v5434_v48, 5  ;;  %v5439_v3 = vshll.u32 %v14444_v29, %v5436_v52 }
 0x931   : > { %v5586_v31 = vadd.s32 %v5585_v63, %v5581_v17  ;;  %v5440_v24 = vshrl.u32 %v14484_v7, %v5437_v8  ;;  %v5442_v34 = vshll.u32 %v14484_v7, %v5436_v52  ;;  %v5443_v57 = vshrl.u32 %v14485_v6, %v5437_v8 }
 0x932   : > { %v5296_v61 = vcvt.s32.f32 %v5289_v0  ;;  %v5445_v50 = vshll.u32 %v14485_v6, %v5436_v52  ;;  %v5446_v14 = vshrl.u32 %v14441_v59, %v5437_v8  ;;  %v5448_v37 = vshll.u32 %v14441_v59, %v5436_v52 }
 0x933   : > { %v5587_v2 = vadd.s32 536870912, %v5586_v31  ;;  %v5441_v53 = vor.u32 %v5440_v24, %v5439_v3  ;;  %v5444_v41 = vor.u32 %v5443_v57, %v5442_v34  ;;  %v5449_v22 = vshrl.u32 %v14575_v19, %v5437_v8 }
 0x934   : > { %v5447_v11 = vor.u32 %v5446_v14, %v5445_v50  ;;  %v5451_v26 = vshll.u32 %v14575_v19, %v5436_v52  ;;  %v5452_v27 = vshrl.u32 %v14576_v46, %v5437_v8  ;;  %v5633_v28 = vand.u32 2139095040, %v12991_v16 }
 0x935   : > { %v13024_v49 = vmul.f32 %v5296_v61, %v5294_v32  ;;  %v13026_v36 = vshrl.u32 %v5587_v2, 30  ;;  %v5438_v23 = vshrl.u32 %v14444_v29, %v5437_v8  ;;  %v5450_v10 = vor.u32 %v5449_v22, %v5448_v37 }
 0x936   : > { %v5453_v51 = vor.u32 %v5452_v27, %v5451_v26  ;;  %vm5454_vm7 = vcmp.lt.s32.totalorder %v5435_v44, 1  ;;  %vm5456_vm1 = vcmp.lt.s32.totalorder %v5435_v44, 3  ;;  %vm5457_vm10 = vcmp.lt.s32.totalorder %v5435_v44, 4 }
 0x937   : > { %v5589_v1 = vshll.u32 %v13026_v36, 30  ;;  %v5458_v47 = vsel %vm5454_vm7, %v5438_v23, %v5441_v53  ;;  %v5459_v55 = vsel %vm5457_vm10, %v5447_v11, 2102212464  ;;  %v5462_v48 = vsel %vm5454_vm7, %v5441_v53, %v5444_v41 }
 0x938   : > { %v5460_v54 = vsel %vm5456_vm1, %v5444_v41, %v5459_v55  ;;  %v5463_v45 = vsel %vm5457_vm10, %v5450_v10, 920167782  ;;  %v5466_v52 = vsel %vm5454_vm7, %v5444_v41, %v5447_v11  ;;  %v5467_v0 = vsel %vm5457_vm10, %v5453_v51, 1326507024 }
 0x939   : > { %v13030_v4 = vsub.s32 %v5586_v31, %v5589_v1  ;;  %vm5455_vm12 = vcmp.lt.s32.totalorder %v5435_v44, 2  ;;  %v5464_v17 = vsel %vm5456_vm1, %v5447_v11, %v5463_v45  ;;  %v5468_v32 = vsel %vm5456_vm1, %v5450_v10, %v5467_v0 }
 0x93a   : > { %v5461_v8 = vsel %vm5455_vm12, %v5458_v47, %v5460_v54  ;;  %v5465_v63 = vsel %vm5455_vm12, %v5462_v48, %v5464_v17  ;;  %v5469_v3 = vsel %vm5455_vm12, %v5466_v52, %v5468_v32  ;;  %vm5745_vm15 = vcmp.gt.s32.totalorder %v5744_v9, 0 }
 0x93b   : > { %v5592_v24 = vsub.s32 0, %v13030_v4  ;;  %v13034_v34 = vmul.u32.u64.low %v13001_v40, %v5469_v3  ;;  %v13035_v57 = vmul.u32.u64.high %v13001_v40, %v5469_v3, %v13034_v34  ;;  %v5746_v61 = vsel %vm5745_vm15, %v5744_v9, 0 }
 0x93c   : > { %v13038_v50 = vmul.u32.u64.low %v13001_v40, %v5465_v63  ;;  %v13039_v14 = vmul.u32.u64.high %v13001_v40, %v5465_v63, %v13038_v50  ;;  %v5748_v31 = vand.u32 31, %v5746_v61  ;;  %v5582_v44 = vadd.s32 %v12979_v15, %v12986_v25 }
 0x93d   : > { %v7489_v37 = vmin.u32 %v5592_v24, %v13030_v4  ;;  %v13045_v2 = vshll.u32 %v5742_v30, 8  ;;  %v14415_v53 = vand.u32 2147483647, %v12991_v16  ;;  %v5298_v41 = vxor.u32 2147483648, %v13024_v49 }
 0x93e   : > { %v5477_v22 = vmul.u32 %v13001_v40, %v5461_v8  ;;  %v13050_v9 = vshrl.u32 %v5746_v61, 5  ;;  %v5749_v11 = vsub.s32 32, %v5748_v31  ;;  %vm5479_vm4 = vc.u32 %v13035_v57, %v13038_v50 }
 0x93f   : > { %v5594_v26 = vclz %v7489_v37  ;;  %v5751_v27 = vshll.u32 %v14444_v29, %v5748_v31  ;;  %v5634_v15 = vshrl.u32 %v5633_v28, 23  ;;  %v5480_v25 = vadd.s32 1, %v13039_v14 }
 0x940   : > { %v5752_v30 = vshrl.u32 %v14484_v7, %v5749_v11  ;;  %v5754_v23 = vshll.u32 %v14484_v7, %v5748_v31  ;;  %v5755_v10 = vshrl.u32 %v14485_v6, %v5749_v11  ;;  %v5757_v40 = vshll.u32 %v14485_v6, %v5748_v31 }
 0x941   : > { %v7490_v51 = vadd.s32 4294967294, %v5594_v26  ;;  %v5758_v1 = vshrl.u32 %v14441_v59, %v5749_v11  ;;  %v5761_v47 = vshrl.u32 %v14575_v19, %v5749_v11  ;;  %v5481_v55 = vsel %vm5479_vm4, %v5480_v25, %v13039_v14 }
 0x942   : > { %v5760_v48 = vshll.u32 %v14441_v59, %v5748_v31  ;;  %v5763_v28 = vshll.u32 %v14575_v19, %v5748_v31  ;;  %v5764_v54 = vshrl.u32 %v14576_v46, %v5749_v11  ;;  %v5482_v45 = vadd.s32 %v5481_v55, %v5477_v22 }
 0x943   : > { %vm7491_vm3 = vcmp.lt.s32.totalorder %v7490_v51, 0  ;;  %v5753_v52 = vor.u32 %v5752_v30, %v5751_v27  ;;  %v5756_v0 = vor.u32 %v5755_v10, %v5754_v23  ;;  %v5759_v32 = vor.u32 %v5758_v1, %v5757_v40 }
 0x944   : > { %v5597_v17 = vsel %vm7491_vm3, 0, %v7490_v51  ;;  %v5762_v8 = vor.u32 %v5761_v47, %v5760_v48  ;;  %v5765_v63 = vor.u32 %v5764_v54, %v5763_v28  ;;  %v5483_v24 = vadd.s32 536870912, %v5482_v45 }
 0x945   : > { %v5602_v3 = vsub.s32 4294967266, %v5597_v17  ;;  %v13068_v34 = vand.u32 8388607, %v14415_v53  ;;  %v13072_v61 = vadd.f32 %v12911_v20, %v12789_v39  ;;  %vm5216_vm8 = vcmp.lt.s32.totalorder %v12795_v18, 0  ;;  %v6061_v53 = vld [vmem:[#allocation2 + $0x170] sm:$0xff] }
 0x946   : > { %v5598_v14 = vsub.s32 32, %v5597_v17  ;;  %v5750_v31 = vshrl.u32 %v14444_v29, %v5749_v11  ;;  %vm5766_vm2 = vcmp.lt.s32.totalorder %v13050_v9, 1  ;;  %vm5767_vm13 = vcmp.lt.s32.totalorder %v13050_v9, 2 }
 0x947   : > { %v5599_v37 = vshll.u32 %v13030_v4, %v5597_v17  ;;  %v5603_v22 = vadd.s32 127, %v5602_v3  ;;  %v13079_v26 = vshrl.u32 %v5483_v24, 30  ;;  %vm5769_vm9 = vcmp.lt.s32.totalorder %v13050_v9, 4 }
 0x948   : > { %v5771_v27 = vsel %vm5769_vm9, %v5759_v32, 2102212464  ;;  %v5774_v20 = vsel %vm5766_vm2, %v5753_v52, %v5756_v0  ;;  %v5775_v25 = vsel %vm5769_vm9, %v5762_v8, 920167782  ;;  %v5779_v30 = vsel %vm5769_vm9, %v5765_v63, 1326507024 }
 0x949   : > { %v5604_v23 = vshll.u32 %v5603_v22, 23  ;;  %v5485_v11 = vshll.u32 %v13079_v26, 30  ;;  %vm5768_vm5 = vcmp.lt.s32.totalorder %v13050_v9, 3  ;;  %v5778_v10 = vsel %vm5766_vm2, %v5756_v0, %v5759_v32 }
 0x94a   : > { %v5600_v4 = vshrl.u32 %v5582_v44, %v5598_v14  ;;  %v5776_v51 = vsel %vm5768_vm5, %v5759_v32, %v5775_v25  ;;  %v5780_v40 = vsel %vm5768_vm5, %v5762_v8, %v5779_v30  ;;  %v7492_v1 = vadd.s32 4294967169, %v5634_v15 }
 0x94b   : > { %v13088_v47 = vsub.s32 %v5482_v45, %v5485_v11  ;;  %v5770_v55 = vsel %vm5766_vm2, %v5750_v31, %v5753_v52  ;;  %v5772_v48 = vsel %vm5768_vm5, %v5756_v0, %v5771_v27  ;;  %v5777_v28 = vsel %vm5767_vm13, %v5774_v20, %v5776_v51  ;;  %v6047_v52 = vld [vmem:[#allocation2 + $0x100] sm:$0xff]  ;;  %v6048_v0 = vld [vmem:[#allocation2 + $0x108] sm:$0xff] }
 0x94c   : > { %v5605_v54 = vor.u32 4788187, %v5604_v23  ;;  %v5781_v17 = vsel %vm5767_vm13, %v5778_v10, %v5780_v40  ;;  %v13097_v63 = vmul.u32.u64.low %v13045_v2, %v5777_v28  ;;  %v13098_v3 = vmul.u32.u64.high %v13045_v2, %v5777_v28, %v13097_v63 }
 0x94d   : > { %8744 = vcosq.f32 %v13006_v56  ;;  %v5488_v44 = vsub.s32 0, %v13088_v47  ;;  %v13104_v15 = vmul.u32.u64.low %v13045_v2, %v5781_v17  ;;  %v13105_v45 = vmul.u32.u64.high %v13045_v2, %v5781_v17, %v13104_v15 }
 0x94e   : > { %8746 = vsinq.f32 %v13006_v56  ;;  %v5601_v32 = vor.u32 %v5600_v4, %v5599_v37  ;;  %v5773_v8 = vsel %vm5767_vm13, %v5770_v55, %v5772_v48  ;;  %v5640_v24 = vadd.s32 1, %v7492_v1 }
 0x94f   : > { %v13115_v14 = vsel %vm5216_vm8, %v5298_v41, %v13024_v49  ;;  %v7485_v31 = vmin.u32 %v5488_v44, %v13088_v47  ;;  %v5638_v22 = vor.u32 8388608, %v13068_v34  ;;  %v5945_v27 = vand.u32 2139095040, %v13072_v61 }
 0x950   : > { %v5606_v20 = vand.u32 2147483647, %v5605_v54  ;;  %v5792_v56 = vadd.s32 1, %v13098_v3  ;;  %vm5641_vm11 = vcmp.gt.s32.totalorder %v5640_v24, 0  ;;  %v8209_v9 = vpack.c.bf16 %v6048_v0, %v6047_v52 }
 0x951   : > { %v5490_v37 = vclz %v7485_v31  ;;  %v5789_v25 = vmul.u32 %v13045_v2, %v5773_v8  ;;  %vm5791_vm14 = vc.u32 %v13105_v45, %v13097_v63  ;;  %v14413_v49 = vand.u32 2147483647, %v13072_v61 }
 0x952   : > { %v5608_v41 = vcvt.s32.f32 %v5601_v32  ;;  %v5793_v30 = vsel %vm5791_vm14, %v5792_v56, %v13098_v3  ;;  %v5642_v23 = vsel %vm5641_vm11, %v5640_v24, 0  ;;  %v5946_v34 = vshrl.u32 %v5945_v27, 23  ;;  %8210 = vmatprep.subr.bf16.mxu0 %v8209_v9 }
 0x953   : > { %v5478_v11 = vadd.s32 %v13038_v50, %v13035_v57  ;;  %v7486_v10 = vadd.s32 4294967294, %v5490_v37  ;;  %v5794_v4 = vadd.s32 %v5793_v30, %v5789_v25  ;;  %v13128_v51 = vshrl.u32 %v5642_v23, 5  ;;  %8212 = vmatpush3.bf16.msra.mxu0 %v8209_v9 }
 0x954   : > { %v13130_v2 = vmul.f32 %v5608_v41, %v5606_v20  ;;  %v5644_v40 = vand.u32 31, %v5642_v23  ;;  %v13132_v1 = vshll.u32 %v5638_v22, 8  ;;  %v13136_v55 = vadd.f32 %v12789_v39, %v12918_v13 }
 0x955   : > { %vm7487_vm7 = vcmp.lt.s32.totalorder %v7486_v10, 0  ;;  %v5795_v48 = vadd.s32 536870912, %v5794_v4  ;;  %v13138_v28 = vadd.s32 4294967169, %v5946_v34  ;;  %v13142_v57 = vand.u32 8388607, %v14413_v49 }
 0x956   : > { %v5493_v50 = vsel %vm7487_vm7, 0, %v7486_v10  ;;  %v5645_v54 = vsub.s32 32, %v5644_v40  ;;  %v5647_v17 = vshll.u32 %v14444_v29, %v5644_v40  ;;  %vm5662_vm1 = vcmp.lt.s32.totalorder %v13128_v51, 1 }
 0x957   : > { %v13146_v3 = vpop.eup %8744  ;;  %v5494_v44 = vsub.s32 32, %v5493_v50  ;;  %v5498_v15 = vsub.s32 4294967266, %v5493_v50  ;;  %v13148_v39 = vshrl.u32 %v5795_v48, 30  ;;  %v5650_v13 = vshll.u32 %v14484_v7, %v5644_v40 }
 0x958   : > { %v13151_v52 = vpop.eup %8746  ;;  %v5495_v0 = vshll.u32 %v13088_v47, %v5493_v50  ;;  %v5648_v32 = vshrl.u32 %v14484_v7, %v5645_v54  ;;  %v5651_v8 = vshrl.u32 %v14485_v6, %v5645_v54  ;;  %v5653_v24 = vshll.u32 %v14485_v6, %v5644_v40 }
 0x959   : > { %v5496_v31 = vshrl.u32 %v5478_v11, %v5494_v44  ;;  %v5499_v22 = vadd.s32 127, %v5498_v15  ;;  %v5797_v27 = vshll.u32 %v13148_v39, 30  ;;  %v5654_v20 = vshrl.u32 %v14441_v59, %v5645_v54 }
 0x95a   : > { %v5649_v56 = vor.u32 %v5648_v32, %v5647_v17  ;;  %v5652_v9 = vor.u32 %v5651_v8, %v5650_v13  ;;  %v5656_v37 = vshll.u32 %v14441_v59, %v5644_v40  ;;  %v5657_v25 = vshrl.u32 %v14575_v19, %v5645_v54 }
 0x95b   : > { %v5497_v41 = vor.u32 %v5496_v31, %v5495_v0  ;;  %v5500_v47 = vshll.u32 %v5499_v22, 23  ;;  %v13161_v30 = vsub.s32 %v5794_v4, %v5797_v27  ;;  %v5655_v23 = vor.u32 %v5654_v20, %v5653_v24 }
 0x95c   : > { %v5658_v34 = vor.u32 %v5657_v25, %v5656_v37  ;;  %v5659_v10 = vshll.u32 %v14575_v19, %v5644_v40  ;;  %v5660_v11 = vshrl.u32 %v14576_v46, %v5645_v54  ;;  %vm5663_vm10 = vcmp.lt.s32.totalorder %v13128_v51, 2  ;;  %v6049_v25 = vld [vmem:[#allocation2 + $0x110] sm:$0xff] }
 0x95d   : > { %v5501_v48 = vor.u32 4788187, %v5500_v47  ;;  %v5800_v50 = vsub.s32 0, %v13161_v30  ;;  %v5646_v17 = vshrl.u32 %v14444_v29, %v5645_v54  ;;  %vm5665_vm12 = vcmp.lt.s32.totalorder %v13128_v51, 4 }
 0x95e   : > { %v5661_v44 = vor.u32 %v5660_v11, %v5659_v10  ;;  %vm5664_vm15 = vcmp.lt.s32.totalorder %v13128_v51, 3  ;;  %v5667_v4 = vsel %vm5665_vm12, %v5655_v23, 2102212464  ;;  %v5670_v15 = vsel %vm5662_vm1, %v5649_v56, %v5652_v9  ;;  %v6050_v10 = vld [vmem:[#allocation2 + $0x118] sm:$0xff]  ;;  %v6051_v11 = vld [vmem:[#allocation2 + $0x120] sm:$0xff] }
 0x95f   : > { %v5502_v13 = vand.u32 2147483647, %v5501_v48  ;;  %v5504_v40 = vcvt.s32.f32 %v5497_v41  ;;  %v7497_v0 = vmin.u32 %v5800_v50, %v13161_v30  ;;  %v5671_v32 = vsel %vm5665_vm12, %v5658_v34, 920167782  ;;  %v6052_v48 = vld [vmem:[#allocation2 + $0x128] sm:$0xff] }
 0x960   : > { %v5666_v8 = vsel %vm5662_vm1, %v5646_v17, %v5649_v56  ;;  %v5672_v24 = vsel %vm5664_vm15, %v5655_v23, %v5671_v32  ;;  %v5674_v54 = vsel %vm5662_vm1, %v5652_v9, %v5655_v23  ;;  %v5675_v31 = vsel %vm5665_vm12, %v5661_v44, 1326507024 }
 0x961   : > { %vm5528_vm4 = vcmp.lt.s32.totalorder %v12867_v43, 0  ;;  %v5802_v22 = vclz %v7497_v0  ;;  %v5668_v27 = vsel %vm5664_vm15, %v5652_v9, %v5667_v4  ;;  %v5673_v20 = vsel %vm5663_vm10, %v5670_v15, %v5672_v24 }
 0x962   : > { %v5676_v37 = vsel %vm5664_vm15, %v5658_v34, %v5675_v31  ;;  %vm5424_vm3 = vcmp.lt.s32.totalorder %v12887_v5, 0  ;;  %v13184_v56 = vmul.u32.u64.low %v13132_v1, %v5673_v20  ;;  %v13185_v47 = vmul.u32.u64.high %v13132_v1, %v5673_v20, %v13184_v56 }
 0x963   : > { %v5677_v41 = vsel %vm5663_vm10, %v5674_v54, %v5676_v37  ;;  %v14412_v23 = vand.u32 2147483647, %v13136_v55  ;;  %v5505_v9 = vmul.f32 %v5504_v40, %v5502_v13  ;;  %v7498_v50 = vadd.s32 4294967294, %v5802_v22 }
 0x964   : > { %v13189_v17 = vmul.u32.u64.low %v13132_v1, %v5677_v41  ;;  %v13190_v34 = vmul.u32.u64.high %v13132_v1, %v5677_v41, %v13189_v17  ;;  %v5610_v44 = vxor.u32 2147483648, %v13130_v2  ;;  %v5669_v4 = vsel %vm5663_vm10, %v5666_v8, %v5668_v27 }
 0x965   : > { %v5952_v15 = vadd.s32 1, %v13138_v28  ;;  %v5841_v0 = vand.u32 2139095040, %v13136_v55  ;;  %vm7499_vm2 = vcmp.lt.s32.totalorder %v7498_v50, 0  ;;  %v5950_v32 = vor.u32 8388608, %v13142_v57 }
 0x966   : > { %v8213_v24 = vpack.c.bf16 %v6050_v10, %v6049_v25  ;;  %v8217_v54 = vpack.c.bf16 %v6052_v48, %v6051_v11  ;;  %v13198_v13 = vsel %vm7499_vm2, 0, %v7498_v50  ;;  %v5688_v40 = vadd.s32 1, %v13185_v47 }
 0x967   : > { %vm5953_vm13 = vcmp.gt.s32.totalorder %v5952_v15, 0  ;;  %v5842_v31 = vshrl.u32 %v5841_v0, 23  ;;  %v5506_v22 = vxor.u32 2147483648, %v5505_v9  ;;  %v5810_v20 = vsub.s32 4294967266, %v13198_v13 }
 0x968   : > { %v5685_v51 = vmul.u32 %v13132_v1, %v5669_v4  ;;  %v13205_v28 = vand.u32 8388607, %v14412_v23  ;;  %8214 = vmatprep.subr.bf16.mxu0 %v8213_v24  ;;  %v5806_v57 = vsub.s32 32, %v13198_v13  ;;  %vm5687_vm9 = vc.u32 %v13190_v34, %v13184_v56 }
 0x969   : > { %v5954_v8 = vsel %vm5953_vm13, %v5952_v15, 0  ;;  %v7500_v27 = vadd.s32 4294967169, %v5842_v31  ;;  %8216 = vmatpush3.bf16.msra.mxu0 %v8213_v24  ;;  %v5790_v37 = vadd.s32 %v13097_v63, %v13105_v45  ;;  %v5811_v25 = vadd.s32 127, %v5810_v20 }
 0x96a   : > { %v5689_v41 = vsel %vm5687_vm9, %v5688_v40, %v13185_v47  ;;  %v5955_v10 = vshrl.u32 %v5954_v8, 5  ;;  %8218 = vmatprep.subr.bf16.mxu0 %v8217_v54  ;;  %v13215_v1 = vsel %vm5528_vm4, %v5610_v44, %v13130_v2  ;;  %v5956_v48 = vand.u32 31, %v5954_v8 }
 0x96b   : > { %v5690_v11 = vadd.s32 %v5689_v41, %v5685_v51  ;;  %v13217_v50 = vshll.u32 %v5950_v32, 8  ;;  %v13221_v17 = vsel %vm5424_vm3, %v5506_v22, %v5505_v9  ;;  %v5807_v63 = vshll.u32 %v13161_v30, %v13198_v13 }
 0x96c   : > { %v13226_v45 = vadd.s32 %v13184_v56, %v13190_v34  ;;  %v5846_v47 = vor.u32 8388608, %v13205_v28  ;;  %v5808_v4 = vshrl.u32 %v5790_v37, %v5806_v57  ;;  %v5957_v2 = vsub.s32 32, %v5956_v48 }
 0x96d   : > { %v5691_v15 = vadd.s32 536870912, %v5690_v11  ;;  %v5848_v44 = vadd.s32 1, %v7500_v27  ;;  %8220 = vmatpush3.bf16.msra.mxu0 %v8217_v54  ;;  %v5812_v0 = vshll.u32 %v5811_v25, 23  ;;  %v5959_v32 = vshll.u32 %v14444_v29, %v5956_v48 }
 0x96e   : > { %v5962_v24 = vshll.u32 %v14484_v7, %v5956_v48  ;;  %vm5974_vm5 = vcmp.lt.s32.totalorder %v5955_v10, 1  ;;  %v5960_v30 = vshrl.u32 %v14484_v7, %v5957_v2  ;;  %v5963_v56 = vshrl.u32 %v14485_v6, %v5957_v2 }
 0x96f   : > { %v13231_v9 = vshrl.u32 %v5691_v15, 30  ;;  %v5965_v34 = vshll.u32 %v14485_v6, %v5956_v48  ;;  %v5966_v13 = vshrl.u32 %v14441_v59, %v5957_v2  ;;  %v5968_v40 = vshll.u32 %v14441_v59, %v5956_v48 }
 0x970   : > { %v5969_v54 = vshrl.u32 %v14575_v19, %v5957_v2  ;;  %v5971_v31 = vshll.u32 %v14575_v19, %v5956_v48  ;;  %v5961_v20 = vor.u32 %v5960_v30, %v5959_v32  ;;  %v5964_v51 = vor.u32 %v5963_v56, %v5962_v24  ;;  %v6053_v56 = vld [vmem:[#allocation2 + $0x130] sm:$0xff] }
 0x971   : > { %v5693_v22 = vshll.u32 %v13231_v9, 30  ;;  %v5972_v57 = vshrl.u32 %v14576_v46, %v5957_v2  ;;  %v5958_v8 = vshrl.u32 %v14444_v29, %v5957_v2  ;;  %v5967_v27 = vor.u32 %v5966_v13, %v5965_v34 }
 0x972   : > { %v5970_v37 = vor.u32 %v5969_v54, %v5968_v40  ;;  %vm5975_vm11 = vcmp.lt.s32.totalorder %v5955_v10, 2  ;;  %vm5976_vm14 = vcmp.lt.s32.totalorder %v5955_v10, 3  ;;  %vm5977_vm7 = vcmp.lt.s32.totalorder %v5955_v10, 4 }
 0x973   : > { %v13243_v25 = vsub.s32 %v5690_v11, %v5693_v22  ;;  %v5973_v41 = vor.u32 %v5972_v57, %v5971_v31  ;;  %v5978_v15 = vsel %vm5974_vm5, %v5958_v8, %v5961_v20  ;;  %v5979_v23 = vsel %vm5977_vm7, %v5967_v27, 2102212464  ;;  %v6054_v11 = vld [vmem:[#allocation2 + $0x138] sm:$0xff] }
 0x974   : > { %v5982_v48 = vsel %vm5974_vm5, %v5961_v20, %v5964_v51  ;;  %v5983_v49 = vsel %vm5977_vm7, %v5970_v37, 920167782  ;;  %v5980_v24 = vsel %vm5976_vm14, %v5964_v51, %v5979_v23  ;;  %v5986_v30 = vsel %vm5974_vm5, %v5964_v51, %v5967_v27  ;;  %v6056_v51 = vld [vmem:[#allocation2 + $0x148] sm:$0xff] }
 0x975   : > { %v5696_v32 = vsub.s32 0, %v13243_v25  ;;  %v5984_v2 = vsel %vm5976_vm14, %v5967_v27, %v5983_v49  ;;  %v13251_v34 = vor.u32 %v5808_v4, %v5807_v63  ;;  %v13253_v13 = vor.u32 4788187, %v5812_v0  ;;  %v6055_v49 = vld [vmem:[#allocation2 + $0x140] sm:$0xff]  ;;  %v6057_v0 = vld [vmem:[#allocation2 + $0x150] sm:$0xff] }
 0x976   : > { %v5985_v40 = vsel %vm5975_vm11, %v5982_v48, %v5984_v2  ;;  %v5987_v54 = vsel %vm5977_vm7, %v5973_v41, 1326507024  ;;  %v5981_v57 = vsel %vm5975_vm11, %v5978_v15, %v5980_v24  ;;  %vm5849_vm1 = vcmp.gt.s32.totalorder %v5848_v44, 0  ;;  %v6058_v48 = vld [vmem:[#allocation2 + $0x158] sm:$0xff]  ;;  %v6060_v2 = vld [vmem:[#allocation2 + $0x168] sm:$0xff] }
 0x977   : > { %v7493_v31 = vmin.u32 %v5696_v32, %v13243_v25  ;;  %v5988_v22 = vsel %vm5976_vm14, %v5970_v37, %v5987_v54  ;;  %v13259_v20 = vmul.u32.u64.low %v13217_v50, %v5985_v40  ;;  %v13260_v23 = vmul.u32.u64.high %v13217_v50, %v5985_v40, %v13259_v20  ;;  %v6059_v32 = vld [vmem:[#allocation2 + $0x160] sm:$0xff] }
 0x978   : > { %v5989_v63 = vsel %vm5975_vm11, %v5986_v30, %v5988_v22  ;;  %v8221_v4 = vpack.c.bf16 %v6054_v11, %v6053_v56  ;;  %v5850_v37 = vsel %vm5849_vm1, %v5848_v44, 0  ;;  %v5814_v40 = vand.u32 2147483647, %v13253_v13 }
 0x979   : > { %v5698_v8 = vclz %v7493_v31  ;;  %v13266_v27 = vmul.u32.u64.low %v13217_v50, %v5989_v63  ;;  %v13267_v41 = vmul.u32.u64.high %v13217_v50, %v5989_v63, %v13266_v27  ;;  %v5816_v54 = vcvt.s32.f32 %v13251_v34 }
 0x97a   : > { %v5852_v58 = vand.u32 31, %v5850_v37  ;;  %8222 = vmatprep.subr.bf16.mxu0 %v8221_v4  ;;  %v8225_v10 = vpack.c.bf16 %v6056_v51, %v6055_v49  ;;  %v5997_v24 = vmul.u32 %v13217_v50, %v5981_v57  ;;  %v6000_v30 = vadd.s32 1, %v13260_v23 }
 0x97b   : > { %v7494_v15 = vadd.s32 4294967294, %v5698_v8  ;;  %v13273_v56 = vshrl.u32 %v5850_v37, 5  ;;  %8224 = vmatpush3.bf16.msra.mxu0 %v8221_v4  ;;  %v8229_v31 = vpack.c.bf16 %v6058_v48, %v6057_v0  ;;  %v8233_v22 = vpack.c.bf16 %v6060_v2, %v6059_v32 }
 0x97c   : > { %v5853_v11 = vsub.s32 32, %v5852_v58  ;;  %v5855_v44 = vshll.u32 %v14444_v29, %v5852_v58  ;;  %8226 = vmatprep.subr.bf16.mxu0 %v8225_v10  ;;  %vm5999_vm12 = vc.u32 %v13267_v41, %v13259_v20  ;;  %v5858_v34 = vshll.u32 %v14484_v7, %v5852_v58 }
 0x97d   : > { %vm7495_vm10 = vcmp.lt.s32.totalorder %v7494_v15, 0  ;;  %v5861_v13 = vshll.u32 %v14485_v6, %v5852_v58  ;;  %v6001_v49 = vsel %vm5999_vm12, %v6000_v30, %v13260_v23  ;;  %v5864_v57 = vshll.u32 %v14441_v59, %v5852_v58 }
 0x97e   : > { %v5701_v50 = vsel %vm7495_vm10, 0, %v7494_v15  ;;  %v5856_v51 = vshrl.u32 %v14484_v7, %v5853_v11  ;;  %v6002_v8 = vadd.s32 %v6001_v49, %v5997_v24  ;;  %v5859_v37 = vshrl.u32 %v14485_v6, %v5853_v11 }
 0x97f   : > { %v5702_v63 = vsub.s32 32, %v5701_v50  ;;  %v5703_v4 = vshll.u32 %v13243_v25, %v5701_v50  ;;  %v5706_v0 = vsub.s32 4294967266, %v5701_v50  ;;  %8228 = vmatpush3.bf16.msra.mxu0 %v8225_v10  ;;  %v5862_v48 = vshrl.u32 %v14441_v59, %v5853_v11 }
 0x980   : > { %v5857_v27 = vor.u32 %v5856_v51, %v5855_v44  ;;  %v5865_v32 = vshrl.u32 %v14575_v19, %v5853_v11  ;;  %8230 = vmatprep.subr.bf16.mxu0 %v8229_v31  ;;  %v6003_v15 = vadd.s32 536870912, %v6002_v8  ;;  %v5867_v30 = vshll.u32 %v14575_v19, %v5852_v58 }
 0x981   : > { %v5704_v23 = vshrl.u32 %v13226_v45, %v5702_v63  ;;  %v5707_v2 = vadd.s32 127, %v5706_v0  ;;  %v5860_v25 = vor.u32 %v5859_v37, %v5858_v34  ;;  %v5863_v50 = vor.u32 %v5862_v48, %v5861_v13 }
 0x982   : > { %v5866_v24 = vor.u32 %v5865_v32, %v5864_v57  ;;  %v5868_v10 = vshrl.u32 %v14576_v46, %v5853_v11  ;;  %v13290_v44 = vmul.f32 %v5816_v54, %v5814_v40  ;;  %v13292_v51 = vshrl.u32 %v6003_v15, 30 }
 0x983   : > { %v5708_v49 = vshll.u32 %v5707_v2, 23  ;;  %v5886_v33 = vshll.u32 %v5846_v47, 8  ;;  %8232 = vmatpush3.bf16.msra.mxu0 %v8229_v31  ;;  %vm13298_vm15 = vcmp.le.f32.partialorder %v5214_v38, 0.7853982  ;;  %v5705_v45 = vor.u32 %v5704_v23, %v5703_v4 }
 0x984   : > { %v5854_v34 = vshrl.u32 %v14444_v29, %v5853_v11  ;;  %v5869_v13 = vor.u32 %v5868_v10, %v5867_v30  ;;  %8234 = vmatprep.subr.bf16.mxu0 %v8233_v22  ;;  %v8237_v40 = vpack.c.bf16 %v6062_v12, %v6061_v53  ;;  %v6005_v57 = vshll.u32 %v13292_v51, 30 }
 0x985   : > { %v5709_v54 = vor.u32 4788187, %v5708_v49  ;;  %vm5870_vm2 = vcmp.lt.s32.totalorder %v13273_v56, 1  ;;  %vm5873_vm13 = vcmp.lt.s32.totalorder %v13273_v56, 4  ;;  %vm5872_vm9 = vcmp.lt.s32.totalorder %v13273_v56, 3 }
 0x986   : > { %v5875_v28 = vsel %vm5873_vm13, %v5863_v50, 2102212464  ;;  %v5878_v38 = vsel %vm5870_vm2, %v5857_v27, %v5860_v25  ;;  %v5879_v47 = vsel %vm5873_vm13, %v5866_v24, 920167782  ;;  %v13307_v31 = vsub.s32 %v6002_v8, %v6005_v57 }
 0x987   : > { %vm5871_vm5 = vcmp.lt.s32.totalorder %v13273_v56, 2  ;;  %v5880_v11 = vsel %vm5872_vm9, %v5863_v50, %v5879_v47  ;;  %v5882_v12 = vsel %vm5870_vm2, %v5860_v25, %v5863_v50  ;;  %8236 = vmatpush3.bf16.msra.mxu0 %v8233_v22  ;;  %v5874_v53 = vsel %vm5870_vm2, %v5854_v34, %v5857_v27 }
 0x988   : > { %v5881_v63 = vsel %vm5871_vm5, %v5878_v38, %v5880_v11  ;;  %v5883_v4 = vsel %vm5873_vm13, %v5869_v13, 1326507024  ;;  %8238 = vmatprep.subr.bf16.mxu0 %v8237_v40  ;;  %v5300_v0 = vsub.s32 4, %v12909_v35  ;;  %v5710_v37 = vand.u32 2147483647, %v5709_v54 }
 0x989   : > { %v6008_v48 = vsub.s32 0, %v13307_v31  ;;  %v5876_v8 = vsel %vm5872_vm9, %v5860_v25, %v5875_v28  ;;  %v5884_v32 = vsel %vm5872_vm9, %v5866_v24, %v5883_v4  ;;  %v5712_v15 = vcvt.s32.f32 %v5705_v45 }
 0x98a   : > { %v5885_v22 = vsel %vm5871_vm5, %v5882_v12, %v5884_v32  ;;  %v13322_v27 = vmul.u32.u64.low %v5886_v33, %v5881_v63  ;;  %v13323_v23 = vmul.u32.u64.high %v5886_v33, %v5881_v63, %v13322_v27  ;;  %v5301_v2 = vsel %vm5216_vm8, %v5300_v0, %v12909_v35 }
 0x98b   : > { %v7505_v30 = vmin.u32 %v6008_v48, %v13307_v31  ;;  %v13330_v50 = vmul.u32.u64.low %v5886_v33, %v5885_v22  ;;  %v13331_v10 = vmul.u32.u64.high %v5886_v33, %v5885_v22, %v13330_v50  ;;  %8240 = vmatpush3.bf16.msra.mxu0 %v8237_v40  ;;  %v5877_v25 = vsel %vm5871_vm5, %v5874_v53, %v5876_v8 }
 0x98c   : > { %v5302_v24 = vsel %vm13298_vm15, %v12795_v18, %v13115_v14  ;;  %v5303_v49 = vsel %vm13298_vm15, 0, %v5301_v2  ;;  %v5404_v35 = vsub.s32 4, %v12880_v21  ;;  %v13342_v45 = vmul.f32 %v5712_v15, %v5710_v37 }
 0x98d   : > { %v6010_v34 = vclz %v7505_v30  ;;  %8748 = vcosq.f32 %v5302_v24  ;;  %v5307_v13 = vadd.s32 3, %v5303_v49  ;;  %v5818_v40 = vxor.u32 2147483648, %v13290_v44 }
 0x98e   : > { %v5896_v56 = vadd.s32 1, %v13323_v23  ;;  %8750 = vsinq.f32 %v5302_v24  ;;  %v5405_v54 = vsel %vm5320_vm0, %v5404_v35, %v12880_v21  ;;  %v5998_v14 = vadd.s32 %v13259_v20, %v13267_v41 }
 0x98f   : > { %v7506_v58 = vadd.s32 4294967294, %v6010_v34  ;;  %v5893_v57 = vmul.u32 %v5886_v33, %v5877_v25  ;;  %vm5895_vm8 = vc.u32 %v13331_v10, %v13322_v27  ;;  %v5308_v38 = vand.u32 3, %v5307_v13 }
 0x990   : > { %v5897_v28 = vsel %vm5895_vm8, %v5896_v56, %v13323_v23  ;;  %v5407_v47 = vsel %vm12955_vm6, 0, %v5405_v54  ;;  %v5508_v11 = vsub.s32 4, %v13079_v26  ;;  %v5714_v12 = vxor.u32 2147483648, %v13342_v45 }
 0x991   : > { %vm7507_vm11 = vcmp.lt.s32.totalorder %v7506_v58, 0  ;;  %v5898_v21 = vadd.s32 %v5897_v28, %v5893_v57  ;;  %v5415_v53 = vxor.u32 2147483648, %v13151_v52  ;;  %vm5410_vm0 = vweird.f32 %v12792_v42 }
 0x992   : > { %v6013_v20 = vsel %vm7507_vm11, 0, %v7506_v58  ;;  %v5411_v33 = vadd.s32 3, %v5407_v47  ;;  %v5418_v41 = vxor.u32 2147483648, %v13146_v3  ;;  %v14601_v63 = vand.u32 2147483647, %v12887_v5 }
 0x993   : > { %vm5632_vm6 = vcmp.lt.s32.totalorder %v12991_v16, 0  ;;  %v6014_v62 = vsub.s32 32, %v6013_v20  ;;  %v6018_v0 = vsub.s32 4294967266, %v6013_v20  ;;  %v5899_v37 = vadd.s32 536870912, %v5898_v21 }
 0x994   : > { %vm13363_vm14 = vcmp.le.f32.partialorder %v14601_v63, 0.7853982  ;;  %v5509_v48 = vsel %vm5424_vm3, %v5508_v11, %v13079_v26  ;;  %vm5306_vm7 = vweird.f32 %v12795_v18  ;;  %vm5309_vm1 = vcmp.lt.s32.totalorder %v5308_v38, 2 }
 0x995   : > { %vm5313_vm10 = vcmp.eq.s32.totalorder %v5308_v38, 2  ;;  %v5412_v8 = vand.u32 3, %v5411_v33  ;;  %v5510_v32 = vsel %vm13363_vm14, %v12887_v5, %v13221_v17  ;;  %vm5736_vm12 = vcmp.lt.s32.totalorder %v12897_v60, 0 }
 0x996   : > { %v6016_v22 = vshrl.u32 %v5998_v14, %v6014_v62  ;;  %v6019_v23 = vadd.s32 127, %v6018_v0  ;;  %v13377_v2 = vshrl.u32 %v5899_v37, 30  ;;  %8752 = vcosq.f32 %v5510_v32 }
 0x997   : > { %v6015_v15 = vshll.u32 %v13307_v31, %v6013_v20  ;;  %vm5414_vm3 = vcmp.eq.s32.totalorder %v5412_v8, 0  ;;  %v5511_v26 = vsel %vm13363_vm14, 0, %v5509_v48  ;;  %8754 = vsinq.f32 %v5510_v32  ;;  %v8749_v30 = vpop.eup %8748 }
 0x998   : > { %v6020_v50 = vshll.u32 %v6019_v23, 23  ;;  %v5901_v25 = vshll.u32 %v13377_v2, 30  ;;  %v5416_v17 = vsel %vm5414_vm3, %v13146_v3, %v5415_v53  ;;  %vm5417_vm15 = vcmp.eq.s32.totalorder %v5412_v8, 2  ;;  %v8751_v24 = vpop.eup %8750 }
 0x999   : > { %v6017_v49 = vor.u32 %v6016_v22, %v6015_v15  ;;  %v5314_v35 = vxor.u32 2147483648, %v8749_v30  ;;  %vm5413_vm2 = vcmp.lt.s32.totalorder %v5412_v8, 2  ;;  %v5419_v34 = vsel %vm5417_vm15, %v5418_v41, %v13151_v52 }
 0x99a   : > { %v6021_v13 = vor.u32 4788187, %v6020_v50  ;;  %v13385_v31 = vsub.s32 %v5898_v21, %v5901_v25  ;;  %v5311_v56 = vxor.u32 2147483648, %v8751_v24  ;;  %v5515_v54 = vadd.s32 3, %v5511_v26 }
 0x99b   : > { %vm5310_vm13 = vcmp.eq.s32.totalorder %v5308_v38, 0  ;;  %v5315_v14 = vsel %vm5313_vm10, %v5314_v35, %v8751_v24  ;;  %v5420_v58 = vsel %vm5413_vm2, %v5416_v17, %v5419_v34  ;;  %v5612_v57 = vsub.s32 4, %v13026_v36 }
 0x99c   : > { %v6022_v28 = vand.u32 2147483647, %v6021_v13  ;;  %v5904_v3 = vsub.s32 0, %v13385_v31  ;;  %v5312_v47 = vsel %vm5310_vm13, %v8749_v30, %v5311_v56  ;;  %v5421_v11 = vsel %vm5410_vm0, nan, %v5420_v58 }
 0x99d   : > { %v5715_v52 = vsel %vm5632_vm6, %v5714_v12, %v13342_v45  ;;  %v6024_v21 = vcvt.s32.f32 %v6017_v49  ;;  %v5316_v53 = vsel %vm5309_vm1, %v5312_v47, %v5315_v14  ;;  %v14604_v20 = vand.u32 2147483647, %v12867_v43 }
 0x99e   : > { %v7501_v41 = vmin.u32 %v5904_v3, %v13385_v31  ;;  %v5317_v63 = vsel %vm5306_vm7, nan, %v5316_v53  ;;  %v5516_v42 = vand.u32 3, %v5515_v54  ;;  %v5613_v4 = vsel %vm5528_vm4, %v5612_v57, %v13026_v36 }
 0x99f   : > { %vm13398_vm9 = vcmp.le.f32.partialorder %v14604_v20, 0.7853982  ;;  %v5819_v45 = vsel %vm5736_vm12, %v5818_v40, %v13290_v44  ;;  %v6025_v38 = vmul.f32 %v6024_v21, %v6022_v28  ;;  %7993 = vmatprep.mubr.f32.mxu0 %v5317_v63  ;;  %v14607_v36 = vand.u32 2147483647, %v12991_v16 }
 0x9a0   : > { %v5614_v12 = vsel %vm13398_vm9, %v12867_v43, %v13215_v1  ;;  %v8753_v18 = vpop.eup %8752  ;;  %v5906_v62 = vclz %v7501_v41  ;;  %7994 = vmatmul.mubr.f32.vlgmr.msra.gmra.mrb[24].mxu0 %v5421_v11  ;;  %v5615_v0 = vsel %vm13398_vm9, 0, %v5613_v4  ;;  %v5716_v48 = vsub.s32 4, %v13231_v9 }
 0x9a1   : > { %8756 = vcosq.f32 %v5614_v12  ;;  %vm13421_vm4 = vcmp.le.f32.partialorder %v14607_v36, 0.7853982  ;;  %v8755_v44 = vpop.eup %8754  ;;  %v5522_v40 = vxor.u32 2147483648, %v8753_v18  ;;  %vm5518_vm5 = vcmp.eq.s32.totalorder %v5516_v42, 0 }
 0x9a2   : > { %8758 = vsinq.f32 %v5614_v12  ;;  %v5718_v1 = vsel %vm13421_vm4, %v12991_v16, %v5715_v52  ;;  %v7502_v8 = vadd.s32 4294967294, %v5906_v62  ;;  %v5519_v32 = vxor.u32 2147483648, %v8755_v44 }
 0x9a3   : > { %vm5521_vm8 = vcmp.eq.s32.totalorder %v5516_v42, 2  ;;  %v5619_v23 = vadd.s32 3, %v5615_v0  ;;  %v5717_v15 = vsel %vm5632_vm6, %v5716_v48, %v13231_v9  ;;  %8760 = vcosq.f32 %v5718_v1 }
 0x9a4   : > { %v5523_v22 = vsel %vm5521_vm8, %v5522_v40, %v8755_v44  ;;  %v5894_v26 = vadd.s32 %v13322_v27, %v13331_v10  ;;  %vm7503_vm11 = vcmp.lt.s32.totalorder %v7502_v8, 0  ;;  %vm5517_vm0 = vcmp.lt.s32.totalorder %v5516_v42, 2 }
 0x9a5   : > { %v5520_v30 = vsel %vm5518_vm5, %v8753_v18, %v5519_v32  ;;  %v6026_v50 = vxor.u32 2147483648, %v6025_v38  ;;  %v5909_v25 = vsel %vm7503_vm11, 0, %v7502_v8  ;;  %vm5514_vm14 = vweird.f32 %v12887_v5 }
 0x9a6   : > { %v5524_v17 = vsel %vm5517_vm0, %v5520_v30, %v5523_v22  ;;  %v5910_v24 = vsub.s32 32, %v5909_v25  ;;  %v5914_v49 = vsub.s32 4294967266, %v5909_v25  ;;  %v5719_v34 = vsel %vm13421_vm4, 0, %v5717_v15 }
 0x9a7   : > { %v5525_v35 = vsel %vm5514_vm14, nan, %v5524_v17  ;;  %v5620_v9 = vand.u32 3, %v5619_v23  ;;  %8762 = vsinq.f32 %v5718_v1  ;;  %v14610_v13 = vand.u32 2147483647, %v12897_v60 }
 0x9a8   : > { %7996 = vmatprep.mubr.f32.mxu0 %v5525_v35  ;;  %v5820_v10 = vsub.s32 4, %v13148_v39  ;;  %v5911_v5 = vshll.u32 %v13385_v31, %v5909_v25  ;;  %v5912_v56 = vshrl.u32 %v5894_v26, %v5910_v24  ;;  %v5915_v54 = vadd.s32 127, %v5914_v49 }
 0x9a9   : > { %vm13439_vm6 = vcmp.le.f32.partialorder %v14610_v13, 0.7853982  ;;  %vm5944_vm7 = vcmp.lt.s32.totalorder %v13072_v61, 0  ;;  %v5723_v58 = vadd.s32 3, %v5719_v34  ;;  %vm5618_vm1 = vweird.f32 %v12867_v43 }
 0x9aa   : > { %v5822_v14 = vsel %vm13439_vm6, %v12897_v60, %v5819_v45  ;;  %v5821_v57 = vsel %vm5736_vm12, %v5820_v10, %v13148_v39  ;;  %v5913_v3 = vor.u32 %v5912_v56, %v5911_v5  ;;  %v5916_v47 = vshll.u32 %v5915_v54, 23 }
 0x9ab   : > { %8764 = vcosq.f32 %v5822_v14  ;;  %v8757_v28 = vpop.eup %8756  ;;  %v5823_v31 = vsel %vm13439_vm6, 0, %v5821_v57  ;;  %v6027_v52 = vsel %vm5944_vm7, %v6026_v50, %v6025_v38  ;;  %vm5621_vm10 = vcmp.lt.s32.totalorder %v5620_v9, 2 }
 0x9ac   : > { %8766 = vsinq.f32 %v5822_v14  ;;  %v8759_v11 = vpop.eup %8758  ;;  %v5626_v21 = vxor.u32 2147483648, %v8757_v28  ;;  %v5917_v53 = vor.u32 4788187, %v5916_v47  ;;  %vm5625_vm3 = vcmp.eq.s32.totalorder %v5620_v9, 2 }
 0x9ad   : > { %v5623_v20 = vxor.u32 2147483648, %v8759_v11  ;;  %v5827_v39 = vadd.s32 3, %v5823_v31  ;;  %v8761_v33 = vpop.eup %8760  ;;  %v5920_v41 = vcvt.s32.f32 %v5913_v3  ;;  %vm5622_vm12 = vcmp.eq.s32.totalorder %v5620_v9, 0 }
 0x9ae   : > { %v5627_v63 = vsel %vm5625_vm3, %v5626_v21, %v8759_v11  ;;  %v5724_v42 = vand.u32 3, %v5723_v58  ;;  %v5918_v4 = vand.u32 2147483647, %v5917_v53  ;;  %v5730_v12 = vxor.u32 2147483648, %v8761_v33 }
 0x9af   : > { %v5624_v45 = vsel %vm5622_vm12, %v8757_v28, %v5623_v20  ;;  %v14613_v18 = vand.u32 2147483647, %v13072_v61  ;;  %v5924_v0 = vsub.s32 4, %v13377_v2  ;;  %v6028_v36 = vsub.s32 4, %v13292_v51 }
 0x9b0   : > { %v5628_v62 = vsel %vm5621_vm10, %v5624_v45, %v5627_v63  ;;  %vm5840_vm2 = vcmp.lt.s32.totalorder %v13136_v55, 0  ;;  %v5921_v44 = vmul.f32 %v5920_v41, %v5918_v4  ;;  %v5828_v48 = vand.u32 3, %v5827_v39 }
 0x9b1   : > { %vm13459_vm15 = vcmp.le.f32.partialorder %v14613_v18, 0.7853982  ;;  %v5629_v40 = vsel %vm5618_vm1, nan, %v5628_v62  ;;  %v8763_v1 = vpop.eup %8762  ;;  %vm5722_vm13 = vweird.f32 %v12991_v16  ;;  %vm5729_vm9 = vcmp.eq.s32.totalorder %v5724_v42, 2 }
 0x9b2   : > { %v6030_v37 = vsel %vm13459_vm15, %v13072_v61, %v6027_v52  ;;  %7997 = vmatmul.mubr.f32.gmra.mrb[26].mxu0 %v5629_v40  ;;  %v14616_v8 = vand.u32 2147483647, %v13136_v55  ;;  %v5922_v22 = vxor.u32 2147483648, %v5921_v44  ;;  %v5727_v23 = vxor.u32 2147483648, %v8763_v1 }
 0x9b3   : > { %8768 = vcosq.f32 %v6030_v37  ;;  %v5731_v15 = vsel %vm5729_vm9, %v5730_v12, %v8763_v1  ;;  %v6029_v43 = vsel %vm5944_vm7, %v6028_v36, %v13292_v51  ;;  %vm5725_vm5 = vcmp.lt.s32.totalorder %v5724_v42, 2 }
 0x9b4   : > { %vm13474_vm4 = vcmp.le.f32.partialorder %v14616_v8, 0.7853982  ;;  %vm5726_vm8 = vcmp.eq.s32.totalorder %v5724_v42, 0  ;;  %v5925_v30 = vsel %vm5840_vm2, %v5924_v0, %v13377_v2  ;;  %8770 = vsinq.f32 %v6030_v37  ;;  %v13501_v42 = vld [vmem:[%s14324_s4 + $0x6] ss:$0 sm:$0xff] }
 0x9b5   : > { %v8765_v26 = vpop.eup %8764  ;;  %v5923_v25 = vsel %vm5840_vm2, %v5922_v22, %v5921_v44  ;;  %v5728_v17 = vsel %vm5726_vm8, %v8761_v33, %v5727_v23  ;;  %vm5833_vm11 = vcmp.eq.s32.totalorder %v5828_v48, 2  ;;  %v6031_v34 = vsel %vm13459_vm15, 0, %v6029_v43 }
 0x9b6   : > { %v8767_v50 = vpop.eup %8766  ;;  %v5834_v24 = vxor.u32 2147483648, %v8765_v26  ;;  %v5732_v49 = vsel %vm5725_vm5, %v5728_v17, %v5731_v15  ;;  %v5926_v51 = vsel %vm13474_vm4, %v13136_v55, %v5923_v25  ;;  %vm5830_vm0 = vcmp.eq.s32.totalorder %v5828_v48, 0 }
 0x9b7   : > { %v5831_v35 = vxor.u32 2147483648, %v8767_v50  ;;  %v5733_v2 = vsel %vm5722_vm13, nan, %v5732_v49  ;;  %8772 = vcosq.f32 %v5926_v51  ;;  %vm5829_vm14 = vcmp.lt.s32.totalorder %v5828_v48, 2 }
 0x9b8   : > { %v5835_v9 = vsel %vm5833_vm11, %v5834_v24, %v8767_v50  ;;  %7999 = vmatprep.mubr.f32.mxu0 %v5733_v2  ;;  %v5927_v27 = vsel %vm13474_vm4, 0, %v5925_v30  ;;  %8774 = vsinq.f32 %v5926_v51  ;;  %vm5826_vm6 = vweird.f32 %v12897_v60 }
 0x9b9   : > { %v5832_v13 = vsel %vm5830_vm0, %v8765_v26, %v5831_v35  ;;  %v6035_v5 = vadd.s32 3, %v6031_v34  ;;  %v5931_v54 = vadd.s32 3, %v5927_v27  ;;  %vm5930_vm2 = vweird.f32 %v13136_v55 }
 0x9ba   : > { %v5836_v10 = vsel %vm5829_vm14, %v5832_v13, %v5835_v9  ;;  %vm6034_vm13 = vweird.f32 %v13072_v61 }
 0x9bb   : > { %v5837_v56 = vsel %vm5826_vm6, nan, %v5836_v10  ;;  %v6036_v16 = vand.u32 3, %v6035_v5  ;;  %v5932_v28 = vand.u32 3, %v5931_v54 }
 0x9bc   : > { %8000 = vmatmul.mubr.f32.gmra.mrb[28].mxu0 %v5837_v56 }
 0x9bd   : > { %v8769_v14 = vpop.eup %8768  ;;  %vm6038_vm7 = vcmp.eq.s32.totalorder %v6036_v16, 0  ;;  %vm6041_vm1 = vcmp.eq.s32.totalorder %v6036_v16, 2  ;;  %vm5937_vm10 = vcmp.eq.s32.totalorder %v5932_v28, 2  ;;  %vm5934_vm3 = vcmp.eq.s32.totalorder %v5932_v28, 0 }
 0x9be   : > { %v8771_v58 = vpop.eup %8770  ;;  %v6042_v57 = vxor.u32 2147483648, %v8769_v14  ;;  %vm6037_vm12 = vcmp.lt.s32.totalorder %v6036_v16, 2  ;;  %vm5933_vm15 = vcmp.lt.s32.totalorder %v5932_v28, 2 }
 0x9bf   : > { %v6039_v3 = vxor.u32 2147483648, %v8771_v58 }
 0x9c0   : > { %v6043_v21 = vsel %vm6041_vm1, %v6042_v57, %v8771_v58 }
 0x9c1   : > { %v8773_v47 = vpop.eup %8772  ;;  %v6040_v52 = vsel %vm6038_vm7, %v8769_v14, %v6039_v3 }
 0x9c2   : > { %v8775_v31 = vpop.eup %8774  ;;  %v5938_v11 = vxor.u32 2147483648, %v8773_v47  ;;  %v6044_v39 = vsel %vm6037_vm12, %v6040_v52, %v6043_v21 }
 0x9c3   : > { %v5935_v53 = vxor.u32 2147483648, %v8775_v31  ;;  %v6045_v63 = vsel %vm6034_vm13, nan, %v6044_v39 }
 0x9c4   : > { %v5939_v60 = vsel %vm5937_vm10, %v5938_v11, %v8775_v31 }
 0x9c5   : > { %v5936_v20 = vsel %vm5934_vm3, %v8773_v47, %v5935_v53 }
 0x9c6   : > { %v5940_v33 = vsel %vm5933_vm15, %v5936_v20, %v5939_v60 }
 0x9c7   : > { %v5941_v41 = vsel %vm5930_vm2, nan, %v5940_v33 }
 0x9c8   : > { %8002 = vmatprep.mubr.f32.mxu0 %v5941_v41 }
 0x9c9   : > { %8003 = vmatmul.mubr.f32.gmra.mrb[30].mxu0 %v6045_v63 }
 0xa73   : > { %v7995_v4 = vpop.f32.mrb[24].mxu0 }
 0xa74   : > { %v13504_v45 = vadd.f32 %v7995_v4, %v13501_v42  ;;  %v6137_v12 = vpop.f32.mrb[25].mxu0 }
 0xa75   : > { %v13507_v18 = vadd.f32 %v13501_v42, %v6137_v12 }
 0xa76   : > { %v6280_v55 = vand.u32 2147483647, %v13504_v45  ;;  %v6283_v61 = vand.u32 2139095040, %v13504_v45 }
 0xa77   : > { %v6176_v38 = vand.u32 2147483647, %v13507_v18  ;;  %v6179_v62 = vand.u32 2139095040, %v13507_v18 }
 0xa78   : > { %v6284_v0 = vshrl.u32 %v6283_v61, 23  ;;  %v6287_v36 = vand.u32 8388607, %v6280_v55 }
 0xa79   : > { %v6180_v37 = vshrl.u32 %v6179_v62, 23  ;;  %v6183_v44 = vand.u32 8388607, %v6176_v38 }
 0xa7a   : > { %v7514_v40 = vadd.s32 4294967169, %v6284_v0  ;;  %v6288_v8 = vor.u32 8388608, %v6287_v36 }
 0xa7b   : > { %v7510_v48 = vadd.s32 4294967169, %v6180_v37  ;;  %v6184_v32 = vor.u32 8388608, %v6183_v44 }
 0xa7c   : > { %v6290_v1 = vadd.s32 1, %v7514_v40  ;;  %v13517_v30 = vshll.u32 %v6288_v8, 8 }
 0xa7d   : > { %v6186_v22 = vadd.s32 1, %v7510_v48  ;;  %v13519_v50 = vshll.u32 %v6184_v32, 8 }
 0xa7e   : > { %vm6291_vm9 = vcmp.gt.s32.totalorder %v6290_v1, 0 }
 0xa7f   : > { %v6292_v23 = vsel %vm6291_vm9, %v6290_v1, 0  ;;  %vm6187_vm4 = vcmp.gt.s32.totalorder %v6186_v22, 0  ;;  %vm6282_vm9 = vcmp.lt.s32.totalorder %v13504_v45, 0 }
 0xa80   : > { %v6293_v15 = vshrl.u32 %v6292_v23, 5  ;;  %v6294_v43 = vand.u32 31, %v6292_v23  ;;  %v6188_v26 = vsel %vm6187_vm4, %v6186_v22, 0 }
 0xa81   : > { %v13522_v24 = vshrl.u32 %v6188_v26, 5  ;;  %v6190_v49 = vand.u32 31, %v6188_v26 }
 0xa82   : > { %v6295_v25 = vsub.s32 32, %v6294_v43  ;;  %v6297_v17 = vshll.u32 %v14444_v29, %v6294_v43  ;;  %v6300_v35 = vshll.u32 %v14484_v7, %v6294_v43  ;;  %v6303_v51 = vshll.u32 %v14485_v6, %v6294_v43 }
 0xa83   : > { %v6306_v34 = vshll.u32 %v14441_v59, %v6294_v43  ;;  %v6309_v2 = vshll.u32 %v14575_v19, %v6294_v43  ;;  %vm6312_vm5 = vcmp.lt.s32.totalorder %v6293_v15, 1  ;;  %vm6313_vm8 = vcmp.lt.s32.totalorder %v6293_v15, 2 }
 0xa84   : > { %v6298_v9 = vshrl.u32 %v14484_v7, %v6295_v25  ;;  %v6301_v13 = vshrl.u32 %v14485_v6, %v6295_v25  ;;  %v6304_v27 = vshrl.u32 %v14441_v59, %v6295_v25  ;;  %v6296_v5 = vshrl.u32 %v14444_v29, %v6295_v25 }
 0xa85   : > { %v13531_v10 = vpop.f32.mrb[26].mxu0  ;;  %v6307_v56 = vshrl.u32 %v14575_v19, %v6295_v25  ;;  %v6310_v54 = vshrl.u32 %v14576_v46, %v6295_v25  ;;  %v6191_v28 = vsub.s32 32, %v6190_v49  ;;  %vm6314_vm11 = vcmp.lt.s32.totalorder %v6293_v15, 3 }
 0xa86   : > { %v13536_v14 = vpop.f32.mrb[27].mxu0  ;;  %v6299_v16 = vor.u32 %v6298_v9, %v6297_v17  ;;  %v6302_v58 = vor.u32 %v6301_v13, %v6300_v35  ;;  %v6305_v57 = vor.u32 %v6304_v27, %v6303_v51  ;;  %vm6315_vm0 = vcmp.lt.s32.totalorder %v6293_v15, 4 }
 0xa87   : > { %v6308_v3 = vor.u32 %v6307_v56, %v6306_v34  ;;  %v6311_v47 = vor.u32 %v6310_v54, %v6309_v2  ;;  %v6193_v39 = vshll.u32 %v14444_v29, %v6190_v49  ;;  %v6194_v63 = vshrl.u32 %v14484_v7, %v6191_v28 }
 0xa88   : > { %v6316_v31 = vsel %vm6312_vm5, %v6296_v5, %v6299_v16  ;;  %v6317_v11 = vsel %vm6315_vm0, %v6305_v57, 2102212464  ;;  %v6320_v52 = vsel %vm6312_vm5, %v6299_v16, %v6302_v58  ;;  %v6324_v21 = vsel %vm6312_vm5, %v6302_v58, %v6305_v57 }
 0xa89   : > { %v6318_v53 = vsel %vm6314_vm11, %v6302_v58, %v6317_v11  ;;  %v6321_v60 = vsel %vm6315_vm0, %v6308_v3, 920167782  ;;  %v6325_v20 = vsel %vm6315_vm0, %v6311_v47, 1326507024  ;;  %v6196_v4 = vshll.u32 %v14484_v7, %v6190_v49 }
 0xa8a   : > { %v6322_v33 = vsel %vm6314_vm11, %v6305_v57, %v6321_v60  ;;  %v6326_v41 = vsel %vm6314_vm11, %v6308_v3, %v6325_v20  ;;  %v6319_v12 = vsel %vm6313_vm8, %v6316_v31, %v6318_v53  ;;  %v6197_v0 = vshrl.u32 %v14485_v6, %v6191_v28 }
 0xa8b   : > { %v6323_v61 = vsel %vm6313_vm8, %v6320_v52, %v6322_v33  ;;  %v6327_v62 = vsel %vm6313_vm8, %v6324_v21, %v6326_v41  ;;  %v6195_v48 = vor.u32 %v6194_v63, %v6193_v39  ;;  %v6199_v8 = vshll.u32 %v14485_v6, %v6190_v49 }
 0xa8c   : > { %v13549_v36 = vmul.u32.u64.low %v13517_v30, %v6327_v62  ;;  %v13550_v37 = vmul.u32.u64.high %v13517_v30, %v6327_v62, %v13549_v36  ;;  %v13553_v44 = vmul.u32.u64.low %v13517_v30, %v6323_v61  ;;  %v13554_v40 = vmul.u32.u64.high %v13517_v30, %v6323_v61, %v13553_v44 }
 0xa8d   : > { %v6198_v1 = vor.u32 %v6197_v0, %v6196_v4  ;;  %v6200_v32 = vshrl.u32 %v14441_v59, %v6191_v28  ;;  %v6192_v23 = vshrl.u32 %v14444_v29, %v6191_v28  ;;  %v6202_v15 = vshll.u32 %v14441_v59, %v6190_v49 }
 0xa8e   : > { %v6203_v43 = vshrl.u32 %v14575_v19, %v6191_v28  ;;  %v6206_v26 = vshrl.u32 %v14576_v46, %v6191_v28  ;;  %v6335_v17 = vmul.u32 %v13517_v30, %v6319_v12  ;;  %v6205_v51 = vshll.u32 %v14575_v19, %v6190_v49 }
 0xa8f   : > { %v8001_v22 = vpop.f32.mrb[28].mxu0  ;;  %v6201_v35 = vor.u32 %v6200_v32, %v6199_v8  ;;  %vm6208_vm14 = vcmp.lt.s32.totalorder %v13522_v24, 1  ;;  %vm6337_vm6 = vc.u32 %v13550_v37, %v13553_v44  ;;  %v6338_v34 = vadd.s32 1, %v13554_v40 }
 0xa90   : > { %v13563_v25 = vpop.f32.mrb[29].mxu0  ;;  %v6204_v2 = vor.u32 %v6203_v43, %v6202_v15  ;;  %vm6209_vm7 = vcmp.lt.s32.totalorder %v13522_v24, 2  ;;  %v6207_v9 = vor.u32 %v6206_v26, %v6205_v51  ;;  %vm6210_vm1 = vcmp.lt.s32.totalorder %v13522_v24, 3 }
 0xa91   : > { %vm6211_vm10 = vcmp.lt.s32.totalorder %v13522_v24, 4  ;;  %v6216_v13 = vsel %vm6208_vm14, %v6195_v48, %v6198_v1  ;;  %v6339_v30 = vsel %vm6337_vm6, %v6338_v34, %v13554_v40  ;;  %v6220_v5 = vsel %vm6208_vm14, %v6198_v1, %v6201_v35 }
 0xa92   : > { %v6213_v27 = vsel %vm6211_vm10, %v6201_v35, 2102212464  ;;  %v6217_v49 = vsel %vm6211_vm10, %v6204_v2, 920167782  ;;  %v6340_v56 = vadd.s32 %v6339_v30, %v6335_v17  ;;  %v6212_v54 = vsel %vm6208_vm14, %v6192_v23, %v6195_v48 }
 0xa93   : > { %v6218_v16 = vsel %vm6210_vm1, %v6201_v35, %v6217_v49  ;;  %v6221_v58 = vsel %vm6211_vm10, %v6207_v9, 1326507024  ;;  %v6214_v57 = vsel %vm6210_vm1, %v6198_v1, %v6213_v27  ;;  %v13579_v47 = vadd.f32 %v13531_v10, %v13501_v42 }
 0xa94   : > { %v6219_v28 = vsel %vm6209_vm7, %v6216_v13, %v6218_v16  ;;  %v6222_v3 = vsel %vm6210_vm1, %v6204_v2, %v6221_v58  ;;  %v6341_v31 = vadd.s32 536870912, %v6340_v56  ;;  %v6215_v10 = vsel %vm6209_vm7, %v6212_v54, %v6214_v57 }
 0xa95   : > { %v6223_v11 = vsel %vm6209_vm7, %v6220_v5, %v6222_v3  ;;  %v13584_v52 = vmul.u32.u64.low %v13519_v50, %v6219_v28  ;;  %v13585_v21 = vmul.u32.u64.high %v13519_v50, %v6219_v28, %v13584_v52  ;;  %v6488_v20 = vand.u32 2147483647, %v13579_v47 }
 0xa96   : > { %v13588_v53 = vmul.u32.u64.low %v13519_v50, %v6223_v11  ;;  %v13589_v60 = vmul.u32.u64.high %v13519_v50, %v6223_v11, %v13588_v53  ;;  %v13592_v39 = vshrl.u32 %v6341_v31, 30  ;;  %v6491_v33 = vand.u32 2139095040, %v13579_v47 }
 0xa97   : > { %v13599_v41 = vadd.f32 %v13501_v42, %v13536_v14  ;;  %v6234_v4 = vadd.s32 1, %v13585_v21  ;;  %v6495_v61 = vand.u32 8388607, %v6488_v20  ;;  %v6231_v62 = vmul.u32 %v13519_v50, %v6215_v10 }
 0xa98   : > { %v6343_v63 = vshll.u32 %v13592_v39, 30  ;;  %v6492_v12 = vshrl.u32 %v6491_v33, 23  ;;  %vm6233_vm3 = vc.u32 %v13589_v60, %v13584_v52  ;;  %v13609_v0 = vadd.f32 %v8001_v22, %v13501_v42 }
 0xa99   : > { %v14422_v24 = vand.u32 2147483647, %v13599_v41  ;;  %v6235_v14 = vsel %vm6233_vm3, %v6234_v4, %v13585_v21  ;;  %v6387_v48 = vand.u32 2139095040, %v13599_v41  ;;  %v6496_v23 = vor.u32 8388608, %v6495_v61 }
 0xa9a   : > { %v13611_v36 = vsub.s32 %v6340_v56, %v6343_v63  ;;  %v7522_v40 = vadd.s32 4294967169, %v6492_v12  ;;  %v6236_v8 = vadd.s32 %v6235_v14, %v6231_v62  ;;  %v14420_v17 = vand.u32 2147483647, %v13609_v0 }
 0xa9b   : > { %v6388_v43 = vshrl.u32 %v6387_v48, 23  ;;  %v13622_v22 = vand.u32 8388607, %v14422_v24  ;;  %v6699_v35 = vand.u32 2139095040, %v13609_v0  ;;  %v6336_v2 = vadd.s32 %v13553_v44, %v13550_v37  ;;  %v7024_v24 = vld [vmem:[#allocation2 + $0x1f8] sm:$0xff] }
 0xa9c   : > { %v13615_v1 = vpop.f32.mrb[30].mxu0  ;;  %v6346_v50 = vsub.s32 0, %v13611_v36  ;;  %v6498_v15 = vadd.s32 1, %v7522_v40  ;;  %v6237_v26 = vadd.s32 536870912, %v6236_v8  ;;  %v13633_v30 = vadd.f32 %v13501_v42, %v13563_v25 }
 0xa9d   : > { %v13617_v32 = vpop.f32.mrb[31].mxu0  ;;  %v7518_v34 = vadd.s32 4294967169, %v6388_v43  ;;  %v13636_v49 = vadd.s32 %v13584_v52, %v13589_v60  ;;  %v13638_v56 = vshll.u32 %v6496_v23, 8  ;;  %v6392_v16 = vor.u32 8388608, %v13622_v22 }
 0xa9e   : > { %v7515_v51 = vmin.u32 %v6346_v50, %v13611_v36  ;;  %vm6499_vm12 = vcmp.gt.s32.totalorder %v6498_v15, 0  ;;  %v13629_v9 = vshrl.u32 %v6237_v26, 30  ;;  %v6700_v58 = vshrl.u32 %v6699_v35, 23 }
 0xa9f   : > { %v6500_v13 = vsel %vm6499_vm12, %v6498_v15, 0  ;;  %v13644_v37 = vand.u32 8388607, %v14420_v17  ;;  %v13648_v28 = vadd.s32 1, %v7518_v34  ;;  %vm13709_vm0 = vcmp.le.f32.partialorder %v6280_v55, 0.7853982 }
 0xaa0   : > { %v6348_v27 = vclz %v7515_v51  ;;  %v6502_v5 = vand.u32 31, %v6500_v13  ;;  %v6239_v54 = vshll.u32 %v13629_v9, 30  ;;  %v13646_v57 = vshrl.u32 %v6500_v13, 5 }
 0xaa1   : > { %v7530_v34 = vadd.s32 4294967169, %v6700_v58  ;;  %vm6395_vm11 = vcmp.gt.s32.totalorder %v13648_v28, 0 }
 0xaa2   : > { %v7516_v44 = vadd.s32 4294967294, %v6348_v27  ;;  %v6503_v25 = vsub.s32 32, %v6502_v5  ;;  %v13650_v3 = vsub.s32 %v6236_v8, %v6239_v54  ;;  %v6505_v31 = vshll.u32 %v14444_v29, %v6502_v5 }
 0xaa3   : > { %v6508_v11 = vshll.u32 %v14484_v7, %v6502_v5  ;;  %v6511_v52 = vshll.u32 %v14485_v6, %v6502_v5  ;;  %v6514_v60 = vshll.u32 %v14441_v59, %v6502_v5  ;;  %v6517_v14 = vshll.u32 %v14575_v19, %v6502_v5 }
 0xaa4   : > { %vm7517_vm15 = vcmp.lt.s32.totalorder %v7516_v44, 0  ;;  %v6506_v21 = vshrl.u32 %v14484_v7, %v6503_v25  ;;  %v6509_v53 = vshrl.u32 %v14485_v6, %v6503_v25  ;;  %v6242_v33 = vsub.s32 0, %v13650_v3 }
 0xaa5   : > { %v6351_v10 = vsel %vm7517_vm15, 0, %v7516_v44  ;;  %v6512_v63 = vshrl.u32 %v14441_v59, %v6503_v25  ;;  %v6515_v4 = vshrl.u32 %v14575_v19, %v6503_v25  ;;  %v6518_v26 = vshrl.u32 %v14576_v46, %v6503_v25 }
 0xaa6   : > { %v6352_v12 = vsub.s32 32, %v6351_v10  ;;  %v6353_v61 = vshll.u32 %v13611_v36, %v6351_v10  ;;  %v6356_v62 = vsub.s32 4294967266, %v6351_v10  ;;  %v7511_v40 = vmin.u32 %v6242_v33, %v13650_v3 }
 0xaa7   : > { %v6507_v48 = vor.u32 %v6506_v21, %v6505_v31  ;;  %v6510_v8 = vor.u32 %v6509_v53, %v6508_v11  ;;  %v6516_v50 = vor.u32 %v6515_v4, %v6514_v60  ;;  %v6513_v43 = vor.u32 %v6512_v63, %v6511_v52 }
 0xaa8   : > { %v6354_v23 = vshrl.u32 %v6336_v2, %v6352_v12  ;;  %v6357_v15 = vadd.s32 127, %v6356_v62  ;;  %v6244_v35 = vclz %v7511_v40  ;;  %v6504_v51 = vshrl.u32 %v14444_v29, %v6503_v25 }
 0xaa9   : > { %vm6520_vm2 = vcmp.lt.s32.totalorder %v13646_v57, 1  ;;  %v6519_v27 = vor.u32 %v6518_v26, %v6517_v14  ;;  %vm6523_vm13 = vcmp.lt.s32.totalorder %v13646_v57, 4  ;;  %vm6522_vm4 = vcmp.lt.s32.totalorder %v13646_v57, 3 }
 0xaaa   : > { %v6355_v36 = vor.u32 %v6354_v23, %v6353_v61  ;;  %v6358_v13 = vshll.u32 %v6357_v15, 23  ;;  %v7512_v5 = vadd.s32 4294967294, %v6244_v35  ;;  %v6528_v2 = vsel %vm6520_vm2, %v6507_v48, %v6510_v8 }
 0xaab   : > { %v6529_v54 = vsel %vm6523_vm13, %v6516_v50, 920167782  ;;  %vm6521_vm5 = vcmp.lt.s32.totalorder %v13646_v57, 2  ;;  %v6525_v58 = vsel %vm6523_vm13, %v6513_v43, 2102212464  ;;  %v6524_v31 = vsel %vm6520_vm2, %v6504_v51, %v6507_v48 }
 0xaac   : > { %v6359_v44 = vor.u32 4788187, %v6358_v13  ;;  %v6530_v25 = vsel %vm6522_vm4, %v6513_v43, %v6529_v54  ;;  %vm7513_vm8 = vcmp.lt.s32.totalorder %v7512_v5, 0  ;;  %v6532_v52 = vsel %vm6520_vm2, %v6510_v8, %v6513_v43 }
 0xaad   : > { %v6531_v11 = vsel %vm6521_vm5, %v6528_v2, %v6530_v25  ;;  %v6362_v53 = vcvt.s32.f32 %v6355_v36  ;;  %v6247_v60 = vsel %vm7513_vm8, 0, %v7512_v5  ;;  %v6533_v10 = vsel %vm6523_vm13, %v6519_v27, 1326507024 }
 0xaae   : > { %v6360_v21 = vand.u32 2147483647, %v6359_v44  ;;  %v6248_v33 = vsub.s32 32, %v6247_v60  ;;  %v6252_v63 = vsub.s32 4294967266, %v6247_v60  ;;  %v6526_v4 = vsel %vm6522_vm4, %v6510_v8, %v6525_v58 }
 0xaaf   : > { %v6534_v12 = vsel %vm6522_vm4, %v6516_v50, %v6533_v10  ;;  %v13694_v14 = vmul.u32.u64.low %v13638_v56, %v6531_v11  ;;  %v13695_v40 = vmul.u32.u64.high %v13638_v56, %v6531_v11, %v13694_v14  ;;  %v6704_v43 = vor.u32 8388608, %v13644_v37 }
 0xab0   : > { %v6363_v61 = vmul.f32 %v6362_v53, %v6360_v21  ;;  %v6535_v62 = vsel %vm6521_vm5, %v6532_v52, %v6534_v12  ;;  %v6253_v48 = vadd.s32 127, %v6252_v63  ;;  %v6250_v26 = vshrl.u32 %v13636_v49, %v6248_v33 }
 0xab1   : > { %v13699_v23 = vmul.u32.u64.low %v13638_v56, %v6535_v62  ;;  %v13700_v15 = vmul.u32.u64.high %v13638_v56, %v6535_v62, %v13699_v23  ;;  %v6527_v50 = vsel %vm6521_vm5, %v6524_v31, %v6526_v4  ;;  %v6396_v36 = vsel %vm6395_vm11, %v13648_v28, 0 }
 0xab2   : > { %v6364_v8 = vxor.u32 2147483648, %v6363_v61  ;;  %v6254_v51 = vshll.u32 %v6253_v48, 23  ;;  %v14421_v13 = vand.u32 2147483647, %v13633_v30  ;;  %v6249_v49 = vshll.u32 %v13650_v3, %v6247_v60 }
 0xab3   : > { %v6546_v57 = vadd.s32 1, %v13695_v40  ;;  %v6398_v27 = vand.u32 31, %v6396_v36  ;;  %v6543_v5 = vmul.u32 %v13638_v56, %v6527_v50  ;;  %v13727_v28 = vshll.u32 %v6392_v16, 8 }
 0xab4   : > { %v6365_v37 = vsel %vm6282_vm9, %v6364_v8, %v6363_v61  ;;  %v6706_v2 = vadd.s32 1, %v7530_v34  ;;  %v6251_v54 = vor.u32 %v6250_v26, %v6249_v49  ;;  %vm6545_vm14 = vc.u32 %v13700_v15, %v13694_v14 }
 0xab5   : > { %v13722_v55 = vsel %vm13709_vm0, %v13504_v45, %v6365_v37  ;;  %v6399_v3 = vsub.s32 32, %v6398_v27  ;;  %v13731_v44 = vshll.u32 %v6704_v43, 8  ;;  %v6255_v58 = vor.u32 4788187, %v6254_v51 }
 0xab6   : > { %v6547_v25 = vsel %vm6545_vm14, %v6546_v57, %v13695_v40  ;;  %v6401_v31 = vshll.u32 %v14444_v29, %v6398_v27  ;;  %v6595_v11 = vand.u32 2139095040, %v13633_v30  ;;  %v6404_v16 = vshll.u32 %v14484_v7, %v6398_v27 }
 0xab7   : > { %v6548_v56 = vadd.s32 %v6547_v25, %v6543_v5  ;;  %v6402_v22 = vshrl.u32 %v14484_v7, %v6399_v3  ;;  %v6405_v34 = vshrl.u32 %v14485_v6, %v6399_v3  ;;  %v6397_v52 = vshrl.u32 %v6396_v36, 5 }
 0xab8   : > { %v6407_v21 = vshll.u32 %v14485_v6, %v6398_v27  ;;  %v6408_v53 = vshrl.u32 %v14441_v59, %v6399_v3  ;;  %v6410_v60 = vshll.u32 %v14441_v59, %v6398_v27  ;;  %v6411_v4 = vshrl.u32 %v14575_v19, %v6399_v3 }
 0xab9   : > { %v6549_v10 = vadd.s32 536870912, %v6548_v56  ;;  %v6403_v33 = vor.u32 %v6402_v22, %v6401_v31  ;;  %v6406_v63 = vor.u32 %v6405_v34, %v6404_v16  ;;  %v6258_v12 = vcvt.s32.f32 %v6251_v54 }
 0xaba   : > { %v6409_v61 = vor.u32 %v6408_v53, %v6407_v21  ;;  %v6413_v62 = vshll.u32 %v14575_v19, %v6398_v27  ;;  %v6414_v40 = vshrl.u32 %v14576_v46, %v6399_v3  ;;  %v6256_v48 = vand.u32 2147483647, %v6255_v58 }
 0xabb   : > { %v13745_v23 = vshrl.u32 %v6549_v10, 30  ;;  %v6400_v43 = vshrl.u32 %v14444_v29, %v6399_v3  ;;  %v6412_v8 = vor.u32 %v6411_v4, %v6410_v60  ;;  %vm6416_vm6 = vcmp.lt.s32.totalorder %v6397_v52, 1 }
 0xabc   : > { %v6415_v26 = vor.u32 %v6414_v40, %v6413_v62  ;;  %vm6418_vm7 = vcmp.lt.s32.totalorder %v6397_v52, 3  ;;  %vm6419_vm1 = vcmp.lt.s32.totalorder %v6397_v52, 4  ;;  %v6424_v37 = vsel %vm6416_vm6, %v6403_v33, %v6406_v63 }
 0xabd   : > { %v6551_v50 = vshll.u32 %v13745_v23, 30  ;;  %v6420_v51 = vsel %vm6416_vm6, %v6400_v43, %v6403_v33  ;;  %v6421_v36 = vsel %vm6419_vm1, %v6409_v61, 2102212464  ;;  %v6425_v57 = vsel %vm6419_vm1, %v6412_v8, 920167782 }
 0xabe   : > { %v6422_v49 = vsel %vm6418_vm7, %v6406_v63, %v6421_v36  ;;  %v6428_v27 = vsel %vm6416_vm6, %v6406_v63, %v6409_v61  ;;  %v6429_v5 = vsel %vm6419_vm1, %v6415_v26, 1326507024  ;;  %vm6417_vm10 = vcmp.lt.s32.totalorder %v6397_v52, 2 }
 0xabf   : > { %v13749_v54 = vsub.s32 %v6548_v56, %v6551_v50  ;;  %v6426_v58 = vsel %vm6418_vm7, %v6409_v61, %v6425_v57  ;;  %v6430_v25 = vsel %vm6418_vm7, %v6412_v8, %v6429_v5  ;;  %v6423_v3 = vsel %vm6417_vm10, %v6420_v51, %v6422_v49 }
 0xac0   : > { %v6427_v31 = vsel %vm6417_vm10, %v6424_v37, %v6426_v58  ;;  %v6431_v22 = vsel %vm6417_vm10, %v6428_v27, %v6430_v25  ;;  %vm6707_vm3 = vcmp.gt.s32.totalorder %v6706_v2, 0  ;;  %v6544_v60 = vadd.s32 %v13694_v14, %v13700_v15 }
 0xac1   : > { %v6554_v16 = vsub.s32 0, %v13749_v54  ;;  %v13753_v34 = vmul.u32.u64.low %v13727_v28, %v6431_v22  ;;  %v13754_v21 = vmul.u32.u64.high %v13727_v28, %v6431_v22, %v13753_v34  ;;  %v6708_v53 = vsel %vm6707_vm3, %v6706_v2, 0 }
 0xac2   : > { %v13759_v56 = vmul.u32.u64.low %v13727_v28, %v6427_v31  ;;  %v13760_v10 = vmul.u32.u64.high %v13727_v28, %v6427_v31, %v13759_v56  ;;  %v6710_v52 = vand.u32 31, %v6708_v53  ;;  %v13763_v33 = vmul.f32 %v6258_v12, %v6256_v48 }
 0xac3   : > { %v7523_v63 = vmin.u32 %v6554_v16, %v13749_v54  ;;  %v6439_v4 = vmul.u32 %v13727_v28, %v6423_v3  ;;  %v13767_v61 = vshrl.u32 %v6708_v53, 5  ;;  %v6596_v40 = vshrl.u32 %v6595_v11, 23 }
 0xac4   : > { %v6711_v62 = vsub.s32 32, %v6710_v52  ;;  %v13771_v2 = vand.u32 8388607, %v14421_v13  ;;  %v13775_v14 = vadd.f32 %v13615_v1, %v13501_v42  ;;  %vm6441_vm12 = vc.u32 %v13754_v21, %v13759_v56 }
 0xac5   : > { %v6556_v15 = vclz %v7523_v63  ;;  %v6713_v12 = vshll.u32 %v14444_v29, %v6710_v52  ;;  %v6716_v28 = vshll.u32 %v14484_v7, %v6710_v52  ;;  %v6442_v48 = vadd.s32 1, %v13760_v10 }
 0xac6   : > { %v6714_v11 = vshrl.u32 %v14484_v7, %v6711_v62  ;;  %v6717_v43 = vshrl.u32 %v14485_v6, %v6711_v62  ;;  %v6719_v8 = vshll.u32 %v14485_v6, %v6710_v52  ;;  %v6720_v1 = vshrl.u32 %v14441_v59, %v6711_v62 }
 0xac7   : > { %v7524_v26 = vadd.s32 4294967294, %v6556_v15  ;;  %v6722_v50 = vshll.u32 %v14441_v59, %v6710_v52  ;;  %v6723_v51 = vshrl.u32 %v14575_v19, %v6711_v62  ;;  %v6443_v36 = vsel %vm6441_vm12, %v6442_v48, %v13760_v10 }
 0xac8   : > { %v6715_v37 = vor.u32 %v6714_v11, %v6713_v12  ;;  %v6725_v49 = vshll.u32 %v14575_v19, %v6710_v52  ;;  %v6726_v57 = vshrl.u32 %v14576_v46, %v6711_v62  ;;  %v6444_v27 = vadd.s32 %v6443_v36, %v6439_v4 }
 0xac9   : > { %vm7525_vm15 = vcmp.lt.s32.totalorder %v7524_v26, 0  ;;  %v6712_v5 = vshrl.u32 %v14444_v29, %v6711_v62  ;;  %v6721_v58 = vor.u32 %v6720_v1, %v6719_v8  ;;  %v6718_v3 = vor.u32 %v6717_v43, %v6716_v28 }
 0xaca   : > { %v6559_v25 = vsel %vm7525_vm15, 0, %v7524_v26  ;;  %v6724_v31 = vor.u32 %v6723_v51, %v6722_v50  ;;  %v6727_v22 = vor.u32 %v6726_v57, %v6725_v49  ;;  %v6445_v53 = vadd.s32 536870912, %v6444_v27 }
 0xacb   : > { %v6560_v16 = vsub.s32 32, %v6559_v25  ;;  %v6564_v34 = vsub.s32 4294967266, %v6559_v25  ;;  %vm6728_vm2 = vcmp.lt.s32.totalorder %v13767_v61, 1  ;;  %v6561_v10 = vshll.u32 %v13749_v54, %v6559_v25 }
 0xacc   : > { %vm6730_vm13 = vcmp.lt.s32.totalorder %v13767_v61, 3  ;;  %vm6731_vm4 = vcmp.lt.s32.totalorder %v13767_v61, 4  ;;  %v6732_v52 = vsel %vm6728_vm2, %v6712_v5, %v6715_v37  ;;  %v13798_v62 = vshrl.u32 %v6445_v53, 30 }
 0xacd   : > { %v6562_v63 = vshrl.u32 %v6544_v60, %v6560_v16  ;;  %v6565_v4 = vadd.s32 127, %v6564_v34  ;;  %v6733_v15 = vsel %vm6731_vm4, %v6721_v58, 2102212464  ;;  %v6736_v28 = vsel %vm6728_vm2, %v6715_v37, %v6718_v3 }
 0xace   : > { %v6734_v12 = vsel %vm6730_vm13, %v6718_v3, %v6733_v15  ;;  %v6737_v48 = vsel %vm6731_vm4, %v6724_v31, 920167782  ;;  %v6741_v54 = vsel %vm6731_vm4, %v6727_v22, 1326507024  ;;  %v6447_v8 = vshll.u32 %v13798_v62, 30 }
 0xacf   : > { %v6563_v11 = vor.u32 %v6562_v63, %v6561_v10  ;;  %v6566_v43 = vshll.u32 %v6565_v4, 23  ;;  %v6740_v26 = vsel %vm6728_vm2, %v6718_v3, %v6721_v58  ;;  %vm6178_vm5 = vcmp.lt.s32.totalorder %v13507_v18, 0 }
 0xad0   : > { %vm6729_vm8 = vcmp.lt.s32.totalorder %v13767_v61, 2  ;;  %v6738_v60 = vsel %vm6730_vm13, %v6721_v58, %v6737_v48  ;;  %v6742_v1 = vsel %vm6730_vm13, %v6724_v31, %v6741_v54  ;;  %v7526_v50 = vadd.s32 4294967169, %v6596_v40  ;;  %v7010_v31 = vld [vmem:[#allocation2 + $0x188] sm:$0xff] }
 0xad1   : > { %v6567_v51 = vor.u32 4788187, %v6566_v43  ;;  %v13813_v36 = vsub.s32 %v6444_v27, %v6447_v8  ;;  %v6735_v37 = vsel %vm6729_vm8, %v6732_v52, %v6734_v12  ;;  %v6739_v49 = vsel %vm6729_vm8, %v6736_v28, %v6738_v60  ;;  %v7009_v27 = vld [vmem:[#allocation2 + $0x180] sm:$0xff] }
 0xad2   : > { %vm6490_vm11 = vcmp.lt.s32.totalorder %v13579_v47, 0  ;;  %v6570_v57 = vcvt.s32.f32 %v6563_v11  ;;  %v6743_v5 = vsel %vm6729_vm8, %v6740_v26, %v6742_v1  ;;  %8776 = vcosq.f32 %v13722_v55 }
 0xad3   : > { %v13817_v25 = vmul.u32.u64.low %v13731_v44, %v6739_v49  ;;  %v13818_v3 = vmul.u32.u64.high %v13731_v44, %v6739_v49, %v13817_v25  ;;  %v6568_v22 = vand.u32 2147483647, %v6567_v51  ;;  %v6450_v58 = vsub.s32 0, %v13813_v36 }
 0xad4   : > { %v13823_v61 = vmul.u32.u64.low %v13731_v44, %v6743_v5  ;;  %v13824_v40 = vmul.u32.u64.high %v13731_v44, %v6743_v5, %v13823_v61  ;;  %v6260_v16 = vxor.u32 2147483648, %v13763_v33  ;;  %v6602_v34 = vadd.s32 1, %v7526_v50 }
 0xad5   : > { %v14419_v53 = vand.u32 2147483647, %v13775_v14  ;;  %v6571_v10 = vmul.f32 %v6570_v57, %v6568_v22  ;;  %v7519_v52 = vmin.u32 %v6450_v58, %v13813_v36  ;;  %v6751_v63 = vmul.u32 %v13731_v44, %v6735_v37 }
 0xad6   : > { %v6907_v4 = vand.u32 2139095040, %v13775_v14  ;;  %v6754_v15 = vadd.s32 1, %v13818_v3  ;;  %v6600_v12 = vor.u32 8388608, %v13771_v2  ;;  %vm6603_vm14 = vcmp.gt.s32.totalorder %v6602_v34, 0 }
 0xad7   : > { %v8241_v28 = vpack.c.bf16 %v7010_v31, %v7009_v27  ;;  %v6572_v48 = vxor.u32 2147483648, %v6571_v10  ;;  %v6452_v54 = vclz %v7519_v52  ;;  %vm6753_vm6 = vc.u32 %v13824_v40, %v13817_v25 }
 0xad8   : > { %v13838_v11 = vand.u32 8388607, %v14419_v53  ;;  %8778 = vsinq.f32 %v13722_v55  ;;  %v6755_v44 = vsel %vm6753_vm6, %v6754_v15, %v13818_v3  ;;  %v6604_v43 = vsel %vm6603_vm14, %v6602_v34, 0  ;;  %v7021_v53 = vld [vmem:[#allocation2 + $0x1e0] sm:$0xff] }
 0xad9   : > { %v6908_v8 = vshrl.u32 %v6907_v4, 23  ;;  %8242 = vmatprep.subr.bf16.mxu0 %v8241_v28  ;;  %8273 = vmatprep.subr.bf16.mxu1 %v8241_v28  ;;  %v13845_v2 = vsel %vm6178_vm5, %v6260_v16, %v13763_v33  ;;  %v7520_v26 = vadd.s32 4294967294, %v6452_v54  ;;  %v6756_v60 = vadd.s32 %v6755_v44, %v6751_v63 }
 0xada   : > { %v13847_v1 = vshrl.u32 %v6604_v43, 5  ;;  %8244 = vmatpush3.bf16.msra.mxu0 %v8241_v28  ;;  %8281 = vmatpush3.bf16.msra.mxu1 %v8241_v28  ;;  %v6440_v55 = vadd.s32 %v13759_v56, %v13754_v21  ;;  %v6606_v50 = vand.u32 31, %v6604_v43  ;;  %v13851_v51 = vshll.u32 %v6600_v12, 8 }
 0xadb   : > { %v13855_v37 = vadd.f32 %v13501_v42, %v13617_v32  ;;  %v6573_v33 = vsel %vm6490_vm11, %v6572_v48, %v6571_v10  ;;  %vm7521_vm7 = vcmp.lt.s32.totalorder %v7520_v26, 0  ;;  %v6757_v49 = vadd.s32 536870912, %v6756_v60 }
 0xadc   : > { %v6912_v57 = vor.u32 8388608, %v13838_v11  ;;  %v6455_v5 = vsel %vm7521_vm7, 0, %v7520_v26  ;;  %v6607_v3 = vsub.s32 32, %v6606_v50  ;;  %vm6624_vm1 = vcmp.lt.s32.totalorder %v13847_v1, 1  ;;  %v13864_v42 = vpop.eup %8776 }
 0xadd   : > { %v7538_v22 = vadd.s32 4294967169, %v6908_v8  ;;  %v6456_v21 = vsub.s32 32, %v6455_v5  ;;  %v6460_v56 = vsub.s32 4294967266, %v6455_v5  ;;  %v13861_v58 = vshrl.u32 %v6757_v49, 30 }
 0xade   : > { %v6609_v61 = vshll.u32 %v14444_v29, %v6606_v50  ;;  %v6457_v32 = vshll.u32 %v13813_v36, %v6455_v5  ;;  %v6610_v27 = vshrl.u32 %v14484_v7, %v6607_v3  ;;  %v6612_v31 = vshll.u32 %v14484_v7, %v6606_v50 }
 0xadf   : > { %v6613_v16 = vshrl.u32 %v14485_v6, %v6607_v3  ;;  %vm13872_vm10 = vcmp.le.f32.partialorder %v6488_v20, 0.7853982  ;;  %v6458_v10 = vshrl.u32 %v6440_v55, %v6456_v21  ;;  %v6461_v52 = vadd.s32 127, %v6460_v56 }
 0xae0   : > { %v6759_v63 = vshll.u32 %v13861_v58, 30  ;;  %v6615_v4 = vshll.u32 %v14485_v6, %v6606_v50  ;;  %v6611_v15 = vor.u32 %v6610_v27, %v6609_v61  ;;  %v6616_v12 = vshrl.u32 %v14441_v59, %v6607_v3 }
 0xae1   : > { %v6614_v36 = vor.u32 %v6613_v16, %v6612_v31  ;;  %v6618_v28 = vshll.u32 %v14441_v59, %v6606_v50  ;;  %v6459_v48 = vor.u32 %v6458_v10, %v6457_v32  ;;  %v6462_v54 = vshll.u32 %v6461_v52, 23 }
 0xae2   : > { %v13880_v44 = vsub.s32 %v6756_v60, %v6759_v63  ;;  %v6619_v20 = vshrl.u32 %v14575_v19, %v6607_v3  ;;  %v13883_v43 = vpop.eup %8778  ;;  %v6608_v8 = vshrl.u32 %v14444_v29, %v6607_v3  ;;  %v6617_v26 = vor.u32 %v6616_v12, %v6615_v4 }
 0xae3   : > { %v6621_v55 = vshll.u32 %v14575_v19, %v6606_v50  ;;  %v6622_v49 = vshrl.u32 %v14576_v46, %v6607_v3  ;;  %v6463_v5 = vor.u32 4788187, %v6462_v54  ;;  %v6466_v21 = vcvt.s32.f32 %v6459_v48 }
 0xae4   : > { %v6762_v56 = vsub.s32 0, %v13880_v44  ;;  %v6620_v61 = vor.u32 %v6619_v20, %v6618_v28  ;;  %vm6626_vm3 = vcmp.lt.s32.totalorder %v13847_v1, 3  ;;  %vm6627_vm12 = vcmp.lt.s32.totalorder %v13847_v1, 4 }
 0xae5   : > { %v6623_v32 = vor.u32 %v6622_v49, %v6621_v55  ;;  %v6628_v60 = vsel %vm6624_vm1, %v6608_v8, %v6611_v15  ;;  %vm6386_vm15 = vcmp.lt.s32.totalorder %v13599_v41, 0  ;;  %v6464_v27 = vand.u32 2147483647, %v6463_v5 }
 0xae6   : > { %v7531_v50 = vmin.u32 %v6762_v56, %v13880_v44  ;;  %v6629_v31 = vsel %vm6627_vm12, %v6617_v26, 2102212464  ;;  %v6632_v3 = vsel %vm6624_vm1, %v6611_v15, %v6614_v36  ;;  %v6633_v10 = vsel %vm6627_vm12, %v6620_v61, 920167782 }
 0xae7   : > { %v6630_v16 = vsel %vm6626_vm3, %v6614_v36, %v6629_v31  ;;  %v6636_v52 = vsel %vm6624_vm1, %v6614_v36, %v6617_v26  ;;  %v6637_v63 = vsel %vm6627_vm12, %v6623_v32, 1326507024  ;;  %v6467_v4 = vmul.f32 %v6466_v21, %v6464_v27 }
 0xae8   : > { %v6764_v12 = vclz %v7531_v50  ;;  %vm6625_vm2 = vcmp.lt.s32.totalorder %v13847_v1, 2  ;;  %v6634_v28 = vsel %vm6626_vm3, %v6617_v26, %v6633_v10  ;;  %v6576_v48 = vsel %vm13872_vm10, %v13579_v47, %v6573_v33 }
 0xae9   : > { %v6635_v15 = vsel %vm6625_vm2, %v6632_v3, %v6634_v28  ;;  %v6638_v54 = vsel %vm6626_vm3, %v6620_v61, %v6637_v63  ;;  %v6914_v20 = vadd.s32 1, %v7538_v22  ;;  %v6468_v8 = vxor.u32 2147483648, %v6467_v4 }
 0xaea   : > { %v7532_v55 = vadd.s32 4294967294, %v6764_v12  ;;  %v6631_v36 = vsel %vm6625_vm2, %v6628_v60, %v6630_v16  ;;  %v6639_v49 = vsel %vm6625_vm2, %v6636_v52, %v6638_v54  ;;  %v6752_v33 = vadd.s32 %v13817_v25, %v13824_v40 }
 0xaeb   : > { %v13910_v5 = vmul.u32.u64.low %v13851_v51, %v6639_v49  ;;  %v13911_v21 = vmul.u32.u64.high %v13851_v51, %v6639_v49, %v13910_v5  ;;  %v13914_v56 = vmul.u32.u64.low %v13851_v51, %v6635_v15  ;;  %v13915_v26 = vmul.u32.u64.high %v13851_v51, %v6635_v15, %v13914_v56 }
 0xaec   : > { %vm7533_vm13 = vcmp.lt.s32.totalorder %v7532_v55, 0  ;;  %vm6915_vm4 = vcmp.gt.s32.totalorder %v6914_v20, 0  ;;  %v14418_v1 = vand.u32 2147483647, %v13855_v37  ;;  %8780 = vcosq.f32 %v6576_v48 }
 0xaed   : > { %v6767_v22 = vsel %vm7533_vm13, 0, %v7532_v55  ;;  %v6916_v61 = vsel %vm6915_vm4, %v6914_v20, 0  ;;  %v13923_v32 = vshll.u32 %v6912_v57, 8  ;;  %8782 = vsinq.f32 %v6576_v48 }
 0xaee   : > { %v6768_v60 = vsub.s32 32, %v6767_v22  ;;  %v6772_v27 = vsub.s32 4294967266, %v6767_v22  ;;  %v6647_v50 = vmul.u32 %v13851_v51, %v6631_v36  ;;  %v13928_v31 = vsel %vm6386_vm15, %v6468_v8, %v6467_v4 }
 0xaef   : > { %vm6649_vm8 = vc.u32 %v13911_v21, %v13914_v56  ;;  %v6650_v25 = vadd.s32 1, %v13915_v26  ;;  %v6918_v40 = vand.u32 31, %v6916_v61  ;;  %v6917_v16 = vshrl.u32 %v6916_v61, 5 }
 0xaf0   : > { %v6773_v3 = vadd.s32 127, %v6772_v27  ;;  %v6803_v11 = vand.u32 2139095040, %v13855_v37  ;;  %v13936_v57 = vand.u32 8388607, %v14418_v1  ;;  %v6769_v51 = vshll.u32 %v13880_v44, %v6767_v22 }
 0xaf1   : > { %v6770_v10 = vshrl.u32 %v6752_v33, %v6768_v60  ;;  %v6651_v52 = vsel %vm6649_vm8, %v6650_v25, %v13915_v26  ;;  %v6919_v63 = vsub.s32 32, %v6918_v40  ;;  %v6921_v28 = vshll.u32 %v14444_v29, %v6918_v40 }
 0xaf2   : > { %v6774_v4 = vshll.u32 %v6773_v3, 23  ;;  %v6652_v12 = vadd.s32 %v6651_v52, %v6647_v50  ;;  %v6924_v48 = vshll.u32 %v14484_v7, %v6918_v40  ;;  %v6927_v20 = vshll.u32 %v14485_v6, %v6918_v40 }
 0xaf3   : > { %v6922_v15 = vshrl.u32 %v14484_v7, %v6919_v63  ;;  %v6925_v54 = vshrl.u32 %v14485_v6, %v6919_v63  ;;  %v6928_v8 = vshrl.u32 %v14441_v59, %v6919_v63  ;;  %v6930_v44 = vshll.u32 %v14441_v59, %v6918_v40 }
 0xaf4   : > { %v6653_v55 = vadd.s32 536870912, %v6652_v12  ;;  %vm6936_vm14 = vcmp.lt.s32.totalorder %v6917_v16, 1  ;;  %vm6937_vm6 = vcmp.lt.s32.totalorder %v6917_v16, 2  ;;  %v6931_v26 = vshrl.u32 %v14575_v19, %v6919_v63 }
 0xaf5   : > { %v6923_v36 = vor.u32 %v6922_v15, %v6921_v28  ;;  %v6926_v49 = vor.u32 %v6925_v54, %v6924_v48  ;;  %v6929_v5 = vor.u32 %v6928_v8, %v6927_v20  ;;  %v6775_v33 = vor.u32 4788187, %v6774_v4 }
 0xaf6   : > { %v13948_v22 = vshrl.u32 %v6653_v55, 30  ;;  %v6933_v61 = vshll.u32 %v14575_v19, %v6918_v40  ;;  %v6934_v60 = vshrl.u32 %v14576_v46, %v6919_v63  ;;  %v13952_v27 = vpop.eup %8780  ;;  %v6771_v50 = vor.u32 %v6770_v10, %v6769_v51 }
 0xaf7   : > { %v6920_v25 = vshrl.u32 %v14444_v29, %v6919_v63  ;;  %v6932_v3 = vor.u32 %v6931_v26, %v6930_v44  ;;  %vm6939_vm7 = vcmp.lt.s32.totalorder %v6917_v16, 4  ;;  %v13955_v52 = vpop.eup %8782  ;;  %vm6938_vm1 = vcmp.lt.s32.totalorder %v6917_v16, 3  ;;  %v7020_v16 = vld [vmem:[#allocation2 + $0x1d8] sm:$0xff] }
 0xaf8   : > { %v6655_v28 = vshll.u32 %v13948_v22, 30  ;;  %v6935_v48 = vor.u32 %v6934_v60, %v6933_v61  ;;  %v6941_v4 = vsel %vm6939_vm7, %v6929_v5, 2102212464  ;;  %v6944_v54 = vsel %vm6936_vm14, %v6923_v36, %v6926_v49  ;;  %v7011_v60 = vld [vmem:[#allocation2 + $0x190] sm:$0xff] }
 0xaf9   : > { %v6940_v15 = vsel %vm6936_vm14, %v6920_v25, %v6923_v36  ;;  %v6942_v40 = vsel %vm6938_vm1, %v6926_v49, %v6941_v4  ;;  %v6945_v51 = vsel %vm6939_vm7, %v6932_v3, 920167782  ;;  %v6776_v10 = vand.u32 2147483647, %v6775_v33  ;;  %v7012_v36 = vld [vmem:[#allocation2 + $0x198] sm:$0xff]  ;;  %v7014_v25 = vld [vmem:[#allocation2 + $0x1a8] sm:$0xff] }
 0xafa   : > { %v13963_v63 = vsub.s32 %v6652_v12, %v6655_v28  ;;  %v6946_v20 = vsel %vm6938_vm1, %v6929_v5, %v6945_v51  ;;  %v6948_v8 = vsel %vm6936_vm14, %v6926_v49, %v6929_v5  ;;  %v13969_v55 = vadd.s32 %v13914_v56, %v13911_v21  ;;  %v7013_v56 = vld [vmem:[#allocation2 + $0x1a0] sm:$0xff]  ;;  %v7015_v28 = vld [vmem:[#allocation2 + $0x1b0] sm:$0xff] }
 0xafb   : > { %v6947_v44 = vsel %vm6937_vm6, %v6944_v54, %v6946_v20  ;;  %v6949_v26 = vsel %vm6939_vm7, %v6935_v48, 1326507024  ;;  %v6804_v61 = vshrl.u32 %v6803_v11, 23  ;;  %vm13975_vm3 = vcmp.le.f32.partialorder %v6176_v38, 0.7853982  ;;  %v7016_v54 = vld [vmem:[#allocation2 + $0x1b8] sm:$0xff] }
 0xafc   : > { %v6778_v33 = vcvt.s32.f32 %v6771_v50  ;;  %v6658_v49 = vsub.s32 0, %v13963_v63  ;;  %v6943_v5 = vsel %vm6937_vm6, %v6940_v15, %v6942_v40  ;;  %v6950_v21 = vsel %vm6938_vm1, %v6932_v3, %v6949_v26  ;;  %v7017_v51 = vld [vmem:[#allocation2 + $0x1c0] sm:$0xff]  ;;  %v7018_v50 = vld [vmem:[#allocation2 + $0x1c8] sm:$0xff]  ;;  %v7019_v26 = vld [vmem:[#allocation2 + $0x1d0] sm:$0xff] }
 0xafd   : > { %v6951_v11 = vsel %vm6937_vm6, %v6948_v8, %v6950_v21  ;;  %v13984_v48 = vmul.u32.u64.low %v13923_v32, %v6947_v44  ;;  %v13985_v4 = vmul.u32.u64.high %v13923_v32, %v6947_v44, %v13984_v48  ;;  %v7534_v38 = vadd.s32 4294967169, %v6804_v61  ;;  %v7022_v61 = vld [vmem:[#allocation2 + $0x1e8] sm:$0xff] }
 0xafe   : > { %v13988_v20 = vmul.f32 %v6778_v33, %v6776_v10  ;;  %v7527_v15 = vmin.u32 %v6658_v49, %v13963_v63  ;;  %v13992_v3 = vmul.u32.u64.low %v13923_v32, %v6951_v11  ;;  %v13993_v40 = vmul.u32.u64.high %v13923_v32, %v6951_v11, %v13992_v3  ;;  %v7023_v49 = vld [vmem:[#allocation2 + $0x1f0] sm:$0xff] }
 0xaff   : > { %v6959_v8 = vmul.u32 %v13923_v32, %v6943_v5  ;;  %v6810_v21 = vadd.s32 1, %v7534_v38  ;;  %v8245_v44 = vpack.c.bf16 %v7012_v36, %v7011_v60  ;;  %v8249_v1 = vpack.c.bf16 %v7014_v25, %v7013_v56 }
 0xb00   : > { %v6660_v17 = vclz %v7527_v15  ;;  %v6808_v13 = vor.u32 8388608, %v13936_v57  ;;  %v8253_v10 = vpack.c.bf16 %v7016_v54, %v7015_v28  ;;  %v13997_v33 = vpack.c.bf16 %v7018_v50, %v7017_v51 }
 0xb01   : > { %v6962_v11 = vadd.s32 1, %v13985_v4  ;;  %vm6811_vm12 = vcmp.gt.s32.totalorder %v6810_v21, 0  ;;  %8246 = vmatprep.subr.bf16.mxu0 %v8245_v44  ;;  %8274 = vmatprep.subr.bf16.mxu1 %v8245_v44  ;;  %v14000_v3 = vpack.c.bf16 %v7020_v16, %v7019_v26  ;;  %v6262_v32 = vsub.s32 4, %v13629_v9 }
 0xb02   : > { %v7528_v60 = vadd.s32 4294967294, %v6660_v17  ;;  %vm6961_vm2 = vc.u32 %v13993_v40, %v13984_v48  ;;  %v6812_v36 = vsel %vm6811_vm12, %v6810_v21, 0  ;;  %8248 = vmatpush3.bf16.msra.mxu0 %v8245_v44  ;;  %8282 = vmatpush3.bf16.msra.mxu1 %v8245_v44  ;;  %v14005_v57 = vpack.c.bf16 %v7022_v61, %v7021_v53 }
 0xb03   : > { %v6963_v5 = vsel %vm6961_vm2, %v6962_v11, %v13985_v4  ;;  %v14008_v56 = vshrl.u32 %v6812_v36, 5  ;;  %v6814_v25 = vand.u32 31, %v6812_v36  ;;  %8250 = vmatprep.subr.bf16.mxu0 %v8249_v1  ;;  %8275 = vmatprep.subr.bf16.mxu1 %v8249_v1  ;;  %v14010_v28 = vpack.c.bf16 %v7024_v24, %v7023_v49 }
 0xb04   : > { %vm7529_vm13 = vcmp.lt.s32.totalorder %v7528_v60, 0  ;;  %v6964_v38 = vadd.s32 %v6963_v5, %v6959_v8  ;;  %v14015_v17 = vsel %vm6178_vm5, %v6262_v32, %v13629_v9  ;;  %v14021_v53 = vsel %vm13975_vm3, %v13507_v18, %v13845_v2 }
 0xb05   : > { %v6663_v4 = vsel %vm7529_vm13, 0, %v7528_v60  ;;  %v6815_v54 = vsub.s32 32, %v6814_v25  ;;  %v6817_v51 = vshll.u32 %v14444_v29, %v6814_v25  ;;  %v6820_v24 = vshll.u32 %v14484_v7, %v6814_v25 }
 0xb06   : > { %v6664_v50 = vsub.s32 32, %v6663_v4  ;;  %v6665_v15 = vshll.u32 %v13963_v63, %v6663_v4  ;;  %v6668_v26 = vsub.s32 4294967266, %v6663_v4  ;;  %v6965_v16 = vadd.s32 536870912, %v6964_v38  ;;  %8252 = vmatpush3.bf16.msra.mxu0 %v8249_v1  ;;  %8283 = vmatpush3.bf16.msra.mxu1 %v8249_v1 }
 0xb07   : > { %v6816_v9 = vshrl.u32 %v14444_v29, %v6815_v54  ;;  %v6818_v8 = vshrl.u32 %v14484_v7, %v6815_v54  ;;  %v6821_v2 = vshrl.u32 %v14485_v6, %v6815_v54  ;;  %v6823_v21 = vshll.u32 %v14485_v6, %v6814_v25  ;;  %8254 = vmatprep.subr.bf16.mxu0 %v8253_v10 }
 0xb08   : > { %v6666_v44 = vshrl.u32 %v13969_v55, %v6664_v50  ;;  %v6669_v61 = vadd.s32 127, %v6668_v26  ;;  %v14031_v49 = vshrl.u32 %v6965_v16, 30  ;;  %v6824_v63 = vshrl.u32 %v14441_v59, %v6815_v54  ;;  %8276 = vmatprep.subr.bf16.mxu1 %v8253_v10 }
 0xb09   : > { %v6819_v11 = vor.u32 %v6818_v8, %v6817_v51  ;;  %v6822_v32 = vor.u32 %v6821_v2, %v6820_v24  ;;  %v6826_v1 = vshll.u32 %v14441_v59, %v6814_v25  ;;  %v6827_v29 = vshrl.u32 %v14575_v19, %v6815_v54 }
 0xb0a   : > { %v6667_v7 = vor.u32 %v6666_v44, %v6665_v15  ;;  %v6670_v60 = vshll.u32 %v6669_v61, 23  ;;  %v6967_v36 = vshll.u32 %v14031_v49, 30  ;;  %v6825_v6 = vor.u32 %v6824_v63, %v6823_v21  ;;  %8256 = vmatpush3.bf16.msra.mxu0 %v8253_v10  ;;  %8284 = vmatpush3.bf16.msra.mxu1 %v8253_v10 }
 0xb0b   : > { %v6828_v55 = vor.u32 %v6827_v29, %v6826_v1  ;;  %v6829_v5 = vshll.u32 %v14575_v19, %v6814_v25  ;;  %v6830_v4 = vshrl.u32 %v14576_v46, %v6815_v54  ;;  %v14039_v50 = vshll.u32 %v6808_v13, 8  ;;  %8258 = vmatprep.subr.bf16.mxu0 %v13997_v33  ;;  %8277 = vmatprep.subr.bf16.mxu1 %v13997_v33 }
 0xb0c   : > { %v6671_v59 = vor.u32 4788187, %v6670_v60  ;;  %v6674_v51 = vcvt.s32.f32 %v6667_v7  ;;  %v14043_v24 = vsub.s32 %v6964_v38, %v6967_v36  ;;  %vm6832_vm5 = vcmp.lt.s32.totalorder %v14008_v56, 1 }
 0xb0d   : > { %v6831_v15 = vor.u32 %v6830_v4, %v6829_v5  ;;  %vm6834_vm4 = vcmp.lt.s32.totalorder %v14008_v56, 3  ;;  %vm6835_vm8 = vcmp.lt.s32.totalorder %v14008_v56, 4  ;;  %v6836_v19 = vsel %vm6832_vm5, %v6816_v9, %v6819_v11 }
 0xb0e   : > { %v6672_v10 = vand.u32 2147483647, %v6671_v59  ;;  %v6970_v46 = vsub.s32 0, %v14043_v24  ;;  %v6837_v13 = vsel %vm6835_vm8, %v6825_v6, 2102212464  ;;  %v6840_v25 = vsel %vm6832_vm5, %v6819_v11, %v6822_v32  ;;  %8260 = vmatpush3.bf16.msra.mxu0 %v13997_v33  ;;  %8285 = vmatpush3.bf16.msra.mxu1 %v13997_v33 }
 0xb0f   : > { %v6838_v38 = vsel %vm6834_vm4, %v6822_v32, %v6837_v13  ;;  %v6841_v54 = vsel %vm6835_vm8, %v6828_v55, 920167782  ;;  %v6844_v26 = vsel %vm6832_vm5, %v6822_v32, %v6825_v6  ;;  %v6845_v16 = vsel %vm6835_vm8, %v6831_v15, 1326507024  ;;  %8262 = vmatprep.subr.bf16.mxu0 %v14000_v3  ;;  %8278 = vmatprep.subr.bf16.mxu1 %v14000_v3 }
 0xb10   : > { %v7539_v9 = vmin.u32 %v6970_v46, %v14043_v24  ;;  %vm6833_vm14 = vcmp.lt.s32.totalorder %v14008_v56, 2  ;;  %v6842_v8 = vsel %vm6834_vm4, %v6825_v6, %v6841_v54  ;;  %v6265_v33 = vsel %vm13975_vm3, 0, %v14015_v17 }
 0xb11   : > { %v14062_v2 = vmul.f32 %v6674_v51, %v6672_v10  ;;  %v6843_v21 = vsel %vm6833_vm14, %v6840_v25, %v6842_v8  ;;  %v6846_v44 = vsel %vm6834_vm4, %v6828_v55, %v6845_v16  ;;  %8784 = vcosq.f32 %v14021_v53 }
 0xb12   : > { %v6972_v61 = vclz %v7539_v9  ;;  %v6839_v63 = vsel %vm6833_vm14, %v6836_v19, %v6838_v38  ;;  %v6847_v11 = vsel %vm6833_vm14, %v6844_v26, %v6846_v44  ;;  %8264 = vmatpush3.bf16.msra.mxu0 %v14000_v3  ;;  %8286 = vmatpush3.bf16.msra.mxu1 %v14000_v3  ;;  %8786 = vsinq.f32 %v14021_v53 }
 0xb13   : > { %v14071_v12 = vmul.u32.u64.low %v14039_v50, %v6847_v11  ;;  %v14072_v17 = vmul.u32.u64.high %v14039_v50, %v6847_v11, %v14071_v12  ;;  %v14075_v32 = vmul.u32.u64.low %v14039_v50, %v6843_v21  ;;  %v14076_v1 = vmul.u32.u64.high %v14039_v50, %v6843_v21, %v14075_v32  ;;  %8266 = vmatprep.subr.bf16.mxu0 %v14005_v57  ;;  %8279 = vmatprep.subr.bf16.mxu1 %v14005_v57 }
 0xb14   : > { %v6780_v56 = vxor.u32 2147483648, %v13988_v20  ;;  %v7540_v29 = vadd.s32 4294967294, %v6972_v61  ;;  %v6269_v7 = vadd.s32 3, %v6265_v33  ;;  %v6366_v3 = vsub.s32 4, %v13592_v39 }
 0xb15   : > { %v6676_v53 = vxor.u32 2147483648, %v14062_v2  ;;  %v6960_v60 = vadd.s32 %v13984_v48, %v13993_v40  ;;  %v6855_v36 = vmul.u32 %v14039_v50, %v6839_v63  ;;  %v6377_v6 = vxor.u32 2147483648, %v13883_v43 }
 0xb16   : > { %vm7541_vm6 = vcmp.lt.s32.totalorder %v7540_v29, 0  ;;  %8268 = vmatpush3.bf16.msra.mxu0 %v14005_v57  ;;  %8287 = vmatpush3.bf16.msra.mxu1 %v14005_v57  ;;  %v6270_v55 = vand.u32 3, %v6269_v7  ;;  %v6367_v5 = vsel %vm6282_vm9, %v6366_v3, %v13592_v39  ;;  %v14625_v4 = vand.u32 2147483647, %v13599_v41 }
 0xb17   : > { %v6975_v48 = vsel %vm7541_vm6, 0, %v7540_v29  ;;  %vm6857_vm1 = vc.u32 %v14072_v17, %v14075_v32  ;;  %v6858_v40 = vadd.s32 1, %v14076_v1  ;;  %8270 = vmatprep.subr.bf16.mxu0 %v14010_v28  ;;  %8280 = vmatprep.subr.bf16.mxu1 %v14010_v28  ;;  %v6470_v57 = vsub.s32 4, %v13798_v62 }
 0xb18   : > { %vm14095_vm7 = vcmp.le.f32.partialorder %v14625_v4, 0.7853982  ;;  %v6976_v50 = vsub.s32 32, %v6975_v48  ;;  %v6980_v39 = vsub.s32 4294967266, %v6975_v48  ;;  %vm6268_vm9 = vweird.f32 %v13507_v18 }
 0xb19   : > { %v6380_v51 = vxor.u32 2147483648, %v13864_v42  ;;  %v6472_v15 = vsel %vm14095_vm7, %v13599_v41, %v13928_v31  ;;  %vm6698_vm3 = vcmp.lt.s32.totalorder %v13609_v0, 0  ;;  %v6977_v19 = vshll.u32 %v14043_v24, %v6975_v48 }
 0xb1a   : > { %v6859_v10 = vsel %vm6857_vm1, %v6858_v40, %v14076_v1  ;;  %vm6271_vm12 = vcmp.lt.s32.totalorder %v6270_v55, 2  ;;  %v6369_v46 = vsel %vm13709_vm0, 0, %v6367_v5  ;;  %v6978_v13 = vshrl.u32 %v6960_v60, %v6976_v50  ;;  %8272 = vmatpush3.bf16.msra.mxu0 %v14010_v28  ;;  %8288 = vmatpush3.bf16.msra.mxu1 %v14010_v28 }
 0xb1b   : > { %v6981_v25 = vadd.s32 127, %v6980_v39  ;;  %v6860_v38 = vadd.s32 %v6859_v10, %v6855_v36  ;;  %vm6372_vm2 = vweird.f32 %v13504_v45  ;;  %v6373_v54 = vadd.s32 3, %v6369_v46  ;;  %v8785_v31 = vpop.eup %8784 }
 0xb1c   : > { %vm6594_vm13 = vcmp.lt.s32.totalorder %v13633_v30, 0  ;;  %vm6272_vm5 = vcmp.eq.s32.totalorder %v6270_v55, 0  ;;  %vm6275_vm4 = vcmp.eq.s32.totalorder %v6270_v55, 2  ;;  %v6471_v35 = vsel %vm6386_vm15, %v6470_v57, %v13798_v62  ;;  %v8787_v24 = vpop.eup %8786 }
 0xb1d   : > { %8788 = vcosq.f32 %v6472_v15  ;;  %v6982_v26 = vshll.u32 %v6981_v25, 23  ;;  %v6861_v16 = vadd.s32 536870912, %v6860_v38  ;;  %v6276_v9 = vxor.u32 2147483648, %v8785_v31 }
 0xb1e   : > { %v6574_v8 = vsub.s32 4, %v13745_v23  ;;  %v6979_v33 = vor.u32 %v6978_v13, %v6977_v19  ;;  %v6273_v21 = vxor.u32 2147483648, %v8787_v24  ;;  %v6374_v44 = vand.u32 3, %v6373_v54 }
 0xb1f   : > { %8790 = vsinq.f32 %v6472_v15  ;;  %v6983_v28 = vor.u32 4788187, %v6982_v26  ;;  %v14124_v61 = vshrl.u32 %v6861_v16, 30  ;;  %v6277_v63 = vsel %vm6275_vm4, %v6276_v9, %v8787_v24 }
 0xb20   : > { %v6473_v11 = vsel %vm14095_vm7, 0, %v6471_v35  ;;  %v6274_v62 = vsel %vm6272_vm5, %v8785_v31, %v6273_v21  ;;  %vm6375_vm0 = vcmp.lt.s32.totalorder %v6374_v44, 2  ;;  %vm6376_vm15 = vcmp.eq.s32.totalorder %v6374_v44, 0 }
 0xb21   : > { %vm6379_vm8 = vcmp.eq.s32.totalorder %v6374_v44, 2  ;;  %v6984_v12 = vand.u32 2147483647, %v6983_v28  ;;  %v6863_v1 = vshll.u32 %v14124_v61, 30  ;;  %v6278_v29 = vsel %vm6271_vm12, %v6274_v62, %v6277_v63 }
 0xb22   : > { %v6378_v7 = vsel %vm6376_vm15, %v13864_v42, %v6377_v6  ;;  %v6279_v3 = vsel %vm6268_vm9, nan, %v6278_v29  ;;  %v6381_v60 = vsel %vm6379_vm8, %v6380_v51, %v13883_v43  ;;  %v6477_v36 = vadd.s32 3, %v6473_v11 }
 0xb23   : > { %v6575_v5 = vsel %vm6490_vm11, %v6574_v8, %v13745_v23  ;;  %v6781_v4 = vsel %vm6698_vm3, %v6780_v56, %v13988_v20  ;;  %v14143_v55 = vsub.s32 %v6860_v38, %v6863_v1  ;;  %8037 = vmatprep.mubr.f32.mxu0 %v6279_v3  ;;  %v6382_v42 = vsel %vm6375_vm0, %v6378_v7, %v6381_v60 }
 0xb24   : > { %v6577_v18 = vsel %vm13872_vm10, 0, %v6575_v5  ;;  %v6986_v6 = vcvt.s32.f32 %v6979_v33  ;;  %v6383_v43 = vsel %vm6372_vm2, nan, %v6382_v42  ;;  %v6478_v59 = vand.u32 3, %v6477_v36 }
 0xb25   : > { %v6581_v48 = vadd.s32 3, %v6577_v18  ;;  %v6677_v23 = vsel %vm6594_vm13, %v6676_v53, %v14062_v2  ;;  %v6866_v20 = vsub.s32 0, %v14143_v55  ;;  %8038 = vmatmul.mubr.f32.vlgmr.msra.gmra.mrb[32].mxu0 %v6383_v43  ;;  %vm6476_vm11 = vweird.f32 %v13599_v41 }
 0xb26   : > { %v6585_v34 = vxor.u32 2147483648, %v13955_v52  ;;  %v6987_v40 = vmul.f32 %v6986_v6, %v6984_v12  ;;  %vm6580_vm10 = vweird.f32 %v13579_v47  ;;  %v6588_v57 = vxor.u32 2147483648, %v13952_v27 }
 0xb27   : > { %v8789_v56 = vpop.eup %8788  ;;  %v6582_v45 = vand.u32 3, %v6581_v48  ;;  %v7535_v50 = vmin.u32 %v6866_v20, %v14143_v55  ;;  %vm6480_vm14 = vcmp.eq.s32.totalorder %v6478_v59, 0  ;;  %vm6483_vm6 = vcmp.eq.s32.totalorder %v6478_v59, 2 }
 0xb28   : > { %v6484_v39 = vxor.u32 2147483648, %v8789_v56  ;;  %v14628_v53 = vand.u32 2147483647, %v13633_v30  ;;  %v6678_v15 = vsub.s32 4, %v13948_v22  ;;  %vm6479_vm2 = vcmp.lt.s32.totalorder %v6478_v59, 2 }
 0xb29   : > { %v8791_v2 = vpop.eup %8790  ;;  %vm6584_vm7 = vcmp.eq.s32.totalorder %v6582_v45, 0  ;;  %vm6587_vm1 = vcmp.eq.s32.totalorder %v6582_v45, 2  ;;  %v6868_v19 = vclz %v7535_v50  ;;  %vm6583_vm12 = vcmp.lt.s32.totalorder %v6582_v45, 2 }
 0xb2a   : > { %vm14162_vm9 = vcmp.le.f32.partialorder %v14628_v53, 0.7853982  ;;  %v6481_v10 = vxor.u32 2147483648, %v8791_v2  ;;  %v6485_v46 = vsel %vm6483_vm6, %v6484_v39, %v8791_v2  ;;  %v6586_v13 = vsel %vm6584_vm7, %v13952_v27, %v6585_v34 }
 0xb2b   : > { %v6589_v25 = vsel %vm6587_vm1, %v6588_v57, %v13955_v52  ;;  %v6679_v38 = vsel %vm6594_vm13, %v6678_v15, %v13948_v22  ;;  %v6680_v54 = vsel %vm14162_vm9, %v13633_v30, %v6677_v23  ;;  %v7536_v31 = vadd.s32 4294967294, %v6868_v19 }
 0xb2c   : > { %v6482_v35 = vsel %vm6480_vm14, %v8789_v56, %v6481_v10  ;;  %v6590_v24 = vsel %vm6583_vm12, %v6586_v13, %v6589_v25  ;;  %v6988_v26 = vxor.u32 2147483648, %v6987_v40  ;;  %v6681_v27 = vsel %vm14162_vm9, 0, %v6679_v38 }
 0xb2d   : > { %v6486_v16 = vsel %vm6479_vm2, %v6482_v35, %v6485_v46  ;;  %8792 = vcosq.f32 %v6680_v54  ;;  %vm7537_vm5 = vcmp.lt.s32.totalorder %v7536_v31, 0  ;;  %v14631_v22 = vand.u32 2147483647, %v13609_v0 }
 0xb2e   : > { %v6487_v52 = vsel %vm6476_vm11, nan, %v6486_v16  ;;  %8794 = vsinq.f32 %v6680_v54  ;;  %v6871_v8 = vsel %vm7537_vm5, 0, %v7536_v31  ;;  %v6591_v33 = vsel %vm6580_vm10, nan, %v6590_v24 }
 0xb2f   : > { %vm14182_vm13 = vcmp.le.f32.partialorder %v14631_v22, 0.7853982  ;;  %8040 = vmatprep.mubr.f32.mxu1 %v6487_v52  ;;  %v6782_v21 = vsub.s32 4, %v13861_v58  ;;  %v6856_v41 = vadd.s32 %v14075_v32, %v14072_v17  ;;  %v6872_v28 = vsub.s32 32, %v6871_v8 }
 0xb30   : > { %v6784_v44 = vsel %vm14182_vm13, %v13609_v0, %v6781_v4  ;;  %v6876_v63 = vsub.s32 4294967266, %v6871_v8  ;;  %8041 = vmatmul.mubr.f32.vlgmr.msra.gmra.mrb[24].mxu1 %v6591_v33  ;;  %vm6906_vm4 = vcmp.lt.s32.totalorder %v13775_v14, 0  ;;  %v6873_v11 = vshll.u32 %v14143_v55, %v6871_v8 }
 0xb31   : > { %8796 = vcosq.f32 %v6784_v44  ;;  %v6685_v62 = vadd.s32 3, %v6681_v27  ;;  %v6783_v47 = vsel %vm6698_vm3, %v6782_v21, %v13861_v58  ;;  %v6874_v12 = vshrl.u32 %v6856_v41, %v6872_v28 }
 0xb32   : > { %v6877_v1 = vadd.s32 127, %v6876_v63  ;;  %v6785_v29 = vsel %vm14182_vm13, 0, %v6783_v47  ;;  %8798 = vsinq.f32 %v6784_v44  ;;  %v6989_v17 = vsel %vm6906_vm4, %v6988_v26, %v6987_v40 }
 0xb33   : > { %v6789_v32 = vadd.s32 3, %v6785_v29  ;;  %v6875_v7 = vor.u32 %v6874_v12, %v6873_v11  ;;  %v6686_v60 = vand.u32 3, %v6685_v62  ;;  %v14634_v36 = vand.u32 2147483647, %v13775_v14  ;;  %v7543_v29 = vld [vmem:[%s14324_s4 + $0x7] ss:$0 sm:$0xff] }
 0xb34   : > { %v6878_v3 = vshll.u32 %v6877_v1, 23  ;;  %v6990_v48 = vsub.s32 4, %v14031_v49  ;;  %v6886_v40 = vsub.s32 4, %v14124_v61  ;;  %vm6684_vm8 = vweird.f32 %v13633_v30  ;;  %v7157_v1 = vpop.permute.xlu0 %7156 }
 0xb35   : > { %vm14205_vm0 = vcmp.le.f32.partialorder %v14634_v36, 0.7853982  ;;  %v6790_v42 = vand.u32 3, %v6789_v32  ;;  %v6882_v43 = vcvt.s32.f32 %v6875_v7  ;;  %vm6688_vm3 = vcmp.eq.s32.totalorder %v6686_v60, 0 }
 0xb36   : > { %v6879_v58 = vor.u32 4788187, %v6878_v3  ;;  %v6992_v4 = vsel %vm14205_vm0, %v13775_v14, %v6989_v17  ;;  %vm6691_vm15 = vcmp.eq.s32.totalorder %v6686_v60, 2  ;;  %vm6687_vm11 = vcmp.lt.s32.totalorder %v6686_v60, 2  ;;  %v7161_v3 = vpop.permute.xlu1 %7160 }
 0xb37   : > { %v8793_v55 = vpop.eup %8792  ;;  %8800 = vcosq.f32 %v6992_v4  ;;  %vm6795_vm10 = vcmp.eq.s32.totalorder %v6790_v42, 2  ;;  %v6991_v53 = vsel %vm6906_vm4, %v6990_v48, %v14031_v49  ;;  %vm6802_vm14 = vcmp.lt.s32.totalorder %v13855_v37, 0 }
 0xb38   : > { %v8795_v18 = vpop.eup %8794  ;;  %v6880_v6 = vand.u32 2147483647, %v6879_v58  ;;  %v6692_v59 = vxor.u32 2147483648, %v8793_v55  ;;  %8802 = vsinq.f32 %v6992_v4  ;;  %vm6792_vm6 = vcmp.eq.s32.totalorder %v6790_v42, 0 }
 0xb39   : > { %v6689_v23 = vxor.u32 2147483648, %v8795_v18  ;;  %v14637_v30 = vand.u32 2147483647, %v13855_v37  ;;  %v6887_v13 = vsel %vm6802_vm14, %v6886_v40, %v14124_v61  ;;  %vm6791_vm1 = vcmp.lt.s32.totalorder %v6790_v42, 2 }
 0xb3a   : > { %v6883_v34 = vmul.f32 %v6882_v43, %v6880_v6  ;;  %v6693_v56 = vsel %vm6691_vm15, %v6692_v59, %v8795_v18  ;;  %v6993_v38 = vsel %vm14205_vm0, 0, %v6991_v53  ;;  %vm6788_vm9 = vweird.f32 %v13609_v0  ;;  %v7159_v4 = vpop.permute.xlu1 %7158 }
 0xb3b   : > { %v8797_v20 = vpop.eup %8796  ;;  %v6690_v45 = vsel %vm6688_vm3, %v8793_v55, %v6689_v23  ;;  %vm14221_vm7 = vcmp.le.f32.partialorder %v14637_v30, 0.7853982  ;;  %v6997_v61 = vadd.s32 3, %v6993_v38  ;;  %vm6892_vm3 = vweird.f32 %v13855_v37 }
 0xb3c   : > { %v6796_v57 = vxor.u32 2147483648, %v8797_v20  ;;  %v8799_v50 = vpop.eup %8798  ;;  %v6884_v39 = vxor.u32 2147483648, %v6883_v34  ;;  %v6694_v2 = vsel %vm6687_vm11, %v6690_v45, %v6693_v56  ;;  %v6889_v35 = vsel %vm14221_vm7, 0, %v6887_v13 }
 0xb3d   : > { %v6695_v51 = vsel %vm6684_vm8, nan, %v6694_v2  ;;  %v6793_v15 = vxor.u32 2147483648, %v8799_v50  ;;  %v6893_v16 = vadd.s32 3, %v6889_v35  ;;  %v6998_v27 = vand.u32 3, %v6997_v61 }
 0xb3e   : > { %v6797_v19 = vsel %vm6795_vm10, %v6796_v57, %v8799_v50  ;;  %v6885_v10 = vsel %vm6802_vm14, %v6884_v39, %v6883_v34  ;;  %8043 = vmatprep.mubr.f32.mxu1 %v6695_v51  ;;  %vm6996_vm15 = vweird.f32 %v13775_v14  ;;  %vm7178_vm8 = vcmask 48160   ;;  %v7155_v14 = vpop.permute.xlu0 %7154  ;;  %v7165_v43 = vpop.permute.xlu1 %7164 }
 0xb3f   : > { %v6794_v25 = vsel %vm6792_vm6, %v8797_v20, %v6793_v15  ;;  %v6888_v49 = vsel %vm14221_vm7, %v13855_v37, %v6885_v10  ;;  %v6894_v9 = vand.u32 3, %v6893_v16  ;;  %vm7000_vm12 = vcmp.eq.s32.totalorder %v6998_v27, 0 }
 0xb40   : > { %v6798_v54 = vsel %vm6791_vm1, %v6794_v25, %v6797_v19  ;;  %8804 = vcosq.f32 %v6888_v49  ;;  %vm7003_vm2 = vcmp.eq.s32.totalorder %v6998_v27, 2  ;;  %vm6999_vm4 = vcmp.lt.s32.totalorder %v6998_v27, 2 }
 0xb41   : > { %v6799_v31 = vsel %vm6788_vm9, nan, %v6798_v54  ;;  %8806 = vsinq.f32 %v6888_v49  ;;  %v8801_v24 = vpop.eup %8800  ;;  %vm6899_vm5 = vcmp.eq.s32.totalorder %v6894_v9, 2  ;;  %vm6896_vm13 = vcmp.eq.s32.totalorder %v6894_v9, 0 }
 0xb42   : > { %8044 = vmatmul.mubr.f32.gmra.mrb[26].mxu1 %v6799_v31  ;;  %v8803_v26 = vpop.eup %8802  ;;  %v7004_v22 = vxor.u32 2147483648, %v8801_v24  ;;  %vm6895_vm0 = vcmp.lt.s32.totalorder %v6894_v9, 2  ;;  %v7163_v59 = vpop.permute.xlu0 %7162 }
 0xb43   : > { %v7001_v52 = vxor.u32 2147483648, %v8803_v26  ;;  %v7169_v56 = vpop.permute.xlu1 %7168 }
 0xb44   : > { %v7005_v44 = vsel %vm7003_vm2, %v7004_v22, %v8803_v26 }
 0xb45   : > { %v7002_v21 = vsel %vm7000_vm12, %v8801_v24, %v7001_v52 }
 0xb46   : > { %v7006_v11 = vsel %vm6999_vm4, %v7002_v21, %v7005_v44  ;;  %v7167_v40 = vpop.permute.xlu0 %7166 }
 0xb47   : > { %v7007_v12 = vsel %vm6996_vm15, nan, %v7006_v11 }
 0xb4a   : > { %v8805_v8 = vpop.eup %8804 }
 0xb4b   : > { %v8807_v0 = vpop.eup %8806  ;;  %v6900_v33 = vxor.u32 2147483648, %v8805_v8 }
 0xb4c   : > { %v6897_v41 = vxor.u32 2147483648, %v8807_v0 }
 0xb4d   : > { %v6901_v28 = vsel %vm6899_vm5, %v6900_v33, %v8807_v0 }
 0xb4e   : > { %v6898_v63 = vsel %vm6896_vm13, %v8805_v8, %v6897_v41 }
 0xb4f   : > { %v6902_v62 = vsel %vm6895_vm0, %v6898_v63, %v6901_v28 }
 0xb50   : > { %v6903_v47 = vsel %vm6892_vm3, nan, %v6902_v62 }
 0xb51   : > { %8046 = vmatprep.mubr.f32.mxu1 %v6903_v47 }
 0xb52   : > { %8047 = vmatmul.mubr.f32.gmra.mrb[28].mxu1 %v7007_v12 }
 0xbf8   : > { %v8039_v17 = vpop.f32.mrb[32].mxu0 }
 0xbf9   : > { %v7105_v32 = vadd.f32 %v8039_v17, %v7543_v29  ;;  %v7099_v7 = vpop.f32.mrb[33].mxu0 }
 0xbfa   : > { %v7100_v37 = vadd.f32 %v7543_v29, %v7099_v7 }
 0xbfb   : > { %7139 = vst [vmem:[%s14242_s15 + $0x8] sm:$0xff] %v7105_v32 }
 0xbfc   : > { %7180 = vst.msk [vmem:[%s14242_s15 + $0x8] sm:$0xff] %vm7178_vm8, %v7157_v1  ;;  %7138 = vst [vmem:[%s14242_s15] sm:$0xff] %v7100_v37 }
 0xbfd   : > { %7179 = vst.msk [vmem:[%s14242_s15] sm:$0xff] %vm7178_vm8, %v7155_v14 }
 0xc03   : > { %v8042_v60 = vpop.f32.mrb[24].mxu1 }
 0xc04   : > { %v7115_v36 = vadd.f32 %v8042_v60, %v7543_v29  ;;  %v7109_v5 = vpop.f32.mrb[25].mxu1 }
 0xc05   : > { %v7110_v58 = vadd.f32 %v7543_v29, %v7109_v5 }
 0xc06   : > { %7141 = vst [vmem:[%s14242_s15 + $0x18] sm:$0xff] %v7115_v36 }
 0xc07   : > { %7182 = vst.msk [vmem:[%s14242_s15 + $0x18] sm:$0xff] %vm7178_vm8, %v7161_v3  ;;  %7140 = vst [vmem:[%s14242_s15 + $0x10] sm:$0xff] %v7110_v58 }
 0xc08   : > { %7181 = vst.msk [vmem:[%s14242_s15 + $0x10] sm:$0xff] %vm7178_vm8, %v7159_v4 }
 0xc15   : > { %v8045_v55 = vpop.f32.mrb[26].mxu1 }
 0xc16   : > { %v7125_v42 = vadd.f32 %v8045_v55, %v7543_v29  ;;  %v7119_v18 = vpop.f32.mrb[27].mxu1 }
 0xc17   : > { %v7120_v6 = vadd.f32 %v7543_v29, %v7119_v18 }
 0xc18   : > { %7143 = vst [vmem:[%s14242_s15 + $0x28] sm:$0xff] %v7125_v42 }
 0xc19   : > { %7184 = vst.msk [vmem:[%s14242_s15 + $0x28] sm:$0xff] %vm7178_vm8, %v7165_v43  ;;  %7142 = vst [vmem:[%s14242_s15 + $0x20] sm:$0xff] %v7120_v6 }
 0xc1a   : > { %7183 = vst.msk [vmem:[%s14242_s15 + $0x20] sm:$0xff] %vm7178_vm8, %v7163_v59 }
 0xc25   : > { %v8048_v48 = vpop.f32.mrb[28].mxu1 }
 0xc26   : > { %v7135_v23 = vadd.f32 %v8048_v48, %v7543_v29  ;;  %v7129_v20 = vpop.f32.mrb[29].mxu1 }
 0xc27   : > { %v7130_v34 = vadd.f32 %v7543_v29, %v7129_v20 }
 0xc28   : > { %7145 = vst [vmem:[%s14242_s15 + $0x38] sm:$0xff] %v7135_v23 }
 0xc29   : > { %7186 = vst.msk [vmem:[%s14242_s15 + $0x38] sm:$0xff] %vm7178_vm8, %v7169_v56  ;;  %7144 = vst [vmem:[%s14242_s15 + $0x30] sm:$0xff] %v7130_v34 }
 0xc2a   : > { %7185 = vst.msk [vmem:[%s14242_s15 + $0x30] sm:$0xff] %vm7178_vm8, %v7167_v40 }
 0xc2b   : > { %8877 = shalt.err (!%p8874_p11)
}
 0xc2c   : > { %s8878_s26 = scalar_lea.hbm %s14267_s6, 1024  ;;  %s8882_s12 = scalar_lea.hbm %s14325_s5, 2048 }
 0xc2d   : > { %p8879_p13 = scmp.ne.s32.totalorder %s14267_s6, %s8878_s26  ;;  %p8883_p6 = scmp.lt.u32.totalorder %s14267_s6, %s14325_s5 }
 0xc2e   : > { %p8884_p9 = scmp.lt.u32.totalorder %s8882_s12, %s8878_s26  ;;  %p8886_p12 = scmp.lt.u32.totalorder %s8878_s26, %s14267_s6 }
 0xc2f   : > { %p8880_p5 = pnand %p8879_p13, %p14640_p1 }
 0xc30   : > { %p8885_p10 = por %p8884_p9, %p8883_p6 }
 0xc31   : > { %p8881_p0 = pneg %p8880_p5 }
 0xc32   : > { %p8887_p2 = por %p8886_p12, %p8885_p10 }
 0xc34   : > { %p8888_p3 = pnand %p8887_p2, %p8881_p0 }
 0xc36   : > { %8891 = shalt.err (!%p8888_p3)
}
 0xc37   : > { %s8948_s15 = smov 128   ;;  %s8949_s16 = smov 8  }
 0xc38   : > { %8521 = dma.vmem_to_hbm [thread:$0]  (%p14640_p1), %s14269_s17, 1024, %s14267_s6, %s14279_s22, %s8948_s15, %s8948_s15, %s8949_s16  }
 0xc39 PF: > { %p8538_p4 = scmp.ge.s32.totalorder %s8934_s21, 2  ;;  %s7216_s7 = sand.u32 1, %s8922_s18  }
 0xc3a   : > { %p14641_p7 = scmp.ne.s32.totalorder %s14424_s29, 0  ;;  %s7217_s23 = scalar_lea.sflag [#allocation4], %s7216_s7 }
 0xc3c   : > { %p8531_p8 = pnand %p8538_p4, %p14641_p7 }
 0xc3e   : > { %8917 = dma.done.wait (!%p8531_p8), %s7217_s23, 1024  }
 0xc3f   : > { %8919 = vsyncadd (!%p8531_p8), %s7217_s23, 4294966272  ;;  %p17_p11 = scmp.ge.s32.totalorder %s9005_s24, 4   ;;  %s14642_s18 = smov %s8926_s19 }
 0xc40   : > { %s14643_s19 = smov %s8930_s20  ;;  %s14644_s20 = smov %s9016_s27 }
 0xc41   : > { %s14645_s21 = smov %s9005_s24  ;;  %19 = sbr.rel (!%p17_p11) target bundleno = 5 (0x5), region = 96 }
 0xc48   :  { %7222 = vsyncpa [#allocation3], 1 }
 0xc49   :  { %7224 = vsyncpa [#allocation3 + $0x1], 1 }
 0xc4a   :  { %7225 = vsyncpa [#allocation6], 1 }
 0xc4b   :  { %7226 = vsyncpa [#allocation4], 1 }
 0xc4c   :  { %7228 = vsyncpa [#allocation4 + $0x1], 1 }

</bundles_post_ra>
